<compile_context>
chip_gen: v7x
topology: tpu7x:2x2x1
jax: 0.10.0
libtpu: 0.0.40
codegen_flags: <defaults>
</compile_context>

<pallas_src>
import jax
import jax.numpy as jnp
from jax.experimental import pallas as pl
from jax.experimental.pallas import tpu as pltpu

EPS = 1e-5


def fused_add_conv_bn_kernel(a_ref, b_ref, w_ref, gamma_ref, beta_ref, o_ref):
    # a_ref, b_ref : [Cin, M]  f32   (channels-first, M = N*H*W)
    # w_ref        : [Ct,  Cin] bf16 (Cout tile of the 1x1 conv weight)
    # gamma/beta   : [Ct,  1]  f32
    # o_ref        : [Ct,  M]  f32
    s = a_ref[...] + b_ref[...]                                   # VPU add, f32 [Cin, M]

    # 1x1 conv == matmul over channels (MXU). bf16 inputs, f32 accumulate.
    y = jnp.dot(w_ref[...], s.astype(jnp.bfloat16),
                preferred_element_type=jnp.float32)               # [Ct, M] f32

    # Single-pass BN stats (per output channel, over the M axis), all f32.
    # Batch mean taken directly from the resident accumulator (XLU lane
    # reduce) — no second pass of the weight through the MXU.
    mean_y = jnp.mean(y, axis=1, keepdims=True)                   # [Ct, 1]
    ex2 = jnp.mean(y * y, axis=1, keepdims=True)                  # [Ct, 1]
    var = jnp.maximum(ex2 - mean_y * mean_y, 0.0)                 # biased var (training BN)
    inv = jax.lax.rsqrt(var + EPS)                                # EUP

    scale = inv * gamma_ref[...]                                  # [Ct, 1]
    o_ref[...] = ((y - mean_y) * scale + beta_ref[...]).astype(o_ref.dtype)


def _pick_n_tiles(cout):
    # 2-way Cout split only pays on multi-TensorCore chips (v7x). On single-TC
    # v5e/v6e the extra grid step (~0.35 us) is pure overhead vs. ~0.5 us DMA.
    try:
        kind = jax.devices()[0].device_kind.lower()
        multi_tc = "v7" in kind
    except Exception:
        multi_tc = False
    n = 2 if multi_tc else 1
    if cout % n != 0 or (cout // n) % 8 != 0:
        n = 1
    return n


def fused_add_conv_bn(x272, x257, weight, gamma, beta, *, n_tiles=None):
    """x272, x257: NCHW [N, Cin, H, W]; weight: [Cout, Cin] (1x1 kernel squeezed);
    gamma, beta: [Cout]. Returns NCHW [N, Cout, H, W]."""
    N, Cin, H, W = x272.shape
    Cout = weight.shape[0]
    M = N * H * W

    if n_tiles is None:
        n_tiles = _pick_n_tiles(Cout)
    assert Cout % n_tiles == 0 and (Cout // n_tiles) % 8 == 0
    ct = Cout // n_tiles

    if N == 1:
        # Pure reshapes — no HBM data movement.
        a = x272.reshape(Cin, M)
        b = x257.reshape(Cin, M)
    else:
        # Fallback (not hit in this module): gather channels-first flat layout.
        a = jnp.transpose(x272, (1, 0, 2, 3)).reshape(Cin, M)
        b = jnp.transpose(x257, (1, 0, 2, 3)).reshape(Cin, M)

    # Halve the dominant weight DMA; matmul accumulates in f32 regardless.
    w_bf16 = weight.astype(jnp.bfloat16)
    g = gamma.reshape(Cout, 1).astype(jnp.float32)
    bt = beta.reshape(Cout, 1).astype(jnp.float32)

    bytes_accessed = (2 * Cin * M * 4          # a, b (f32)
                      + Cin * Cout * 2         # weight (bf16)
                      + 2 * Cout * 4           # gamma, beta
                      + Cout * M * 4)          # output (f32)

    out_flat = pl.pallas_call(
        fused_add_conv_bn_kernel,
        out_shape=jax.ShapeDtypeStruct((Cout, M), x272.dtype),
        grid_spec=pltpu.PrefetchScalarGridSpec(
            num_scalar_prefetch=0,
            grid=(n_tiles,),
            in_specs=[
                pl.BlockSpec((Cin, M), lambda j: (0, 0)),     # a (resident across tiles)
                pl.BlockSpec((Cin, M), lambda j: (0, 0)),     # b
                pl.BlockSpec((ct, Cin), lambda j: (j, 0)),    # weight tile (bf16)
                pl.BlockSpec((ct, 1), lambda j: (j, 0)),      # gamma tile
                pl.BlockSpec((ct, 1), lambda j: (j, 0)),      # beta tile
            ],
            out_specs=pl.BlockSpec((ct, M), lambda j: (j, 0)),
        ),
        compiler_params=pltpu.CompilerParams(
            # Cout tiles are independent (per-channel BN stats) -> megacore
            # split on v7x; single "arbitrary" step on v5e/v6e.
            dimension_semantics=("parallel",) if n_tiles > 1 else ("arbitrary",),
        ),
        cost_estimate=pl.CostEstimate(
            flops=2 * M * Cin * Cout,
            transcendentals=Cout,
            bytes_accessed=bytes_accessed,
        ),
    )(a, b, w_bf16, g, bt)

    if N == 1:
        return out_flat.reshape(1, Cout, H, W)                # zero-copy back to NCHW
    return jnp.transpose(out_flat.reshape(Cout, N, H, W), (1, 0, 2, 3))


def reference(x272, x257, weight, gamma, beta, match_bf16=False):
    s = x272 + x257
    if match_bf16:
        # Mirror the kernel's bf16-input / f32-accumulate matmul numerics.
        y = jnp.einsum("nchw,oc->nohw",
                       s.astype(jnp.bfloat16), weight.astype(jnp.bfloat16),
                       preferred_element_type=jnp.float32)
    else:
        y = jnp.einsum("nchw,oc->nohw", s, weight,
                       preferred_element_type=jnp.float32)
    mean = jnp.mean(y, axis=(0, 2, 3), keepdims=True)
    var = jnp.mean((y - mean) ** 2, axis=(0, 2, 3), keepdims=True)
    yhat = (y - mean) * jax.lax.rsqrt(var + EPS)
    return yhat * gamma.reshape(1, -1, 1, 1) + beta.reshape(1, -1, 1, 1)


if __name__ == "__main__":
    N, Cin, H, W = 1, 192, 7, 7
    Cout = 1152

    key = jax.random.PRNGKey(0)
    k1, k2, k3, k4, k5 = jax.random.split(key, 5)

    x272 = jax.random.normal(k1, (N, Cin, H, W), dtype=jnp.float32)
    x257 = jax.random.normal(k2, (N, Cin, H, W), dtype=jnp.float32)

    # Conv2d(192, 1152, 1x1, bias=False) weight: [Cout, Cin, 1, 1] -> [Cout, Cin]
    bound = 1.0 / (Cin ** 0.5)
    weight = jax.random.uniform(k3, (Cout, Cin), dtype=jnp.float32,
                                minval=-bound, maxval=bound)
    # Non-trivial affine params to exercise the scale/shift path.
    gamma = jax.random.uniform(k4, (Cout,), dtype=jnp.float32, minval=0.5, maxval=1.5)
    beta = 0.1 * jax.random.normal(k5, (Cout,), dtype=jnp.float32)

    out = jax.block_until_ready(fused_add_conv_bn(x272, x257, weight, gamma, beta))
    assert out.shape == (N, Cout, H, W)

    # Tight check against a reference that matches the kernel's bf16-dot numerics.
    ref_bf = reference(x272, x257, weight, gamma, beta, match_bf16=True)
    assert jnp.allclose(out, ref_bf, atol=2e-3, rtol=2e-3), \
        float(jnp.max(jnp.abs(out - ref_bf)))

    # Loose sanity check against the full-f32 reference (bf16 weight rounding
    # enters the conv; after BN normalization the deviation stays small).
    ref_f32 = reference(x272, x257, weight, gamma, beta, match_bf16=False)
    assert jnp.allclose(out, ref_f32, atol=5e-2, rtol=5e-2), \
        float(jnp.max(jnp.abs(out - ref_f32)))

    print("KERNEL_OK")
</pallas_src>

<mosaic_0001>
module attributes {stable_mosaic.version = 11 : i64} {
  func.func @fused_add_conv_bn_kernel(%arg0: i32, %arg1: memref<192x49xf32, #tpu.memory_space<vmem>>, %arg2: memref<192x49xf32, #tpu.memory_space<vmem>>, %arg3: memref<1152x192xbf16, #tpu.memory_space<vmem>>, %arg4: memref<1152x1xf32, #tpu.memory_space<vmem>>, %arg5: memref<1152x1xf32, #tpu.memory_space<vmem>>, %arg6: memref<1152x49xf32, #tpu.memory_space<vmem>>) attributes {dimension_semantics = [#tpu.dimension_semantics<arbitrary>], iteration_bounds = array<i64: 1>, scalar_prefetch = 0 : i64, scratch_operands = 0 : i64, tpu.core_type = #tpu.core_type<tc>, window_params = [{pipeline_mode = #tpu.pipeline_mode<synchronous>, transform_indices = @transform_0, window_bounds = array<i64: 192, 49>}, {pipeline_mode = #tpu.pipeline_mode<synchronous>, transform_indices = @transform_1, window_bounds = array<i64: 192, 49>}, {transform_indices = @transform_2, window_bounds = array<i64: 1152, 192>}, {transform_indices = @transform_3, window_bounds = array<i64: 1152, 1>}, {transform_indices = @transform_4, window_bounds = array<i64: 1152, 1>}, {transform_indices = @transform_5, window_bounds = array<i64: 1152, 49>}]} {
    %c0 = arith.constant 0 : index
    %c0_0 = arith.constant 0 : index
    %0 = vector.load %arg1[%c0, %c0_0] : memref<192x49xf32, #tpu.memory_space<vmem>>, vector<192x49xf32>
    %c0_1 = arith.constant 0 : index
    %c0_2 = arith.constant 0 : index
    %1 = vector.load %arg2[%c0_1, %c0_2] : memref<192x49xf32, #tpu.memory_space<vmem>>, vector<192x49xf32>
    %2 = arith.addf %0, %1 : vector<192x49xf32>
    %c0_3 = arith.constant 0 : index
    %c0_4 = arith.constant 0 : index
    %3 = vector.load %arg3[%c0_3, %c0_4] : memref<1152x192xbf16, #tpu.memory_space<vmem>>, vector<1152x192xbf16>
    %4 = arith.truncf %2 : vector<192x49xf32> to vector<192x49xbf16>
    %cst = arith.constant dense<0.000000e+00> : vector<1152x49xf32>
    %5 = tpu.matmul %3, %4, %cst {dimension_numbers = #tpu.dot_dimension_numbers<[1], [0], [0], [1], [0, 0, 1, 1], [], []>} : vector<1152x192xbf16>, vector<192x49xbf16>, vector<1152x49xf32> -> vector<1152x49xf32>
    %cst_5 = arith.constant dense<0.000000e+00> : vector<1152xf32>
    %6 = vector.multi_reduction <add>, %5, %cst_5 [1] : vector<1152x49xf32> to vector<1152xf32>
    %7 = vector.shape_cast %6 : vector<1152xf32> to vector<1152x1xf32>
    %cst_6 = arith.constant 4.900000e+01 : f32
    %8 = vector.broadcast %cst_6 : f32 to vector<1152x1xf32>
    %9 = arith.divf %7, %8 : vector<1152x1xf32>
    %10 = arith.mulf %5, %5 : vector<1152x49xf32>
    %cst_7 = arith.constant dense<0.000000e+00> : vector<1152xf32>
    %11 = vector.multi_reduction <add>, %10, %cst_7 [1] : vector<1152x49xf32> to vector<1152xf32>
    %12 = vector.shape_cast %11 : vector<1152xf32> to vector<1152x1xf32>
    %cst_8 = arith.constant 4.900000e+01 : f32
    %13 = vector.broadcast %cst_8 : f32 to vector<1152x1xf32>
    %14 = arith.divf %12, %13 : vector<1152x1xf32>
    %15 = arith.mulf %9, %9 : vector<1152x1xf32>
    %16 = arith.subf %14, %15 : vector<1152x1xf32>
    %cst_9 = arith.constant 0.000000e+00 : f32
    %17 = vector.broadcast %cst_9 : f32 to vector<1152x1xf32>
    %18 = arith.maximumf %16, %17 : vector<1152x1xf32>
    %cst_10 = arith.constant 9.99999974E-6 : f32
    %19 = vector.broadcast %cst_10 : f32 to vector<1152x1xf32>
    %20 = arith.addf %18, %19 : vector<1152x1xf32>
    %21 = math.rsqrt %20 : vector<1152x1xf32>
    %c0_11 = arith.constant 0 : index
    %c0_12 = arith.constant 0 : index
    %22 = vector.load %arg4[%c0_11, %c0_12] : memref<1152x1xf32, #tpu.memory_space<vmem>>, vector<1152x1xf32>
    %23 = arith.mulf %21, %22 : vector<1152x1xf32>
    %24 = vector.broadcast %9 : vector<1152x1xf32> to vector<1152x49xf32>
    %25 = arith.subf %5, %24 : vector<1152x49xf32>
    %26 = vector.broadcast %23 : vector<1152x1xf32> to vector<1152x49xf32>
    %27 = arith.mulf %25, %26 : vector<1152x49xf32>
    %c0_13 = arith.constant 0 : index
    %c0_14 = arith.constant 0 : index
    %28 = vector.load %arg5[%c0_13, %c0_14] : memref<1152x1xf32, #tpu.memory_space<vmem>>, vector<1152x1xf32>
    %29 = vector.broadcast %28 : vector<1152x1xf32> to vector<1152x49xf32>
    %30 = arith.addf %27, %29 : vector<1152x49xf32>
    %c0_15 = arith.constant 0 : index
    %c0_16 = arith.constant 0 : index
    %31 = vector.load %arg6[%c0_15, %c0_16] : memref<1152x49xf32, #tpu.memory_space<vmem>>, vector<1152x49xf32>
    tpu.vector_store %arg6[%c0_15, %c0_16], %30 {strides = array<i32>} : memref<1152x49xf32, #tpu.memory_space<vmem>>, vector<1152x49xf32>,
    return
  }
  func.func @transform_0(%arg0: i32) -> (i32, i32) {
    %c0_i32 = arith.constant 0 : i32
    %c0_i32_0 = arith.constant 0 : i32
    %c0_i32_1 = arith.constant 0 : i32
    return %c0_i32, %c0_i32_0 : i32, i32
  }
  func.func @transform_1(%arg0: i32) -> (i32, i32) {
    %c0_i32 = arith.constant 0 : i32
    %c0_i32_0 = arith.constant 0 : i32
    %c0_i32_1 = arith.constant 0 : i32
    return %c0_i32, %c0_i32_0 : i32, i32
  }
  func.func @transform_2(%arg0: i32) -> (i32, i32) {
    %c0_i32 = arith.constant 0 : i32
    %c0_i32_0 = arith.constant 0 : i32
    return %arg0, %c0_i32 : i32, i32
  }
  func.func @transform_3(%arg0: i32) -> (i32, i32) {
    %c0_i32 = arith.constant 0 : i32
    %c0_i32_0 = arith.constant 0 : i32
    return %arg0, %c0_i32 : i32, i32
  }
  func.func @transform_4(%arg0: i32) -> (i32, i32) {
    %c0_i32 = arith.constant 0 : i32
    %c0_i32_0 = arith.constant 0 : i32
    return %arg0, %c0_i32 : i32, i32
  }
  func.func @transform_5(%arg0: i32) -> (i32, i32) {
    %c0_i32 = arith.constant 0 : i32
    %c0_i32_0 = arith.constant 0 : i32
    return %arg0, %c0_i32 : i32, i32
  }
}

</mosaic_0001>

<bundles_post_ra>
// kernel: tpu_custom_call.1
= control target key start
LH: loop header
LB: loop body
LE: loop exit
PB: predicated region body
PF: predicated region fallthrough
CT: control target
= control target key end

     0   :  { %v6940_v0 = vmov 0   ;;  %vm897_vm0 = vcmask 523264   ;;  %vm1723_vm1 = vcmask 400384   ;;  %s12811_s0 = inlined_call_operand.vmem [shape: f32[192,49], index: 0, kind: input, shape index: {}]   ;;  %s12812_s1 = inlined_call_operand.vmem [shape: f32[192,49], index: 1, kind: input, shape index: {}]   ;;  %s12813_s2 = inlined_call_operand.vmem [shape: bf16[1152,192], index: 2, kind: input, shape index: {}]   ;;  %s12814_s3 = inlined_call_operand.vmem [shape: f32[1152,1], index: 3, kind: input, shape index: {}]   ;;  %s12815_s4 = inlined_call_operand.vmem [shape: f32[1152,1], index: 4, kind: input, shape index: {}]   ;;  %s12816_s5 = inlined_call_operand.vmem [shape: f32[1152,49], index: 5, kind: output, shape index: {}]  }
   0x1   :  { %1114 = vmatprep.subr.bf16.mxu0 %v6940_v0  ;;  %6409 = vmatprep.subr.bf16.mxu1 %v6940_v0  ;;  %v21_v1 = vld [vmem:[%s12811_s0] sm:$0xff]  ;;  %v22_v2 = vld [vmem:[%s12811_s0 + $0x8] sm:$0xff]  ;;  %v23_v6 = vld [vmem:[%s12811_s0 + $0x10] sm:$0xff] }
   0x2   :  { %v45_v3 = vld [vmem:[%s12812_s1] sm:$0xff]  ;;  %v46_v4 = vld [vmem:[%s12812_s1 + $0x8] sm:$0xff]  ;;  %v24_v7 = vld [vmem:[%s12811_s0 + $0x18] sm:$0xff]  ;;  %6435 = vset.pattern.permute.xlu1 %v6940_v0  ;;  %6434 = vset.pattern.permute.xlu0 %v6940_v0 }
   0x3   :  { %v69_v5 = vadd.f32 %v45_v3, %v21_v1  ;;  %v70_v8 = vadd.f32 %v46_v4, %v22_v2  ;;  %v47_v9 = vld [vmem:[%s12812_s1 + $0x10] sm:$0xff]  ;;  %v48_v10 = vld [vmem:[%s12812_s1 + $0x18] sm:$0xff]  ;;  %v25_v11 = vld [vmem:[%s12811_s0 + $0x20] sm:$0xff] }
   0x4   :  { %v71_v12 = vadd.f32 %v47_v9, %v23_v6  ;;  %v72_v13 = vadd.f32 %v48_v10, %v24_v7  ;;  %v26_v14 = vld [vmem:[%s12811_s0 + $0x28] sm:$0xff]  ;;  %v49_v15 = vld [vmem:[%s12812_s1 + $0x20] sm:$0xff]  ;;  %v27_v21 = vld [vmem:[%s12811_s0 + $0x30] sm:$0xff] }
   0x5   :  { %v50_v16 = vld [vmem:[%s12812_s1 + $0x28] sm:$0xff]  ;;  %v237_v17 = vpack.c.bf16 %v70_v8, %v69_v5  ;;  %v73_v19 = vadd.f32 %v49_v15, %v25_v11  ;;  %v28_v22 = vld [vmem:[%s12811_s0 + $0x38] sm:$0xff]  ;;  %v51_v23 = vld [vmem:[%s12812_s1 + $0x30] sm:$0xff] }
   0x6   :  { %v238_v18 = vpack.c.bf16 %v72_v13, %v71_v12  ;;  %v74_v20 = vadd.f32 %v50_v16, %v26_v14  ;;  %v52_v24 = vld [vmem:[%s12812_s1 + $0x38] sm:$0xff]  ;;  %v75_v26 = vadd.f32 %v51_v23, %v27_v21  ;;  %v29_v28 = vld [vmem:[%s12811_s0 + $0x40] sm:$0xff]  ;;  %v30_v29 = vld [vmem:[%s12811_s0 + $0x48] sm:$0xff] }
   0x7   :  { %1115 = vmatpush1.bf16.msra.mxu0 %v237_v17  ;;  %6421 = vmatpush1.bf16.msra.mxu1 %v237_v17  ;;  %v76_v27 = vadd.f32 %v52_v24, %v28_v22  ;;  %v53_v30 = vld [vmem:[%s12812_s1 + $0x40] sm:$0xff]  ;;  %v54_v31 = vld [vmem:[%s12812_s1 + $0x48] sm:$0xff]  ;;  %v31_v35 = vld [vmem:[%s12811_s0 + $0x50] sm:$0xff] }
   0x8   :  { %1116 = vmatprep.subr.bf16.mxu0 %v6940_v0  ;;  %6410 = vmatprep.subr.bf16.mxu1 %v6940_v0  ;;  %v239_v25 = vpack.c.bf16 %v74_v20, %v73_v19  ;;  %v77_v33 = vadd.f32 %v53_v30, %v29_v28  ;;  %v78_v34 = vadd.f32 %v54_v31, %v30_v29  ;;  %v32_v36 = vld [vmem:[%s12811_s0 + $0x58] sm:$0xff]  ;;  %v55_v37 = vld [vmem:[%s12812_s1 + $0x50] sm:$0xff]  ;;  %v33_v39 = vld [vmem:[%s12811_s0 + $0x60] sm:$0xff] }
   0x9   :  { %v240_v32 = vpack.c.bf16 %v76_v27, %v75_v26  ;;  %v56_v38 = vld [vmem:[%s12812_s1 + $0x58] sm:$0xff]  ;;  %v6438_v40 = vld [vmem:[%s12813_s2 + $0x4] ss:$8 sps:$4 sm:$0xff]   ;;  %v79_v42 = vadd.f32 %v55_v37, %v31_v35  ;;  %v35_v51 = vld [vmem:[%s12811_s0 + $0x70] sm:$0xff] }
   0xa   :  { %v241_v41 = vpack.c.bf16 %v78_v34, %v77_v33  ;;  %v80_v43 = vadd.f32 %v56_v38, %v32_v36  ;;  %v34_v44 = vld [vmem:[%s12811_s0 + $0x68] sm:$0xff]  ;;  %v57_v46 = vld [vmem:[%s12812_s1 + $0x60] sm:$0xff]  ;;  %6337 = vmatprep.mubr.msk.bf16.mxu0 %vm897_vm0, %v6438_v40  ;;  %v36_v52 = vld [vmem:[%s12811_s0 + $0x78] sm:$0xff] }
   0xb   :  { %1117 = vmatpush1.bf16.msra.mxu0 %v238_v18  ;;  %6422 = vmatpush1.bf16.msra.mxu1 %v238_v18  ;;  %v6441_v45 = vld [vmem:[%s12813_s2 + $0x244] ss:$8 sps:$4 sm:$0xff]   ;;  %v81_v49 = vadd.f32 %v57_v46, %v33_v39  ;;  %v59_v53 = vld [vmem:[%s12812_s1 + $0x70] sm:$0xff]  ;;  %v60_v54 = vld [vmem:[%s12812_s1 + $0x78] sm:$0xff] }
   0xc   :  { %1118 = vmatprep.subr.bf16.mxu0 %v6940_v0  ;;  %6411 = vmatprep.subr.bf16.mxu1 %v6940_v0  ;;  %v58_v47 = vld [vmem:[%s12812_s1 + $0x68] sm:$0xff]  ;;  %v242_v48 = vpack.c.bf16 %v80_v43, %v79_v42  ;;  %v83_v56 = vadd.f32 %v59_v53, %v35_v51  ;;  %v84_v57 = vadd.f32 %v60_v54, %v36_v52  ;;  %v37_v58 = vld [vmem:[%s12811_s0 + $0x80] sm:$0xff]  ;;  %v39_v2 = vld [vmem:[%s12811_s0 + $0x90] sm:$0xff] }
   0xd   :  { %6373 = vmatprep.mubr.msk.bf16.mxu1 %vm897_vm0, %v6441_v45  ;;  %v82_v50 = vadd.f32 %v58_v47, %v34_v44  ;;  %v38_v59 = vld [vmem:[%s12811_s0 + $0x88] sm:$0xff]  ;;  %v61_v60 = vld [vmem:[%s12812_s1 + $0x80] sm:$0xff]  ;;  %v40_v3 = vld [vmem:[%s12811_s0 + $0x98] sm:$0xff] }
   0xe   :  { %v62_v61 = vld [vmem:[%s12812_s1 + $0x88] sm:$0xff]  ;;  %v244_v62 = vpack.c.bf16 %v84_v57, %v83_v56  ;;  %v85_v63 = vadd.f32 %v61_v60, %v37_v58  ;;  %v63_v4 = vld [vmem:[%s12812_s1 + $0x90] sm:$0xff]  ;;  %v64_v5 = vld [vmem:[%s12812_s1 + $0x98] sm:$0xff] }
   0xf   :  { %1119 = vmatpush1.bf16.msra.mxu0 %v239_v25  ;;  %6423 = vmatpush1.bf16.msra.mxu1 %v239_v25  ;;  %v243_v55 = vpack.c.bf16 %v82_v50, %v81_v49  ;;  %v86_v1 = vadd.f32 %v62_v61, %v38_v59  ;;  %v87_v7 = vadd.f32 %v63_v4, %v39_v2  ;;  %v41_v9 = vld [vmem:[%s12811_s0 + $0xa0] sm:$0xff]  ;;  %v42_v10 = vld [vmem:[%s12811_s0 + $0xa8] sm:$0xff]  ;;  %v43_v16 = vld [vmem:[%s12811_s0 + $0xb0] sm:$0xff] }
  0x10   :  { %1120 = vmatprep.subr.bf16.mxu0 %v6940_v0  ;;  %6412 = vmatprep.subr.bf16.mxu1 %v6940_v0  ;;  %v88_v8 = vadd.f32 %v64_v5, %v40_v3  ;;  %v65_v11 = vld [vmem:[%s12812_s1 + $0xa0] sm:$0xff]  ;;  %v66_v12 = vld [vmem:[%s12812_s1 + $0xa8] sm:$0xff]  ;;  %v44_v17 = vld [vmem:[%s12811_s0 + $0xb8] sm:$0xff] }
  0x11   :  { %v245_v6 = vpack.c.bf16 %v86_v1, %v85_v63  ;;  %v89_v14 = vadd.f32 %v65_v11, %v41_v9  ;;  %v90_v15 = vadd.f32 %v66_v12, %v42_v10  ;;  %v67_v18 = vld [vmem:[%s12812_s1 + $0xb0] sm:$0xff]  ;;  %v68_v19 = vld [vmem:[%s12812_s1 + $0xb8] sm:$0xff]  ;;  %v6436_v24 = vld [vmem:[%s12813_s2] ss:$8 sps:$4 sm:$0xff]  }
  0x12   :  { %v246_v13 = vpack.c.bf16 %v88_v8, %v87_v7  ;;  %v91_v21 = vadd.f32 %v67_v18, %v43_v16  ;;  %v92_v22 = vadd.f32 %v68_v19, %v44_v17  ;;  %v6439_v25 = vld [vmem:[%s12813_s2 + $0x240] ss:$8 sps:$4 sm:$0xff]   ;;  %v6442_v26 = vld [vmem:[%s12813_s2 + $0x14] ss:$8 sps:$4 sm:$0xff]   ;;  %v6447_v28 = vld [vmem:[%s12813_s2 + $0x250] ss:$8 sps:$4 sm:$0xff]  }
  0x13   :  { %1121 = vmatpush1.bf16.msra.mxu0 %v240_v32  ;;  %6424 = vmatpush1.bf16.msra.mxu1 %v240_v32  ;;  %v247_v20 = vpack.c.bf16 %v90_v15, %v89_v14  ;;  %v6445_v27 = vld [vmem:[%s12813_s2 + $0x254] ss:$8 sps:$4 sm:$0xff]   ;;  %v6448_v29 = vld [vmem:[%s12813_s2 + $0x24] ss:$8 sps:$4 sm:$0xff]   ;;  %v6450_v31 = vld [vmem:[%s12813_s2 + $0x20] ss:$8 sps:$4 sm:$0xff]  }
  0x14   :  { %1122 = vmatprep.subr.bf16.mxu0 %v6940_v0  ;;  %6413 = vmatprep.subr.bf16.mxu1 %v6940_v0  ;;  %v248_v23 = vpack.c.bf16 %v92_v22, %v91_v21  ;;  %v6451_v30 = vld [vmem:[%s12813_s2 + $0x264] ss:$8 sps:$4 sm:$0xff]   ;;  %v6453_v32 = vld [vmem:[%s12813_s2 + $0x260] ss:$8 sps:$4 sm:$0xff]   ;;  %v6454_v33 = vld [vmem:[%s12813_s2 + $0x34] ss:$8 sps:$4 sm:$0xff]  }
  0x15   :  { %v6457_v34 = vld [vmem:[%s12813_s2 + $0x274] ss:$8 sps:$4 sm:$0xff]   ;;  %v6456_v35 = vld [vmem:[%s12813_s2 + $0x30] ss:$8 sps:$4 sm:$0xff]   ;;  %v6460_v37 = vld [vmem:[%s12813_s2 + $0x44] ss:$8 sps:$4 sm:$0xff]  }
  0x16   :  { %v6459_v36 = vld [vmem:[%s12813_s2 + $0x270] ss:$8 sps:$4 sm:$0xff]   ;;  %v6463_v38 = vld [vmem:[%s12813_s2 + $0x284] ss:$8 sps:$4 sm:$0xff]   ;;  %v6462_v39 = vld [vmem:[%s12813_s2 + $0x40] ss:$8 sps:$4 sm:$0xff]  }
  0x17   :  { %1123 = vmatpush1.bf16.msra.mxu0 %v241_v41  ;;  %6425 = vmatpush1.bf16.msra.mxu1 %v241_v41  ;;  %v6465_v40 = vld [vmem:[%s12813_s2 + $0x280] ss:$8 sps:$4 sm:$0xff]   ;;  %v6466_v41 = vld [vmem:[%s12813_s2 + $0x54] ss:$8 sps:$4 sm:$0xff]   ;;  %v6468_v43 = vld [vmem:[%s12813_s2 + $0x50] ss:$8 sps:$4 sm:$0xff]  }
  0x18   :  { %1124 = vmatprep.subr.bf16.mxu0 %v6940_v0  ;;  %6414 = vmatprep.subr.bf16.mxu1 %v6940_v0  ;;  %v6469_v42 = vld [vmem:[%s12813_s2 + $0x294] ss:$8 sps:$4 sm:$0xff]   ;;  %v6471_v44 = vld [vmem:[%s12813_s2 + $0x290] ss:$8 sps:$4 sm:$0xff]   ;;  %v6472_v45 = vld [vmem:[%s12813_s2 + $0x64] ss:$8 sps:$4 sm:$0xff]  }
  0x19   :  { %v6475_v46 = vld [vmem:[%s12813_s2 + $0x2a4] ss:$8 sps:$4 sm:$0xff]   ;;  %v6474_v47 = vld [vmem:[%s12813_s2 + $0x60] ss:$8 sps:$4 sm:$0xff]   ;;  %v6478_v49 = vld [vmem:[%s12813_s2 + $0x74] ss:$8 sps:$4 sm:$0xff]  }
  0x1a   :  { %v6481_v50 = vld [vmem:[%s12813_s2 + $0x2b4] ss:$8 sps:$4 sm:$0xff]   ;;  %v6480_v51 = vld [vmem:[%s12813_s2 + $0x70] ss:$8 sps:$4 sm:$0xff]   ;;  %v6484_v53 = vld [vmem:[%s12813_s2 + $0x84] ss:$8 sps:$4 sm:$0xff]  }
  0x1b   :  { %1125 = vmatpush1.bf16.msra.mxu0 %v242_v48  ;;  %6426 = vmatpush1.bf16.msra.mxu1 %v242_v48  ;;  %v6477_v48 = vld [vmem:[%s12813_s2 + $0x2a0] ss:$8 sps:$4 sm:$0xff]   ;;  %v6483_v52 = vld [vmem:[%s12813_s2 + $0x2b0] ss:$8 sps:$4 sm:$0xff]   ;;  %v6487_v54 = vld [vmem:[%s12813_s2 + $0x2c4] ss:$8 sps:$4 sm:$0xff]  }
  0x1c   :  { %1126 = vmatprep.subr.bf16.mxu0 %v6940_v0  ;;  %6415 = vmatprep.subr.bf16.mxu1 %v6940_v0  ;;  %v6489_v56 = vld [vmem:[%s12813_s2 + $0x2c0] ss:$8 sps:$4 sm:$0xff]   ;;  %v6490_v57 = vld [vmem:[%s12813_s2 + $0x94] ss:$8 sps:$4 sm:$0xff]   ;;  %v6492_v59 = vld [vmem:[%s12813_s2 + $0x90] ss:$8 sps:$4 sm:$0xff]  }
  0x1d   :  { %v6493_v58 = vld [vmem:[%s12813_s2 + $0x2d4] ss:$8 sps:$4 sm:$0xff]   ;;  %v6495_v60 = vld [vmem:[%s12813_s2 + $0x2d0] ss:$8 sps:$4 sm:$0xff]   ;;  %v6496_v61 = vld [vmem:[%s12813_s2 + $0xa4] ss:$8 sps:$4 sm:$0xff]  }
  0x1e   :  { %v6498_v63 = vld [vmem:[%s12813_s2 + $0xa0] ss:$8 sps:$4 sm:$0xff]   ;;  %v6502_v2 = vld [vmem:[%s12813_s2 + $0xb4] ss:$8 sps:$4 sm:$0xff]   ;;  %v6504_v4 = vld [vmem:[%s12813_s2 + $0xb0] ss:$8 sps:$4 sm:$0xff]  }
  0x1f   :  { %1127 = vmatpush1.bf16.msra.mxu0 %v243_v55  ;;  %6427 = vmatpush1.bf16.msra.mxu1 %v243_v55  ;;  %v6486_v55 = vld [vmem:[%s12813_s2 + $0x80] ss:$8 sps:$4 sm:$0xff]   ;;  %v6505_v3 = vld [vmem:[%s12813_s2 + $0x2f4] ss:$8 sps:$4 sm:$0xff]   ;;  %v6507_v5 = vld [vmem:[%s12813_s2 + $0x2f0] ss:$8 sps:$4 sm:$0xff]  }
  0x20   :  { %1128 = vmatprep.subr.bf16.mxu0 %v6940_v0  ;;  %6416 = vmatprep.subr.bf16.mxu1 %v6940_v0  ;;  %v6501_v1 = vld [vmem:[%s12813_s2 + $0x2e0] ss:$8 sps:$4 sm:$0xff]   ;;  %v6511_v7 = vld [vmem:[%s12813_s2 + $0x304] ss:$8 sps:$4 sm:$0xff]   ;;  %v6514_v10 = vld [vmem:[%s12813_s2 + $0xd4] ss:$8 sps:$4 sm:$0xff]  }
  0x21   :  { %v6510_v8 = vld [vmem:[%s12813_s2 + $0xc0] ss:$8 sps:$4 sm:$0xff]   ;;  %v6517_v11 = vld [vmem:[%s12813_s2 + $0x314] ss:$8 sps:$4 sm:$0xff]   ;;  %v6516_v12 = vld [vmem:[%s12813_s2 + $0xd0] ss:$8 sps:$4 sm:$0xff]  }
  0x22   :  { %v6513_v9 = vld [vmem:[%s12813_s2 + $0x300] ss:$8 sps:$4 sm:$0xff]   ;;  %v6520_v14 = vld [vmem:[%s12813_s2 + $0xe4] ss:$8 sps:$4 sm:$0xff]   ;;  %v6526_v18 = vld [vmem:[%s12813_s2 + $0xf4] ss:$8 sps:$4 sm:$0xff]  }
  0x23   :  { %1129 = vmatpush1.bf16.msra.mxu0 %v244_v62  ;;  %6428 = vmatpush1.bf16.msra.mxu1 %v244_v62  ;;  %v6499_v62 = vld [vmem:[%s12813_s2 + $0x2e4] ss:$8 sps:$4 sm:$0xff]   ;;  %v6522_v16 = vld [vmem:[%s12813_s2 + $0xe0] ss:$8 sps:$4 sm:$0xff]   ;;  %v6529_v19 = vld [vmem:[%s12813_s2 + $0x334] ss:$8 sps:$4 sm:$0xff]  }
  0x24   :  { %1130 = vmatprep.subr.bf16.mxu0 %v6940_v0  ;;  %6417 = vmatprep.subr.bf16.mxu1 %v6940_v0  ;;  %v6523_v15 = vld [vmem:[%s12813_s2 + $0x324] ss:$8 sps:$4 sm:$0xff]   ;;  %v6525_v17 = vld [vmem:[%s12813_s2 + $0x320] ss:$8 sps:$4 sm:$0xff]   ;;  %v6531_v21 = vld [vmem:[%s12813_s2 + $0x330] ss:$8 sps:$4 sm:$0xff]  }
  0x25   :  { %v6532_v22 = vld [vmem:[%s12813_s2 + $0x104] ss:$8 sps:$4 sm:$0xff]  }
  0x27   :  { %1131 = vmatpush1.bf16.msra.mxu0 %v245_v6  ;;  %6429 = vmatpush1.bf16.msra.mxu1 %v245_v6  ;;  %v6508_v6 = vld [vmem:[%s12813_s2 + $0xc4] ss:$8 sps:$4 sm:$0xff]  }
  0x28   :  { %1132 = vmatprep.subr.bf16.mxu0 %v6940_v0  ;;  %6418 = vmatprep.subr.bf16.mxu1 %v6940_v0 }
  0x2b   :  { %1133 = vmatpush1.bf16.msra.mxu0 %v246_v13  ;;  %6430 = vmatpush1.bf16.msra.mxu1 %v246_v13  ;;  %v6519_v13 = vld [vmem:[%s12813_s2 + $0x310] ss:$8 sps:$4 sm:$0xff]  }
  0x2c   :  { %1134 = vmatprep.subr.bf16.mxu0 %v6940_v0  ;;  %6419 = vmatprep.subr.bf16.mxu1 %v6940_v0 }
  0x2f   :  { %1135 = vmatpush1.bf16.msra.mxu0 %v247_v20  ;;  %6431 = vmatpush1.bf16.msra.mxu1 %v247_v20  ;;  %v6528_v20 = vld [vmem:[%s12813_s2 + $0xf0] ss:$8 sps:$4 sm:$0xff]  }
  0x30   :  { %1136 = vmatprep.subr.bf16.mxu0 %v6940_v0  ;;  %6420 = vmatprep.subr.bf16.mxu1 %v6940_v0  ;;  %v6444_v0 = vld [vmem:[%s12813_s2 + $0x10] ss:$8 sps:$4 sm:$0xff]  }
  0x33   :  { %1137 = vmatpush1.bf16.msra.mxu0 %v248_v23  ;;  %6432 = vmatpush1.bf16.msra.mxu1 %v248_v23  ;;  %v6534_v23 = vld [vmem:[%s12813_s2 + $0x100] ss:$8 sps:$4 sm:$0xff]  }
  0x36   :  { %1147 = vmatmul.mubr.bf16.vlgmr.msra.gmra.mrb[0].mxu0 %v6436_v24  ;;  %1435 = vmatmul.mubr.bf16.vlgmr.msra.gmra.mrb[0].mxu1 %v6439_v25  ;;  %v6535_v24 = vld [vmem:[%s12813_s2 + $0x344] ss:$8 sps:$4 sm:$0xff]   ;;  %v6537_v25 = vld [vmem:[%s12813_s2 + $0x340] ss:$8 sps:$4 sm:$0xff]  }
  0x37   :  { %6338 = vmatprep.mubr.msk.bf16.mxu0 %vm897_vm0, %v6442_v26  ;;  %6374 = vmatprep.mubr.msk.bf16.mxu1 %vm897_vm0, %v6445_v27  ;;  %v6538_v26 = vld [vmem:[%s12813_s2 + $0x114] ss:$8 sps:$4 sm:$0xff]   ;;  %v6540_v27 = vld [vmem:[%s12813_s2 + $0x110] ss:$8 sps:$4 sm:$0xff]  }
  0x3e   :  { %1155 = vmatmul.mubr.bf16.gmra.mrb[4].mxu0 %v6444_v0  ;;  %1443 = vmatmul.mubr.bf16.gmra.mrb[4].mxu1 %v6447_v28  ;;  %v6541_v0 = vld [vmem:[%s12813_s2 + $0x354] ss:$8 sps:$4 sm:$0xff]   ;;  %v6543_v28 = vld [vmem:[%s12813_s2 + $0x350] ss:$8 sps:$4 sm:$0xff]  }
  0x3f   :  { %6339 = vmatprep.mubr.msk.bf16.mxu0 %vm897_vm0, %v6448_v29  ;;  %6375 = vmatprep.mubr.msk.bf16.mxu1 %vm897_vm0, %v6451_v30  ;;  %v6544_v29 = vld [vmem:[%s12813_s2 + $0x124] ss:$8 sps:$4 sm:$0xff]   ;;  %v6546_v30 = vld [vmem:[%s12813_s2 + $0x120] ss:$8 sps:$4 sm:$0xff]  }
  0x46   :  { %1163 = vmatmul.mubr.bf16.gmra.mrb[8].mxu0 %v6450_v31  ;;  %1451 = vmatmul.mubr.bf16.gmra.mrb[8].mxu1 %v6453_v32  ;;  %v6547_v31 = vld [vmem:[%s12813_s2 + $0x364] ss:$8 sps:$4 sm:$0xff]   ;;  %v6549_v32 = vld [vmem:[%s12813_s2 + $0x360] ss:$8 sps:$4 sm:$0xff]  }
  0x47   :  { %6340 = vmatprep.mubr.msk.bf16.mxu0 %vm897_vm0, %v6454_v33  ;;  %6376 = vmatprep.mubr.msk.bf16.mxu1 %vm897_vm0, %v6457_v34  ;;  %v6550_v33 = vld [vmem:[%s12813_s2 + $0x134] ss:$8 sps:$4 sm:$0xff]   ;;  %v6552_v34 = vld [vmem:[%s12813_s2 + $0x130] ss:$8 sps:$4 sm:$0xff]  }
  0x4e   :  { %1171 = vmatmul.mubr.bf16.gmra.mrb[12].mxu0 %v6456_v35  ;;  %1459 = vmatmul.mubr.bf16.gmra.mrb[12].mxu1 %v6459_v36  ;;  %v6553_v35 = vld [vmem:[%s12813_s2 + $0x374] ss:$8 sps:$4 sm:$0xff]   ;;  %v6555_v36 = vld [vmem:[%s12813_s2 + $0x370] ss:$8 sps:$4 sm:$0xff]  }
  0x4f   :  { %6341 = vmatprep.mubr.msk.bf16.mxu0 %vm897_vm0, %v6460_v37  ;;  %6377 = vmatprep.mubr.msk.bf16.mxu1 %vm897_vm0, %v6463_v38  ;;  %v6556_v37 = vld [vmem:[%s12813_s2 + $0x144] ss:$8 sps:$4 sm:$0xff]   ;;  %v6558_v38 = vld [vmem:[%s12813_s2 + $0x140] ss:$8 sps:$4 sm:$0xff]  }
  0x56   :  { %1179 = vmatmul.mubr.bf16.gmra.mrb[16].mxu0 %v6462_v39  ;;  %1467 = vmatmul.mubr.bf16.gmra.mrb[16].mxu1 %v6465_v40  ;;  %v6559_v39 = vld [vmem:[%s12813_s2 + $0x384] ss:$8 sps:$4 sm:$0xff]   ;;  %v6561_v40 = vld [vmem:[%s12813_s2 + $0x380] ss:$8 sps:$4 sm:$0xff]  }
  0x57   :  { %6342 = vmatprep.mubr.msk.bf16.mxu0 %vm897_vm0, %v6466_v41  ;;  %6378 = vmatprep.mubr.msk.bf16.mxu1 %vm897_vm0, %v6469_v42  ;;  %v6562_v41 = vld [vmem:[%s12813_s2 + $0x154] ss:$8 sps:$4 sm:$0xff]   ;;  %v6564_v42 = vld [vmem:[%s12813_s2 + $0x150] ss:$8 sps:$4 sm:$0xff]  }
  0x5e   :  { %1187 = vmatmul.mubr.bf16.gmra.mrb[20].mxu0 %v6468_v43  ;;  %1475 = vmatmul.mubr.bf16.gmra.mrb[20].mxu1 %v6471_v44  ;;  %v6565_v43 = vld [vmem:[%s12813_s2 + $0x394] ss:$8 sps:$4 sm:$0xff]   ;;  %v6567_v44 = vld [vmem:[%s12813_s2 + $0x390] ss:$8 sps:$4 sm:$0xff]  }
  0x5f   :  { %6343 = vmatprep.mubr.msk.bf16.mxu0 %vm897_vm0, %v6472_v45  ;;  %6379 = vmatprep.mubr.msk.bf16.mxu1 %vm897_vm0, %v6475_v46 }
  0x66   :  { %1195 = vmatmul.mubr.bf16.gmra.mrb[24].mxu0 %v6474_v47  ;;  %1483 = vmatmul.mubr.bf16.gmra.mrb[24].mxu1 %v6477_v48 }
  0x67   :  { %6344 = vmatprep.mubr.msk.bf16.mxu0 %vm897_vm0, %v6478_v49  ;;  %6380 = vmatprep.mubr.msk.bf16.mxu1 %vm897_vm0, %v6481_v50 }
  0x6e   :  { %1203 = vmatmul.mubr.bf16.gmra.mrb[28].mxu0 %v6480_v51  ;;  %1491 = vmatmul.mubr.bf16.gmra.mrb[28].mxu1 %v6483_v52 }
  0x6f   :  { %6345 = vmatprep.mubr.msk.bf16.mxu0 %vm897_vm0, %v6484_v53  ;;  %6381 = vmatprep.mubr.msk.bf16.mxu1 %vm897_vm0, %v6487_v54 }
  0x76   :  { %1211 = vmatmul.mubr.bf16.gmra.mrb[32].mxu0 %v6486_v55  ;;  %1499 = vmatmul.mubr.bf16.gmra.mrb[32].mxu1 %v6489_v56 }
  0x77   :  { %6346 = vmatprep.mubr.msk.bf16.mxu0 %vm897_vm0, %v6490_v57  ;;  %6382 = vmatprep.mubr.msk.bf16.mxu1 %vm897_vm0, %v6493_v58 }
  0x7e   :  { %1219 = vmatmul.mubr.bf16.gmra.mrb[36].mxu0 %v6492_v59  ;;  %1507 = vmatmul.mubr.bf16.gmra.mrb[36].mxu1 %v6495_v60 }
  0x7f   :  { %6347 = vmatprep.mubr.msk.bf16.mxu0 %vm897_vm0, %v6496_v61  ;;  %6383 = vmatprep.mubr.msk.bf16.mxu1 %vm897_vm0, %v6499_v62  ;;  %v6568_v61 = vld [vmem:[%s12813_s2 + $0x164] ss:$8 sps:$4 sm:$0xff]   ;;  %v6570_v62 = vld [vmem:[%s12813_s2 + $0x160] ss:$8 sps:$4 sm:$0xff]  }
  0x86   :  { %1227 = vmatmul.mubr.bf16.gmra.mrb[40].mxu0 %v6498_v63  ;;  %1515 = vmatmul.mubr.bf16.gmra.mrb[40].mxu1 %v6501_v1 }
  0x87   :  { %6348 = vmatprep.mubr.msk.bf16.mxu0 %vm897_vm0, %v6502_v2  ;;  %6384 = vmatprep.mubr.msk.bf16.mxu1 %vm897_vm0, %v6505_v3 }
  0x8e   :  { %1235 = vmatmul.mubr.bf16.gmra.mrb[44].mxu0 %v6504_v4  ;;  %1523 = vmatmul.mubr.bf16.gmra.mrb[44].mxu1 %v6507_v5 }
  0x8f   :  { %6349 = vmatprep.mubr.msk.bf16.mxu0 %vm897_vm0, %v6508_v6  ;;  %6385 = vmatprep.mubr.msk.bf16.mxu1 %vm897_vm0, %v6511_v7 }
  0x96   :  { %1243 = vmatmul.mubr.bf16.gmra.mrb[48].mxu0 %v6510_v8  ;;  %1531 = vmatmul.mubr.bf16.gmra.mrb[48].mxu1 %v6513_v9  ;;  %v6571_v9 = vld [vmem:[%s12813_s2 + $0x3a4] ss:$8 sps:$4 sm:$0xff]  }
  0x97   :  { %6350 = vmatprep.mubr.msk.bf16.mxu0 %vm897_vm0, %v6514_v10  ;;  %6386 = vmatprep.mubr.msk.bf16.mxu1 %vm897_vm0, %v6517_v11  ;;  %v6573_v10 = vld [vmem:[%s12813_s2 + $0x3a0] ss:$8 sps:$4 sm:$0xff]  }
  0x9e   :  { %1251 = vmatmul.mubr.bf16.gmra.mrb[52].mxu0 %v6516_v12  ;;  %1539 = vmatmul.mubr.bf16.gmra.mrb[52].mxu1 %v6519_v13 }
  0x9f   :  { %6351 = vmatprep.mubr.msk.bf16.mxu0 %vm897_vm0, %v6520_v14  ;;  %6387 = vmatprep.mubr.msk.bf16.mxu1 %vm897_vm0, %v6523_v15 }
  0xa6   :  { %1259 = vmatmul.mubr.bf16.gmra.mrb[56].mxu0 %v6522_v16  ;;  %1547 = vmatmul.mubr.bf16.gmra.mrb[56].mxu1 %v6525_v17 }
  0xa7   :  { %6352 = vmatprep.mubr.msk.bf16.mxu0 %vm897_vm0, %v6526_v18  ;;  %6388 = vmatprep.mubr.msk.bf16.mxu1 %vm897_vm0, %v6529_v19 }
  0xae   :  { %1267 = vmatmul.mubr.bf16.gmra.mrb[60].mxu0 %v6528_v20  ;;  %1555 = vmatmul.mubr.bf16.gmra.mrb[60].mxu1 %v6531_v21 }
  0xaf   :  { %6353 = vmatprep.mubr.msk.bf16.mxu0 %vm897_vm0, %v6532_v22  ;;  %6389 = vmatprep.mubr.msk.bf16.mxu1 %vm897_vm0, %v6535_v24 }
  0xb6   :  { %1275 = vmatmul.mubr.bf16.gmra.mrb[64].mxu0 %v6534_v23  ;;  %1563 = vmatmul.mubr.bf16.gmra.mrb[64].mxu1 %v6537_v25 }
  0xb7   :  { %6354 = vmatprep.mubr.msk.bf16.mxu0 %vm897_vm0, %v6538_v26  ;;  %6390 = vmatprep.mubr.msk.bf16.mxu1 %vm897_vm0, %v6541_v0 }
  0xbe   :  { %1283 = vmatmul.mubr.bf16.gmra.mrb[68].mxu0 %v6540_v27  ;;  %1571 = vmatmul.mubr.bf16.gmra.mrb[68].mxu1 %v6543_v28 }
  0xbf   :  { %6355 = vmatprep.mubr.msk.bf16.mxu0 %vm897_vm0, %v6544_v29  ;;  %6391 = vmatprep.mubr.msk.bf16.mxu1 %vm897_vm0, %v6547_v31  ;;  %v6574_v29 = vld [vmem:[%s12813_s2 + $0x174] ss:$8 sps:$4 sm:$0xff]  }
  0xc6   :  { %1291 = vmatmul.mubr.bf16.gmra.mrb[72].mxu0 %v6546_v30  ;;  %1579 = vmatmul.mubr.bf16.gmra.mrb[72].mxu1 %v6549_v32 }
  0xc7   :  { %6356 = vmatprep.mubr.msk.bf16.mxu0 %vm897_vm0, %v6550_v33  ;;  %6392 = vmatprep.mubr.msk.bf16.mxu1 %vm897_vm0, %v6553_v35 }
  0xce   :  { %1299 = vmatmul.mubr.bf16.gmra.mrb[76].mxu0 %v6552_v34  ;;  %1587 = vmatmul.mubr.bf16.gmra.mrb[76].mxu1 %v6555_v36  ;;  %v6576_v34 = vld [vmem:[%s12813_s2 + $0x170] ss:$8 sps:$4 sm:$0xff]  }
  0xcf   :  { %6357 = vmatprep.mubr.msk.bf16.mxu0 %vm897_vm0, %v6556_v37  ;;  %6393 = vmatprep.mubr.msk.bf16.mxu1 %vm897_vm0, %v6559_v39 }
  0xd6   :  { %1307 = vmatmul.mubr.bf16.gmra.mrb[80].mxu0 %v6558_v38  ;;  %1595 = vmatmul.mubr.bf16.gmra.mrb[80].mxu1 %v6561_v40 }
  0xd7   :  { %6358 = vmatprep.mubr.msk.bf16.mxu0 %vm897_vm0, %v6562_v41  ;;  %6394 = vmatprep.mubr.msk.bf16.mxu1 %vm897_vm0, %v6565_v43  ;;  %v6577_v41 = vld [vmem:[%s12813_s2 + $0x3b4] ss:$8 sps:$4 sm:$0xff]   ;;  %v6579_v43 = vld [vmem:[%s12813_s2 + $0x3b0] ss:$8 sps:$4 sm:$0xff]  }
  0xde   :  { %1315 = vmatmul.mubr.bf16.gmra.mrb[84].mxu0 %v6564_v42  ;;  %1603 = vmatmul.mubr.bf16.gmra.mrb[84].mxu1 %v6567_v44 }
  0xdf   :  { %6359 = vmatprep.mubr.msk.bf16.mxu0 %vm897_vm0, %v6568_v61  ;;  %6395 = vmatprep.mubr.msk.bf16.mxu1 %vm897_vm0, %v6571_v9 }
  0xe6   :  { %1323 = vmatmul.mubr.bf16.gmra.mrb[88].mxu0 %v6570_v62  ;;  %1611 = vmatmul.mubr.bf16.gmra.mrb[88].mxu1 %v6573_v10 }
  0xe7   :  { %6360 = vmatprep.mubr.msk.bf16.mxu0 %vm897_vm0, %v6574_v29  ;;  %6396 = vmatprep.mubr.msk.bf16.mxu1 %vm897_vm0, %v6577_v41 }
  0xee   :  { %1331 = vmatmul.mubr.bf16.gmra.mrb[92].mxu0 %v6576_v34  ;;  %1619 = vmatmul.mubr.bf16.gmra.mrb[92].mxu1 %v6579_v43 }
 0x109   :  { %v7449_v45 = vpop.f32.mrb[0].mxu0  ;;  %v7451_v46 = vpop.f32.mrb[0].mxu1 }
 0x10a   :  { %13368 = vst [vmem:[#allocation2_spill] sm:$0xff] %v7449_v45  ;;  %13369 = vst [vmem:[#allocation3_spill] sm:$0xff] %v7451_v46  ;;  %v1150_v47 = vpop.f32.mrb[1].mxu0  ;;  %v1438_v48 = vpop.f32.mrb[1].mxu1  ;;  %v1724_v49 = vsel %vm1723_vm1, %v7449_v45, 0.0  ;;  %v1940_v56 = vsel %vm1723_vm1, %v7451_v46, 0.0  ;;  %v2301_v2 = vmul.f32 %v7449_v45, %v7449_v45  ;;  %v2373_v13 = vmul.f32 %v7451_v46, %v7451_v46 }
 0x10b   :  { %v7455_v50 = vpop.f32.mrb[2].mxu1  ;;  %1725 = vadd.xlane.f32.xlu0 %v1724_v49  ;;  %v7457_v51 = vpop.f32.mrb[2].mxu0 }
 0x10c   :  { %13370 = vst [vmem:[#allocation4_spill] sm:$0xff] %v7455_v50  ;;  %13371 = vst [vmem:[#allocation5_spill] sm:$0xff] %v7457_v51  ;;  %v1153_v52 = vpop.f32.mrb[3].mxu0  ;;  %v1441_v53 = vpop.f32.mrb[3].mxu1  ;;  %v1943_v54 = vsel %vm1723_vm1, %v7455_v50, 0.0  ;;  %v2302_v55 = vmul.f32 %v7457_v51, %v7457_v51  ;;  %v2374_v58 = vmul.f32 %v7455_v50, %v7455_v50  ;;  %v1727_v63 = vsel %vm1723_vm1, %v7457_v51, 0.0 }
 0x10d   :  { %1944 = vadd.xlane.f32.xlu1 %v1943_v54  ;;  %v2445_v11 = vsel %vm1723_vm1, %v2301_v2, 0.0  ;;  %v2661_v16 = vsel %vm1723_vm1, %v2373_v13, 0.0 }
 0x10e   :  { %v2448_v57 = vsel %vm1723_vm1, %v2302_v55, 0.0  ;;  %v2664_v6 = vsel %vm1723_vm1, %v2374_v58, 0.0 }
 0x10f   :  { %1941 = vadd.xlane.f32.xlu0 %v1940_v56 }
 0x111   :  { %2449 = vadd.xlane.f32.xlu1 %v2448_v57  ;;  %v7468_v59 = vpop.f32.mrb[4].mxu0  ;;  %v7470_v60 = vpop.f32.mrb[4].mxu1 }
 0x112   :  { %13372 = vst [vmem:[#allocation6_spill] sm:$0xff] %v7468_v59  ;;  %13373 = vst [vmem:[#allocation7_spill] sm:$0xff] %v7470_v60  ;;  %v1158_v1 = vpop.f32.mrb[5].mxu0  ;;  %v1446_v3 = vpop.f32.mrb[5].mxu1  ;;  %v1730_v12 = vsel %vm1723_vm1, %v7468_v59, 0.0  ;;  %v1946_v22 = vsel %vm1723_vm1, %v7470_v60, 0.0  ;;  %v2303_v25 = vmul.f32 %v7468_v59, %v7468_v59  ;;  %v2375_v31 = vmul.f32 %v7470_v60, %v7470_v60 }
 0x113   :  { %1728 = vadd.xlane.f32.xlu0 %v1727_v63  ;;  %v7482_v4 = vpop.f32.mrb[6].mxu0  ;;  %v7484_v5 = vpop.f32.mrb[6].mxu1 }
 0x114   :  { %13374 = vst [vmem:[#allocation8_spill] sm:$0xff] %v7482_v4  ;;  %13375 = vst [vmem:[#allocation9_spill] sm:$0xff] %v7484_v5  ;;  %v1161_v7 = vpop.f32.mrb[7].mxu0  ;;  %v1449_v8 = vpop.f32.mrb[7].mxu1  ;;  %v1733_v21 = vsel %vm1723_vm1, %v7482_v4, 0.0  ;;  %v1949_v26 = vsel %vm1723_vm1, %v7484_v5, 0.0  ;;  %v2304_v27 = vmul.f32 %v7482_v4, %v7482_v4  ;;  %v2376_v38 = vmul.f32 %v7484_v5, %v7484_v5 }
 0x115   :  { %2665 = vadd.xlane.f32.xlu1 %v2664_v6  ;;  %v2451_v30 = vsel %vm1723_vm1, %v2303_v25, 0.0  ;;  %v2667_v42 = vsel %vm1723_vm1, %v2375_v31, 0.0  ;;  %v6580_v6 = vld [vmem:[%s12813_s2 + $0x184] ss:$8 sps:$4 sm:$0xff]  }
 0x116   :  { %v2454_v37 = vsel %vm1723_vm1, %v2304_v27, 0.0  ;;  %v2670_v44 = vsel %vm1723_vm1, %v2376_v38, 0.0  ;;  %6361 = vmatprep.mubr.msk.bf16.mxu0 %vm897_vm0, %v6580_v6 }
 0x117   :  { %2446 = vadd.xlane.f32.xlu0 %v2445_v11  ;;  %v6582_v11 = vld [vmem:[%s12813_s2 + $0x180] ss:$8 sps:$4 sm:$0xff]  }
 0x118   :  { %1339 = vmatmul.mubr.bf16.gmra.mrb[96].mxu0 %v6582_v11 }
 0x119   :  { %1731 = vadd.xlane.f32.xlu1 %v1730_v12  ;;  %v7500_v14 = vpop.f32.mrb[8].mxu0  ;;  %v7502_v15 = vpop.f32.mrb[8].mxu1 }
 0x11a   :  { %13376 = vst [vmem:[#allocation10_spill] sm:$0xff] %v7500_v14  ;;  %13377 = vst [vmem:[#allocation11_spill] sm:$0xff] %v7502_v15  ;;  %v1166_v17 = vpop.f32.mrb[9].mxu0  ;;  %v1454_v18 = vpop.f32.mrb[9].mxu1  ;;  %v1736_v47 = vsel %vm1723_vm1, %v7500_v14, 0.0  ;;  %v1952_v57 = vsel %vm1723_vm1, %v7502_v15, 0.0  ;;  %v2305_v62 = vmul.f32 %v7500_v14, %v7500_v14  ;;  %v2377_v8 = vmul.f32 %v7502_v15, %v7502_v15 }
 0x11b   :  { %2662 = vadd.xlane.f32.xlu0 %v2661_v16  ;;  %v7505_v19 = vpop.f32.mrb[10].mxu0  ;;  %v7507_v20 = vpop.f32.mrb[10].mxu1 }
 0x11c   :  { %13378 = vst [vmem:[#allocation12_spill] sm:$0xff] %v7505_v19  ;;  %13379 = vst [vmem:[#allocation13_spill] sm:$0xff] %v7507_v20  ;;  %v1169_v23 = vpop.f32.mrb[11].mxu0  ;;  %v1457_v24 = vpop.f32.mrb[11].mxu1  ;;  %v1739_v56 = vsel %vm1723_vm1, %v7505_v19, 0.0  ;;  %v1955_v63 = vsel %vm1723_vm1, %v7507_v20, 0.0  ;;  %v2306_v1 = vmul.f32 %v7505_v19, %v7505_v19  ;;  %v2378_v17 = vmul.f32 %v7507_v20, %v7507_v20 }
 0x11d   :  { %1734 = vadd.xlane.f32.xlu1 %v1733_v21  ;;  %v2457_v7 = vsel %vm1723_vm1, %v2305_v62, 0.0  ;;  %v2673_v23 = vsel %vm1723_vm1, %v2377_v8, 0.0  ;;  %v6585_v24 = vld [vmem:[%s12813_s2 + $0x3c0] ss:$8 sps:$4 sm:$0xff]   ;;  %v6589_v8 = vld [vmem:[%s12813_s2 + $0x3d4] ss:$8 sps:$4 sm:$0xff]  }
 0x11e   :  { %v2460_v16 = vsel %vm1723_vm1, %v2306_v1, 0.0  ;;  %v2676_v25 = vsel %vm1723_vm1, %v2378_v17, 0.0 }
 0x11f   :  { %1947 = vadd.xlane.f32.xlu0 %v1946_v22  ;;  %v6583_v22 = vld [vmem:[%s12813_s2 + $0x3c4] ss:$8 sps:$4 sm:$0xff]  }
 0x120   :  { %6397 = vmatprep.mubr.msk.bf16.mxu1 %vm897_vm0, %v6583_v22 }
 0x121   :  { %1950 = vadd.xlane.f32.xlu1 %v1949_v26  ;;  %v7519_v0 = vpop.f32.mrb[12].mxu0  ;;  %v7521_v28 = vpop.f32.mrb[12].mxu1  ;;  %1627 = vmatmul.mubr.bf16.gmra.mrb[96].mxu1 %v6585_v24 }
 0x122   :  { %13380 = vst [vmem:[#allocation14_spill] sm:$0xff] %v7519_v0  ;;  %13381 = vst [vmem:[#allocation15_spill] sm:$0xff] %v7521_v28  ;;  %v1174_v32 = vpop.f32.mrb[13].mxu0  ;;  %v1462_v33 = vpop.f32.mrb[13].mxu1  ;;  %v1742_v26 = vsel %vm1723_vm1, %v7519_v0, 0.0  ;;  %6398 = vmatprep.mubr.msk.bf16.mxu1 %vm897_vm0, %v6589_v8 }
 0x123   :  { %2452 = vadd.xlane.f32.xlu0 %v2451_v30  ;;  %v7532_v35 = vpop.f32.mrb[14].mxu0  ;;  %v7534_v36 = vpop.f32.mrb[14].mxu1  ;;  %v6595_v8 = vld [vmem:[%s12813_s2 + $0x3e4] ss:$8 sps:$4 sm:$0xff]  }
 0x124   :  { %13382 = vst [vmem:[#allocation16_spill] sm:$0xff] %v7532_v35  ;;  %13383 = vst [vmem:[#allocation17_spill] sm:$0xff] %v7534_v36  ;;  %v1177_v39 = vpop.f32.mrb[15].mxu0  ;;  %v1465_v40 = vpop.f32.mrb[15].mxu1  ;;  %v1745_v34 = vsel %vm1723_vm1, %v7532_v35, 0.0  ;;  %v1961_v41 = vsel %vm1723_vm1, %v7534_v36, 0.0  ;;  %v2380_v1 = vmul.f32 %v7534_v36, %v7534_v36 }
 0x125   :  { %2455 = vadd.xlane.f32.xlu1 %v2454_v37  ;;  %v1958_v37 = vsel %vm1723_vm1, %v7521_v28, 0.0  ;;  %v2307_v40 = vmul.f32 %v7519_v0, %v7519_v0 }
 0x126   :  { %v2682_v11 = vsel %vm1723_vm1, %v2380_v1, 0.0 }
 0x127   :  { %2668 = vadd.xlane.f32.xlu0 %v2667_v42  ;;  %v2308_v42 = vmul.f32 %v7532_v35, %v7532_v35 }
 0x129   :  { %2671 = vadd.xlane.f32.xlu1 %v2670_v44  ;;  %v7551_v48 = vpop.f32.mrb[16].mxu0  ;;  %v7553_v49 = vpop.f32.mrb[16].mxu1 }
 0x12a   :  { %13384 = vst [vmem:[#allocation18_spill] sm:$0xff] %v7551_v48  ;;  %13385 = vst [vmem:[#allocation19_spill] sm:$0xff] %v7553_v49  ;;  %v1182_v52 = vpop.f32.mrb[17].mxu0  ;;  %v1470_v53 = vpop.f32.mrb[17].mxu1 }
 0x12b   :  { %1737 = vadd.xlane.f32.xlu0 %v1736_v47  ;;  %v7555_v54 = vpop.f32.mrb[18].mxu0  ;;  %v7557_v55 = vpop.f32.mrb[18].mxu1  ;;  %v6586_v47 = vld [vmem:[%s12813_s2 + $0x194] ss:$8 sps:$4 sm:$0xff]   ;;  %v2463_v52 = vsel %vm1723_vm1, %v2307_v40, 0.0  ;;  %v2379_v53 = vmul.f32 %v7521_v28, %v7521_v28 }
 0x12c   :  { %13386 = vst [vmem:[#allocation20_spill] sm:$0xff] %v7555_v54  ;;  %13387 = vst [vmem:[#allocation21_spill] sm:$0xff] %v7557_v55  ;;  %v1185_v58 = vpop.f32.mrb[19].mxu0  ;;  %v1473_v61 = vpop.f32.mrb[19].mxu1  ;;  %6362 = vmatprep.mubr.msk.bf16.mxu0 %vm897_vm0, %v6586_v47  ;;  %v2381_v47 = vmul.f32 %v7553_v49, %v7553_v49  ;;  %v2382_v1 = vmul.f32 %v7557_v55, %v7557_v55 }
 0x12d   :  { %1740 = vadd.xlane.f32.xlu1 %v1739_v56  ;;  %v6588_v58 = vld [vmem:[%s12813_s2 + $0x190] ss:$8 sps:$4 sm:$0xff]  }
 0x12e   :  { %1347 = vmatmul.mubr.bf16.gmra.mrb[100].mxu0 %v6588_v58 }
 0x12f   :  { %1953 = vadd.xlane.f32.xlu0 %v1952_v57 }
 0x131   :  { %1956 = vadd.xlane.f32.xlu1 %v1955_v63  ;;  %v7569_v2 = vpop.f32.mrb[20].mxu0  ;;  %v7571_v3 = vpop.f32.mrb[20].mxu1  ;;  %v2466_v63 = vsel %vm1723_vm1, %v2308_v42, 0.0 }
 0x132   :  { %13388 = vst [vmem:[#allocation22_spill] sm:$0xff] %v7569_v2  ;;  %13389 = vst [vmem:[#allocation23_spill] sm:$0xff] %v7571_v3  ;;  %v1190_v9 = vpop.f32.mrb[21].mxu0  ;;  %v1478_v10 = vpop.f32.mrb[21].mxu1 }
 0x133   :  { %2458 = vadd.xlane.f32.xlu0 %v2457_v7  ;;  %v7582_v12 = vpop.f32.mrb[22].mxu0  ;;  %v7584_v13 = vpop.f32.mrb[22].mxu1  ;;  %v2679_v9 = vsel %vm1723_vm1, %v2379_v53, 0.0  ;;  %v6591_v10 = vld [vmem:[%s12813_s2 + $0x3d0] ss:$8 sps:$4 sm:$0xff]  }
 0x134   :  { %13390 = vst [vmem:[#allocation24_spill] sm:$0xff] %v7582_v12  ;;  %13391 = vst [vmem:[#allocation25_spill] sm:$0xff] %v7584_v13  ;;  %v1193_v18 = vpop.f32.mrb[23].mxu0  ;;  %v1481_v21 = vpop.f32.mrb[23].mxu1  ;;  %1635 = vmatmul.mubr.bf16.gmra.mrb[100].mxu1 %v6591_v10  ;;  %v6597_v10 = vld [vmem:[%s12813_s2 + $0x3e0] ss:$8 sps:$4 sm:$0xff]  }
 0x135   :  { %2461 = vadd.xlane.f32.xlu1 %v2460_v16  ;;  %v1748_v16 = vsel %vm1723_vm1, %v7551_v48, 0.0  ;;  %6399 = vmatprep.mubr.msk.bf16.mxu1 %vm897_vm0, %v6595_v8 }
 0x137   :  { %2674 = vadd.xlane.f32.xlu0 %v2673_v23 }
 0x139   :  { %2677 = vadd.xlane.f32.xlu1 %v2676_v25  ;;  %v7601_v27 = vpop.f32.mrb[24].mxu0  ;;  %v7603_v29 = vpop.f32.mrb[24].mxu1  ;;  %v1751_v25 = vsel %vm1723_vm1, %v7555_v54, 0.0 }
 0x13a   :  { %13392 = vst [vmem:[#allocation26_spill] sm:$0xff] %v7601_v27  ;;  %13393 = vst [vmem:[#allocation27_spill] sm:$0xff] %v7603_v29  ;;  %v1198_v30 = vpop.f32.mrb[25].mxu0  ;;  %v1486_v31 = vpop.f32.mrb[25].mxu1 }
 0x13b   :  { %1743 = vadd.xlane.f32.xlu0 %v1742_v26  ;;  %v7605_v32 = vpop.f32.mrb[26].mxu0  ;;  %v7607_v33 = vpop.f32.mrb[26].mxu1  ;;  %v1964_v26 = vsel %vm1723_vm1, %v7553_v49, 0.0 }
 0x13c   :  { %13394 = vst [vmem:[#allocation28_spill] sm:$0xff] %v7605_v32  ;;  %13395 = vst [vmem:[#allocation29_spill] sm:$0xff] %v7607_v33  ;;  %v1201_v38 = vpop.f32.mrb[27].mxu0  ;;  %v1489_v39 = vpop.f32.mrb[27].mxu1  ;;  %1643 = vmatmul.mubr.bf16.gmra.mrb[104].mxu1 %v6597_v10 }
 0x13d   :  { %1746 = vadd.xlane.f32.xlu1 %v1745_v34  ;;  %v2309_v34 = vmul.f32 %v7551_v48, %v7551_v48  ;;  %v2310_v38 = vmul.f32 %v7555_v54, %v7555_v54 }
 0x13f   :  { %1959 = vadd.xlane.f32.xlu0 %v1958_v37  ;;  %v1967_v37 = vsel %vm1723_vm1, %v7557_v55, 0.0  ;;  %v2469_v42 = vsel %vm1723_vm1, %v2309_v34, 0.0  ;;  %v1757_v34 = vsel %vm1723_vm1, %v7582_v12, 0.0 }
 0x141   :  { %1962 = vadd.xlane.f32.xlu1 %v1961_v41  ;;  %v7619_v43 = vpop.f32.mrb[28].mxu0  ;;  %v7621_v44 = vpop.f32.mrb[28].mxu1  ;;  %v6592_v41 = vld [vmem:[%s12813_s2 + $0x1a4] ss:$8 sps:$4 sm:$0xff]  }
 0x142   :  { %13396 = vst [vmem:[#allocation30_spill] sm:$0xff] %v7619_v43  ;;  %13397 = vst [vmem:[#allocation31_spill] sm:$0xff] %v7621_v44  ;;  %v1206_v56 = vpop.f32.mrb[29].mxu0  ;;  %v1494_v57 = vpop.f32.mrb[29].mxu1  ;;  %6363 = vmatprep.mubr.msk.bf16.mxu0 %vm897_vm0, %v6592_v41 }
 0x143   :  { %2464 = vadd.xlane.f32.xlu0 %v2463_v52  ;;  %v7632_v61 = vpop.f32.mrb[30].mxu0  ;;  %v7634_v62 = vpop.f32.mrb[30].mxu1  ;;  %v6594_v56 = vld [vmem:[%s12813_s2 + $0x1a0] ss:$8 sps:$4 sm:$0xff]  }
 0x144   :  { %13398 = vst [vmem:[#allocation32_spill] sm:$0xff] %v7632_v61  ;;  %13399 = vst [vmem:[#allocation33_spill] sm:$0xff] %v7634_v62  ;;  %v1209_v6 = vpop.f32.mrb[31].mxu0  ;;  %v1497_v7 = vpop.f32.mrb[31].mxu1  ;;  %1355 = vmatmul.mubr.bf16.gmra.mrb[104].mxu0 %v6594_v56 }
 0x145   :  { %2467 = vadd.xlane.f32.xlu1 %v2466_v63  ;;  %v2472_v63 = vsel %vm1723_vm1, %v2310_v38, 0.0 }
 0x147   :  { %2680 = vadd.xlane.f32.xlu0 %v2679_v9  ;;  %v2685_v9 = vsel %vm1723_vm1, %v2381_v47, 0.0  ;;  %v1973_v47 = vsel %vm1723_vm1, %v7584_v13, 0.0 }
 0x149   :  { %2683 = vadd.xlane.f32.xlu1 %v2682_v11  ;;  %v7651_v17 = vpop.f32.mrb[32].mxu0  ;;  %v7653_v18 = vpop.f32.mrb[32].mxu1  ;;  %v2688_v11 = vsel %vm1723_vm1, %v2382_v1, 0.0 }
 0x14a   :  { %13400 = vst [vmem:[#allocation34_spill] sm:$0xff] %v7651_v17  ;;  %13401 = vst [vmem:[#allocation35_spill] sm:$0xff] %v7653_v18  ;;  %v1214_v21 = vpop.f32.mrb[33].mxu0  ;;  %v1502_v22 = vpop.f32.mrb[33].mxu1 }
 0x14b   :  { %1749 = vadd.xlane.f32.xlu0 %v1748_v16  ;;  %v7655_v23 = vpop.f32.mrb[34].mxu0  ;;  %v7657_v24 = vpop.f32.mrb[34].mxu1  ;;  %v1754_v16 = vsel %vm1723_vm1, %v7569_v2, 0.0 }
 0x14c   :  { %13402 = vst [vmem:[#allocation36_spill] sm:$0xff] %v7655_v23  ;;  %13403 = vst [vmem:[#allocation37_spill] sm:$0xff] %v7657_v24  ;;  %v1217_v30 = vpop.f32.mrb[35].mxu0  ;;  %v1505_v31 = vpop.f32.mrb[35].mxu1 }
 0x14d   :  { %1752 = vadd.xlane.f32.xlu1 %v1751_v25 }
 0x14f   :  { %1965 = vadd.xlane.f32.xlu0 %v1964_v26 }
 0x151   :  { %1968 = vadd.xlane.f32.xlu1 %v1967_v37  ;;  %v7669_v39 = vpop.f32.mrb[36].mxu0  ;;  %v7671_v40 = vpop.f32.mrb[36].mxu1  ;;  %v1970_v37 = vsel %vm1723_vm1, %v7571_v3, 0.0 }
 0x152   :  { %13404 = vst [vmem:[#allocation38_spill] sm:$0xff] %v7669_v39  ;;  %13405 = vst [vmem:[#allocation39_spill] sm:$0xff] %v7671_v40  ;;  %v1222_v52 = vpop.f32.mrb[37].mxu0  ;;  %v1510_v53 = vpop.f32.mrb[37].mxu1 }
 0x153   :  { %2470 = vadd.xlane.f32.xlu0 %v2469_v42  ;;  %v7682_v57 = vpop.f32.mrb[38].mxu0  ;;  %v7684_v58 = vpop.f32.mrb[38].mxu1  ;;  %v2311_v42 = vmul.f32 %v7569_v2, %v7569_v2  ;;  %v2312_v52 = vmul.f32 %v7582_v12, %v7582_v12 }
 0x154   :  { %13406 = vst [vmem:[#allocation40_spill] sm:$0xff] %v7682_v57  ;;  %13407 = vst [vmem:[#allocation41_spill] sm:$0xff] %v7684_v58  ;;  %v1225_v6 = vpop.f32.mrb[39].mxu0  ;;  %v1513_v7 = vpop.f32.mrb[39].mxu1  ;;  %v2320_v45 = vmul.f32 %v7682_v57, %v7682_v57 }
 0x155   :  { %2473 = vadd.xlane.f32.xlu1 %v2472_v63  ;;  %v6598_v63 = vld [vmem:[%s12813_s2 + $0x1b4] ss:$8 sps:$4 sm:$0xff]   ;;  %v2475_v1 = vsel %vm1723_vm1, %v2311_v42, 0.0  ;;  %v2383_v6 = vmul.f32 %v7571_v3, %v7571_v3 }
 0x156   :  { %6364 = vmatprep.mubr.msk.bf16.mxu0 %vm897_vm0, %v6598_v63 }
 0x157   :  { %2686 = vadd.xlane.f32.xlu0 %v2685_v9  ;;  %v6600_v9 = vld [vmem:[%s12813_s2 + $0x1b0] ss:$8 sps:$4 sm:$0xff]  }
 0x158   :  { %1363 = vmatmul.mubr.bf16.gmra.mrb[108].mxu0 %v6600_v9  ;;  %v1763_v9 = vsel %vm1723_vm1, %v7605_v32, 0.0 }
 0x159   :  { %2689 = vadd.xlane.f32.xlu1 %v2688_v11  ;;  %v7701_v21 = vpop.f32.mrb[40].mxu0  ;;  %v7703_v22 = vpop.f32.mrb[40].mxu1 }
 0x15a   :  { %13408 = vst [vmem:[#allocation42_spill] sm:$0xff] %v7701_v21  ;;  %13409 = vst [vmem:[#allocation43_spill] sm:$0xff] %v7703_v22  ;;  %v1230_v25 = vpop.f32.mrb[41].mxu0  ;;  %v1518_v26 = vpop.f32.mrb[41].mxu1 }
 0x15b   :  { %1755 = vadd.xlane.f32.xlu0 %v1754_v16  ;;  %v7705_v30 = vpop.f32.mrb[42].mxu0  ;;  %v7707_v31 = vpop.f32.mrb[42].mxu1  ;;  %v2478_v16 = vsel %vm1723_vm1, %v2312_v52, 0.0  ;;  %v2384_v25 = vmul.f32 %v7584_v13, %v7584_v13 }
 0x15c   :  { %13410 = vst [vmem:[#allocation44_spill] sm:$0xff] %v7705_v30  ;;  %13411 = vst [vmem:[#allocation45_spill] sm:$0xff] %v7707_v31  ;;  %v1233_v38 = vpop.f32.mrb[43].mxu0  ;;  %v1521_v41 = vpop.f32.mrb[43].mxu1 }
 0x15d   :  { %1758 = vadd.xlane.f32.xlu1 %v1757_v34  ;;  %v2691_v38 = vsel %vm1723_vm1, %v2383_v6, 0.0  ;;  %v6603_v41 = vld [vmem:[%s12813_s2 + $0x3f0] ss:$8 sps:$4 sm:$0xff]   ;;  %v2694_v42 = vsel %vm1723_vm1, %v2384_v25, 0.0 }
 0x15f   :  { %1971 = vadd.xlane.f32.xlu0 %v1970_v37  ;;  %v6601_v37 = vld [vmem:[%s12813_s2 + $0x3f4] ss:$8 sps:$4 sm:$0xff]  }
 0x160   :  { %6400 = vmatprep.mubr.msk.bf16.mxu1 %vm897_vm0, %v6601_v37  ;;  %v1979_v37 = vsel %vm1723_vm1, %v7607_v33, 0.0 }
 0x161   :  { %1974 = vadd.xlane.f32.xlu1 %v1973_v47  ;;  %v7719_v53 = vpop.f32.mrb[44].mxu0  ;;  %v7721_v56 = vpop.f32.mrb[44].mxu1  ;;  %v1760_v47 = vsel %vm1723_vm1, %v7601_v27, 0.0  ;;  %1651 = vmatmul.mubr.bf16.gmra.mrb[108].mxu1 %v6603_v41 }
 0x162   :  { %13412 = vst [vmem:[#allocation46_spill] sm:$0xff] %v7719_v53  ;;  %13413 = vst [vmem:[#allocation47_spill] sm:$0xff] %v7721_v56  ;;  %v1238_v7 = vpop.f32.mrb[45].mxu0  ;;  %v1526_v8 = vpop.f32.mrb[45].mxu1  ;;  %v2395_v14 = vmul.f32 %v7721_v56, %v7721_v56 }
 0x163   :  { %2476 = vadd.xlane.f32.xlu0 %v2475_v1  ;;  %v7732_v10 = vpop.f32.mrb[46].mxu0  ;;  %v7734_v11 = vpop.f32.mrb[46].mxu1 }
 0x164   :  { %13414 = vst [vmem:[#allocation48_spill] sm:$0xff] %v7732_v10  ;;  %13415 = vst [vmem:[#allocation49_spill] sm:$0xff] %v7734_v11  ;;  %v1241_v26 = vpop.f32.mrb[47].mxu0  ;;  %v1529_v34 = vpop.f32.mrb[47].mxu1 }
 0x165   :  { %2479 = vadd.xlane.f32.xlu1 %v2478_v16  ;;  %v1976_v16 = vsel %vm1723_vm1, %v7603_v29, 0.0  ;;  %v2313_v34 = vmul.f32 %v7601_v27, %v7601_v27 }
 0x167   :  { %2692 = vadd.xlane.f32.xlu0 %v2691_v38  ;;  %v2314_v38 = vmul.f32 %v7605_v32, %v7605_v32 }
 0x169   :  { %2695 = vadd.xlane.f32.xlu1 %v2694_v42  ;;  %v7751_v52 = vpop.f32.mrb[48].mxu0  ;;  %v7753_v63 = vpop.f32.mrb[48].mxu1  ;;  %v2484_v27 = vsel %vm1723_vm1, %v2314_v38, 0.0 }
 0x16a   :  { %13416 = vst [vmem:[#allocation50_spill] sm:$0xff] %v7751_v52  ;;  %13417 = vst [vmem:[#allocation51_spill] sm:$0xff] %v7753_v63  ;;  %v1246_v1 = vpop.f32.mrb[49].mxu0  ;;  %v1534_v6 = vpop.f32.mrb[49].mxu1  ;;  %v1796_v20 = vsel %vm1723_vm1, %v7751_v52, 0.0 }
 0x16b   :  { %1761 = vadd.xlane.f32.xlu0 %v1760_v47  ;;  %v7755_v7 = vpop.f32.mrb[50].mxu0  ;;  %v7757_v8 = vpop.f32.mrb[50].mxu1  ;;  %v6604_v47 = vld [vmem:[%s12813_s2 + $0x1c4] ss:$8 sps:$4 sm:$0xff]   ;;  %v2481_v1 = vsel %vm1723_vm1, %v2313_v34, 0.0  ;;  %v2385_v6 = vmul.f32 %v7603_v29, %v7603_v29  ;;  %v2386_v34 = vmul.f32 %v7607_v33, %v7607_v33 }
 0x16c   :  { %13418 = vst [vmem:[#allocation52_spill] sm:$0xff] %v7755_v7  ;;  %13419 = vst [vmem:[#allocation53_spill] sm:$0xff] %v7757_v8  ;;  %v1249_v25 = vpop.f32.mrb[51].mxu0  ;;  %v1537_v26 = vpop.f32.mrb[51].mxu1  ;;  %6365 = vmatprep.mubr.msk.bf16.mxu0 %vm897_vm0, %v6604_v47 }
 0x16d   :  { %1764 = vadd.xlane.f32.xlu1 %v1763_v9  ;;  %v6606_v25 = vld [vmem:[%s12813_s2 + $0x1c0] ss:$8 sps:$4 sm:$0xff]   ;;  %v2700_v38 = vsel %vm1723_vm1, %v2386_v34, 0.0  ;;  %v1982_v34 = vsel %vm1723_vm1, %v7621_v44, 0.0 }
 0x16e   :  { %1371 = vmatmul.mubr.bf16.gmra.mrb[112].mxu0 %v6606_v25 }
 0x16f   :  { %1977 = vadd.xlane.f32.xlu0 %v1976_v16 }
 0x171   :  { %1980 = vadd.xlane.f32.xlu1 %v1979_v37  ;;  %v7769_v41 = vpop.f32.mrb[52].mxu0  ;;  %v7771_v42 = vpop.f32.mrb[52].mxu1 }
 0x172   :  { %13420 = vst [vmem:[#allocation54_spill] sm:$0xff] %v7769_v41  ;;  %13421 = vst [vmem:[#allocation55_spill] sm:$0xff] %v7771_v42  ;;  %v1254_v9 = vpop.f32.mrb[53].mxu0  ;;  %v1542_v16 = vpop.f32.mrb[53].mxu1 }
 0x173   :  { %2482 = vadd.xlane.f32.xlu0 %v2481_v1  ;;  %v7782_v26 = vpop.f32.mrb[54].mxu0  ;;  %v7784_v37 = vpop.f32.mrb[54].mxu1  ;;  %v6607_v9 = vld [vmem:[%s12813_s2 + $0x404] ss:$8 sps:$4 sm:$0xff]   ;;  %v2697_v1 = vsel %vm1723_vm1, %v2385_v6, 0.0 }
 0x174   :  { %13422 = vst [vmem:[#allocation56_spill] sm:$0xff] %v7782_v26  ;;  %13423 = vst [vmem:[#allocation57_spill] sm:$0xff] %v7784_v37  ;;  %v1257_v32 = vpop.f32.mrb[55].mxu0  ;;  %v1545_v29 = vpop.f32.mrb[55].mxu1  ;;  %v6609_v16 = vld [vmem:[%s12813_s2 + $0x400] ss:$8 sps:$4 sm:$0xff]   ;;  %6401 = vmatprep.mubr.msk.bf16.mxu1 %vm897_vm0, %v6607_v9 }
 0x175   :  { %2485 = vadd.xlane.f32.xlu1 %v2484_v27  ;;  %v1766_v29 = vsel %vm1723_vm1, %v7619_v43, 0.0  ;;  %1659 = vmatmul.mubr.bf16.gmra.mrb[112].mxu1 %v6609_v16  ;;  %v1769_v9 = vsel %vm1723_vm1, %v7632_v61, 0.0 }
 0x177   :  { %2698 = vadd.xlane.f32.xlu0 %v2697_v1 }
 0x179   :  { %2701 = vadd.xlane.f32.xlu1 %v2700_v38  ;;  %v7801_v27 = vpop.f32.mrb[56].mxu0  ;;  %v7803_v32 = vpop.f32.mrb[56].mxu1  ;;  %v2315_v38 = vmul.f32 %v7619_v43, %v7619_v43 }
 0x17a   :  { %13424 = vst [vmem:[#allocation58_spill] sm:$0xff] %v7801_v27  ;;  %13425 = vst [vmem:[#allocation59_spill] sm:$0xff] %v7803_v32  ;;  %v1262_v47 = vpop.f32.mrb[57].mxu0  ;;  %v1550_v6 = vpop.f32.mrb[57].mxu1 }
 0x17b   :  { %1767 = vadd.xlane.f32.xlu0 %v1766_v29  ;;  %v7805_v25 = vpop.f32.mrb[58].mxu0  ;;  %v7807_v33 = vpop.f32.mrb[58].mxu1  ;;  %v1985_v29 = vsel %vm1723_vm1, %v7634_v62, 0.0  ;;  %v2316_v47 = vmul.f32 %v7632_v61, %v7632_v61  ;;  %v6612_v61 = vld [vmem:[%s12813_s2 + $0x1d0] ss:$8 sps:$4 sm:$0xff]  }
 0x17c   :  { %13426 = vst [vmem:[#allocation60_spill] sm:$0xff] %v7805_v25  ;;  %13427 = vst [vmem:[#allocation61_spill] sm:$0xff] %v7807_v33  ;;  %v1265_v1 = vpop.f32.mrb[59].mxu0  ;;  %v1553_v16 = vpop.f32.mrb[59].mxu1 }
 0x17d   :  { %1770 = vadd.xlane.f32.xlu1 %v1769_v9  ;;  %v6610_v1 = vld [vmem:[%s12813_s2 + $0x1d4] ss:$8 sps:$4 sm:$0xff]   ;;  %v2487_v9 = vsel %vm1723_vm1, %v2315_v38, 0.0  ;;  %v2388_v38 = vmul.f32 %v7634_v62, %v7634_v62 }
 0x17e   :  { %6366 = vmatprep.mubr.msk.bf16.mxu0 %vm897_vm0, %v6610_v1 }
 0x17f   :  { %1983 = vadd.xlane.f32.xlu0 %v1982_v34  ;;  %v2387_v34 = vmul.f32 %v7621_v44, %v7621_v44  ;;  %1379 = vmatmul.mubr.bf16.gmra.mrb[116].mxu0 %v6612_v61 }
 0x181   :  { %1986 = vadd.xlane.f32.xlu1 %v1985_v29  ;;  %v7819_v6 = vpop.f32.mrb[60].mxu0  ;;  %v7821_v3 = vpop.f32.mrb[60].mxu1 }
 0x182   :  { %13428 = vst [vmem:[#allocation62_spill] sm:$0xff] %v7819_v6  ;;  %13429 = vst [vmem:[#allocation63_spill] sm:$0xff] %v7821_v3  ;;  %v1270_v16 = vpop.f32.mrb[61].mxu0  ;;  %v1558_v43 = vpop.f32.mrb[61].mxu1  ;;  %v2490_v3 = vsel %vm1723_vm1, %v2316_v47, 0.0  ;;  %v2706_v47 = vsel %vm1723_vm1, %v2388_v38, 0.0 }
 0x183   :  { %2488 = vadd.xlane.f32.xlu0 %v2487_v9  ;;  %v7832_v29 = vpop.f32.mrb[62].mxu0  ;;  %v7834_v6 = vpop.f32.mrb[62].mxu1  ;;  %v6613_v43 = vld [vmem:[%s12813_s2 + $0x414] ss:$8 sps:$4 sm:$0xff]   ;;  %v2703_v9 = vsel %vm1723_vm1, %v2387_v34, 0.0  ;;  %v1775_v34 = vsel %vm1723_vm1, %v7655_v23, 0.0 }
 0x184   :  { %13430 = vst [vmem:[#allocation64_spill] sm:$0xff] %v7832_v29  ;;  %13431 = vst [vmem:[#allocation65_spill] sm:$0xff] %v7834_v6  ;;  %v1273_v13 = vpop.f32.mrb[63].mxu0  ;;  %v1561_v44 = vpop.f32.mrb[63].mxu1  ;;  %v6615_v16 = vld [vmem:[%s12813_s2 + $0x410] ss:$8 sps:$4 sm:$0xff]   ;;  %6402 = vmatprep.mubr.msk.bf16.mxu1 %vm897_vm0, %v6613_v43 }
 0x185   :  { %2491 = vadd.xlane.f32.xlu1 %v2490_v3  ;;  %v1772_v13 = vsel %vm1723_vm1, %v7651_v17, 0.0  ;;  %1667 = vmatmul.mubr.bf16.gmra.mrb[116].mxu1 %v6615_v16  ;;  %v1988_v43 = vsel %vm1723_vm1, %v7653_v18, 0.0  ;;  %v2317_v16 = vmul.f32 %v7651_v17, %v7651_v17  ;;  %v6621_v17 = vld [vmem:[%s12813_s2 + $0x420] ss:$8 sps:$4 sm:$0xff]  }
 0x187   :  { %2704 = vadd.xlane.f32.xlu0 %v2703_v9 }
 0x189   :  { %2707 = vadd.xlane.f32.xlu1 %v2706_v47  ;;  %v7851_v3 = vpop.f32.mrb[64].mxu0  ;;  %v7855_v1 = vpop.f32.mrb[64].mxu1 }
 0x18a   :  { %13432 = vst [vmem:[#allocation66_spill] sm:$0xff] %v7851_v3  ;;  %v1278_v44 = vpop.f32.mrb[65].mxu0  ;;  %13434 = vst [vmem:[#allocation68_spill] sm:$0xff] %v7855_v1  ;;  %v1566_v9 = vpop.f32.mrb[65].mxu1 }
 0x18b   :  { %1773 = vadd.xlane.f32.xlu0 %v1772_v13  ;;  %v7853_v61 = vpop.f32.mrb[66].mxu0  ;;  %v7861_v62 = vpop.f32.mrb[66].mxu1  ;;  %v1991_v13 = vsel %vm1723_vm1, %v7657_v24, 0.0  ;;  %v2318_v44 = vmul.f32 %v7655_v23, %v7655_v23  ;;  %v2389_v9 = vmul.f32 %v7653_v18, %v7653_v18 }
 0x18c   :  { %13433 = vst [vmem:[#allocation67_spill] sm:$0xff] %v7853_v61  ;;  %v1281_v38 = vpop.f32.mrb[67].mxu0  ;;  %13435 = vst [vmem:[#allocation69_spill] sm:$0xff] %v7861_v62  ;;  %v1569_v47 = vpop.f32.mrb[67].mxu1 }
 0x18d   :  { %1776 = vadd.xlane.f32.xlu1 %v1775_v34  ;;  %v6616_v38 = vld [vmem:[%s12813_s2 + $0x1e4] ss:$8 sps:$4 sm:$0xff]   ;;  %v2493_v34 = vsel %vm1723_vm1, %v2317_v16, 0.0  ;;  %v2496_v47 = vsel %vm1723_vm1, %v2318_v44, 0.0  ;;  %v2709_v18 = vsel %vm1723_vm1, %v2389_v9, 0.0 }
 0x18e   :  { %6367 = vmatprep.mubr.msk.bf16.mxu0 %vm897_vm0, %v6616_v38  ;;  %v6619_v16 = vld [vmem:[%s12813_s2 + $0x424] ss:$8 sps:$4 sm:$0xff]  }
 0x18f   :  { %1989 = vadd.xlane.f32.xlu0 %v1988_v43  ;;  %v6618_v43 = vld [vmem:[%s12813_s2 + $0x1e0] ss:$8 sps:$4 sm:$0xff]   ;;  %6403 = vmatprep.mubr.msk.bf16.mxu1 %vm897_vm0, %v6619_v16 }
 0x190   :  { %1387 = vmatmul.mubr.bf16.gmra.mrb[120].mxu0 %v6618_v43  ;;  %v1778_v43 = vsel %vm1723_vm1, %v7669_v39, 0.0  ;;  %1675 = vmatmul.mubr.bf16.gmra.mrb[120].mxu1 %v6621_v17  ;;  %v1994_v17 = vsel %vm1723_vm1, %v7671_v40, 0.0 }
 0x191   :  { %1992 = vadd.xlane.f32.xlu1 %v1991_v13  ;;  %v2390_v13 = vmul.f32 %v7657_v24, %v7657_v24  ;;  %v7890_v38 = vpop.f32.mrb[68].mxu0  ;;  %v7901_v16 = vpop.f32.mrb[68].mxu1 }
 0x192   :  { %13436 = vst [vmem:[#allocation70_spill] sm:$0xff] %v7890_v38  ;;  %13440 = vst [vmem:[#allocation74_spill] sm:$0xff] %v7901_v16 }
 0x193   :  { %2494 = vadd.xlane.f32.xlu0 %v2493_v34  ;;  %v2712_v34 = vsel %vm1723_vm1, %v2390_v13, 0.0  ;;  %v1781_v13 = vsel %vm1723_vm1, %v7682_v57, 0.0  ;;  %v2392_v57 = vmul.f32 %v7684_v58, %v7684_v58 }
 0x195   :  { %2497 = vadd.xlane.f32.xlu1 %v2496_v47  ;;  %v1286_v47 = vpop.f32.mrb[69].mxu0 }
 0x196   :  { %v7897_v9 = vpop.f32.mrb[70].mxu0  ;;  %v1574_v47 = vpop.f32.mrb[69].mxu1 }
 0x197   :  { %2710 = vadd.xlane.f32.xlu0 %v2709_v18  ;;  %13438 = vst [vmem:[#allocation72_spill] sm:$0xff] %v7897_v9  ;;  %v1289_v62 = vpop.f32.mrb[71].mxu0  ;;  %v2319_v9 = vmul.f32 %v7669_v39, %v7669_v39 }
 0x198   :  { %v1726_v44 = vpop.xlane.xlu0 %1725  ;;  %v7911_v62 = vpop.f32.mrb[70].mxu1 }
 0x199   :  { %v7895_v24 = vmul.f32 0.020408163, %v1726_v44  ;;  %2713 = vadd.xlane.f32.xlu1 %v2712_v34  ;;  %13442 = vst [vmem:[#allocation76_spill] sm:$0xff] %v7911_v62  ;;  %v1577_v47 = vpop.f32.mrb[71].mxu1  ;;  %v1997_v44 = vsel %vm1723_vm1, %v7684_v58, 0.0  ;;  %v2499_v39 = vsel %vm1723_vm1, %v2319_v9, 0.0 }
 0x19a   :  { %v1945_v23 = vpop.xlane.xlu1 %1944 }
 0x19b   :  { %13437 = vst [vmem:[#allocation71_spill] sm:$0xff] %v7895_v24  ;;  %v7899_v18 = vmul.f32 0.020408163, %v1945_v23  ;;  %1779 = vadd.xlane.f32.xlu0 %v1778_v43  ;;  %v6622_v23 = vld [vmem:[%s12813_s2 + $0x1f4] ss:$8 sps:$4 sm:$0xff]  }
 0x19c   :  { %v1942_v38 = vpop.xlane.xlu0 %1941  ;;  %6368 = vmatprep.mubr.msk.bf16.mxu0 %vm897_vm0, %v6622_v23 }
 0x19d   :  { %13439 = vst [vmem:[#allocation73_spill] sm:$0xff] %v7899_v18  ;;  %v7909_v34 = vmul.f32 0.020408163, %v1942_v38  ;;  %1782 = vadd.xlane.f32.xlu1 %v1781_v13  ;;  %v6624_v38 = vld [vmem:[%s12813_s2 + $0x1f0] ss:$8 sps:$4 sm:$0xff]   ;;  %v7937_v23 = vmul.f32 %v7899_v18, %v7899_v18 }
 0x19e   :  { %v2450_v16 = vpop.xlane.xlu1 %2449  ;;  %1395 = vmatmul.mubr.bf16.gmra.mrb[124].mxu0 %v6624_v38  ;;  %v2391_v38 = vmul.f32 %v7671_v40, %v7671_v40  ;;  %v2502_v40 = vsel %vm1723_vm1, %v2320_v45, 0.0 }
 0x19f   :  { %13441 = vst [vmem:[#allocation75_spill] sm:$0xff] %v7909_v34  ;;  %1995 = vadd.xlane.f32.xlu0 %v1994_v17  ;;  %v6625_v17 = vld [vmem:[%s12813_s2 + $0x434] ss:$8 sps:$4 sm:$0xff]   ;;  %13444 = vst [vmem:[#allocation78_spill] sm:$0xff] %v7937_v23  ;;  %v7945_v43 = vmul.f32 0.020408163, %v2450_v16  ;;  %v7961_v16 = vmul.f32 %v7895_v24, %v7895_v24 }
 0x1a0   :  { %v1729_v13 = vpop.xlane.xlu0 %1728  ;;  %6404 = vmatprep.mubr.msk.bf16.mxu1 %vm897_vm0, %v6625_v17  ;;  %v2715_v45 = vsel %vm1723_vm1, %v2391_v38, 0.0  ;;  %v7974_v24 = vpop.f32.mrb[72].mxu0  ;;  %v7983_v38 = vmul.f32 %v7909_v34, %v7909_v34  ;;  %v6628_v23 = vld [vmem:[%s12813_s2 + $0x204] ss:$8 sps:$4 sm:$0xff]  }
 0x1a1   :  { %v7930_v50 = vmul.f32 0.020408163, %v1729_v13  ;;  %1998 = vadd.xlane.f32.xlu1 %v1997_v44  ;;  %v6627_v13 = vld [vmem:[%s12813_s2 + $0x430] ss:$8 sps:$4 sm:$0xff]   ;;  %13445 = vst [vmem:[#allocation79_spill] sm:$0xff] %v7945_v43  ;;  %13448 = vst [vmem:[#allocation82_spill] sm:$0xff] %v7961_v16  ;;  %6369 = vmatprep.mubr.msk.bf16.mxu0 %vm897_vm0, %v6628_v23 }
 0x1a2   :  { %v2666_v47 = vpop.xlane.xlu1 %2665  ;;  %1683 = vmatmul.mubr.bf16.gmra.mrb[124].mxu1 %v6627_v13  ;;  %13451 = vst [vmem:[#allocation85_spill] sm:$0xff] %v7974_v24  ;;  %13453 = vst [vmem:[#allocation87_spill] sm:$0xff] %v7983_v38  ;;  %v6633_v16 = vld [vmem:[%s12813_s2 + $0x440] ss:$8 sps:$4 sm:$0xff]  }
 0x1a3   :  { %13443 = vst [vmem:[#allocation77_spill] sm:$0xff] %v7930_v50  ;;  %v7949_v44 = vmul.f32 %v7930_v50, %v7930_v50  ;;  %v7951_v46 = vmul.f32 0.020408163, %v2666_v47  ;;  %2500 = vadd.xlane.f32.xlu0 %v2499_v39  ;;  %v2718_v47 = vsel %vm1723_vm1, %v2392_v57, 0.0  ;;  %v1784_v39 = vsel %vm1723_vm1, %v7701_v21, 0.0 }
 0x1a4   :  { %v2447_v18 = vpop.xlane.xlu0 %2446 }
 0x1a5   :  { %13446 = vst [vmem:[#allocation80_spill] sm:$0xff] %v7949_v44  ;;  %13447 = vst [vmem:[#allocation81_spill] sm:$0xff] %v7951_v46  ;;  %v7967_v17 = vmul.f32 0.020408163, %v2447_v18  ;;  %2503 = vadd.xlane.f32.xlu1 %v2502_v40  ;;  %v1294_v18 = vpop.f32.mrb[73].mxu0 }
 0x1a6   :  { %v1732_v9 = vpop.xlane.xlu1 %1731  ;;  %v7979_v40 = vpop.f32.mrb[74].mxu0  ;;  %v6631_v18 = vld [vmem:[%s12813_s2 + $0x444] ss:$8 sps:$4 sm:$0xff]  }
 0x1a7   :  { %13449 = vst [vmem:[#allocation83_spill] sm:$0xff] %v7967_v17  ;;  %v7972_v13 = vmul.f32 0.020408163, %v1732_v9  ;;  %2716 = vadd.xlane.f32.xlu0 %v2715_v45  ;;  %13452 = vst [vmem:[#allocation86_spill] sm:$0xff] %v7979_v40  ;;  %v1297_v45 = vpop.f32.mrb[75].mxu0  ;;  %6405 = vmatprep.mubr.msk.bf16.mxu1 %vm897_vm0, %v6631_v18  ;;  %v2003_v17 = vsel %vm1723_vm1, %v7707_v31, 0.0 }
 0x1a8   :  { %v2663_v51 = vpop.xlane.xlu0 %2662  ;;  %v2000_v45 = vsel %vm1723_vm1, %v7703_v22, 0.0 }
 0x1a9   :  { %13450 = vst [vmem:[#allocation84_spill] sm:$0xff] %v7972_v13  ;;  %2719 = vadd.xlane.f32.xlu1 %v2718_v47  ;;  %v7985_v50 = vmul.f32 0.020408163, %v2663_v51  ;;  %v7994_v47 = vpop.f32.mrb[72].mxu1  ;;  %v1787_v51 = vsel %vm1723_vm1, %v7705_v30, 0.0  ;;  %v8031_v44 = vmul.f32 %v7972_v13, %v7972_v13 }
 0x1aa   :  { %v1735_v9 = vpop.xlane.xlu1 %1734  ;;  %13456 = vst [vmem:[#allocation90_spill] sm:$0xff] %v7994_v47  ;;  %v1582_v57 = vpop.f32.mrb[73].mxu1  ;;  %1691 = vmatmul.mubr.bf16.gmra.mrb[128].mxu1 %v6633_v16 }
 0x1ab   :  { %13454 = vst [vmem:[#allocation88_spill] sm:$0xff] %v7985_v50  ;;  %v7992_v46 = vmul.f32 0.020408163, %v1735_v9  ;;  %1785 = vadd.xlane.f32.xlu0 %v1784_v39  ;;  %v6630_v9 = vld [vmem:[%s12813_s2 + $0x200] ss:$8 sps:$4 sm:$0xff]   ;;  %v8008_v59 = vpop.f32.mrb[74].mxu1  ;;  %v2321_v50 = vmul.f32 %v7701_v21, %v7701_v21 }
 0x1ac   :  { %v1948_v34 = vpop.xlane.xlu0 %1947  ;;  %13458 = vst [vmem:[#allocation92_spill] sm:$0xff] %v8008_v59  ;;  %1403 = vmatmul.mubr.bf16.gmra.mrb[128].mxu0 %v6630_v9  ;;  %v1585_v23 = vpop.f32.mrb[75].mxu1  ;;  %v2322_v9 = vmul.f32 %v7705_v30, %v7705_v30  ;;  %13460 = vst [vmem:[#allocation94_spill] sm:$0xff] %v8031_v44 }
 0x1ad   :  { %13455 = vst [vmem:[#allocation89_spill] sm:$0xff] %v7992_v46  ;;  %v8006_v39 = vmul.f32 0.020408163, %v1948_v34  ;;  %1788 = vadd.xlane.f32.xlu1 %v1787_v51  ;;  %v2505_v18 = vsel %vm1723_vm1, %v2321_v50, 0.0  ;;  %v2393_v34 = vmul.f32 %v7703_v22, %v7703_v22  ;;  %v8042_v16 = vmul.f32 %v7992_v46, %v7992_v46  ;;  %v6636_v23 = vld [vmem:[%s12813_s2 + $0x210] ss:$8 sps:$4 sm:$0xff]  }
 0x1ae   :  { %v1951_v38 = vpop.xlane.xlu1 %1950  ;;  %v2394_v50 = vmul.f32 %v7707_v31, %v7707_v31 }
 0x1af   :  { %13457 = vst [vmem:[#allocation91_spill] sm:$0xff] %v8006_v39  ;;  %v8020_v57 = vmul.f32 0.020408163, %v1951_v38  ;;  %2001 = vadd.xlane.f32.xlu0 %v2000_v45  ;;  %13462 = vst [vmem:[#allocation96_spill] sm:$0xff] %v8042_v16  ;;  %v8053_v13 = vmul.f32 %v8006_v39, %v8006_v39  ;;  %v1790_v16 = vsel %vm1723_vm1, %v7719_v53, 0.0 }
 0x1b0   :  { %v2453_v51 = vpop.xlane.xlu0 %2452 }
 0x1b1   :  { %13459 = vst [vmem:[#allocation93_spill] sm:$0xff] %v8020_v57  ;;  %v8033_v38 = vmul.f32 0.020408163, %v2453_v51  ;;  %2004 = vadd.xlane.f32.xlu1 %v2003_v17  ;;  %v2508_v51 = vsel %vm1723_vm1, %v2322_v9, 0.0  ;;  %13464 = vst [vmem:[#allocation98_spill] sm:$0xff] %v8053_v13  ;;  %v2721_v9 = vsel %vm1723_vm1, %v2393_v34, 0.0  ;;  %v8068_v39 = vmul.f32 %v8020_v57, %v8020_v57 }
 0x1b2   :  { %v2456_v45 = vpop.xlane.xlu1 %2455  ;;  %v2724_v34 = vsel %vm1723_vm1, %v2394_v50, 0.0  ;;  %v6639_v50 = vld [vmem:[%s12813_s2 + $0x450] ss:$8 sps:$4 sm:$0xff]   ;;  %v1793_v57 = vsel %vm1723_vm1, %v7732_v10, 0.0 }
 0x1b3   :  { %13461 = vst [vmem:[#allocation95_spill] sm:$0xff] %v8033_v38  ;;  %v8046_v60 = vmul.f32 0.020408163, %v2456_v45  ;;  %2506 = vadd.xlane.f32.xlu0 %v2505_v18  ;;  %v6634_v45 = vld [vmem:[%s12813_s2 + $0x214] ss:$8 sps:$4 sm:$0xff]   ;;  %13466 = vst [vmem:[#allocation100_spill] sm:$0xff] %v8068_v39 }
 0x1b4   :  { %v2669_v17 = vpop.xlane.xlu0 %2668  ;;  %6370 = vmatprep.mubr.msk.bf16.mxu0 %vm897_vm0, %v6634_v45  ;;  %v6637_v45 = vld [vmem:[%s12813_s2 + $0x454] ss:$8 sps:$4 sm:$0xff]  }
 0x1b5   :  { %13463 = vst [vmem:[#allocation97_spill] sm:$0xff] %v8046_v60  ;;  %v8057_v5 = vmul.f32 0.020408163, %v2669_v17  ;;  %2509 = vadd.xlane.f32.xlu1 %v2508_v51  ;;  %v8075_v51 = vpop.f32.mrb[76].mxu0  ;;  %1411 = vmatmul.mubr.bf16.gmra.mrb[132].mxu0 %v6636_v23 }
 0x1b6   :  { %v2672_v18 = vpop.xlane.xlu1 %2671  ;;  %13468 = vst [vmem:[#allocation102_spill] sm:$0xff] %v8075_v51  ;;  %v1302_v60 = vpop.f32.mrb[77].mxu0  ;;  %6406 = vmatprep.mubr.msk.bf16.mxu1 %vm897_vm0, %v6637_v45  ;;  %v2323_v45 = vmul.f32 %v7719_v53, %v7719_v53 }
 0x1b7   :  { %13465 = vst [vmem:[#allocation99_spill] sm:$0xff] %v8057_v5  ;;  %v8072_v4 = vmul.f32 0.020408163, %v2672_v18  ;;  %2722 = vadd.xlane.f32.xlu0 %v2721_v9  ;;  %v8082_v17 = vpop.f32.mrb[78].mxu0  ;;  %v8092_v60 = vpop.f32.mrb[76].mxu1  ;;  %1699 = vmatmul.mubr.bf16.gmra.mrb[132].mxu1 %v6639_v50 }
 0x1b8   :  { %v1738_v46 = vpop.xlane.xlu0 %1737  ;;  %13469 = vst [vmem:[#allocation103_spill] sm:$0xff] %v8082_v17  ;;  %v1305_v13 = vpop.f32.mrb[79].mxu0  ;;  %13471 = vst [vmem:[#allocation105_spill] sm:$0xff] %v8092_v60  ;;  %v6642_v50 = vld [vmem:[%s12813_s2 + $0x220] ss:$8 sps:$4 sm:$0xff]  }
 0x1b9   :  { %13467 = vst [vmem:[#allocation101_spill] sm:$0xff] %v8072_v4  ;;  %2725 = vadd.xlane.f32.xlu1 %v2724_v34  ;;  %v8087_v18 = vmul.f32 0.020408163, %v1738_v46  ;;  %v2006_v46 = vsel %vm1723_vm1, %v7721_v56, 0.0  ;;  %v1590_v5 = vpop.f32.mrb[77].mxu1  ;;  %v2511_v4 = vsel %vm1723_vm1, %v2323_v45, 0.0 }
 0x1ba   :  { %v1741_v9 = vpop.xlane.xlu1 %1740  ;;  %v8101_v13 = vpop.f32.mrb[78].mxu1  ;;  %v2009_v5 = vsel %vm1723_vm1, %v7734_v11, 0.0 }
 0x1bb   :  { %13470 = vst [vmem:[#allocation104_spill] sm:$0xff] %v8087_v18  ;;  %1791 = vadd.xlane.f32.xlu0 %v1790_v16  ;;  %v8095_v23 = vmul.f32 0.020408163, %v1741_v9  ;;  %13473 = vst [vmem:[#allocation107_spill] sm:$0xff] %v8101_v13  ;;  %v1593_v9 = vpop.f32.mrb[79].mxu1 }
 0x1bc   :  { %v1954_v34 = vpop.xlane.xlu0 %1953 }
 0x1bd   :  { %13472 = vst [vmem:[#allocation106_spill] sm:$0xff] %v8095_v23  ;;  %1794 = vadd.xlane.f32.xlu1 %v1793_v57  ;;  %v8103_v39 = vmul.f32 0.020408163, %v1954_v34  ;;  %v2324_v57 = vmul.f32 %v7732_v10, %v7732_v10  ;;  %v8119_v34 = vmul.f32 %v8087_v18, %v8087_v18  ;;  %v2396_v18 = vmul.f32 %v7734_v11, %v7734_v11 }
 0x1be   :  { %v1957_v16 = vpop.xlane.xlu1 %1956 }
 0x1bf   :  { %13474 = vst [vmem:[#allocation108_spill] sm:$0xff] %v8103_v39  ;;  %v8109_v44 = vmul.f32 0.020408163, %v1957_v16  ;;  %2007 = vadd.xlane.f32.xlu0 %v2006_v46  ;;  %13476 = vst [vmem:[#allocation110_spill] sm:$0xff] %v8119_v34  ;;  %v6640_v46 = vld [vmem:[%s12813_s2 + $0x224] ss:$8 sps:$4 sm:$0xff]  }
 0x1c0   :  { %v2459_v38 = vpop.xlane.xlu0 %2458  ;;  %6371 = vmatprep.mubr.msk.bf16.mxu0 %vm897_vm0, %v6640_v46  ;;  %v2514_v56 = vsel %vm1723_vm1, %v2324_v57, 0.0  ;;  %v2727_v57 = vsel %vm1723_vm1, %v2395_v14, 0.0  ;;  %v2730_v14 = vsel %vm1723_vm1, %v2396_v18, 0.0 }
 0x1c1   :  { %13475 = vst [vmem:[#allocation109_spill] sm:$0xff] %v8109_v44  ;;  %v8121_v9 = vmul.f32 0.020408163, %v2459_v38  ;;  %2010 = vadd.xlane.f32.xlu1 %v2009_v5  ;;  %v8138_v5 = vmul.f32 %v8095_v23, %v8095_v23  ;;  %1419 = vmatmul.mubr.bf16.gmra.mrb[136].mxu0 %v6642_v50  ;;  %v8150_v38 = vmul.f32 %v8103_v39, %v8103_v39  ;;  %v6645_v50 = vld [vmem:[%s12813_s2 + $0x460] ss:$8 sps:$4 sm:$0xff]  }
 0x1c2   :  { %v2462_v16 = vpop.xlane.xlu1 %2461 }
 0x1c3   :  { %13477 = vst [vmem:[#allocation111_spill] sm:$0xff] %v8121_v9  ;;  %13478 = vst [vmem:[#allocation112_spill] sm:$0xff] %v8138_v5  ;;  %v8142_v19 = vmul.f32 0.020408163, %v2462_v16  ;;  %2512 = vadd.xlane.f32.xlu0 %v2511_v4  ;;  %v6643_v4 = vld [vmem:[%s12813_s2 + $0x464] ss:$8 sps:$4 sm:$0xff]   ;;  %v8165_v16 = vmul.f32 %v8109_v44, %v8109_v44 }
 0x1c4   :  { %v2675_v43 = vpop.xlane.xlu0 %2674  ;;  %13480 = vst [vmem:[#allocation114_spill] sm:$0xff] %v8150_v38  ;;  %6407 = vmatprep.mubr.msk.bf16.mxu1 %vm897_vm0, %v6643_v4 }
 0x1c5   :  { %13479 = vst [vmem:[#allocation113_spill] sm:$0xff] %v8142_v19  ;;  %v8154_v45 = vmul.f32 0.020408163, %v2675_v43  ;;  %2515 = vadd.xlane.f32.xlu1 %v2514_v56  ;;  %13482 = vst [vmem:[#allocation116_spill] sm:$0xff] %v8165_v16  ;;  %v8172_v56 = vpop.f32.mrb[80].mxu0  ;;  %1707 = vmatmul.mubr.bf16.gmra.mrb[136].mxu1 %v6645_v50  ;;  %v1799_v50 = vsel %vm1723_vm1, %v7755_v7, 0.0 }
 0x1c6   :  { %v2678_v46 = vpop.xlane.xlu1 %2677  ;;  %13484 = vst [vmem:[#allocation118_spill] sm:$0xff] %v8172_v56  ;;  %v1310_v23 = vpop.f32.mrb[81].mxu0  ;;  %v6646_v16 = vld [vmem:[%s12813_s2 + $0x234] ss:$8 sps:$4 sm:$0xff]   ;;  %v2015_v19 = vsel %vm1723_vm1, %v7757_v8, 0.0 }
 0x1c7   :  { %13481 = vst [vmem:[#allocation115_spill] sm:$0xff] %v8154_v45  ;;  %v8169_v15 = vmul.f32 0.020408163, %v2678_v46  ;;  %2728 = vadd.xlane.f32.xlu0 %v2727_v57  ;;  %v8179_v43 = vpop.f32.mrb[82].mxu0  ;;  %v8185_v45 = vpop.f32.mrb[80].mxu1  ;;  %v2012_v23 = vsel %vm1723_vm1, %v7753_v63, 0.0  ;;  %6372 = vmatprep.mubr.msk.bf16.mxu0 %vm897_vm0, %v6646_v16 }
 0x1c8   :  { %v1744_v39 = vpop.xlane.xlu0 %1743  ;;  %13485 = vst [vmem:[#allocation119_spill] sm:$0xff] %v8179_v43  ;;  %v1313_v4 = vpop.f32.mrb[83].mxu0  ;;  %13488 = vst [vmem:[#allocation122_spill] sm:$0xff] %v8185_v45  ;;  %v6651_v16 = vld [vmem:[%s12813_s2 + $0x470] ss:$8 sps:$4 sm:$0xff]  }
 0x1c9   :  { %13483 = vst [vmem:[#allocation117_spill] sm:$0xff] %v8169_v15  ;;  %2731 = vadd.xlane.f32.xlu1 %v2730_v14  ;;  %v8181_v46 = vmul.f32 0.020408163, %v1744_v39  ;;  %v1598_v44 = vpop.f32.mrb[81].mxu1  ;;  %v6648_v15 = vld [vmem:[%s12813_s2 + $0x230] ss:$8 sps:$4 sm:$0xff]  }
 0x1ca   :  { %v1747_v57 = vpop.xlane.xlu1 %1746  ;;  %v8193_v39 = vpop.f32.mrb[82].mxu1  ;;  %1427 = vmatmul.mubr.bf16.gmra.mrb[140].mxu0 %v6648_v15 }
 0x1cb   :  { %13486 = vst [vmem:[#allocation120_spill] sm:$0xff] %v8181_v46  ;;  %v8183_v38 = vmul.f32 0.020408163, %v1747_v57  ;;  %1797 = vadd.xlane.f32.xlu0 %v1796_v20  ;;  %13490 = vst [vmem:[#allocation124_spill] sm:$0xff] %v8193_v39  ;;  %v2325_v57 = vmul.f32 %v7751_v52, %v7751_v52  ;;  %v1601_v20 = vpop.f32.mrb[83].mxu1  ;;  %v8216_v34 = vmul.f32 %v8181_v46, %v8181_v46 }
 0x1cc   :  { %v1960_v18 = vpop.xlane.xlu0 %1959  ;;  %v2326_v20 = vmul.f32 %v7755_v7, %v7755_v7 }
 0x1cd   :  { %13487 = vst [vmem:[#allocation121_spill] sm:$0xff] %v8183_v38  ;;  %v8191_v14 = vmul.f32 0.020408163, %v1960_v18  ;;  %1800 = vadd.xlane.f32.xlu1 %v1799_v50  ;;  %13492 = vst [vmem:[#allocation126_spill] sm:$0xff] %v8216_v34  ;;  %v2517_v0 = vsel %vm1723_vm1, %v2325_v57, 0.0  ;;  %v2398_v57 = vmul.f32 %v7757_v8, %v7757_v8 }
 0x1ce   :  { %v1963_v4 = vpop.xlane.xlu1 %1962 }
 0x1cf   :  { %13489 = vst [vmem:[#allocation123_spill] sm:$0xff] %v8191_v14  ;;  %v8207_v50 = vmul.f32 0.020408163, %v1963_v4  ;;  %2013 = vadd.xlane.f32.xlu0 %v2012_v23  ;;  %v6649_v23 = vld [vmem:[%s12813_s2 + $0x474] ss:$8 sps:$4 sm:$0xff]   ;;  %v2397_v4 = vmul.f32 %v7753_v63, %v7753_v63  ;;  %v8247_v15 = vmul.f32 %v8191_v14, %v8191_v14  ;;  %v8262_v14 = vpop.f32.mrb[84].mxu0 }
 0x1d0   :  { %v2465_v5 = vpop.xlane.xlu0 %2464  ;;  %6408 = vmatprep.mubr.msk.bf16.mxu1 %vm897_vm0, %v6649_v23  ;;  %13500 = vst [vmem:[#allocation134_spill] sm:$0xff] %v8262_v14  ;;  %v1318_v28 = vpop.f32.mrb[85].mxu0 }
 0x1d1   :  { %13491 = vst [vmem:[#allocation125_spill] sm:$0xff] %v8207_v50  ;;  %v8218_v44 = vmul.f32 0.020408163, %v2465_v5  ;;  %2016 = vadd.xlane.f32.xlu1 %v2015_v19  ;;  %v8235_v19 = vmul.f32 %v8183_v38, %v8183_v38  ;;  %v2520_v5 = vsel %vm1723_vm1, %v2326_v20, 0.0  ;;  %1715 = vmatmul.mubr.bf16.gmra.mrb[140].mxu1 %v6651_v16  ;;  %13496 = vst [vmem:[#allocation130_spill] sm:$0xff] %v8247_v15  ;;  %v2018_v28 = vsel %vm1723_vm1, %v7771_v42, 0.0 }
 0x1d2   :  { %v2468_v18 = vpop.xlane.xlu1 %2467  ;;  %v8256_v23 = vmul.f32 %v8207_v50, %v8207_v50  ;;  %v8269_v50 = vpop.f32.mrb[86].mxu0 }
 0x1d3   :  { %13493 = vst [vmem:[#allocation127_spill] sm:$0xff] %v8218_v44  ;;  %13494 = vst [vmem:[#allocation128_spill] sm:$0xff] %v8235_v19  ;;  %v8239_v35 = vmul.f32 0.020408163, %v2468_v18  ;;  %2518 = vadd.xlane.f32.xlu0 %v2517_v0  ;;  %v2733_v18 = vsel %vm1723_vm1, %v2397_v4, 0.0  ;;  %v1321_v20 = vpop.f32.mrb[87].mxu0  ;;  %v2328_v19 = vmul.f32 %v7782_v26, %v7782_v26 }
 0x1d4   :  { %v2681_v9 = vpop.xlane.xlu0 %2680  ;;  %13498 = vst [vmem:[#allocation132_spill] sm:$0xff] %v8256_v23  ;;  %13501 = vst [vmem:[#allocation135_spill] sm:$0xff] %v8269_v50 }
 0x1d5   :  { %13495 = vst [vmem:[#allocation129_spill] sm:$0xff] %v8239_v35  ;;  %v8251_v46 = vmul.f32 0.020408163, %v2681_v9  ;;  %2521 = vadd.xlane.f32.xlu1 %v2520_v5  ;;  %v2736_v9 = vsel %vm1723_vm1, %v2398_v57, 0.0  ;;  %v1802_v5 = vsel %vm1723_vm1, %v7769_v41, 0.0 }
 0x1d6   :  { %v2684_v0 = vpop.xlane.xlu1 %2683 }
 0x1d7   :  { %13497 = vst [vmem:[#allocation131_spill] sm:$0xff] %v8251_v46  ;;  %v8260_v16 = vmul.f32 0.020408163, %v2684_v0  ;;  %2734 = vadd.xlane.f32.xlu0 %v2733_v18  ;;  %v8273_v18 = vpop.f32.mrb[84].mxu1  ;;  %v1805_v46 = vsel %vm1723_vm1, %v7782_v26, 0.0 }
 0x1d8   :  { %v1750_v36 = vpop.xlane.xlu0 %1749  ;;  %13503 = vst [vmem:[#allocation137_spill] sm:$0xff] %v8273_v18  ;;  %v1606_v4 = vpop.f32.mrb[85].mxu1 }
 0x1d9   :  { %13499 = vst [vmem:[#allocation133_spill] sm:$0xff] %v8260_v16  ;;  %2737 = vadd.xlane.f32.xlu1 %v2736_v9  ;;  %v8275_v15 = vmul.f32 0.020408163, %v1750_v36  ;;  %v8281_v9 = vpop.f32.mrb[86].mxu1 }
 0x1da   :  { %v1753_v38 = vpop.xlane.xlu1 %1752  ;;  %13505 = vst [vmem:[#allocation139_spill] sm:$0xff] %v8281_v9  ;;  %v1609_v23 = vpop.f32.mrb[87].mxu1 }
 0x1db   :  { %v8271_v0 = vmul.f32 0.020408163, %v1753_v38  ;;  %1803 = vadd.xlane.f32.xlu0 %v1802_v5  ;;  %13504 = vst [vmem:[#allocation138_spill] sm:$0xff] %v8275_v15  ;;  %v2327_v38 = vmul.f32 %v7769_v41, %v7769_v41 }
 0x1dc   :  { %v1966_v57 = vpop.xlane.xlu0 %1965 }
 0x1dd   :  { %13502 = vst [vmem:[#allocation136_spill] sm:$0xff] %v8271_v0  ;;  %1806 = vadd.xlane.f32.xlu1 %v1805_v46  ;;  %v8285_v20 = vmul.f32 0.020408163, %v1966_v57  ;;  %v2021_v46 = vsel %vm1723_vm1, %v7784_v37, 0.0  ;;  %v8299_v57 = vmul.f32 %v8275_v15, %v8275_v15  ;;  %v2523_v54 = vsel %vm1723_vm1, %v2327_v38, 0.0 }
 0x1de   :  { %v1969_v5 = vpop.xlane.xlu1 %1968  ;;  %v8312_v35 = vmul.f32 %v8271_v0, %v8271_v0  ;;  %v2526_v15 = vsel %vm1723_vm1, %v2328_v19, 0.0 }
 0x1df   :  { %13506 = vst [vmem:[#allocation140_spill] sm:$0xff] %v8285_v20  ;;  %v8289_v16 = vmul.f32 0.020408163, %v1969_v5  ;;  %2019 = vadd.xlane.f32.xlu0 %v2018_v28  ;;  %13508 = vst [vmem:[#allocation142_spill] sm:$0xff] %v8299_v57  ;;  %v2399_v5 = vmul.f32 %v7771_v42, %v7771_v42  ;;  %v2400_v28 = vmul.f32 %v7784_v37, %v7784_v37 }
 0x1e0   :  { %v2471_v4 = vpop.xlane.xlu0 %2470  ;;  %13510 = vst [vmem:[#allocation144_spill] sm:$0xff] %v8312_v35  ;;  %v8323_v38 = vmul.f32 %v8285_v20, %v8285_v20  ;;  %v8338_v20 = vpop.f32.mrb[88].mxu0 }
 0x1e1   :  { %13507 = vst [vmem:[#allocation141_spill] sm:$0xff] %v8289_v16  ;;  %v8301_v23 = vmul.f32 0.020408163, %v2471_v4  ;;  %2022 = vadd.xlane.f32.xlu1 %v2021_v46  ;;  %13516 = vst [vmem:[#allocation150_spill] sm:$0xff] %v8338_v20  ;;  %v1326_v34 = vpop.f32.mrb[89].mxu0 }
 0x1e2   :  { %v2474_v36 = vpop.xlane.xlu1 %2473  ;;  %13512 = vst [vmem:[#allocation146_spill] sm:$0xff] %v8323_v38  ;;  %v2024_v34 = vsel %vm1723_vm1, %v7803_v32, 0.0 }
 0x1e3   :  { %13509 = vst [vmem:[#allocation143_spill] sm:$0xff] %v8301_v23  ;;  %v8316_v46 = vmul.f32 0.020408163, %v2474_v36  ;;  %2524 = vadd.xlane.f32.xlu0 %v2523_v54  ;;  %v2739_v36 = vsel %vm1723_vm1, %v2399_v5, 0.0  ;;  %v8332_v54 = vmul.f32 %v8289_v16, %v8289_v16  ;;  %v8345_v16 = vpop.f32.mrb[90].mxu0  ;;  %v2330_v23 = vmul.f32 %v7805_v25, %v7805_v25 }
 0x1e4   :  { %v2687_v55 = vpop.xlane.xlu0 %2686  ;;  %13517 = vst [vmem:[#allocation151_spill] sm:$0xff] %v8345_v16  ;;  %v1329_v19 = vpop.f32.mrb[91].mxu0 }
 0x1e5   :  { %13511 = vst [vmem:[#allocation145_spill] sm:$0xff] %v8316_v46  ;;  %v8327_v49 = vmul.f32 0.020408163, %v2687_v55  ;;  %2527 = vadd.xlane.f32.xlu1 %v2526_v15  ;;  %13514 = vst [vmem:[#allocation148_spill] sm:$0xff] %v8332_v54  ;;  %v2742_v55 = vsel %vm1723_vm1, %v2400_v28, 0.0  ;;  %v1808_v15 = vsel %vm1723_vm1, %v7801_v27, 0.0 }
 0x1e6   :  { %v2690_v4 = vpop.xlane.xlu1 %2689 }
 0x1e7   :  { %13513 = vst [vmem:[#allocation147_spill] sm:$0xff] %v8327_v49  ;;  %v8336_v48 = vmul.f32 0.020408163, %v2690_v4  ;;  %2740 = vadd.xlane.f32.xlu0 %v2739_v36  ;;  %v8349_v36 = vpop.f32.mrb[88].mxu1  ;;  %v1811_v49 = vsel %vm1723_vm1, %v7805_v25, 0.0 }
 0x1e8   :  { %v1756_v0 = vpop.xlane.xlu0 %1755  ;;  %13519 = vst [vmem:[#allocation153_spill] sm:$0xff] %v8349_v36  ;;  %v1614_v5 = vpop.f32.mrb[89].mxu1 }
 0x1e9   :  { %13515 = vst [vmem:[#allocation149_spill] sm:$0xff] %v8336_v48  ;;  %2743 = vadd.xlane.f32.xlu1 %v2742_v55  ;;  %v8351_v38 = vmul.f32 0.020408163, %v1756_v0  ;;  %v8357_v55 = vpop.f32.mrb[90].mxu1  ;;  %v2401_v0 = vmul.f32 %v7803_v32, %v7803_v32 }
 0x1ea   :  { %v1759_v57 = vpop.xlane.xlu1 %1758  ;;  %13521 = vst [vmem:[#allocation155_spill] sm:$0xff] %v8357_v55  ;;  %v1617_v54 = vpop.f32.mrb[91].mxu1  ;;  %v2418_v37 = vmul.f32 %v8357_v55, %v8357_v55 }
 0x1eb   :  { %v8347_v4 = vmul.f32 0.020408163, %v1759_v57  ;;  %1809 = vadd.xlane.f32.xlu0 %v1808_v15  ;;  %13520 = vst [vmem:[#allocation154_spill] sm:$0xff] %v8351_v38  ;;  %v2329_v57 = vmul.f32 %v7801_v27, %v7801_v27  ;;  %v13535_v27 = vld [vmem:[#allocation62_spill] sm:$0xff] }
 0x1ec   :  { %v1972_v28 = vpop.xlane.xlu0 %1971 }
 0x1ed   :  { %13518 = vst [vmem:[#allocation152_spill] sm:$0xff] %v8347_v4  ;;  %1812 = vadd.xlane.f32.xlu1 %v1811_v49  ;;  %v8361_v19 = vmul.f32 0.020408163, %v1972_v28  ;;  %v2027_v49 = vsel %vm1723_vm1, %v7807_v33, 0.0  ;;  %v8375_v28 = vmul.f32 %v8351_v38, %v8351_v38  ;;  %v2529_v35 = vsel %vm1723_vm1, %v2329_v57, 0.0 }
 0x1ee   :  { %v1975_v15 = vpop.xlane.xlu1 %1974  ;;  %v8388_v44 = vmul.f32 %v8347_v4, %v8347_v4  ;;  %v2532_v38 = vsel %vm1723_vm1, %v2330_v23, 0.0 }
 0x1ef   :  { %13522 = vst [vmem:[#allocation156_spill] sm:$0xff] %v8361_v19  ;;  %v8365_v48 = vmul.f32 0.020408163, %v1975_v15  ;;  %2025 = vadd.xlane.f32.xlu0 %v2024_v34  ;;  %13524 = vst [vmem:[#allocation158_spill] sm:$0xff] %v8375_v28  ;;  %v2402_v34 = vmul.f32 %v7807_v33, %v7807_v33  ;;  %v8399_v57 = vmul.f32 %v8361_v19, %v8361_v19  ;;  %v8414_v19 = vpop.f32.mrb[92].mxu0 }
 0x1f0   :  { %v2477_v5 = vpop.xlane.xlu0 %2476  ;;  %13528 = vst [vmem:[#allocation160_spill] sm:$0xff] %v8388_v44  ;;  %13534 = vst [vmem:[#allocation166_spill] sm:$0xff] %v8414_v19  ;;  %v1334_v28 = vpop.f32.mrb[93].mxu0  ;;  %v2332_v33 = vmul.f32 %v7832_v29, %v7832_v29 }
 0x1f1   :  { %13523 = vst [vmem:[#allocation157_spill] sm:$0xff] %v8365_v48  ;;  %v8377_v54 = vmul.f32 0.020408163, %v2477_v5  ;;  %2028 = vadd.xlane.f32.xlu1 %v2027_v49  ;;  %13530 = vst [vmem:[#allocation162_spill] sm:$0xff] %v8399_v57  ;;  %v13540_v28 = vld [vmem:[#allocation63_spill] sm:$0xff] }
 0x1f2   :  { %v2480_v12 = vpop.xlane.xlu1 %2479  ;;  %v2030_v44 = vsel %vm1723_vm1, %v13540_v28, 0.0 }
 0x1f3   :  { %13525 = vst [vmem:[#allocation159_spill] sm:$0xff] %v8377_v54  ;;  %v8392_v49 = vmul.f32 0.020408163, %v2480_v12  ;;  %2530 = vadd.xlane.f32.xlu0 %v2529_v35  ;;  %v2745_v12 = vsel %vm1723_vm1, %v2401_v0, 0.0  ;;  %v8408_v35 = vmul.f32 %v8365_v48, %v8365_v48  ;;  %v8421_v48 = vpop.f32.mrb[94].mxu0 }
 0x1f4   :  { %v2693_v15 = vpop.xlane.xlu0 %2692  ;;  %13536 = vst [vmem:[#allocation167_spill] sm:$0xff] %v8421_v48  ;;  %v1337_v23 = vpop.f32.mrb[95].mxu0 }
 0x1f5   :  { %13529 = vst [vmem:[#allocation161_spill] sm:$0xff] %v8392_v49  ;;  %v8403_v46 = vmul.f32 0.020408163, %v2693_v15  ;;  %2533 = vadd.xlane.f32.xlu1 %v2532_v38  ;;  %13532 = vst [vmem:[#allocation164_spill] sm:$0xff] %v8408_v35  ;;  %v2748_v15 = vsel %vm1723_vm1, %v2402_v34, 0.0  ;;  %v1814_v38 = vsel %vm1723_vm1, %v13535_v27, 0.0 }
 0x1f6   :  { %v2696_v5 = vpop.xlane.xlu1 %2695 }
 0x1f7   :  { %13531 = vst [vmem:[#allocation163_spill] sm:$0xff] %v8403_v46  ;;  %v8412_v2 = vmul.f32 0.020408163, %v2696_v5  ;;  %2746 = vadd.xlane.f32.xlu0 %v2745_v12  ;;  %v8425_v12 = vpop.f32.mrb[92].mxu1  ;;  %v1817_v46 = vsel %vm1723_vm1, %v7832_v29, 0.0 }
 0x1f8   :  { %v1762_v4 = vpop.xlane.xlu0 %1761  ;;  %13538 = vst [vmem:[#allocation169_spill] sm:$0xff] %v8425_v12  ;;  %v1622_v0 = vpop.f32.mrb[93].mxu1 }
 0x1f9   :  { %13533 = vst [vmem:[#allocation165_spill] sm:$0xff] %v8412_v2  ;;  %2749 = vadd.xlane.f32.xlu1 %v2748_v15  ;;  %v8427_v57 = vmul.f32 0.020408163, %v1762_v4  ;;  %v8433_v15 = vpop.f32.mrb[94].mxu1  ;;  %v2403_v2 = vmul.f32 %v13540_v28, %v13540_v28 }
 0x1fa   :  { %v1765_v54 = vpop.xlane.xlu1 %1764  ;;  %13541 = vst [vmem:[#allocation171_spill] sm:$0xff] %v8433_v15  ;;  %v1625_v35 = vpop.f32.mrb[95].mxu1 }
 0x1fb   :  { %v8423_v5 = vmul.f32 0.020408163, %v1765_v54  ;;  %1815 = vadd.xlane.f32.xlu0 %v1814_v38  ;;  %13539 = vst [vmem:[#allocation170_spill] sm:$0xff] %v8427_v57  ;;  %v2331_v54 = vmul.f32 %v13535_v27, %v13535_v27 }
 0x1fc   :  { %v1978_v34 = vpop.xlane.xlu0 %1977 }
 0x1fd   :  { %13537 = vst [vmem:[#allocation168_spill] sm:$0xff] %v8423_v5  ;;  %1818 = vadd.xlane.f32.xlu1 %v1817_v46  ;;  %v8437_v23 = vmul.f32 0.020408163, %v1978_v34  ;;  %v2033_v46 = vsel %vm1723_vm1, %v7834_v6, 0.0  ;;  %v8451_v34 = vmul.f32 %v8427_v57, %v8427_v57  ;;  %v2535_v29 = vsel %vm1723_vm1, %v2331_v54, 0.0 }
 0x1fe   :  { %v1981_v38 = vpop.xlane.xlu1 %1980  ;;  %v8464_v27 = vmul.f32 %v8423_v5, %v8423_v5  ;;  %v2538_v57 = vsel %vm1723_vm1, %v2332_v33, 0.0 }
 0x1ff   :  { %13542 = vst [vmem:[#allocation172_spill] sm:$0xff] %v8437_v23  ;;  %v8441_v49 = vmul.f32 0.020408163, %v1981_v38  ;;  %2031 = vadd.xlane.f32.xlu0 %v2030_v44  ;;  %13546 = vst [vmem:[#allocation174_spill] sm:$0xff] %v8451_v34  ;;  %v2404_v44 = vmul.f32 %v7834_v6, %v7834_v6  ;;  %v8475_v54 = vmul.f32 %v8437_v23, %v8437_v23  ;;  %v8490_v23 = vpop.f32.mrb[96].mxu0 }
 0x200   :  { %v2483_v0 = vpop.xlane.xlu0 %2482  ;;  %13550 = vst [vmem:[#allocation176_spill] sm:$0xff] %v8464_v27  ;;  %13556 = vst [vmem:[#allocation182_spill] sm:$0xff] %v8490_v23  ;;  %v1342_v25 = vpop.f32.mrb[97].mxu0  ;;  %v2334_v27 = vmul.f32 %v7853_v61, %v7853_v61 }
 0x201   :  { %13544 = vst [vmem:[#allocation173_spill] sm:$0xff] %v8441_v49  ;;  %v8453_v35 = vmul.f32 0.020408163, %v2483_v0  ;;  %2034 = vadd.xlane.f32.xlu1 %v2033_v46  ;;  %13552 = vst [vmem:[#allocation178_spill] sm:$0xff] %v8475_v54  ;;  %v2036_v25 = vsel %vm1723_vm1, %v7855_v1, 0.0 }
 0x202   :  { %v2486_v4 = vpop.xlane.xlu1 %2485 }
 0x203   :  { %13547 = vst [vmem:[#allocation175_spill] sm:$0xff] %v8453_v35  ;;  %v8468_v46 = vmul.f32 0.020408163, %v2486_v4  ;;  %2536 = vadd.xlane.f32.xlu0 %v2535_v29  ;;  %v2751_v4 = vsel %vm1723_vm1, %v2403_v2, 0.0  ;;  %v8484_v29 = vmul.f32 %v8441_v49, %v8441_v49  ;;  %v8497_v49 = vpop.f32.mrb[98].mxu0 }
 0x204   :  { %v2699_v38 = vpop.xlane.xlu0 %2698  ;;  %13557 = vst [vmem:[#allocation183_spill] sm:$0xff] %v8497_v49  ;;  %v1345_v33 = vpop.f32.mrb[99].mxu0 }
 0x205   :  { %13551 = vst [vmem:[#allocation177_spill] sm:$0xff] %v8468_v46  ;;  %v8479_v15 = vmul.f32 0.020408163, %v2699_v38  ;;  %2539 = vadd.xlane.f32.xlu1 %v2538_v57  ;;  %13554 = vst [vmem:[#allocation180_spill] sm:$0xff] %v8484_v29  ;;  %v2754_v38 = vsel %vm1723_vm1, %v2404_v44, 0.0  ;;  %v1820_v57 = vsel %vm1723_vm1, %v7851_v3, 0.0 }
 0x206   :  { %v2702_v0 = vpop.xlane.xlu1 %2701 }
 0x207   :  { %13553 = vst [vmem:[#allocation179_spill] sm:$0xff] %v8479_v15  ;;  %v8488_v32 = vmul.f32 0.020408163, %v2702_v0  ;;  %2752 = vadd.xlane.f32.xlu0 %v2751_v4  ;;  %v8501_v4 = vpop.f32.mrb[96].mxu1  ;;  %v1823_v15 = vsel %vm1723_vm1, %v7853_v61, 0.0 }
 0x208   :  { %v1768_v5 = vpop.xlane.xlu0 %1767  ;;  %13559 = vst [vmem:[#allocation185_spill] sm:$0xff] %v8501_v4  ;;  %v1630_v2 = vpop.f32.mrb[97].mxu1 }
 0x209   :  { %13555 = vst [vmem:[#allocation181_spill] sm:$0xff] %v8488_v32  ;;  %2755 = vadd.xlane.f32.xlu1 %v2754_v38  ;;  %v8503_v54 = vmul.f32 0.020408163, %v1768_v5  ;;  %v8509_v38 = vpop.f32.mrb[98].mxu1  ;;  %v2405_v32 = vmul.f32 %v7855_v1, %v7855_v1 }
 0x20a   :  { %v1771_v34 = vpop.xlane.xlu1 %1770  ;;  %13561 = vst [vmem:[#allocation187_spill] sm:$0xff] %v8509_v38  ;;  %v1633_v29 = vpop.f32.mrb[99].mxu1  ;;  %v13578_v38 = vld [vmem:[#allocation70_spill] sm:$0xff] }
 0x20b   :  { %v8499_v0 = vmul.f32 0.020408163, %v1771_v34  ;;  %1821 = vadd.xlane.f32.xlu0 %v1820_v57  ;;  %13560 = vst [vmem:[#allocation186_spill] sm:$0xff] %v8503_v54  ;;  %v2333_v34 = vmul.f32 %v7851_v3, %v7851_v3 }
 0x20c   :  { %v1984_v44 = vpop.xlane.xlu0 %1983 }
 0x20d   :  { %13558 = vst [vmem:[#allocation184_spill] sm:$0xff] %v8499_v0  ;;  %1824 = vadd.xlane.f32.xlu1 %v1823_v15  ;;  %v8513_v33 = vmul.f32 0.020408163, %v1984_v44  ;;  %v13565_v15 = vld [vmem:[#allocation69_spill] sm:$0xff]  ;;  %v8527_v44 = vmul.f32 %v8503_v54, %v8503_v54  ;;  %v2541_v61 = vsel %vm1723_vm1, %v2333_v34, 0.0  ;;  %v8540_v3 = vmul.f32 %v8499_v0, %v8499_v0 }
 0x20e   :  { %v1987_v57 = vpop.xlane.xlu1 %1986  ;;  %v2039_v46 = vsel %vm1723_vm1, %v13565_v15, 0.0  ;;  %v2544_v54 = vsel %vm1723_vm1, %v2334_v27, 0.0 }
 0x20f   :  { %13562 = vst [vmem:[#allocation188_spill] sm:$0xff] %v8513_v33  ;;  %v8517_v35 = vmul.f32 0.020408163, %v1987_v57  ;;  %2037 = vadd.xlane.f32.xlu0 %v2036_v25  ;;  %13567 = vst [vmem:[#allocation190_spill] sm:$0xff] %v8527_v44  ;;  %v2406_v25 = vmul.f32 %v13565_v15, %v13565_v15  ;;  %v8551_v34 = vmul.f32 %v8513_v33, %v8513_v33  ;;  %v8566_v33 = vpop.f32.mrb[100].mxu0 }
 0x210   :  { %v2489_v2 = vpop.xlane.xlu0 %2488  ;;  %13571 = vst [vmem:[#allocation192_spill] sm:$0xff] %v8540_v3  ;;  %13577 = vst [vmem:[#allocation198_spill] sm:$0xff] %v8566_v33  ;;  %v1350_v44 = vpop.f32.mrb[101].mxu0 }
 0x211   :  { %13564 = vst [vmem:[#allocation189_spill] sm:$0xff] %v8517_v35  ;;  %v8529_v29 = vmul.f32 0.020408163, %v2489_v2  ;;  %2040 = vadd.xlane.f32.xlu1 %v2039_v46  ;;  %13573 = vst [vmem:[#allocation194_spill] sm:$0xff] %v8551_v34  ;;  %v13584_v44 = vld [vmem:[#allocation74_spill] sm:$0xff] }
 0x212   :  { %v2492_v5 = vpop.xlane.xlu1 %2491 }
 0x213   :  { %13568 = vst [vmem:[#allocation191_spill] sm:$0xff] %v8529_v29  ;;  %v8544_v46 = vmul.f32 0.020408163, %v2492_v5  ;;  %2542 = vadd.xlane.f32.xlu0 %v2541_v61  ;;  %v2757_v5 = vsel %vm1723_vm1, %v2405_v32, 0.0  ;;  %v8560_v61 = vmul.f32 %v8517_v35, %v8517_v35  ;;  %v8573_v35 = vpop.f32.mrb[102].mxu0 }
 0x214   :  { %v2705_v57 = vpop.xlane.xlu0 %2704  ;;  %13579 = vst [vmem:[#allocation199_spill] sm:$0xff] %v8573_v35  ;;  %v1353_v27 = vpop.f32.mrb[103].mxu0 }
 0x215   :  { %13572 = vst [vmem:[#allocation193_spill] sm:$0xff] %v8544_v46  ;;  %v8555_v6 = vmul.f32 0.020408163, %v2705_v57  ;;  %2545 = vadd.xlane.f32.xlu1 %v2544_v54  ;;  %13575 = vst [vmem:[#allocation196_spill] sm:$0xff] %v8560_v61  ;;  %v2760_v57 = vsel %vm1723_vm1, %v2406_v25, 0.0  ;;  %v1826_v54 = vsel %vm1723_vm1, %v13578_v38, 0.0 }
 0x216   :  { %v2708_v2 = vpop.xlane.xlu1 %2707  ;;  %v2042_v46 = vsel %vm1723_vm1, %v13584_v44, 0.0 }
 0x217   :  { %13574 = vst [vmem:[#allocation195_spill] sm:$0xff] %v8555_v6  ;;  %v8564_v28 = vmul.f32 0.020408163, %v2708_v2  ;;  %2758 = vadd.xlane.f32.xlu0 %v2757_v5  ;;  %v8577_v5 = vpop.f32.mrb[100].mxu1  ;;  %v13583_v6 = vld [vmem:[#allocation72_spill] sm:$0xff] }
 0x218   :  { %v1774_v0 = vpop.xlane.xlu0 %1773  ;;  %13581 = vst [vmem:[#allocation201_spill] sm:$0xff] %v8577_v5  ;;  %v1829_v3 = vsel %vm1723_vm1, %v13583_v6, 0.0  ;;  %v1638_v32 = vpop.f32.mrb[101].mxu1  ;;  %v2336_v15 = vmul.f32 %v13583_v6, %v13583_v6 }
 0x219   :  { %13576 = vst [vmem:[#allocation197_spill] sm:$0xff] %v8564_v28  ;;  %2761 = vadd.xlane.f32.xlu1 %v2760_v57  ;;  %v8579_v34 = vmul.f32 0.020408163, %v1774_v0  ;;  %v8585_v57 = vpop.f32.mrb[102].mxu1  ;;  %v2407_v28 = vmul.f32 %v13584_v44, %v13584_v44 }
 0x21a   :  { %v1777_v29 = vpop.xlane.xlu1 %1776  ;;  %13585 = vst [vmem:[#allocation203_spill] sm:$0xff] %v8585_v57  ;;  %v1641_v61 = vpop.f32.mrb[103].mxu1 }
 0x21b   :  { %v8575_v2 = vmul.f32 0.020408163, %v1777_v29  ;;  %1827 = vadd.xlane.f32.xlu0 %v1826_v54  ;;  %13582 = vst [vmem:[#allocation202_spill] sm:$0xff] %v8579_v34  ;;  %v2335_v29 = vmul.f32 %v13578_v38, %v13578_v38 }
 0x21c   :  { %v1990_v25 = vpop.xlane.xlu0 %1989 }
 0x21d   :  { %13580 = vst [vmem:[#allocation200_spill] sm:$0xff] %v8575_v2  ;;  %1830 = vadd.xlane.f32.xlu1 %v1829_v3  ;;  %v8589_v27 = vmul.f32 0.020408163, %v1990_v25  ;;  %v2045_v3 = vsel %vm1723_vm1, %v7911_v62, 0.0  ;;  %v8603_v25 = vmul.f32 %v8579_v34, %v8579_v34  ;;  %v2547_v6 = vsel %vm1723_vm1, %v2335_v29, 0.0 }
 0x21e   :  { %v1993_v54 = vpop.xlane.xlu1 %1992  ;;  %v8616_v38 = vmul.f32 %v8575_v2, %v8575_v2  ;;  %v2550_v34 = vsel %vm1723_vm1, %v2336_v15, 0.0 }
 0x21f   :  { %13586 = vst [vmem:[#allocation204_spill] sm:$0xff] %v8589_v27  ;;  %v8593_v1 = vmul.f32 0.020408163, %v1993_v54  ;;  %2043 = vadd.xlane.f32.xlu0 %v2042_v46  ;;  %13590 = vst [vmem:[#allocation206_spill] sm:$0xff] %v8603_v25  ;;  %v2408_v46 = vmul.f32 %v7911_v62, %v7911_v62  ;;  %v8627_v29 = vmul.f32 %v8589_v27, %v8589_v27  ;;  %v8642_v27 = vpop.f32.mrb[104].mxu0 }
 0x220   :  { %v2495_v32 = vpop.xlane.xlu0 %2494  ;;  %13594 = vst [vmem:[#allocation208_spill] sm:$0xff] %v8616_v38  ;;  %13600 = vst [vmem:[#allocation214_spill] sm:$0xff] %v8642_v27  ;;  %v1358_v35 = vpop.f32.mrb[105].mxu0  ;;  %v2338_v38 = vmul.f32 %v7979_v40, %v7979_v40 }
 0x221   :  { %13588 = vst [vmem:[#allocation205_spill] sm:$0xff] %v8593_v1  ;;  %v8605_v61 = vmul.f32 0.020408163, %v2495_v32  ;;  %2046 = vadd.xlane.f32.xlu1 %v2045_v3  ;;  %13596 = vst [vmem:[#allocation210_spill] sm:$0xff] %v8627_v29  ;;  %v2048_v35 = vsel %vm1723_vm1, %v7994_v47, 0.0 }
 0x222   :  { %v2498_v0 = vpop.xlane.xlu1 %2497 }
 0x223   :  { %13591 = vst [vmem:[#allocation207_spill] sm:$0xff] %v8605_v61  ;;  %v8620_v3 = vmul.f32 0.020408163, %v2498_v0  ;;  %2548 = vadd.xlane.f32.xlu0 %v2547_v6  ;;  %v2763_v0 = vsel %vm1723_vm1, %v2407_v28, 0.0  ;;  %v8636_v6 = vmul.f32 %v8593_v1, %v8593_v1  ;;  %v8649_v1 = vpop.f32.mrb[106].mxu0 }
 0x224   :  { %v2711_v54 = vpop.xlane.xlu0 %2710  ;;  %13601 = vst [vmem:[#allocation215_spill] sm:$0xff] %v8649_v1  ;;  %v1361_v15 = vpop.f32.mrb[107].mxu0 }
 0x225   :  { %13595 = vst [vmem:[#allocation209_spill] sm:$0xff] %v8620_v3  ;;  %v8631_v5 = vmul.f32 0.020408163, %v2711_v54  ;;  %2551 = vadd.xlane.f32.xlu1 %v2550_v34  ;;  %13598 = vst [vmem:[#allocation212_spill] sm:$0xff] %v8636_v6  ;;  %v2766_v54 = vsel %vm1723_vm1, %v2408_v46, 0.0  ;;  %v1832_v34 = vsel %vm1723_vm1, %v7974_v24, 0.0 }
 0x226   :  { %v2714_v32 = vpop.xlane.xlu1 %2713 }
 0x227   :  { %13597 = vst [vmem:[#allocation211_spill] sm:$0xff] %v8631_v5  ;;  %v8640_v57 = vmul.f32 0.020408163, %v2714_v32  ;;  %2764 = vadd.xlane.f32.xlu0 %v2763_v0  ;;  %v8653_v0 = vpop.f32.mrb[104].mxu1  ;;  %v1835_v5 = vsel %vm1723_vm1, %v7979_v40, 0.0 }
 0x228   :  { %v1780_v2 = vpop.xlane.xlu0 %1779  ;;  %13603 = vst [vmem:[#allocation217_spill] sm:$0xff] %v8653_v0  ;;  %v1646_v28 = vpop.f32.mrb[105].mxu1 }
 0x229   :  { %13599 = vst [vmem:[#allocation213_spill] sm:$0xff] %v8640_v57  ;;  %2767 = vadd.xlane.f32.xlu1 %v2766_v54  ;;  %v8655_v29 = vmul.f32 0.020408163, %v1780_v2  ;;  %v8661_v54 = vpop.f32.mrb[106].mxu1 }
 0x22a   :  { %v1783_v25 = vpop.xlane.xlu1 %1782  ;;  %13605 = vst [vmem:[#allocation219_spill] sm:$0xff] %v8661_v54  ;;  %v1649_v6 = vpop.f32.mrb[107].mxu1 }
 0x22b   :  { %v8651_v32 = vmul.f32 0.020408163, %v1783_v25  ;;  %1833 = vadd.xlane.f32.xlu0 %v1832_v34  ;;  %13604 = vst [vmem:[#allocation218_spill] sm:$0xff] %v8655_v29  ;;  %v2337_v25 = vmul.f32 %v7974_v24, %v7974_v24 }
 0x22c   :  { %v1996_v46 = vpop.xlane.xlu0 %1995 }
 0x22d   :  { %13602 = vst [vmem:[#allocation216_spill] sm:$0xff] %v8651_v32  ;;  %1836 = vadd.xlane.f32.xlu1 %v1835_v5  ;;  %v8665_v15 = vmul.f32 0.020408163, %v1996_v46  ;;  %v2051_v5 = vsel %vm1723_vm1, %v8008_v59, 0.0  ;;  %v8679_v46 = vmul.f32 %v8655_v29, %v8655_v29  ;;  %v2553_v2 = vsel %vm1723_vm1, %v2337_v25, 0.0 }
 0x22e   :  { %v1999_v34 = vpop.xlane.xlu1 %1998  ;;  %v8692_v24 = vmul.f32 %v8651_v32, %v8651_v32  ;;  %v2556_v29 = vsel %vm1723_vm1, %v2338_v38, 0.0 }
 0x22f   :  { %13606 = vst [vmem:[#allocation220_spill] sm:$0xff] %v8665_v15  ;;  %v8669_v61 = vmul.f32 0.020408163, %v1999_v34  ;;  %2049 = vadd.xlane.f32.xlu0 %v2048_v35  ;;  %13610 = vst [vmem:[#allocation222_spill] sm:$0xff] %v8679_v46  ;;  %v2409_v34 = vmul.f32 %v7994_v47, %v7994_v47  ;;  %v2410_v35 = vmul.f32 %v8008_v59, %v8008_v59 }
 0x230   :  { %v2501_v28 = vpop.xlane.xlu0 %2500  ;;  %13613 = vst [vmem:[#allocation224_spill] sm:$0xff] %v8692_v24  ;;  %v8703_v25 = vmul.f32 %v8665_v15, %v8665_v15  ;;  %v8718_v15 = vpop.f32.mrb[108].mxu0 }
 0x231   :  { %13608 = vst [vmem:[#allocation221_spill] sm:$0xff] %v8669_v61  ;;  %v8681_v6 = vmul.f32 0.020408163, %v2501_v28  ;;  %2052 = vadd.xlane.f32.xlu1 %v2051_v5  ;;  %13619 = vst [vmem:[#allocation230_spill] sm:$0xff] %v8718_v15  ;;  %v1366_v62 = vpop.f32.mrb[109].mxu0 }
 0x232   :  { %v2504_v57 = vpop.xlane.xlu1 %2503  ;;  %13615 = vst [vmem:[#allocation226_spill] sm:$0xff] %v8703_v25  ;;  %v2054_v62 = vsel %vm1723_vm1, %v8092_v60, 0.0 }
 0x233   :  { %13611 = vst [vmem:[#allocation223_spill] sm:$0xff] %v8681_v6  ;;  %v8696_v5 = vmul.f32 0.020408163, %v2504_v57  ;;  %2554 = vadd.xlane.f32.xlu0 %v2553_v2  ;;  %v2769_v57 = vsel %vm1723_vm1, %v2409_v34, 0.0  ;;  %v8712_v2 = vmul.f32 %v8669_v61, %v8669_v61  ;;  %v8725_v61 = vpop.f32.mrb[110].mxu0  ;;  %v2340_v6 = vmul.f32 %v8082_v17, %v8082_v17 }
 0x234   :  { %v2717_v58 = vpop.xlane.xlu0 %2716  ;;  %13620 = vst [vmem:[#allocation231_spill] sm:$0xff] %v8725_v61  ;;  %v1369_v38 = vpop.f32.mrb[111].mxu0 }
 0x235   :  { %13614 = vst [vmem:[#allocation225_spill] sm:$0xff] %v8696_v5  ;;  %v8707_v40 = vmul.f32 0.020408163, %v2717_v58  ;;  %2557 = vadd.xlane.f32.xlu1 %v2556_v29  ;;  %13617 = vst [vmem:[#allocation228_spill] sm:$0xff] %v8712_v2  ;;  %v2772_v58 = vsel %vm1723_vm1, %v2410_v35, 0.0  ;;  %v1838_v29 = vsel %vm1723_vm1, %v8075_v51, 0.0 }
 0x236   :  { %v2720_v28 = vpop.xlane.xlu1 %2719 }
 0x237   :  { %13616 = vst [vmem:[#allocation227_spill] sm:$0xff] %v8707_v40  ;;  %v8716_v3 = vmul.f32 0.020408163, %v2720_v28  ;;  %2770 = vadd.xlane.f32.xlu0 %v2769_v57  ;;  %v8729_v57 = vpop.f32.mrb[108].mxu1  ;;  %v1841_v40 = vsel %vm1723_vm1, %v8082_v17, 0.0 }
 0x238   :  { %v1786_v32 = vpop.xlane.xlu0 %1785  ;;  %13622 = vst [vmem:[#allocation233_spill] sm:$0xff] %v8729_v57  ;;  %v1654_v34 = vpop.f32.mrb[109].mxu1 }
 0x239   :  { %13618 = vst [vmem:[#allocation229_spill] sm:$0xff] %v8716_v3  ;;  %2773 = vadd.xlane.f32.xlu1 %v2772_v58  ;;  %v8731_v25 = vmul.f32 0.020408163, %v1786_v32  ;;  %v8737_v58 = vpop.f32.mrb[110].mxu1 }
 0x23a   :  { %v1789_v46 = vpop.xlane.xlu1 %1788  ;;  %13624 = vst [vmem:[#allocation235_spill] sm:$0xff] %v8737_v58  ;;  %v1657_v2 = vpop.f32.mrb[111].mxu1 }
 0x23b   :  { %v8727_v28 = vmul.f32 0.020408163, %v1789_v46  ;;  %1839 = vadd.xlane.f32.xlu0 %v1838_v29  ;;  %13623 = vst [vmem:[#allocation234_spill] sm:$0xff] %v8731_v25  ;;  %v2339_v46 = vmul.f32 %v8075_v51, %v8075_v51 }
 0x23c   :  { %v2002_v35 = vpop.xlane.xlu0 %2001 }
 0x23d   :  { %13621 = vst [vmem:[#allocation232_spill] sm:$0xff] %v8727_v28  ;;  %1842 = vadd.xlane.f32.xlu1 %v1841_v40  ;;  %v8741_v38 = vmul.f32 0.020408163, %v2002_v35  ;;  %v2057_v40 = vsel %vm1723_vm1, %v8101_v13, 0.0  ;;  %v8755_v35 = vmul.f32 %v8731_v25, %v8731_v25  ;;  %v2559_v30 = vsel %vm1723_vm1, %v2339_v46, 0.0 }
 0x23e   :  { %v2005_v29 = vpop.xlane.xlu1 %2004  ;;  %v8768_v24 = vmul.f32 %v8727_v28, %v8727_v28  ;;  %v2562_v25 = vsel %vm1723_vm1, %v2340_v6, 0.0 }
 0x23f   :  { %13625 = vst [vmem:[#allocation236_spill] sm:$0xff] %v8741_v38  ;;  %v8745_v3 = vmul.f32 0.020408163, %v2005_v29  ;;  %2055 = vadd.xlane.f32.xlu0 %v2054_v62  ;;  %13627 = vst [vmem:[#allocation238_spill] sm:$0xff] %v8755_v35  ;;  %v2411_v29 = vmul.f32 %v8092_v60, %v8092_v60  ;;  %v2412_v62 = vmul.f32 %v8101_v13, %v8101_v13 }
 0x240   :  { %v2507_v34 = vpop.xlane.xlu0 %2506  ;;  %13629 = vst [vmem:[#allocation240_spill] sm:$0xff] %v8768_v24  ;;  %v8779_v46 = vmul.f32 %v8741_v38, %v8741_v38 }
 0x241   :  { %13626 = vst [vmem:[#allocation237_spill] sm:$0xff] %v8745_v3  ;;  %v8757_v2 = vmul.f32 0.020408163, %v2507_v34  ;;  %2058 = vadd.xlane.f32.xlu1 %v2057_v40  ;;  %v8794_v38 = vpop.f32.mrb[112].mxu0 }
 0x242   :  { %v2510_v32 = vpop.xlane.xlu1 %2509  ;;  %13631 = vst [vmem:[#allocation242_spill] sm:$0xff] %v8779_v46  ;;  %13635 = vst [vmem:[#allocation246_spill] sm:$0xff] %v8794_v38  ;;  %v1374_v5 = vpop.f32.mrb[113].mxu0 }
 0x243   :  { %13628 = vst [vmem:[#allocation239_spill] sm:$0xff] %v8757_v2  ;;  %v8772_v40 = vmul.f32 0.020408163, %v2510_v32  ;;  %2560 = vadd.xlane.f32.xlu0 %v2559_v30  ;;  %v2775_v32 = vsel %vm1723_vm1, %v2411_v29, 0.0  ;;  %v8788_v30 = vmul.f32 %v8745_v3, %v8745_v3  ;;  %v8801_v3 = vpop.f32.mrb[114].mxu0  ;;  %v2060_v5 = vsel %vm1723_vm1, %v8185_v45, 0.0 }
 0x244   :  { %v2723_v31 = vpop.xlane.xlu0 %2722  ;;  %13636 = vst [vmem:[#allocation247_spill] sm:$0xff] %v8801_v3  ;;  %v1377_v6 = vpop.f32.mrb[115].mxu0  ;;  %v2342_v2 = vmul.f32 %v8179_v43, %v8179_v43 }
 0x245   :  { %13630 = vst [vmem:[#allocation241_spill] sm:$0xff] %v8772_v40  ;;  %v8783_v22 = vmul.f32 0.020408163, %v2723_v31  ;;  %2563 = vadd.xlane.f32.xlu1 %v2562_v25  ;;  %13633 = vst [vmem:[#allocation244_spill] sm:$0xff] %v8788_v30  ;;  %v2778_v31 = vsel %vm1723_vm1, %v2412_v62, 0.0  ;;  %v1844_v25 = vsel %vm1723_vm1, %v8172_v56, 0.0 }
 0x246   :  { %v2726_v34 = vpop.xlane.xlu1 %2725 }
 0x247   :  { %13632 = vst [vmem:[#allocation243_spill] sm:$0xff] %v8783_v22  ;;  %v8792_v21 = vmul.f32 0.020408163, %v2726_v34  ;;  %2776 = vadd.xlane.f32.xlu0 %v2775_v32  ;;  %v1847_v22 = vsel %vm1723_vm1, %v8179_v43, 0.0 }
 0x248   :  { %v1792_v28 = vpop.xlane.xlu0 %1791  ;;  %v8805_v32 = vpop.f32.mrb[112].mxu1 }
 0x249   :  { %13634 = vst [vmem:[#allocation245_spill] sm:$0xff] %v8792_v21  ;;  %2779 = vadd.xlane.f32.xlu1 %v2778_v31  ;;  %13638 = vst [vmem:[#allocation249_spill] sm:$0xff] %v8805_v32  ;;  %v8807_v46 = vmul.f32 0.020408163, %v1792_v28  ;;  %v1662_v29 = vpop.f32.mrb[113].mxu1 }
 0x24a   :  { %v1795_v35 = vpop.xlane.xlu1 %1794  ;;  %v8813_v31 = vpop.f32.mrb[114].mxu1 }
 0x24b   :  { %v8803_v34 = vmul.f32 0.020408163, %v1795_v35  ;;  %1845 = vadd.xlane.f32.xlu0 %v1844_v25  ;;  %13639 = vst [vmem:[#allocation250_spill] sm:$0xff] %v8807_v46  ;;  %13640 = vst [vmem:[#allocation251_spill] sm:$0xff] %v8813_v31  ;;  %v2341_v35 = vmul.f32 %v8172_v56, %v8172_v56  ;;  %v1665_v30 = vpop.f32.mrb[115].mxu1 }
 0x24c   :  { %v2008_v62 = vpop.xlane.xlu0 %2007 }
 0x24d   :  { %13637 = vst [vmem:[#allocation248_spill] sm:$0xff] %v8803_v34  ;;  %1848 = vadd.xlane.f32.xlu1 %v1847_v22  ;;  %v8817_v6 = vmul.f32 0.020408163, %v2008_v62  ;;  %v2063_v22 = vsel %vm1723_vm1, %v8193_v39, 0.0  ;;  %v8831_v62 = vmul.f32 %v8807_v46, %v8807_v46  ;;  %v2565_v10 = vsel %vm1723_vm1, %v2341_v35, 0.0 }
 0x24e   :  { %v2011_v25 = vpop.xlane.xlu1 %2010  ;;  %v8844_v24 = vmul.f32 %v8803_v34, %v8803_v34  ;;  %v2568_v46 = vsel %vm1723_vm1, %v2342_v2, 0.0 }
 0x24f   :  { %13641 = vst [vmem:[#allocation252_spill] sm:$0xff] %v8817_v6  ;;  %v8821_v21 = vmul.f32 0.020408163, %v2011_v25  ;;  %2061 = vadd.xlane.f32.xlu0 %v2060_v5  ;;  %13643 = vst [vmem:[#allocation254_spill] sm:$0xff] %v8831_v62  ;;  %v2413_v25 = vmul.f32 %v8185_v45, %v8185_v45  ;;  %v2414_v5 = vmul.f32 %v8193_v39, %v8193_v39 }
 0x250   :  { %v2513_v29 = vpop.xlane.xlu0 %2512  ;;  %13646 = vst [vmem:[#allocation256_spill] sm:$0xff] %v8844_v24  ;;  %v8855_v35 = vmul.f32 %v8817_v6, %v8817_v6 }
 0x251   :  { %13642 = vst [vmem:[#allocation253_spill] sm:$0xff] %v8821_v21  ;;  %v8833_v30 = vmul.f32 0.020408163, %v2513_v29  ;;  %2064 = vadd.xlane.f32.xlu1 %v2063_v22 }
 0x252   :  { %v2516_v28 = vpop.xlane.xlu1 %2515  ;;  %13648 = vst [vmem:[#allocation258_spill] sm:$0xff] %v8855_v35  ;;  %v8870_v6 = vpop.f32.mrb[116].mxu0 }
 0x253   :  { %13644 = vst [vmem:[#allocation255_spill] sm:$0xff] %v8833_v30  ;;  %v8848_v22 = vmul.f32 0.020408163, %v2516_v28  ;;  %2566 = vadd.xlane.f32.xlu0 %v2565_v10  ;;  %v2781_v28 = vsel %vm1723_vm1, %v2413_v25, 0.0  ;;  %v8864_v10 = vmul.f32 %v8821_v21, %v8821_v21  ;;  %13652 = vst [vmem:[#allocation262_spill] sm:$0xff] %v8870_v6  ;;  %v1382_v43 = vpop.f32.mrb[117].mxu0  ;;  %v2344_v30 = vmul.f32 %v8269_v50, %v8269_v50 }
 0x254   :  { %v2729_v11 = vpop.xlane.xlu0 %2728  ;;  %v8877_v21 = vpop.f32.mrb[118].mxu0  ;;  %v2066_v43 = vsel %vm1723_vm1, %v8273_v18, 0.0 }
 0x255   :  { %13647 = vst [vmem:[#allocation257_spill] sm:$0xff] %v8848_v22  ;;  %v8859_v40 = vmul.f32 0.020408163, %v2729_v11  ;;  %2569 = vadd.xlane.f32.xlu1 %v2568_v46  ;;  %13650 = vst [vmem:[#allocation260_spill] sm:$0xff] %v8864_v10  ;;  %v2784_v11 = vsel %vm1723_vm1, %v2414_v5, 0.0  ;;  %v1850_v46 = vsel %vm1723_vm1, %v8262_v14, 0.0 }
 0x256   :  { %v2732_v29 = vpop.xlane.xlu1 %2731  ;;  %13653 = vst [vmem:[#allocation263_spill] sm:$0xff] %v8877_v21  ;;  %v1385_v2 = vpop.f32.mrb[119].mxu0 }
 0x257   :  { %13649 = vst [vmem:[#allocation259_spill] sm:$0xff] %v8859_v40  ;;  %v8868_v53 = vmul.f32 0.020408163, %v2732_v29  ;;  %2782 = vadd.xlane.f32.xlu0 %v2781_v28  ;;  %v1853_v40 = vsel %vm1723_vm1, %v8269_v50, 0.0 }
 0x258   :  { %v1798_v34 = vpop.xlane.xlu0 %1797  ;;  %v8881_v28 = vpop.f32.mrb[116].mxu1 }
 0x259   :  { %13651 = vst [vmem:[#allocation261_spill] sm:$0xff] %v8868_v53  ;;  %2785 = vadd.xlane.f32.xlu1 %v2784_v11  ;;  %13655 = vst [vmem:[#allocation265_spill] sm:$0xff] %v8881_v28  ;;  %v8883_v35 = vmul.f32 0.020408163, %v1798_v34  ;;  %v1670_v25 = vpop.f32.mrb[117].mxu1 }
 0x25a   :  { %v1801_v62 = vpop.xlane.xlu1 %1800  ;;  %v8889_v11 = vpop.f32.mrb[118].mxu1 }
 0x25b   :  { %v8879_v29 = vmul.f32 0.020408163, %v1801_v62  ;;  %1851 = vadd.xlane.f32.xlu0 %v1850_v46  ;;  %13656 = vst [vmem:[#allocation266_spill] sm:$0xff] %v8883_v35  ;;  %13657 = vst [vmem:[#allocation267_spill] sm:$0xff] %v8889_v11  ;;  %v2343_v62 = vmul.f32 %v8262_v14, %v8262_v14  ;;  %v1673_v10 = vpop.f32.mrb[119].mxu1 }
 0x25c   :  { %v2014_v5 = vpop.xlane.xlu0 %2013 }
 0x25d   :  { %13654 = vst [vmem:[#allocation264_spill] sm:$0xff] %v8879_v29  ;;  %1854 = vadd.xlane.f32.xlu1 %v1853_v40  ;;  %v8893_v2 = vmul.f32 0.020408163, %v2014_v5  ;;  %v2069_v40 = vsel %vm1723_vm1, %v8281_v9, 0.0  ;;  %v8907_v5 = vmul.f32 %v8883_v35, %v8883_v35  ;;  %v2571_v7 = vsel %vm1723_vm1, %v2343_v62, 0.0 }
 0x25e   :  { %v2017_v46 = vpop.xlane.xlu1 %2016  ;;  %v8920_v24 = vmul.f32 %v8879_v29, %v8879_v29  ;;  %v2574_v35 = vsel %vm1723_vm1, %v2344_v30, 0.0 }
 0x25f   :  { %13658 = vst [vmem:[#allocation268_spill] sm:$0xff] %v8893_v2  ;;  %v8897_v53 = vmul.f32 0.020408163, %v2017_v46  ;;  %2067 = vadd.xlane.f32.xlu0 %v2066_v43  ;;  %13660 = vst [vmem:[#allocation270_spill] sm:$0xff] %v8907_v5  ;;  %v2415_v46 = vmul.f32 %v8273_v18, %v8273_v18  ;;  %v2416_v43 = vmul.f32 %v8281_v9, %v8281_v9 }
 0x260   :  { %v2519_v25 = vpop.xlane.xlu0 %2518  ;;  %13662 = vst [vmem:[#allocation272_spill] sm:$0xff] %v8920_v24  ;;  %v8931_v62 = vmul.f32 %v8893_v2, %v8893_v2 }
 0x261   :  { %13659 = vst [vmem:[#allocation269_spill] sm:$0xff] %v8897_v53  ;;  %v8909_v10 = vmul.f32 0.020408163, %v2519_v25  ;;  %2070 = vadd.xlane.f32.xlu1 %v2069_v40 }
 0x262   :  { %v2522_v34 = vpop.xlane.xlu1 %2521  ;;  %13664 = vst [vmem:[#allocation274_spill] sm:$0xff] %v8931_v62 }
 0x263   :  { %13661 = vst [vmem:[#allocation271_spill] sm:$0xff] %v8909_v10  ;;  %v8924_v40 = vmul.f32 0.020408163, %v2522_v34  ;;  %2572 = vadd.xlane.f32.xlu0 %v2571_v7  ;;  %v2787_v34 = vsel %vm1723_vm1, %v2415_v46, 0.0  ;;  %v8940_v7 = vmul.f32 %v8897_v53, %v8897_v53  ;;  %v8946_v2 = vpop.f32.mrb[120].mxu0  ;;  %v2346_v10 = vmul.f32 %v8345_v16, %v8345_v16 }
 0x264   :  { %v2735_v8 = vpop.xlane.xlu0 %2734  ;;  %13668 = vst [vmem:[#allocation278_spill] sm:$0xff] %v8946_v2  ;;  %v1390_v22 = vpop.f32.mrb[121].mxu0 }
 0x265   :  { %13663 = vst [vmem:[#allocation273_spill] sm:$0xff] %v8924_v40  ;;  %v8935_v63 = vmul.f32 0.020408163, %v2735_v8  ;;  %2575 = vadd.xlane.f32.xlu1 %v2574_v35  ;;  %13666 = vst [vmem:[#allocation276_spill] sm:$0xff] %v8940_v7  ;;  %v2790_v8 = vsel %vm1723_vm1, %v2416_v43, 0.0  ;;  %v1856_v35 = vsel %vm1723_vm1, %v8338_v20, 0.0 }
 0x266   :  { %v2738_v25 = vpop.xlane.xlu1 %2737  ;;  %v8953_v53 = vpop.f32.mrb[122].mxu0  ;;  %v2072_v22 = vsel %vm1723_vm1, %v8349_v36, 0.0 }
 0x267   :  { %13665 = vst [vmem:[#allocation275_spill] sm:$0xff] %v8935_v63  ;;  %v8944_v52 = vmul.f32 0.020408163, %v2738_v25  ;;  %2788 = vadd.xlane.f32.xlu0 %v2787_v34  ;;  %13669 = vst [vmem:[#allocation279_spill] sm:$0xff] %v8953_v53  ;;  %v1393_v30 = vpop.f32.mrb[123].mxu0  ;;  %v8957_v34 = vpop.f32.mrb[120].mxu1 }
 0x268   :  { %v1804_v29 = vpop.xlane.xlu0 %1803  ;;  %13671 = vst [vmem:[#allocation281_spill] sm:$0xff] %v8957_v34  ;;  %v1859_v63 = vsel %vm1723_vm1, %v8345_v16, 0.0  ;;  %v1678_v46 = vpop.f32.mrb[121].mxu1 }
 0x269   :  { %13667 = vst [vmem:[#allocation277_spill] sm:$0xff] %v8944_v52  ;;  %2791 = vadd.xlane.f32.xlu1 %v2790_v8  ;;  %v8959_v62 = vmul.f32 0.020408163, %v1804_v29  ;;  %v8965_v8 = vpop.f32.mrb[122].mxu1 }
 0x26a   :  { %v1807_v5 = vpop.xlane.xlu1 %1806  ;;  %13673 = vst [vmem:[#allocation283_spill] sm:$0xff] %v8965_v8  ;;  %v1681_v7 = vpop.f32.mrb[123].mxu1 }
 0x26b   :  { %v8955_v25 = vmul.f32 0.020408163, %v1807_v5  ;;  %1857 = vadd.xlane.f32.xlu0 %v1856_v35  ;;  %13672 = vst [vmem:[#allocation282_spill] sm:$0xff] %v8959_v62  ;;  %v2345_v5 = vmul.f32 %v8338_v20, %v8338_v20 }
 0x26c   :  { %v2020_v43 = vpop.xlane.xlu0 %2019 }
 0x26d   :  { %13670 = vst [vmem:[#allocation280_spill] sm:$0xff] %v8955_v25  ;;  %1860 = vadd.xlane.f32.xlu1 %v1859_v63  ;;  %v8969_v30 = vmul.f32 0.020408163, %v2020_v43  ;;  %v2075_v63 = vsel %vm1723_vm1, %v8357_v55, 0.0  ;;  %v8983_v43 = vmul.f32 %v8959_v62, %v8959_v62  ;;  %v2577_v26 = vsel %vm1723_vm1, %v2345_v5, 0.0 }
 0x26e   :  { %v2023_v35 = vpop.xlane.xlu1 %2022  ;;  %v8996_v24 = vmul.f32 %v8955_v25, %v8955_v25  ;;  %v2580_v5 = vsel %vm1723_vm1, %v2346_v10, 0.0 }
 0x26f   :  { %13674 = vst [vmem:[#allocation284_spill] sm:$0xff] %v8969_v30  ;;  %v8973_v52 = vmul.f32 0.020408163, %v2023_v35  ;;  %2073 = vadd.xlane.f32.xlu0 %v2072_v22  ;;  %13676 = vst [vmem:[#allocation286_spill] sm:$0xff] %v8983_v43  ;;  %v2417_v35 = vmul.f32 %v8349_v36, %v8349_v36  ;;  %v9009_v40 = vmul.f32 %v8969_v30, %v8969_v30 }
 0x270   :  { %v2525_v46 = vpop.xlane.xlu0 %2524  ;;  %13678 = vst [vmem:[#allocation288_spill] sm:$0xff] %v8996_v24 }
 0x271   :  { %13675 = vst [vmem:[#allocation285_spill] sm:$0xff] %v8973_v52  ;;  %v8985_v7 = vmul.f32 0.020408163, %v2525_v46  ;;  %2076 = vadd.xlane.f32.xlu1 %v2075_v63  ;;  %v9002_v22 = vpop.f32.mrb[124].mxu0  ;;  %13681 = vst [vmem:[#allocation291_spill] sm:$0xff] %v9009_v40  ;;  %v2793_v25 = vsel %vm1723_vm1, %v2417_v35, 0.0  ;;  %v9020_v10 = vmul.f32 %v8973_v52, %v8973_v52 }
 0x272   :  { %v2528_v29 = vpop.xlane.xlu1 %2527  ;;  %13680 = vst [vmem:[#allocation290_spill] sm:$0xff] %v9002_v22  ;;  %v1398_v41 = vpop.f32.mrb[125].mxu0 }
 0x273   :  { %13677 = vst [vmem:[#allocation287_spill] sm:$0xff] %v8985_v7  ;;  %v9000_v63 = vmul.f32 0.020408163, %v2528_v29  ;;  %2578 = vadd.xlane.f32.xlu0 %v2577_v26  ;;  %v9015_v26 = vpop.f32.mrb[126].mxu0  ;;  %13684 = vst [vmem:[#allocation294_spill] sm:$0xff] %v9020_v10  ;;  %v1862_v7 = vsel %vm1723_vm1, %v8414_v19, 0.0 }
 0x274   :  { %v2741_v62 = vpop.xlane.xlu0 %2740  ;;  %13683 = vst [vmem:[#allocation293_spill] sm:$0xff] %v9015_v26  ;;  %v1401_v43 = vpop.f32.mrb[127].mxu0 }
 0x275   :  { %13679 = vst [vmem:[#allocation289_spill] sm:$0xff] %v9000_v63  ;;  %v9013_v46 = vmul.f32 0.020408163, %v2741_v62  ;;  %2581 = vadd.xlane.f32.xlu1 %v2580_v5  ;;  %v9026_v42 = vpop.f32.mrb[124].mxu1  ;;  %v2796_v5 = vsel %vm1723_vm1, %v2418_v37, 0.0  ;;  %v1865_v37 = vsel %vm1723_vm1, %v8421_v48, 0.0 }
 0x276   :  { %v2744_v29 = vpop.xlane.xlu1 %2743  ;;  %13686 = vst [vmem:[#allocation296_spill] sm:$0xff] %v9026_v42  ;;  %v1686_v35 = vpop.f32.mrb[125].mxu1 }
 0x277   :  { %13682 = vst [vmem:[#allocation292_spill] sm:$0xff] %v9013_v46  ;;  %v9024_v30 = vmul.f32 0.020408163, %v2744_v29  ;;  %2794 = vadd.xlane.f32.xlu0 %v2793_v25  ;;  %v9033_v52 = vpop.f32.mrb[126].mxu1  ;;  %v2078_v35 = vsel %vm1723_vm1, %v8425_v12, 0.0 }
 0x278   :  { %v1810_v62 = vpop.xlane.xlu0 %1809  ;;  %13687 = vst [vmem:[#allocation297_spill] sm:$0xff] %v9033_v52  ;;  %v1689_v41 = vpop.f32.mrb[127].mxu1 }
 0x279   :  { %13685 = vst [vmem:[#allocation295_spill] sm:$0xff] %v9024_v30  ;;  %2797 = vadd.xlane.f32.xlu1 %v2796_v5  ;;  %v9035_v29 = vmul.f32 0.020408163, %v1810_v62  ;;  %v2347_v5 = vmul.f32 %v8414_v19, %v8414_v19  ;;  %v2348_v30 = vmul.f32 %v8421_v48, %v8421_v48 }
 0x27a   :  { %v1813_v24 = vpop.xlane.xlu1 %1812 }
 0x27b   :  { %13688 = vst [vmem:[#allocation298_spill] sm:$0xff] %v9035_v29  ;;  %v9037_v25 = vmul.f32 0.020408163, %v1813_v24  ;;  %1863 = vadd.xlane.f32.xlu0 %v1862_v7  ;;  %v9061_v36 = vmul.f32 %v9035_v29, %v9035_v29  ;;  %v2419_v7 = vmul.f32 %v8425_v12, %v8425_v12  ;;  %v2583_v48 = vsel %vm1723_vm1, %v2347_v5, 0.0 }
 0x27c   :  { %v2026_v40 = vpop.xlane.xlu0 %2025 }
 0x27d   :  { %13689 = vst [vmem:[#allocation299_spill] sm:$0xff] %v9037_v25  ;;  %v9043_v46 = vmul.f32 0.020408163, %v2026_v40  ;;  %1866 = vadd.xlane.f32.xlu1 %v1865_v37  ;;  %v13694_v40 = vld [vmem:[#allocation171_spill] sm:$0xff]  ;;  %13696 = vst [vmem:[#allocation302_spill] sm:$0xff] %v9061_v36  ;;  %v9074_v19 = vmul.f32 %v9037_v25, %v9037_v25  ;;  %v9082_v62 = vpop.f32.mrb[128].mxu1 }
 0x27e   :  { %v2029_v43 = vpop.xlane.xlu1 %2028  ;;  %v2081_v37 = vsel %vm1723_vm1, %v13694_v40, 0.0  ;;  %13703 = vst [vmem:[#allocation308_spill] sm:$0xff] %v9082_v62  ;;  %v2420_v10 = vmul.f32 %v13694_v40, %v13694_v40 }
 0x27f   :  { %13690 = vst [vmem:[#allocation300_spill] sm:$0xff] %v9043_v46  ;;  %v9049_v24 = vmul.f32 0.020408163, %v2029_v43  ;;  %2079 = vadd.xlane.f32.xlu0 %v2078_v35  ;;  %v9065_v35 = vpop.f32.mrb[128].mxu0  ;;  %13700 = vst [vmem:[#allocation305_spill] sm:$0xff] %v9074_v19  ;;  %v9089_v25 = vmul.f32 %v9043_v46, %v9043_v46 }
 0x280   :  { %v2531_v63 = vpop.xlane.xlu0 %2530  ;;  %13698 = vst [vmem:[#allocation304_spill] sm:$0xff] %v9065_v35  ;;  %v1406_v16 = vpop.f32.mrb[129].mxu0 }
 0x281   :  { %13692 = vst [vmem:[#allocation301_spill] sm:$0xff] %v9049_v24  ;;  %v9063_v43 = vmul.f32 0.020408163, %v2531_v63  ;;  %2082 = vadd.xlane.f32.xlu1 %v2081_v37  ;;  %v9080_v55 = vpop.f32.mrb[130].mxu0  ;;  %v2586_v16 = vsel %vm1723_vm1, %v2348_v30, 0.0  ;;  %13704 = vst [vmem:[#allocation309_spill] sm:$0xff] %v9089_v25  ;;  %v9100_v30 = vmul.f32 %v9049_v24, %v9049_v24 }
 0x282   :  { %v2534_v41 = vpop.xlane.xlu1 %2533  ;;  %13702 = vst [vmem:[#allocation307_spill] sm:$0xff] %v9080_v55  ;;  %v1409_v5 = vpop.f32.mrb[131].mxu0  ;;  %v13718_v25 = vld [vmem:[#allocation187_spill] sm:$0xff] }
 0x283   :  { %13697 = vst [vmem:[#allocation303_spill] sm:$0xff] %v9063_v43  ;;  %v9078_v37 = vmul.f32 0.020408163, %v2534_v41  ;;  %2584 = vadd.xlane.f32.xlu0 %v2583_v48  ;;  %v1694_v48 = vpop.f32.mrb[129].mxu1  ;;  %v2799_v43 = vsel %vm1723_vm1, %v2419_v7, 0.0  ;;  %13707 = vst [vmem:[#allocation312_spill] sm:$0xff] %v9100_v30  ;;  %v2421_v30 = vmul.f32 %v8501_v4, %v8501_v4 }
 0x284   :  { %v2747_v29 = vpop.xlane.xlu0 %2746  ;;  %v9096_v12 = vpop.f32.mrb[130].mxu1  ;;  %v1868_v48 = vsel %vm1723_vm1, %v8490_v23, 0.0 }
 0x285   :  { %13701 = vst [vmem:[#allocation306_spill] sm:$0xff] %v9078_v37  ;;  %v9093_v63 = vmul.f32 0.020408163, %v2747_v29  ;;  %2587 = vadd.xlane.f32.xlu1 %v2586_v16  ;;  %13706 = vst [vmem:[#allocation311_spill] sm:$0xff] %v9096_v12  ;;  %v1697_v41 = vpop.f32.mrb[131].mxu1  ;;  %v2802_v16 = vsel %vm1723_vm1, %v2420_v10, 0.0 }
 0x286   :  { %v2750_v36 = vpop.xlane.xlu1 %2749  ;;  %v1871_v41 = vsel %vm1723_vm1, %v8497_v49, 0.0  ;;  %v2084_v10 = vsel %vm1723_vm1, %v8501_v4, 0.0 }
 0x287   :  { %13705 = vst [vmem:[#allocation310_spill] sm:$0xff] %v9093_v63  ;;  %v9104_v46 = vmul.f32 0.020408163, %v2750_v36  ;;  %2800 = vadd.xlane.f32.xlu0 %v2799_v43 }
 0x288   :  { %v1816_v29 = vpop.xlane.xlu0 %1815  ;;  %v9115_v36 = vpop.f32.mrb[132].mxu0 }
 0x289   :  { %13708 = vst [vmem:[#allocation313_spill] sm:$0xff] %v9104_v46  ;;  %2803 = vadd.xlane.f32.xlu1 %v2802_v16  ;;  %v9111_v19 = vmul.f32 0.020408163, %v1816_v29  ;;  %13711 = vst [vmem:[#allocation316_spill] sm:$0xff] %v9115_v36  ;;  %v1414_v5 = vpop.f32.mrb[133].mxu0  ;;  %v2422_v46 = vmul.f32 %v13718_v25, %v13718_v25 }
 0x28a   :  { %v1819_v24 = vpop.xlane.xlu1 %1818  ;;  %v9123_v29 = vpop.f32.mrb[134].mxu0 }
 0x28b   :  { %13709 = vst [vmem:[#allocation314_spill] sm:$0xff] %v9111_v19  ;;  %v9113_v37 = vmul.f32 0.020408163, %v1819_v24  ;;  %1869 = vadd.xlane.f32.xlu0 %v1868_v48  ;;  %13713 = vst [vmem:[#allocation317_spill] sm:$0xff] %v9123_v29  ;;  %v2349_v24 = vmul.f32 %v8490_v23, %v8490_v23  ;;  %v1417_v63 = vpop.f32.mrb[135].mxu0  ;;  %v9133_v5 = vpop.f32.mrb[132].mxu1 }
 0x28c   :  { %v2032_v43 = vpop.xlane.xlu0 %2031  ;;  %13717 = vst [vmem:[#allocation320_spill] sm:$0xff] %v9133_v5  ;;  %v2087_v29 = vsel %vm1723_vm1, %v13718_v25, 0.0  ;;  %v1702_v23 = vpop.f32.mrb[133].mxu1 }
 0x28d   :  { %13710 = vst [vmem:[#allocation315_spill] sm:$0xff] %v9113_v37  ;;  %1872 = vadd.xlane.f32.xlu1 %v1871_v41  ;;  %v9127_v16 = vmul.f32 0.020408163, %v2032_v43  ;;  %v2350_v41 = vmul.f32 %v8497_v49, %v8497_v49  ;;  %v9141_v43 = vmul.f32 %v9111_v19, %v9111_v19  ;;  %v2589_v5 = vsel %vm1723_vm1, %v2349_v24, 0.0 }
 0x28e   :  { %v2035_v48 = vpop.xlane.xlu1 %2034 }
 0x28f   :  { %13714 = vst [vmem:[#allocation318_spill] sm:$0xff] %v9127_v16  ;;  %v9131_v40 = vmul.f32 0.020408163, %v2035_v48  ;;  %2085 = vadd.xlane.f32.xlu0 %v2084_v10  ;;  %13719 = vst [vmem:[#allocation321_spill] sm:$0xff] %v9141_v43  ;;  %v9145_v48 = vpop.f32.mrb[134].mxu1  ;;  %v2592_v24 = vsel %vm1723_vm1, %v2350_v41, 0.0 }
 0x290   :  { %v2537_v7 = vpop.xlane.xlu0 %2536  ;;  %13721 = vst [vmem:[#allocation323_spill] sm:$0xff] %v9145_v48  ;;  %v1705_v36 = vpop.f32.mrb[135].mxu1 }
 0x291   :  { %13716 = vst [vmem:[#allocation319_spill] sm:$0xff] %v9131_v40  ;;  %v9143_v63 = vmul.f32 0.020408163, %v2537_v7  ;;  %2088 = vadd.xlane.f32.xlu1 %v2087_v29  ;;  %v9156_v7 = vmul.f32 %v9113_v37, %v9113_v37  ;;  %v9167_v36 = vmul.f32 %v9127_v16, %v9127_v16 }
 0x292   :  { %v2540_v49 = vpop.xlane.xlu1 %2539 }
 0x293   :  { %13720 = vst [vmem:[#allocation322_spill] sm:$0xff] %v9143_v63  ;;  %13724 = vst [vmem:[#allocation324_spill] sm:$0xff] %v9156_v7  ;;  %v9160_v19 = vmul.f32 0.020408163, %v2540_v49  ;;  %2590 = vadd.xlane.f32.xlu0 %v2589_v5  ;;  %v2805_v49 = vsel %vm1723_vm1, %v2421_v30, 0.0  ;;  %v9176_v5 = vmul.f32 %v9131_v40, %v9131_v40 }
 0x294   :  { %v2753_v10 = vpop.xlane.xlu0 %2752  ;;  %13726 = vst [vmem:[#allocation326_spill] sm:$0xff] %v9167_v36  ;;  %v9182_v16 = vpop.f32.mrb[136].mxu0 }
 0x295   :  { %13725 = vst [vmem:[#allocation325_spill] sm:$0xff] %v9160_v19  ;;  %v9171_v23 = vmul.f32 0.020408163, %v2753_v10  ;;  %2593 = vadd.xlane.f32.xlu1 %v2592_v24  ;;  %13728 = vst [vmem:[#allocation328_spill] sm:$0xff] %v9176_v5  ;;  %v2808_v10 = vsel %vm1723_vm1, %v2422_v46, 0.0  ;;  %v1874_v24 = vsel %vm1723_vm1, %v8566_v33, 0.0 }
 0x296   :  { %v2756_v29 = vpop.xlane.xlu1 %2755  ;;  %13730 = vst [vmem:[#allocation330_spill] sm:$0xff] %v9182_v16  ;;  %v1422_v12 = vpop.f32.mrb[137].mxu0 }
 0x297   :  { %13727 = vst [vmem:[#allocation327_spill] sm:$0xff] %v9171_v23  ;;  %v9180_v37 = vmul.f32 0.020408163, %v2756_v29  ;;  %2806 = vadd.xlane.f32.xlu0 %v2805_v49  ;;  %v9189_v40 = vpop.f32.mrb[138].mxu0  ;;  %v13735_v23 = vld [vmem:[#allocation199_spill] sm:$0xff]  ;;  %v13736_v12 = vld [vmem:[#allocation201_spill] sm:$0xff] }
 0x298   :  { %v1822_v43 = vpop.xlane.xlu0 %1821  ;;  %13731 = vst [vmem:[#allocation331_spill] sm:$0xff] %v9189_v40  ;;  %v1425_v41 = vpop.f32.mrb[139].mxu0  ;;  %v1877_v7 = vsel %vm1723_vm1, %v13735_v23, 0.0  ;;  %v2090_v19 = vsel %vm1723_vm1, %v13736_v12, 0.0  ;;  %v2352_v4 = vmul.f32 %v13735_v23, %v13735_v23 }
 0x299   :  { %13729 = vst [vmem:[#allocation329_spill] sm:$0xff] %v9180_v37  ;;  %2809 = vadd.xlane.f32.xlu1 %v2808_v10  ;;  %v9193_v49 = vpop.f32.mrb[136].mxu1  ;;  %v9195_v36 = vmul.f32 0.020408163, %v1822_v43  ;;  %v2423_v37 = vmul.f32 %v13736_v12, %v13736_v12 }
 0x29a   :  { %v1825_v63 = vpop.xlane.xlu1 %1824  ;;  %13733 = vst [vmem:[#allocation333_spill] sm:$0xff] %v9193_v49  ;;  %v1710_v30 = vpop.f32.mrb[137].mxu1 }
 0x29b   :  { %v9191_v29 = vmul.f32 0.020408163, %v1825_v63  ;;  %1875 = vadd.xlane.f32.xlu0 %v1874_v24  ;;  %13734 = vst [vmem:[#allocation334_spill] sm:$0xff] %v9195_v36  ;;  %v9201_v10 = vpop.f32.mrb[138].mxu1  ;;  %v2351_v63 = vmul.f32 %v8566_v33, %v8566_v33 }
 0x29c   :  { %v2038_v46 = vpop.xlane.xlu0 %2037  ;;  %13737 = vst [vmem:[#allocation335_spill] sm:$0xff] %v9201_v10  ;;  %v1713_v5 = vpop.f32.mrb[139].mxu1 }
 0x29d   :  { %13732 = vst [vmem:[#allocation332_spill] sm:$0xff] %v9191_v29  ;;  %1878 = vadd.xlane.f32.xlu1 %v1877_v7  ;;  %v9205_v41 = vmul.f32 0.020408163, %v2038_v46  ;;  %v13741_v7 = vld [vmem:[#allocation203_spill] sm:$0xff]  ;;  %v9219_v46 = vmul.f32 %v9195_v36, %v9195_v36  ;;  %v2595_v23 = vsel %vm1723_vm1, %v2351_v63, 0.0  ;;  %v9232_v33 = vmul.f32 %v9191_v29, %v9191_v29  ;;  %v9241_v63 = vpop.f32.mrb[140].mxu0 }
 0x29e   :  { %v2041_v24 = vpop.xlane.xlu1 %2040  ;;  %v2093_v10 = vsel %vm1723_vm1, %v13741_v7, 0.0  ;;  %v2598_v36 = vsel %vm1723_vm1, %v2352_v4, 0.0  ;;  %13749 = vst [vmem:[#allocation342_spill] sm:$0xff] %v9241_v63 }
 0x29f   :  { %13738 = vst [vmem:[#allocation336_spill] sm:$0xff] %v9205_v41  ;;  %v9209_v25 = vmul.f32 0.020408163, %v2041_v24  ;;  %2091 = vadd.xlane.f32.xlu0 %v2090_v19  ;;  %13743 = vst [vmem:[#allocation338_spill] sm:$0xff] %v9219_v46  ;;  %v2424_v19 = vmul.f32 %v13741_v7, %v13741_v7  ;;  %v9245_v16 = vmul.f32 %v9205_v41, %v9205_v41  ;;  %v1883_v41 = vsel %vm1723_vm1, %v8649_v1, 0.0 }
 0x2a0   :  { %v2543_v30 = vpop.xlane.xlu0 %2542  ;;  %13747 = vst [vmem:[#allocation340_spill] sm:$0xff] %v9232_v33 }
 0x2a1   :  { %13740 = vst [vmem:[#allocation337_spill] sm:$0xff] %v9209_v25  ;;  %v9221_v5 = vmul.f32 0.020408163, %v2543_v30  ;;  %2094 = vadd.xlane.f32.xlu1 %v2093_v10  ;;  %13750 = vst [vmem:[#allocation343_spill] sm:$0xff] %v9245_v16  ;;  %v2811_v30 = vsel %vm1723_vm1, %v2423_v37, 0.0  ;;  %v9256_v4 = vmul.f32 %v9209_v25, %v9209_v25  ;;  %v2096_v16 = vsel %vm1723_vm1, %v8653_v0, 0.0 }
 0x2a2   :  { %v2546_v43 = vpop.xlane.xlu1 %2545 }
 0x2a3   :  { %13744 = vst [vmem:[#allocation339_spill] sm:$0xff] %v9221_v5  ;;  %v9236_v10 = vmul.f32 0.020408163, %v2546_v43  ;;  %2596 = vadd.xlane.f32.xlu0 %v2595_v23  ;;  %v1430_v43 = vpop.f32.mrb[141].mxu0  ;;  %13753 = vst [vmem:[#allocation346_spill] sm:$0xff] %v9256_v4  ;;  %v2354_v4 = vmul.f32 %v8649_v1, %v8649_v1 }
 0x2a4   :  { %v2759_v24 = vpop.xlane.xlu0 %2758  ;;  %v9252_v29 = vpop.f32.mrb[142].mxu0  ;;  %v1880_v43 = vsel %vm1723_vm1, %v8642_v27, 0.0 }
 0x2a5   :  { %13748 = vst [vmem:[#allocation341_spill] sm:$0xff] %v9236_v10  ;;  %v9249_v49 = vmul.f32 0.020408163, %v2759_v24  ;;  %2599 = vadd.xlane.f32.xlu1 %v2598_v36  ;;  %13752 = vst [vmem:[#allocation345_spill] sm:$0xff] %v9252_v29  ;;  %v1433_v40 = vpop.f32.mrb[143].mxu0  ;;  %v2814_v36 = vsel %vm1723_vm1, %v2424_v19, 0.0 }
 0x2a6   :  { %v2762_v23 = vpop.xlane.xlu1 %2761  ;;  %v9265_v37 = vpop.f32.mrb[140].mxu1 }
 0x2a7   :  { %13751 = vst [vmem:[#allocation344_spill] sm:$0xff] %v9249_v49  ;;  %v9260_v46 = vmul.f32 0.020408163, %v2762_v23  ;;  %2812 = vadd.xlane.f32.xlu0 %v2811_v30  ;;  %13755 = vst [vmem:[#allocation348_spill] sm:$0xff] %v9265_v37  ;;  %v1718_v25 = vpop.f32.mrb[141].mxu1 }
 0x2a8   :  { %v1828_v24 = vpop.xlane.xlu0 %1827  ;;  %v9269_v10 = vpop.f32.mrb[142].mxu1  ;;  %v2353_v25 = vmul.f32 %v8642_v27, %v8642_v27 }
 0x2a9   :  { %13754 = vst [vmem:[#allocation347_spill] sm:$0xff] %v9260_v46  ;;  %2815 = vadd.xlane.f32.xlu1 %v2814_v36  ;;  %13756 = vst [vmem:[#allocation349_spill] sm:$0xff] %v9269_v10  ;;  %v9271_v23 = vmul.f32 0.020408163, %v1828_v24  ;;  %v1721_v40 = vpop.f32.mrb[143].mxu1 }
 0x2aa   :  { %v1831_v33 = vpop.xlane.xlu1 %1830  ;;  %v2601_v24 = vsel %vm1723_vm1, %v2353_v25, 0.0  ;;  %v2604_v40 = vsel %vm1723_vm1, %v2354_v4, 0.0 }
 0x2ab   :  { %13757 = vst [vmem:[#allocation350_spill] sm:$0xff] %v9271_v23  ;;  %v9273_v30 = vmul.f32 0.020408163, %v1831_v33  ;;  %1881 = vadd.xlane.f32.xlu0 %v1880_v43  ;;  %v9297_v27 = vmul.f32 %v9271_v23, %v9271_v23  ;;  %v2425_v33 = vmul.f32 %v8653_v0, %v8653_v0 }
 0x2ac   :  { %v2044_v19 = vpop.xlane.xlu0 %2043 }
 0x2ad   :  { %13758 = vst [vmem:[#allocation351_spill] sm:$0xff] %v9273_v30  ;;  %v9279_v49 = vmul.f32 0.020408163, %v2044_v19  ;;  %1884 = vadd.xlane.f32.xlu1 %v1883_v41  ;;  %v2099_v41 = vsel %vm1723_vm1, %v8661_v54, 0.0  ;;  %13763 = vst [vmem:[#allocation354_spill] sm:$0xff] %v9297_v27  ;;  %v9308_v1 = vmul.f32 %v9273_v30, %v9273_v30 }
 0x2ae   :  { %v2047_v36 = vpop.xlane.xlu1 %2046 }
 0x2af   :  { %13759 = vst [vmem:[#allocation352_spill] sm:$0xff] %v9279_v49  ;;  %v9285_v5 = vmul.f32 0.020408163, %v2047_v36  ;;  %2097 = vadd.xlane.f32.xlu0 %v2096_v16  ;;  %v9319_v16 = vmul.f32 %v9279_v49, %v9279_v49 }
 0x2b0   :  { %v2549_v46 = vpop.xlane.xlu0 %2548 }
 0x2b1   :  { %13761 = vst [vmem:[#allocation353_spill] sm:$0xff] %v9285_v5  ;;  %v9299_v36 = vmul.f32 0.020408163, %v2549_v46  ;;  %2100 = vadd.xlane.f32.xlu1 %v2099_v41  ;;  %v2426_v46 = vmul.f32 %v8661_v54, %v8661_v54  ;;  %13765 = vst [vmem:[#allocation355_spill] sm:$0xff] %v9319_v16  ;;  %v13879_v54 = vld [vmem:[#allocation82_spill] sm:$0xff] }
 0x2b2   :  { %v2552_v43 = vpop.xlane.xlu1 %2551 }
 0x2b3   :  { %v9312_v44 = vmul.f32 0.020408163, %v2552_v43  ;;  %2602 = vadd.xlane.f32.xlu0 %v2601_v24  ;;  %v2817_v43 = vsel %vm1723_vm1, %v2425_v33, 0.0  ;;  %v9328_v24 = vmul.f32 %v9285_v5, %v9285_v5  ;;  %v2820_v27 = vsel %vm1723_vm1, %v2426_v46, 0.0 }
 0x2b4   :  { %v2765_v41 = vpop.xlane.xlu0 %2764  ;;  %v2102_v46 = vsel %vm1723_vm1, %v8729_v57, 0.0 }
 0x2b5   :  { %v9323_v23 = vmul.f32 0.020408163, %v2765_v41  ;;  %2605 = vadd.xlane.f32.xlu1 %v2604_v40  ;;  %13767 = vst [vmem:[#allocation357_spill] sm:$0xff] %v9328_v24  ;;  %v1886_v41 = vsel %vm1723_vm1, %v8718_v15, 0.0 }
 0x2b6   :  { %v2768_v19 = vpop.xlane.xlu1 %2767 }
 0x2b7   :  { %13766 = vst [vmem:[#allocation356_spill] sm:$0xff] %v9323_v23  ;;  %v9332_v30 = vmul.f32 0.020408163, %v2768_v19  ;;  %2818 = vadd.xlane.f32.xlu0 %v2817_v43  ;;  %v1889_v19 = vsel %vm1723_vm1, %v8725_v61, 0.0 }
 0x2b8   :  { %v1834_v49 = vpop.xlane.xlu0 %1833 }
 0x2b9   :  { %13768 = vst [vmem:[#allocation358_spill] sm:$0xff] %v9332_v30  ;;  %2821 = vadd.xlane.f32.xlu1 %v2820_v27  ;;  %v9339_v33 = vmul.f32 0.020408163, %v1834_v49  ;;  %v2355_v27 = vmul.f32 %v8718_v15, %v8718_v15  ;;  %v2356_v30 = vmul.f32 %v8725_v61, %v8725_v61  ;;  %v13908_v15 = vld [vmem:[#allocation127_spill] sm:$0xff]  ;;  %v13909_v61 = vld [vmem:[#allocation126_spill] sm:$0xff] }
 0x2ba   :  { %v1837_v25 = vpop.xlane.xlu1 %1836 }
 0x2bb   :  { %13769 = vst [vmem:[#allocation359_spill] sm:$0xff] %v9339_v33  ;;  %v9341_v5 = vmul.f32 0.020408163, %v1837_v25  ;;  %1887 = vadd.xlane.f32.xlu0 %v1886_v41  ;;  %v2607_v41 = vsel %vm1723_vm1, %v2355_v27, 0.0 }
 0x2bc   :  { %v2050_v4 = vpop.xlane.xlu0 %2049 }
 0x2bd   :  { %13770 = vst [vmem:[#allocation360_spill] sm:$0xff] %v9341_v5  ;;  %v9349_v23 = vmul.f32 0.020408163, %v2050_v4  ;;  %1890 = vadd.xlane.f32.xlu1 %v1889_v19  ;;  %v2105_v4 = vsel %vm1723_vm1, %v8737_v58, 0.0  ;;  %v9365_v19 = vmul.f32 %v9339_v33, %v9339_v33  ;;  %v9376_v47 = vmul.f32 %v9341_v5, %v9341_v5 }
 0x2be   :  { %v2053_v49 = vpop.xlane.xlu1 %2052 }
 0x2bf   :  { %13772 = vst [vmem:[#allocation361_spill] sm:$0xff] %v9349_v23  ;;  %v9355_v40 = vmul.f32 0.020408163, %v2053_v49  ;;  %2103 = vadd.xlane.f32.xlu0 %v2102_v46  ;;  %13775 = vst [vmem:[#allocation363_spill] sm:$0xff] %v9365_v19  ;;  %v2427_v49 = vmul.f32 %v8729_v57, %v8729_v57  ;;  %v2610_v46 = vsel %vm1723_vm1, %v2356_v30, 0.0  ;;  %v9387_v59 = vmul.f32 %v9349_v23, %v9349_v23 }
 0x2c0   :  { %v2555_v16 = vpop.xlane.xlu0 %2554 }
 0x2c1   :  { %13774 = vst [vmem:[#allocation362_spill] sm:$0xff] %v9355_v40  ;;  %v9367_v43 = vmul.f32 0.020408163, %v2555_v16  ;;  %2106 = vadd.xlane.f32.xlu1 %v2105_v4  ;;  %v2428_v16 = vmul.f32 %v8737_v58, %v8737_v58  ;;  %13777 = vst [vmem:[#allocation365_spill] sm:$0xff] %v9387_v59 }
 0x2c2   :  { %v2558_v24 = vpop.xlane.xlu1 %2557 }
 0x2c3   :  { %13776 = vst [vmem:[#allocation364_spill] sm:$0xff] %v9367_v43  ;;  %v9380_v25 = vmul.f32 0.020408163, %v2558_v24  ;;  %2608 = vadd.xlane.f32.xlu0 %v2607_v41  ;;  %v2823_v24 = vsel %vm1723_vm1, %v2427_v49, 0.0  ;;  %v9396_v41 = vmul.f32 %v9355_v40, %v9355_v40  ;;  %v2826_v43 = vsel %vm1723_vm1, %v2428_v16, 0.0 }
 0x2c4   :  { %v2771_v4 = vpop.xlane.xlu0 %2770  ;;  %v2108_v16 = vsel %vm1723_vm1, %v8805_v32, 0.0 }
 0x2c5   :  { %v9391_v5 = vmul.f32 0.020408163, %v2771_v4  ;;  %2611 = vadd.xlane.f32.xlu1 %v2610_v46  ;;  %13779 = vst [vmem:[#allocation367_spill] sm:$0xff] %v9396_v41  ;;  %v1892_v4 = vsel %vm1723_vm1, %v8794_v38, 0.0 }
 0x2c6   :  { %v2774_v33 = vpop.xlane.xlu1 %2773 }
 0x2c7   :  { %13778 = vst [vmem:[#allocation366_spill] sm:$0xff] %v9391_v5  ;;  %v9400_v19 = vmul.f32 0.020408163, %v2774_v33  ;;  %2824 = vadd.xlane.f32.xlu0 %v2823_v24  ;;  %v1895_v33 = vsel %vm1723_vm1, %v8801_v3, 0.0  ;;  %v2358_v5 = vmul.f32 %v8801_v3, %v8801_v3 }
 0x2c8   :  { %v1840_v23 = vpop.xlane.xlu0 %1839 }
 0x2c9   :  { %13780 = vst [vmem:[#allocation368_spill] sm:$0xff] %v9400_v19  ;;  %2827 = vadd.xlane.f32.xlu1 %v2826_v43  ;;  %v9407_v49 = vmul.f32 0.020408163, %v1840_v23  ;;  %v2357_v23 = vmul.f32 %v8794_v38, %v8794_v38 }
 0x2ca   :  { %v1843_v27 = vpop.xlane.xlu1 %1842 }
 0x2cb   :  { %13781 = vst [vmem:[#allocation369_spill] sm:$0xff] %v9407_v49  ;;  %v9409_v40 = vmul.f32 0.020408163, %v1843_v27  ;;  %1893 = vadd.xlane.f32.xlu0 %v1892_v4  ;;  %v2613_v27 = vsel %vm1723_vm1, %v2357_v23, 0.0 }
 0x2cc   :  { %v2056_v30 = vpop.xlane.xlu0 %2055 }
 0x2cd   :  { %13782 = vst [vmem:[#allocation370_spill] sm:$0xff] %v9409_v40  ;;  %v9417_v59 = vmul.f32 0.020408163, %v2056_v30  ;;  %1896 = vadd.xlane.f32.xlu1 %v1895_v33  ;;  %v2111_v30 = vsel %vm1723_vm1, %v8813_v31, 0.0  ;;  %v9433_v33 = vmul.f32 %v9407_v49, %v9407_v49  ;;  %v9444_v60 = vmul.f32 %v9409_v40, %v9409_v40 }
 0x2ce   :  { %v2059_v43 = vpop.xlane.xlu1 %2058 }
 0x2cf   :  { %13783 = vst [vmem:[#allocation371_spill] sm:$0xff] %v9417_v59  ;;  %v9423_v4 = vmul.f32 0.020408163, %v2059_v43  ;;  %2109 = vadd.xlane.f32.xlu0 %v2108_v16  ;;  %13785 = vst [vmem:[#allocation373_spill] sm:$0xff] %v9433_v33  ;;  %v2429_v43 = vmul.f32 %v8805_v32, %v8805_v32  ;;  %v2616_v16 = vsel %vm1723_vm1, %v2358_v5, 0.0  ;;  %v9455_v13 = vmul.f32 %v9417_v59, %v9417_v59 }
 0x2d0   :  { %v2561_v24 = vpop.xlane.xlu0 %2560 }
 0x2d1   :  { %13784 = vst [vmem:[#allocation372_spill] sm:$0xff] %v9423_v4  ;;  %v9435_v51 = vmul.f32 0.020408163, %v2561_v24  ;;  %2112 = vadd.xlane.f32.xlu1 %v2111_v30  ;;  %v2430_v24 = vmul.f32 %v8813_v31, %v8813_v31  ;;  %13787 = vst [vmem:[#allocation375_spill] sm:$0xff] %v9455_v13 }
 0x2d2   :  { %v2564_v46 = vpop.xlane.xlu1 %2563 }
 0x2d3   :  { %13786 = vst [vmem:[#allocation374_spill] sm:$0xff] %v9435_v51  ;;  %v9448_v17 = vmul.f32 0.020408163, %v2564_v46  ;;  %2614 = vadd.xlane.f32.xlu0 %v2613_v27  ;;  %v2829_v46 = vsel %vm1723_vm1, %v2429_v43, 0.0  ;;  %v9464_v27 = vmul.f32 %v9423_v4, %v9423_v4  ;;  %v2832_v19 = vsel %vm1723_vm1, %v2430_v24, 0.0  ;;  %v13835_v51 = vld [vmem:[#allocation320_spill] sm:$0xff] }
 0x2d4   :  { %v2777_v30 = vpop.xlane.xlu0 %2776  ;;  %v2114_v24 = vsel %vm1723_vm1, %v8881_v28, 0.0 }
 0x2d5   :  { %v9459_v40 = vmul.f32 0.020408163, %v2777_v30  ;;  %2617 = vadd.xlane.f32.xlu1 %v2616_v16  ;;  %13789 = vst [vmem:[#allocation377_spill] sm:$0xff] %v9464_v27  ;;  %v1898_v30 = vsel %vm1723_vm1, %v8870_v6, 0.0  ;;  %v2360_v27 = vmul.f32 %v8877_v21, %v8877_v21 }
 0x2d6   :  { %v2780_v49 = vpop.xlane.xlu1 %2779 }
 0x2d7   :  { %13788 = vst [vmem:[#allocation376_spill] sm:$0xff] %v9459_v40  ;;  %v9468_v41 = vmul.f32 0.020408163, %v2780_v49  ;;  %2830 = vadd.xlane.f32.xlu0 %v2829_v46  ;;  %v1901_v49 = vsel %vm1723_vm1, %v8877_v21, 0.0 }
 0x2d8   :  { %v1846_v59 = vpop.xlane.xlu0 %1845 }
 0x2d9   :  { %13790 = vst [vmem:[#allocation378_spill] sm:$0xff] %v9468_v41  ;;  %2833 = vadd.xlane.f32.xlu1 %v2832_v19  ;;  %v9475_v43 = vmul.f32 0.020408163, %v1846_v59  ;;  %v2359_v59 = vmul.f32 %v8870_v6, %v8870_v6 }
 0x2da   :  { %v1849_v23 = vpop.xlane.xlu1 %1848 }
 0x2db   :  { %13791 = vst [vmem:[#allocation379_spill] sm:$0xff] %v9475_v43  ;;  %v9477_v4 = vmul.f32 0.020408163, %v1849_v23  ;;  %1899 = vadd.xlane.f32.xlu0 %v1898_v30  ;;  %v2619_v30 = vsel %vm1723_vm1, %v2359_v59, 0.0 }
 0x2dc   :  { %v2062_v5 = vpop.xlane.xlu0 %2061 }
 0x2dd   :  { %13792 = vst [vmem:[#allocation380_spill] sm:$0xff] %v9477_v4  ;;  %v9485_v13 = vmul.f32 0.020408163, %v2062_v5  ;;  %1902 = vadd.xlane.f32.xlu1 %v1901_v49  ;;  %v2117_v5 = vsel %vm1723_vm1, %v8889_v11, 0.0  ;;  %v9501_v49 = vmul.f32 %v9475_v43, %v9475_v43  ;;  %v9512_v45 = vmul.f32 %v9477_v4, %v9477_v4 }
 0x2de   :  { %v2065_v19 = vpop.xlane.xlu1 %2064 }
 0x2df   :  { %13793 = vst [vmem:[#allocation381_spill] sm:$0xff] %v9485_v13  ;;  %v9491_v16 = vmul.f32 0.020408163, %v2065_v19  ;;  %2115 = vadd.xlane.f32.xlu0 %v2114_v24  ;;  %13796 = vst [vmem:[#allocation383_spill] sm:$0xff] %v9501_v49  ;;  %v2431_v19 = vmul.f32 %v8881_v28, %v8881_v28  ;;  %v2622_v24 = vsel %vm1723_vm1, %v2360_v27, 0.0  ;;  %v9523_v39 = vmul.f32 %v9485_v13, %v9485_v13 }
 0x2e0   :  { %v2567_v46 = vpop.xlane.xlu0 %2566 }
 0x2e1   :  { %13795 = vst [vmem:[#allocation382_spill] sm:$0xff] %v9491_v16  ;;  %v9503_v56 = vmul.f32 0.020408163, %v2567_v46  ;;  %2118 = vadd.xlane.f32.xlu1 %v2117_v5  ;;  %v2432_v46 = vmul.f32 %v8889_v11, %v8889_v11  ;;  %13798 = vst [vmem:[#allocation385_spill] sm:$0xff] %v9523_v39 }
 0x2e2   :  { %v2570_v40 = vpop.xlane.xlu1 %2569 }
 0x2e3   :  { %13797 = vst [vmem:[#allocation384_spill] sm:$0xff] %v9503_v56  ;;  %v9516_v23 = vmul.f32 0.020408163, %v2570_v40  ;;  %2620 = vadd.xlane.f32.xlu0 %v2619_v30  ;;  %v2835_v40 = vsel %vm1723_vm1, %v2431_v19, 0.0  ;;  %v9532_v30 = vmul.f32 %v9491_v16, %v9491_v16  ;;  %v2838_v49 = vsel %vm1723_vm1, %v2432_v46, 0.0  ;;  %v13843_v56 = vld [vmem:[#allocation330_spill] sm:$0xff] }
 0x2e4   :  { %v2783_v5 = vpop.xlane.xlu0 %2782  ;;  %v2120_v46 = vsel %vm1723_vm1, %v8957_v34, 0.0 }
 0x2e5   :  { %v9527_v4 = vmul.f32 0.020408163, %v2783_v5  ;;  %2623 = vadd.xlane.f32.xlu1 %v2622_v24  ;;  %13800 = vst [vmem:[#allocation387_spill] sm:$0xff] %v9532_v30  ;;  %v1904_v5 = vsel %vm1723_vm1, %v8946_v2, 0.0 }
 0x2e6   :  { %v2786_v43 = vpop.xlane.xlu1 %2785 }
 0x2e7   :  { %13799 = vst [vmem:[#allocation386_spill] sm:$0xff] %v9527_v4  ;;  %v9536_v41 = vmul.f32 0.020408163, %v2786_v43  ;;  %2836 = vadd.xlane.f32.xlu0 %v2835_v40  ;;  %v1907_v43 = vsel %vm1723_vm1, %v8953_v53, 0.0  ;;  %v2362_v4 = vmul.f32 %v8953_v53, %v8953_v53 }
 0x2e8   :  { %v1852_v13 = vpop.xlane.xlu0 %1851 }
 0x2e9   :  { %13801 = vst [vmem:[#allocation388_spill] sm:$0xff] %v9536_v41  ;;  %2839 = vadd.xlane.f32.xlu1 %v2838_v49  ;;  %v9543_v19 = vmul.f32 0.020408163, %v1852_v13  ;;  %v2361_v13 = vmul.f32 %v8946_v2, %v8946_v2 }
 0x2ea   :  { %v1855_v59 = vpop.xlane.xlu1 %1854 }
 0x2eb   :  { %13802 = vst [vmem:[#allocation389_spill] sm:$0xff] %v9543_v19  ;;  %v9545_v16 = vmul.f32 0.020408163, %v1855_v59  ;;  %1905 = vadd.xlane.f32.xlu0 %v1904_v5  ;;  %v2625_v24 = vsel %vm1723_vm1, %v2361_v13, 0.0  ;;  %v2363_v13 = vmul.f32 %v9002_v22, %v9002_v22 }
 0x2ec   :  { %v2068_v27 = vpop.xlane.xlu0 %2067 }
 0x2ed   :  { %13803 = vst [vmem:[#allocation390_spill] sm:$0xff] %v9545_v16  ;;  %v9553_v39 = vmul.f32 0.020408163, %v2068_v27  ;;  %1908 = vadd.xlane.f32.xlu1 %v1907_v43  ;;  %v2123_v27 = vsel %vm1723_vm1, %v8965_v8, 0.0  ;;  %v9569_v43 = vmul.f32 %v9543_v19, %v9543_v19  ;;  %v9578_v59 = vmul.f32 %v9545_v16, %v9545_v16 }
 0x2ee   :  { %v2071_v49 = vpop.xlane.xlu1 %2070 }
 0x2ef   :  { %13804 = vst [vmem:[#allocation391_spill] sm:$0xff] %v9553_v39  ;;  %v9559_v5 = vmul.f32 0.020408163, %v2071_v49  ;;  %2121 = vadd.xlane.f32.xlu0 %v2120_v46  ;;  %13806 = vst [vmem:[#allocation393_spill] sm:$0xff] %v9569_v43  ;;  %v9589_v46 = vmul.f32 %v9553_v39, %v9553_v39  ;;  %v1913_v39 = vsel %vm1723_vm1, %v9015_v26, 0.0 }
 0x2f0   :  { %v2573_v40 = vpop.xlane.xlu0 %2572 }
 0x2f1   :  { %13805 = vst [vmem:[#allocation392_spill] sm:$0xff] %v9559_v5  ;;  %v9571_v14 = vmul.f32 0.020408163, %v2573_v40  ;;  %2124 = vadd.xlane.f32.xlu1 %v2123_v27  ;;  %v2628_v40 = vsel %vm1723_vm1, %v2362_v4, 0.0  ;;  %v1910_v27 = vsel %vm1723_vm1, %v9002_v22, 0.0  ;;  %13808 = vst [vmem:[#allocation395_spill] sm:$0xff] %v9589_v46 }
 0x2f2   :  { %v2576_v49 = vpop.xlane.xlu1 %2575 }
 0x2f3   :  { %13807 = vst [vmem:[#allocation394_spill] sm:$0xff] %v9571_v14  ;;  %v9582_v50 = vmul.f32 0.020408163, %v2576_v49  ;;  %2626 = vadd.xlane.f32.xlu0 %v2625_v24  ;;  %v9597_v24 = vmul.f32 %v9559_v5, %v9559_v5 }
 0x2f4   :  { %v2789_v19 = vpop.xlane.xlu0 %2788 }
 0x2f5   :  { %v9593_v9 = vmul.f32 0.020408163, %v2789_v19  ;;  %2629 = vadd.xlane.f32.xlu1 %v2628_v40  ;;  %13810 = vst [vmem:[#allocation397_spill] sm:$0xff] %v9597_v24  ;;  %v2126_v19 = vsel %vm1723_vm1, %v9026_v42, 0.0 }
 0x2f6   :  { %v2792_v18 = vpop.xlane.xlu1 %2791 }
 0x2f7   :  { %13809 = vst [vmem:[#allocation396_spill] sm:$0xff] %v9593_v9  ;;  %v9601_v49 = vmul.f32 0.020408163, %v2792_v18  ;;  %1911 = vadd.xlane.f32.xlu0 %v1910_v27  ;;  %v2364_v27 = vmul.f32 %v9015_v26, %v9015_v26  ;;  %v2129_v9 = vsel %vm1723_vm1, %v9033_v52, 0.0 }
 0x2f8   :  { %v1858_v16 = vpop.xlane.xlu0 %1857 }
 0x2f9   :  { %13811 = vst [vmem:[#allocation398_spill] sm:$0xff] %v9601_v49  ;;  %1914 = vadd.xlane.f32.xlu1 %v1913_v39  ;;  %v9611_v5 = vmul.f32 0.020408163, %v1858_v16  ;;  %v2631_v16 = vsel %vm1723_vm1, %v2363_v13, 0.0  ;;  %v2634_v14 = vsel %vm1723_vm1, %v2364_v27, 0.0 }
 0x2fa   :  { %v1861_v4 = vpop.xlane.xlu1 %1860 }
 0x2fb   :  { %13812 = vst [vmem:[#allocation399_spill] sm:$0xff] %v9611_v5  ;;  %v9613_v18 = vmul.f32 0.020408163, %v1861_v4  ;;  %2127 = vadd.xlane.f32.xlu0 %v2126_v19 }
 0x2fc   :  { %v2074_v46 = vpop.xlane.xlu0 %2073 }
 0x2fd   :  { %13813 = vst [vmem:[#allocation400_spill] sm:$0xff] %v9613_v18  ;;  %v9621_v39 = vmul.f32 0.020408163, %v2074_v46  ;;  %2130 = vadd.xlane.f32.xlu1 %v2129_v9  ;;  %v1916_v46 = vsel %vm1723_vm1, %v9065_v35, 0.0  ;;  %v9635_v9 = vmul.f32 %v9611_v5, %v9611_v5  ;;  %v9643_v41 = vmul.f32 %v9613_v18, %v9613_v18 }
 0x2fe   :  { %v2077_v24 = vpop.xlane.xlu1 %2076 }
 0x2ff   :  { %13814 = vst [vmem:[#allocation401_spill] sm:$0xff] %v9621_v39  ;;  %v9626_v19 = vmul.f32 0.020408163, %v2077_v24  ;;  %2632 = vadd.xlane.f32.xlu0 %v2631_v16  ;;  %13818 = vst [vmem:[#allocation403_spill] sm:$0xff] %v9635_v9  ;;  %v9655_v40 = vmul.f32 %v9621_v39, %v9621_v39  ;;  %v2366_v24 = vmul.f32 %v9080_v55, %v9080_v55  ;;  %v13825_v39 = vld [vmem:[#allocation311_spill] sm:$0xff] }
 0x300   :  { %v2579_v43 = vpop.xlane.xlu0 %2578 }
 0x301   :  { %13816 = vst [vmem:[#allocation402_spill] sm:$0xff] %v9626_v19  ;;  %v9637_v13 = vmul.f32 0.020408163, %v2579_v43  ;;  %2635 = vadd.xlane.f32.xlu1 %v2634_v14  ;;  %v1919_v43 = vsel %vm1723_vm1, %v9080_v55, 0.0  ;;  %v2132_v14 = vsel %vm1723_vm1, %v9082_v62, 0.0  ;;  %13821 = vst [vmem:[#allocation405_spill] sm:$0xff] %v9655_v40  ;;  %v9665_v27 = vmul.f32 %v9626_v19, %v9626_v19 }
 0x302   :  { %v2582_v16 = vpop.xlane.xlu1 %2581  ;;  %v13828_v40 = vld [vmem:[#allocation316_spill] sm:$0xff]  ;;  %v2138_v55 = vsel %vm1723_vm1, %v13835_v51, 0.0 }
 0x303   :  { %13819 = vst [vmem:[#allocation404_spill] sm:$0xff] %v9637_v13  ;;  %v9647_v49 = vmul.f32 0.020408163, %v2582_v16  ;;  %1917 = vadd.xlane.f32.xlu0 %v1916_v46  ;;  %v2365_v46 = vmul.f32 %v9065_v35, %v9065_v35  ;;  %13823 = vst [vmem:[#allocation407_spill] sm:$0xff] %v9665_v27  ;;  %v13834_v27 = vld [vmem:[#allocation317_spill] sm:$0xff] }
 0x304   :  { %v2795_v30 = vpop.xlane.xlu0 %2794 }
 0x305   :  { %v9659_v5 = vmul.f32 0.020408163, %v2795_v30  ;;  %1920 = vadd.xlane.f32.xlu1 %v1919_v43  ;;  %v2135_v43 = vsel %vm1723_vm1, %v13825_v39, 0.0  ;;  %v2637_v13 = vsel %vm1723_vm1, %v2365_v46, 0.0 }
 0x306   :  { %v2798_v16 = vpop.xlane.xlu1 %2797 }
 0x307   :  { %13822 = vst [vmem:[#allocation406_spill] sm:$0xff] %v9659_v5  ;;  %v9669_v18 = vmul.f32 0.020408163, %v2798_v16  ;;  %2133 = vadd.xlane.f32.xlu0 %v2132_v14  ;;  %v2640_v16 = vsel %vm1723_vm1, %v2366_v24, 0.0  ;;  %v1922_v5 = vsel %vm1723_vm1, %v13828_v40, 0.0 }
 0x308   :  { %v1864_v30 = vpop.xlane.xlu0 %1863 }
 0x309   :  { %13824 = vst [vmem:[#allocation408_spill] sm:$0xff] %v9669_v18  ;;  %2136 = vadd.xlane.f32.xlu1 %v2135_v43  ;;  %v9677_v9 = vmul.f32 0.020408163, %v1864_v30  ;;  %v1925_v18 = vsel %vm1723_vm1, %v13834_v27, 0.0 }
 0x30a   :  { %v1867_v19 = vpop.xlane.xlu1 %1866 }
 0x30b   :  { %13826 = vst [vmem:[#allocation409_spill] sm:$0xff] %v9677_v9  ;;  %v9680_v20 = vmul.f32 0.020408163, %v1867_v19  ;;  %2638 = vadd.xlane.f32.xlu0 %v2637_v13  ;;  %v2367_v13 = vmul.f32 %v13828_v40, %v13828_v40 }
 0x30c   :  { %v2080_v14 = vpop.xlane.xlu0 %2079 }
 0x30d   :  { %13827 = vst [vmem:[#allocation410_spill] sm:$0xff] %v9680_v20  ;;  %v9687_v33 = vmul.f32 0.020408163, %v2080_v14  ;;  %2641 = vadd.xlane.f32.xlu1 %v2640_v16  ;;  %v9701_v14 = vmul.f32 %v9677_v9, %v9677_v9  ;;  %v9711_v19 = vmul.f32 %v9680_v20, %v9680_v20  ;;  %v2643_v20 = vsel %vm1723_vm1, %v2367_v13, 0.0 }
 0x30e   :  { %v2083_v30 = vpop.xlane.xlu1 %2082  ;;  %v2150_v13 = vsel %vm1723_vm1, %v9265_v37, 0.0 }
 0x30f   :  { %13830 = vst [vmem:[#allocation411_spill] sm:$0xff] %v9687_v33  ;;  %v9691_v46 = vmul.f32 0.020408163, %v2083_v30  ;;  %1923 = vadd.xlane.f32.xlu0 %v1922_v5  ;;  %13836 = vst [vmem:[#allocation413_spill] sm:$0xff] %v9701_v14  ;;  %v2141_v5 = vsel %vm1723_vm1, %v9145_v48, 0.0  ;;  %v1928_v33 = vsel %vm1723_vm1, %v13843_v56, 0.0 }
 0x310   :  { %v2585_v24 = vpop.xlane.xlu0 %2584  ;;  %13839 = vst [vmem:[#allocation415_spill] sm:$0xff] %v9711_v19 }
 0x311   :  { %13832 = vst [vmem:[#allocation412_spill] sm:$0xff] %v9691_v46  ;;  %v9703_v16 = vmul.f32 0.020408163, %v2585_v24  ;;  %1926 = vadd.xlane.f32.xlu1 %v1925_v18  ;;  %v2368_v18 = vmul.f32 %v13834_v27, %v13834_v27 }
 0x312   :  { %v2588_v4 = vpop.xlane.xlu1 %2587 }
 0x313   :  { %13837 = vst [vmem:[#allocation414_spill] sm:$0xff] %v9703_v16  ;;  %v9715_v43 = vmul.f32 0.020408163, %v2588_v4  ;;  %2139 = vadd.xlane.f32.xlu0 %v2138_v55  ;;  %v2646_v55 = vsel %vm1723_vm1, %v2368_v18, 0.0  ;;  %v13847_v16 = vld [vmem:[#allocation333_spill] sm:$0xff] }
 0x314   :  { %v9719_v24 = vpop.xlane.xlu0 %2800 }
 0x315   :  { %13840 = vst [vmem:[#allocation416_spill] sm:$0xff] %v9715_v43  ;;  %13841 = vst [vmem:[#allocation417_spill] sm:$0xff] %v9719_v24  ;;  %2142 = vadd.xlane.f32.xlu1 %v2141_v5  ;;  %v13846_v5 = vld [vmem:[#allocation331_spill] sm:$0xff] }
 0x316   :  { %v9725_v9 = vpop.xlane.xlu1 %2803  ;;  %v2370_v35 = vmul.f32 %v13846_v5, %v13846_v5  ;;  %v14049_v26 = vld [vmem:[#allocation413_spill] sm:$0xff] }
 0x317   :  { %13842 = vst [vmem:[#allocation418_spill] sm:$0xff] %v9725_v9  ;;  %2644 = vadd.xlane.f32.xlu0 %v2643_v20  ;;  %v1931_v9 = vsel %vm1723_vm1, %v13846_v5, 0.0  ;;  %v2144_v20 = vsel %vm1723_vm1, %v13847_v16, 0.0  ;;  %v2436_v5 = vmul.f32 %v9033_v52, %v9033_v52 }
 0x318   :  { %v1870_v4 = vpop.xlane.xlu0 %1869  ;;  %v2652_v43 = vsel %vm1723_vm1, %v2370_v35, 0.0 }
 0x319   :  { %2647 = vadd.xlane.f32.xlu1 %v2646_v55  ;;  %v9731_v24 = vmul.f32 0.020408163, %v1870_v4  ;;  %v2369_v4 = vmul.f32 %v13843_v56, %v13843_v56  ;;  %v1937_v56 = vsel %vm1723_vm1, %v9252_v29, 0.0  ;;  %v2850_v7 = vsel %vm1723_vm1, %v2436_v5, 0.0  ;;  %v13874_v5 = vld [vmem:[#allocation79_spill] sm:$0xff] }
 0x31a   :  { %v1873_v46 = vpop.xlane.xlu1 %1872 }
 0x31b   :  { %13844 = vst [vmem:[#allocation419_spill] sm:$0xff] %v9731_v24  ;;  %v9733_v14 = vmul.f32 0.020408163, %v1873_v46  ;;  %1929 = vadd.xlane.f32.xlu0 %v1928_v33  ;;  %v1934_v33 = vsel %vm1723_vm1, %v9241_v63, 0.0 }
 0x31c   :  { %v2086_v30 = vpop.xlane.xlu0 %2085 }
 0x31d   :  { %13845 = vst [vmem:[#allocation420_spill] sm:$0xff] %v9733_v14  ;;  %v9741_v27 = vmul.f32 0.020408163, %v2086_v30  ;;  %1932 = vadd.xlane.f32.xlu1 %v1931_v9  ;;  %v13854_v30 = vld [vmem:[#allocation335_spill] sm:$0xff] }
 0x31e   :  { %v2089_v55 = vpop.xlane.xlu1 %2088  ;;  %v2147_v9 = vsel %vm1723_vm1, %v13854_v30, 0.0 }
 0x31f   :  { %13849 = vst [vmem:[#allocation421_spill] sm:$0xff] %v9741_v27  ;;  %v9747_v40 = vmul.f32 0.020408163, %v2089_v55  ;;  %2145 = vadd.xlane.f32.xlu0 %v2144_v20  ;;  %v2649_v55 = vsel %vm1723_vm1, %v2369_v4, 0.0  ;;  %v2371_v4 = vmul.f32 %v9241_v63, %v9241_v63  ;;  %v2153_v27 = vsel %vm1723_vm1, %v9269_v10, 0.0 }
 0x320   :  { %v9753_v18 = vpop.xlane.xlu0 %2590  ;;  %v2435_v63 = vmul.f32 %v9026_v42, %v9026_v42 }
 0x321   :  { %13851 = vst [vmem:[#allocation422_spill] sm:$0xff] %v9747_v40  ;;  %13853 = vst [vmem:[#allocation423_spill] sm:$0xff] %v9753_v18  ;;  %2148 = vadd.xlane.f32.xlu1 %v2147_v9 }
 0x322   :  { %v9759_v24 = vpop.xlane.xlu1 %2593 }
 0x323   :  { %2650 = vadd.xlane.f32.xlu0 %v2649_v55 }
 0x324   :  { %v9762_v20 = vpop.xlane.xlu0 %2806 }
 0x325   :  { %13856 = vst [vmem:[#allocation424_spill] sm:$0xff] %v9762_v20  ;;  %2653 = vadd.xlane.f32.xlu1 %v2652_v43  ;;  %v2372_v43 = vmul.f32 %v9252_v29, %v9252_v29 }
 0x326   :  { %v9767_v19 = vpop.xlane.xlu1 %2809 }
 0x327   :  { %13857 = vst [vmem:[#allocation425_spill] sm:$0xff] %v9767_v19  ;;  %1935 = vadd.xlane.f32.xlu0 %v1934_v33 }
 0x328   :  { %v1876_v9 = vpop.xlane.xlu0 %1875 }
 0x329   :  { %1938 = vadd.xlane.f32.xlu1 %v1937_v56  ;;  %v9775_v55 = vmul.f32 0.020408163, %v1876_v9  ;;  %v2433_v9 = vmul.f32 %v8957_v34, %v8957_v34 }
 0x32a   :  { %v1879_v35 = vpop.xlane.xlu1 %1878 }
 0x32b   :  { %13858 = vst [vmem:[#allocation426_spill] sm:$0xff] %v9775_v55  ;;  %v9777_v46 = vmul.f32 0.020408163, %v1879_v35  ;;  %2151 = vadd.xlane.f32.xlu0 %v2150_v13  ;;  %v2655_v35 = vsel %vm1723_vm1, %v2371_v4, 0.0  ;;  %v2847_v4 = vsel %vm1723_vm1, %v2435_v63, 0.0  ;;  %v2439_v13 = vmul.f32 %v13835_v51, %v13835_v51 }
 0x32c   :  { %v2092_v33 = vpop.xlane.xlu0 %2091  ;;  %v2440_v63 = vmul.f32 %v9145_v48, %v9145_v48 }
 0x32d   :  { %13859 = vst [vmem:[#allocation427_spill] sm:$0xff] %v9777_v46  ;;  %v9785_v56 = vmul.f32 0.020408163, %v2092_v33  ;;  %2154 = vadd.xlane.f32.xlu1 %v2153_v27  ;;  %v2434_v33 = vmul.f32 %v8965_v8, %v8965_v8  ;;  %v2658_v27 = vsel %vm1723_vm1, %v2372_v43, 0.0  ;;  %v2437_v43 = vmul.f32 %v9082_v62, %v9082_v62  ;;  %v14033_v62 = vld [vmem:[#allocation393_spill] sm:$0xff] }
 0x32e   :  { %v2095_v19 = vpop.xlane.xlu1 %2094 }
 0x32f   :  { %13861 = vst [vmem:[#allocation428_spill] sm:$0xff] %v9785_v56  ;;  %v9792_v29 = vmul.f32 0.020408163, %v2095_v19  ;;  %2656 = vadd.xlane.f32.xlu0 %v2655_v35  ;;  %v2841_v35 = vsel %vm1723_vm1, %v2433_v9, 0.0  ;;  %v2844_v20 = vsel %vm1723_vm1, %v2434_v33, 0.0  ;;  %v2438_v9 = vmul.f32 %v13825_v39, %v13825_v39 }
 0x330   :  { %v9798_v40 = vpop.xlane.xlu0 %2596  ;;  %v2853_v56 = vsel %vm1723_vm1, %v2437_v43, 0.0  ;;  %v2859_v43 = vsel %vm1723_vm1, %v2439_v13, 0.0  ;;  %v13878_v13 = vld [vmem:[#allocation83_spill] sm:$0xff] }
 0x331   :  { %13863 = vst [vmem:[#allocation429_spill] sm:$0xff] %v9792_v29  ;;  %13864 = vst [vmem:[#allocation430_spill] sm:$0xff] %v9798_v40  ;;  %2659 = vadd.xlane.f32.xlu1 %v2658_v27  ;;  %v2856_v29 = vsel %vm1723_vm1, %v2438_v9, 0.0  ;;  %v13875_v9 = vld [vmem:[#allocation80_spill] sm:$0xff] }
 0x332   :  { %v9805_v19 = vpop.xlane.xlu1 %2599  ;;  %v13876_v0 = vsub.f32 %v13874_v5, %v13875_v9 }
 0x333   :  { %2842 = vadd.xlane.f32.xlu0 %v2841_v35 }
 0x334   :  { %v9810_v12 = vpop.xlane.xlu0 %2812 }
 0x335   :  { %13865 = vst [vmem:[#allocation431_spill] sm:$0xff] %v9810_v12  ;;  %2845 = vadd.xlane.f32.xlu1 %v2844_v20 }
 0x336   :  { %v9815_v27 = vpop.xlane.xlu1 %2815 }
 0x337   :  { %13866 = vst [vmem:[#allocation432_spill] sm:$0xff] %v9815_v27  ;;  %2848 = vadd.xlane.f32.xlu0 %v2847_v4 }
 0x338   :  { %v1882_v35 = vpop.xlane.xlu0 %1881 }
 0x339   :  { %2851 = vadd.xlane.f32.xlu1 %v2850_v7  ;;  %v9823_v33 = vmul.f32 0.020408163, %v1882_v35  ;;  %v2441_v35 = vmul.f32 %v13847_v16, %v13847_v16  ;;  %v13882_v16 = vld [vmem:[#allocation94_spill] sm:$0xff] }
 0x33a   :  { %v1885_v20 = vpop.xlane.xlu1 %1884 }
 0x33b   :  { %13867 = vst [vmem:[#allocation433_spill] sm:$0xff] %v9823_v33  ;;  %v9826_v12 = vmul.f32 0.020408163, %v1885_v20  ;;  %2854 = vadd.xlane.f32.xlu0 %v2853_v56  ;;  %v2443_v20 = vmul.f32 %v9265_v37, %v9265_v37  ;;  %v3310_v56 = vmax.f32 %v13876_v0, 0.0 }
 0x33c   :  { %v2098_v4 = vpop.xlane.xlu0 %2097 }
 0x33d   :  { %13868 = vst [vmem:[#allocation434_spill] sm:$0xff] %v9826_v12  ;;  %v9833_v27 = vmul.f32 0.020408163, %v2098_v4  ;;  %2857 = vadd.xlane.f32.xlu1 %v2856_v29  ;;  %v2442_v4 = vmul.f32 %v13854_v30, %v13854_v30  ;;  %v2862_v29 = vsel %vm1723_vm1, %v2440_v63, 0.0  ;;  %v13881_v30 = vld [vmem:[#allocation95_spill] sm:$0xff]  ;;  %v2871_v0 = vsel %vm1723_vm1, %v2443_v20, 0.0 }
 0x33e   :  { %v2101_v55 = vpop.xlane.xlu1 %2100  ;;  %v3454_v5 = vadd.f32 1e-05, %v3310_v56 }
 0x33f   :  { %13870 = vst [vmem:[#allocation435_spill] sm:$0xff] %v9833_v27  ;;  %v9840_v40 = vmul.f32 0.020408163, %v2101_v55  ;;  %2860 = vadd.xlane.f32.xlu0 %v2859_v43  ;;  %v2865_v43 = vsel %vm1723_vm1, %v2441_v35, 0.0  ;;  %v2444_v27 = vmul.f32 %v9269_v10, %v9269_v10  ;;  %v13883_v35 = vsub.f32 %v13881_v30, %v13882_v16  ;;  %v13885_v10 = vld [vmem:[#allocation145_spill] sm:$0xff] }
 0x340   :  { %v9846_v7 = vpop.xlane.xlu0 %2602  ;;  %6652 = vrsqrt.f32 %v3454_v5  ;;  %v13889_v30 = vld [vmem:[#allocation97_spill] sm:$0xff] }
 0x341   :  { %13872 = vst [vmem:[#allocation436_spill] sm:$0xff] %v9840_v40  ;;  %13873 = vst [vmem:[#allocation437_spill] sm:$0xff] %v9846_v7  ;;  %2863 = vadd.xlane.f32.xlu1 %v2862_v29  ;;  %v2868_v29 = vsel %vm1723_vm1, %v2442_v4, 0.0  ;;  %v13880_v40 = vsub.f32 %v13878_v13, %v13879_v54  ;;  %v3311_v33 = vmax.f32 %v13883_v35, 0.0  ;;  %v13886_v54 = vld [vmem:[#allocation144_spill] sm:$0xff] }
 0x342   :  { %v9853_v55 = vpop.xlane.xlu1 %2605  ;;  %v13890_v35 = vld [vmem:[#allocation96_spill] sm:$0xff] }
 0x343   :  { %2866 = vadd.xlane.f32.xlu0 %v2865_v43  ;;  %v3309_v37 = vmax.f32 %v13880_v40, 0.0  ;;  %v2874_v43 = vsel %vm1723_vm1, %v2444_v27, 0.0  ;;  %v3455_v4 = vadd.f32 1e-05, %v3311_v33  ;;  %v13887_v40 = vsub.f32 %v13885_v10, %v13886_v54  ;;  %v13894_v33 = vld [vmem:[#allocation161_spill] sm:$0xff] }
 0x344   :  { %v9861_v63 = vpop.xlane.xlu0 %2818 }
 0x345   :  { %13877 = vst [vmem:[#allocation79_spill] sm:$0xff] %v9861_v63  ;;  %2869 = vadd.xlane.f32.xlu1 %v2868_v29  ;;  %v3453_v63 = vadd.f32 1e-05, %v3309_v37  ;;  %v3318_v13 = vmax.f32 %v13887_v40, 0.0 }
 0x346   :  { %v9870_v7 = vpop.xlane.xlu1 %2821 }
 0x347   :  { %13884 = vst [vmem:[#allocation80_spill] sm:$0xff] %v9870_v7  ;;  %2872 = vadd.xlane.f32.xlu0 %v2871_v0  ;;  %v13891_v7 = vsub.f32 %v13889_v30, %v13890_v35  ;;  %6654 = vrsqrt.f32 %v3453_v63  ;;  %v3462_v10 = vadd.f32 1e-05, %v3318_v13  ;;  %v13898_v30 = vld [vmem:[#allocation110_spill] sm:$0xff]  ;;  %v13910_v13 = vsub.f32 %v13908_v15, %v13909_v61 }
 0x348   :  { %v1888_v9 = vpop.xlane.xlu0 %1887  ;;  %6656 = vrsqrt.f32 %v3455_v4  ;;  %v3741_v61 = vld [vmem:[%s12814_s3] sm:$0xff] }
 0x349   :  { %2875 = vadd.xlane.f32.xlu1 %v2874_v43  ;;  %v9877_v29 = vmul.f32 0.020408163, %v1888_v9  ;;  %v3312_v20 = vmax.f32 %v13891_v7, 0.0  ;;  %v13895_v9 = vld [vmem:[#allocation160_spill] sm:$0xff]  ;;  %6658 = vrsqrt.f32 %v3462_v10  ;;  %v3315_v10 = vmax.f32 %v13910_v13, 0.0  ;;  %v13915_v13 = vld [vmem:[#allocation129_spill] sm:$0xff] }
 0x34a   :  { %v1891_v16 = vpop.xlane.xlu1 %1890  ;;  %v13896_v43 = vsub.f32 %v13894_v33, %v13895_v9  ;;  %v13901_v33 = vld [vmem:[#allocation177_spill] sm:$0xff]  ;;  %v13902_v9 = vld [vmem:[#allocation176_spill] sm:$0xff]  ;;  %v6653_v57 = vpop.eup %6652 }
 0x34b   :  { %13888 = vst [vmem:[#allocation83_spill] sm:$0xff] %v9877_v29  ;;  %v9882_v56 = vmul.f32 0.020408163, %v1891_v16  ;;  %v3456_v7 = vadd.f32 1e-05, %v3312_v20  ;;  %v13897_v16 = vld [vmem:[#allocation111_spill] sm:$0xff] }
 0x34c   :  { %v2104_v0 = vpop.xlane.xlu0 %2103  ;;  %v3320_v54 = vmax.f32 %v13896_v43, 0.0  ;;  %v13899_v35 = vsub.f32 %v13897_v16, %v13898_v30  ;;  %v13903_v43 = vsub.f32 %v13901_v33, %v13902_v9  ;;  %v13905_v30 = vld [vmem:[#allocation112_spill] sm:$0xff]  ;;  %v13911_v9 = vld [vmem:[#allocation193_spill] sm:$0xff]  ;;  %v3459_v15 = vadd.f32 1e-05, %v3315_v10 }
 0x34d   :  { %13892 = vst [vmem:[#allocation82_spill] sm:$0xff] %v9882_v56  ;;  %v9886_v27 = vmul.f32 0.020408163, %v2104_v0  ;;  %6660 = vrsqrt.f32 %v3456_v7  ;;  %v13912_v7 = vld [vmem:[#allocation192_spill] sm:$0xff] }
 0x34e   :  { %v2107_v5 = vpop.xlane.xlu1 %2106  ;;  %v3313_v48 = vmax.f32 %v13899_v35, 0.0  ;;  %v3464_v0 = vadd.f32 1e-05, %v3320_v54  ;;  %v3322_v20 = vmax.f32 %v13903_v43, 0.0  ;;  %v3742_v54 = vld [vmem:[%s12814_s3 + $0x8] sm:$0xff] }
 0x34f   :  { %13893 = vst [vmem:[#allocation95_spill] sm:$0xff] %v9886_v27  ;;  %v9896_v18 = vmul.f32 0.020408163, %v2107_v5  ;;  %v13904_v5 = vld [vmem:[#allocation113_spill] sm:$0xff] }
 0x350   :  { %v9900_v4 = vpop.xlane.xlu0 %2608  ;;  %v3457_v16 = vadd.f32 1e-05, %v3313_v48  ;;  %v13906_v35 = vsub.f32 %v13904_v5, %v13905_v30  ;;  %6662 = vrsqrt.f32 %v3464_v0  ;;  %v3466_v33 = vadd.f32 1e-05, %v3322_v20  ;;  %v13916_v0 = vld [vmem:[#allocation128_spill] sm:$0xff] }
 0x351   :  { %13900 = vst [vmem:[#allocation94_spill] sm:$0xff] %v9896_v18  ;;  %v13913_v48 = vsub.f32 %v13911_v9, %v13912_v7  ;;  %v6655_v5 = vpop.eup %6654  ;;  %v13917_v20 = vsub.f32 %v13915_v13, %v13916_v0  ;;  %v3743_v9 = vld [vmem:[%s12814_s3 + $0x10] sm:$0xff] }
 0x352   :  { %v9907_v37 = vpop.xlane.xlu1 %2611  ;;  %v3314_v40 = vmax.f32 %v13906_v35, 0.0  ;;  %6664 = vrsqrt.f32 %v3457_v16  ;;  %v6657_v35 = vpop.eup %6656  ;;  %v13918_v16 = vld [vmem:[#allocation209_spill] sm:$0xff]  ;;  %v3885_v29 = vmul.f32 %v6655_v5, %v3741_v61 }
 0x353   :  { %v3324_v43 = vmax.f32 %v13913_v48, 0.0  ;;  %v3316_v18 = vmax.f32 %v13917_v20, 0.0  ;;  %6666 = vrsqrt.f32 %v3466_v33  ;;  %v6659_v13 = vpop.eup %6658  ;;  %v3887_v20 = vmul.f32 %v6657_v35, %v3743_v9  ;;  %v3750_v33 = vld [vmem:[%s12814_s3 + $0x48] sm:$0xff]  ;;  %v13925_v35 = vld [vmem:[#allocation224_spill] sm:$0xff] }
 0x354   :  { %v9912_v63 = vpop.xlane.xlu0 %2824  ;;  %v3458_v30 = vadd.f32 1e-05, %v3314_v40  ;;  %v13919_v40 = vld [vmem:[#allocation208_spill] sm:$0xff]  ;;  %v3894_v38 = vmul.f32 %v6659_v13, %v3750_v33 }
 0x355   :  { %13907 = vst [vmem:[#allocation145_spill] sm:$0xff] %v9912_v63  ;;  %v3886_v63 = vmul.f32 %v6653_v57, %v3742_v54  ;;  %v3468_v7 = vadd.f32 1e-05, %v3324_v43  ;;  %v13920_v48 = vsub.f32 %v13918_v16, %v13919_v40 }
 0x356   :  { %v9923_v58 = vpop.xlane.xlu1 %2827  ;;  %6668 = vrsqrt.f32 %v3458_v30  ;;  %v13924_v30 = vld [vmem:[#allocation225_spill] sm:$0xff] }
 0x357   :  { %13914 = vst [vmem:[#allocation144_spill] sm:$0xff] %v9923_v58  ;;  %v3326_v58 = vmax.f32 %v13920_v48, 0.0  ;;  %v6661_v16 = vpop.eup %6660  ;;  %6670 = vrsqrt.f32 %v3459_v15  ;;  %v13926_v61 = vsub.f32 %v13924_v30, %v13925_v35  ;;  %v13927_v15 = vld [vmem:[#allocation143_spill] sm:$0xff] }
 0x358   :  { %v1894_v27 = vpop.xlane.xlu0 %1893  ;;  %6672 = vrsqrt.f32 %v3468_v7  ;;  %v13935_v7 = vld [vmem:[#allocation159_spill] sm:$0xff] }
 0x359   :  { %v9937_v57 = vmul.f32 0.020408163, %v1894_v27  ;;  %v3460_v27 = vadd.f32 1e-05, %v3316_v18  ;;  %v3470_v5 = vadd.f32 1e-05, %v3326_v58 }
 0x35a   :  { %v1897_v54 = vpop.xlane.xlu1 %1896  ;;  %4180 = vperm.xlu1 %6435, %v3886_v63   ;;  %v3744_v63 = vld [vmem:[%s12814_s3 + $0x18] sm:$0xff]  ;;  %v3328_v9 = vmax.f32 %v13926_v61, 0.0  ;;  %v13928_v18 = vld [vmem:[#allocation142_spill] sm:$0xff]  ;;  %v6663_v58 = vpop.eup %6662 }
 0x35b   :  { %13921 = vst [vmem:[#allocation97_spill] sm:$0xff] %v9937_v57  ;;  %v9939_v10 = vmul.f32 0.020408163, %v1897_v54  ;;  %v3888_v30 = vmul.f32 %v6661_v16, %v3744_v63  ;;  %v3745_v61 = vld [vmem:[%s12814_s3 + $0x20] sm:$0xff]  ;;  %6674 = vrsqrt.f32 %v3470_v5  ;;  %v3754_v5 = vld [vmem:[%s12814_s3 + $0x68] sm:$0xff] }
 0x35c   :  { %v2110_v0 = vpop.xlane.xlu0 %2109  ;;  %v6665_v35 = vpop.eup %6664  ;;  %v3472_v33 = vadd.f32 1e-05, %v3328_v9  ;;  %6676 = vrsqrt.f32 %v3460_v27 }
 0x35d   :  { %13922 = vst [vmem:[#allocation96_spill] sm:$0xff] %v9939_v10  ;;  %v9946_v40 = vmul.f32 0.020408163, %v2110_v0  ;;  %4175 = vperm.xlu0 %6434, %v3885_v29   ;;  %v13929_v0 = vsub.f32 %v13927_v15, %v13928_v18  ;;  %v13933_v15 = vld [vmem:[#allocation240_spill] sm:$0xff]  ;;  %v3889_v13 = vmul.f32 %v6665_v35, %v3745_v61 }
 0x35e   :  { %v2113_v48 = vpop.xlane.xlu1 %2112  ;;  %4185 = vperm.xlu1 %6435, %v3887_v20   ;;  %v3752_v20 = vld [vmem:[%s12814_s3 + $0x58] sm:$0xff]  ;;  %6678 = vrsqrt.f32 %v3472_v33 }
 0x35f   :  { %13923 = vst [vmem:[#allocation161_spill] sm:$0xff] %v9946_v40  ;;  %v3317_v43 = vmax.f32 %v13929_v0, 0.0  ;;  %v9959_v29 = vmul.f32 0.020408163, %v2113_v48  ;;  %v13932_v48 = vld [vmem:[#allocation241_spill] sm:$0xff]  ;;  %v3896_v3 = vmul.f32 %v6663_v58, %v3752_v20  ;;  %v6667_v40 = vpop.eup %6666 }
 0x360   :  { %v9963_v57 = vpop.xlane.xlu0 %2614  ;;  %v13934_v18 = vsub.f32 %v13932_v48, %v13933_v15  ;;  %v6669_v9 = vpop.eup %6668  ;;  %v13939_v48 = vld [vmem:[#allocation175_spill] sm:$0xff]  ;;  %v13940_v15 = vld [vmem:[#allocation174_spill] sm:$0xff]  ;;  %v3898_v31 = vmul.f32 %v6667_v40, %v3754_v5  ;;  %v13949_v40 = vld [vmem:[#allocation273_spill] sm:$0xff] }
 0x361   :  { %13930 = vst [vmem:[#allocation160_spill] sm:$0xff] %v9959_v29  ;;  %13931 = vst [vmem:[#allocation111_spill] sm:$0xff] %v9963_v57  ;;  %4220 = vperm.xlu0 %6434, %v3894_v38   ;;  %v3461_v63 = vadd.f32 1e-05, %v3317_v43  ;;  %v13936_v38 = vld [vmem:[#allocation158_spill] sm:$0xff]  ;;  %v3746_v43 = vld [vmem:[%s12814_s3 + $0x28] sm:$0xff]  ;;  %v6671_v61 = vpop.eup %6670 }
 0x362   :  { %v3330_v0 = vmax.f32 %v13934_v18, 0.0  ;;  %v9976_v16 = vpop.xlane.xlu1 %2617  ;;  %4190 = vperm.xlu1 %6435, %v3888_v30   ;;  %v13937_v54 = vsub.f32 %v13935_v7, %v13936_v38  ;;  %v13941_v18 = vsub.f32 %v13939_v48, %v13940_v15  ;;  %v13943_v7 = vld [vmem:[#allocation256_spill] sm:$0xff]  ;;  %v6673_v48 = vpop.eup %6672 }
 0x363   :  { %6680 = vrsqrt.f32 %v3461_v63  ;;  %v13950_v63 = vld [vmem:[#allocation272_spill] sm:$0xff] }
 0x364   :  { %v3319_v32 = vmax.f32 %v13937_v54, 0.0  ;;  %v9981_v57 = vpop.xlane.xlu0 %2830  ;;  %v3321_v30 = vmax.f32 %v13941_v18, 0.0  ;;  %v3474_v27 = vadd.f32 1e-05, %v3330_v0  ;;  %v13942_v54 = vld [vmem:[#allocation257_spill] sm:$0xff]  ;;  %v13946_v0 = vld [vmem:[#allocation191_spill] sm:$0xff]  ;;  %v13951_v5 = vsub.f32 %v13949_v40, %v13950_v63 }
 0x365   :  { %13938 = vst [vmem:[#allocation110_spill] sm:$0xff] %v9981_v57  ;;  %4230 = vperm.xlu0 %6434, %v3896_v3   ;;  %v13944_v58 = vsub.f32 %v13942_v54, %v13943_v7  ;;  %v3890_v3 = vmul.f32 %v6669_v9, %v3746_v43  ;;  %v3756_v18 = vld [vmem:[%s12814_s3 + $0x78] sm:$0xff]  ;;  %v13947_v57 = vld [vmem:[#allocation190_spill] sm:$0xff] }
 0x366   :  { %v9995_v35 = vpop.xlane.xlu1 %2833  ;;  %4195 = vperm.xlu1 %6435, %v3889_v13   ;;  %v3463_v38 = vadd.f32 1e-05, %v3319_v32  ;;  %v3465_v33 = vadd.f32 1e-05, %v3321_v30  ;;  %v13948_v29 = vsub.f32 %v13946_v0, %v13947_v57  ;;  %v3747_v13 = vld [vmem:[%s12814_s3 + $0x30] sm:$0xff]  ;;  %6682 = vrsqrt.f32 %v3474_v27  ;;  %v3758_v27 = vld [vmem:[%s12814_s3 + $0x88] sm:$0xff] }
 0x367   :  { %v3332_v20 = vmax.f32 %v13944_v58, 0.0  ;;  %13945 = vst [vmem:[#allocation177_spill] sm:$0xff] %v9995_v35  ;;  %v3334_v9 = vmax.f32 %v13951_v5, 0.0  ;;  %v3900_v57 = vmul.f32 %v6673_v48, %v3756_v18  ;;  %v3891_v58 = vmul.f32 %v6671_v61, %v3747_v13  ;;  %v13955_v61 = vld [vmem:[#allocation289_spill] sm:$0xff] }
 0x368   :  { %v1900_v15 = vpop.xlane.xlu0 %1899  ;;  %v3323_v54 = vmax.f32 %v13948_v29, 0.0  ;;  %6684 = vrsqrt.f32 %v3463_v38  ;;  %v6675_v29 = vpop.eup %6674  ;;  %v3748_v38 = vld [vmem:[%s12814_s3 + $0x38] sm:$0xff] }
 0x369   :  { %4240 = vperm.xlu0 %6434, %v3898_v31   ;;  %v3476_v32 = vadd.f32 1e-05, %v3332_v20  ;;  %v10009_v43 = vmul.f32 0.020408163, %v1900_v15  ;;  %v6677_v0 = vpop.eup %6676  ;;  %6686 = vrsqrt.f32 %v3465_v33  ;;  %v3478_v48 = vadd.f32 1e-05, %v3334_v9 }
 0x36a   :  { %v1903_v7 = vpop.xlane.xlu1 %1902  ;;  %4200 = vperm.xlu1 %6435, %v3890_v3   ;;  %v3467_v15 = vadd.f32 1e-05, %v3323_v54  ;;  %v13956_v3 = vld [vmem:[#allocation288_spill] sm:$0xff]  ;;  %v13958_v33 = vld [vmem:[#allocation207_spill] sm:$0xff]  ;;  %v13959_v54 = vld [vmem:[#allocation206_spill] sm:$0xff]  ;;  %v3902_v20 = vmul.f32 %v6675_v29, %v3758_v27  ;;  %v6679_v9 = vpop.eup %6678 }
 0x36b   :  { %13952 = vst [vmem:[#allocation176_spill] sm:$0xff] %v10009_v43  ;;  %v10011_v30 = vmul.f32 0.020408163, %v1903_v7  ;;  %6688 = vrsqrt.f32 %v3476_v32  ;;  %v13957_v18 = vsub.f32 %v13955_v61, %v13956_v3  ;;  %v13960_v7 = vsub.f32 %v13958_v33, %v13959_v54  ;;  %v13963_v33 = vld [vmem:[#allocation305_spill] sm:$0xff]  ;;  %v13965_v32 = vld [vmem:[#allocation223_spill] sm:$0xff] }
 0x36c   :  { %v2116_v31 = vpop.xlane.xlu0 %2115  ;;  %v3892_v61 = vmul.f32 %v6677_v0, %v3748_v38  ;;  %6690 = vrsqrt.f32 %v3478_v48  ;;  %v3762_v48 = vld [vmem:[%s12814_s3 + $0xa8] sm:$0xff] }
 0x36d   :  { %13953 = vst [vmem:[#allocation113_spill] sm:$0xff] %v10011_v30  ;;  %v10018_v40 = vmul.f32 0.020408163, %v2116_v31  ;;  %4250 = vperm.xlu0 %6434, %v3900_v57   ;;  %v3336_v13 = vmax.f32 %v13957_v18, 0.0  ;;  %v3325_v31 = vmax.f32 %v13960_v7, 0.0  ;;  %v6681_v3 = vpop.eup %6680  ;;  %v3749_v18 = vld [vmem:[%s12814_s3 + $0x40] sm:$0xff]  ;;  %6692 = vrsqrt.f32 %v3467_v15 }
 0x36e   :  { %v2119_v63 = vpop.xlane.xlu1 %2118  ;;  %4205 = vperm.xlu1 %6435, %v3891_v58   ;;  %v3760_v58 = vld [vmem:[%s12814_s3 + $0x98] sm:$0xff]  ;;  %v3893_v29 = vmul.f32 %v6681_v3, %v3749_v18  ;;  %v3751_v15 = vld [vmem:[%s12814_s3 + $0x50] sm:$0xff] }
 0x36f   :  { %13954 = vst [vmem:[#allocation112_spill] sm:$0xff] %v10018_v40  ;;  %v10031_v57 = vmul.f32 0.020408163, %v2119_v63  ;;  %v3480_v27 = vadd.f32 1e-05, %v3336_v13  ;;  %v13962_v63 = vld [vmem:[#allocation306_spill] sm:$0xff]  ;;  %v3904_v21 = vmul.f32 %v6679_v9, %v3760_v58 }
 0x370   :  { %v10035_v6 = vpop.xlane.xlu0 %2620  ;;  %v13964_v54 = vsub.f32 %v13962_v63, %v13963_v33  ;;  %v3469_v38 = vadd.f32 1e-05, %v3325_v31  ;;  %v6683_v40 = vpop.eup %6682  ;;  %v13969_v63 = vld [vmem:[#allocation239_spill] sm:$0xff]  ;;  %v13970_v33 = vld [vmem:[#allocation238_spill] sm:$0xff]  ;;  %v13972_v31 = vld [vmem:[#allocation325_spill] sm:$0xff] }
 0x371   :  { %13961 = vst [vmem:[#allocation127_spill] sm:$0xff] %v10031_v57  ;;  %4260 = vperm.xlu0 %6434, %v3902_v20   ;;  %v13966_v20 = vld [vmem:[#allocation222_spill] sm:$0xff]  ;;  %6694 = vrsqrt.f32 %v3480_v27  ;;  %v3906_v11 = vmul.f32 %v6683_v40, %v3762_v48 }
 0x372   :  { %v3338_v7 = vmax.f32 %v13964_v54, 0.0  ;;  %v10048_v0 = vpop.xlane.xlu1 %2623  ;;  %4210 = vperm.xlu1 %6435, %v3892_v61   ;;  %v13967_v5 = vsub.f32 %v13965_v32, %v13966_v20  ;;  %v6685_v13 = vpop.eup %6684  ;;  %v13971_v54 = vsub.f32 %v13969_v63, %v13970_v33  ;;  %v13973_v32 = vld [vmem:[#allocation324_spill] sm:$0xff]  ;;  %6696 = vrsqrt.f32 %v3469_v38 }
 0x373   :  { %v13974_v9 = vsub.f32 %v13972_v31, %v13973_v32  ;;  %v6687_v18 = vpop.eup %6686  ;;  %v13977_v32 = vld [vmem:[#allocation340_spill] sm:$0xff] }
 0x374   :  { %v3327_v28 = vmax.f32 %v13967_v5, 0.0  ;;  %v10053_v35 = vpop.xlane.xlu0 %2836  ;;  %v3329_v61 = vmax.f32 %v13971_v54, 0.0  ;;  %v3482_v5 = vadd.f32 1e-05, %v3338_v7  ;;  %v3764_v54 = vld [vmem:[%s12814_s3 + $0xb8] sm:$0xff]  ;;  %v3753_v7 = vld [vmem:[%s12814_s3 + $0x60] sm:$0xff] }
 0x375   :  { %13968 = vst [vmem:[#allocation126_spill] sm:$0xff] %v10053_v35  ;;  %4270 = vperm.xlu0 %6434, %v3904_v21   ;;  %v3340_v58 = vmax.f32 %v13974_v9, 0.0  ;;  %v6689_v63 = vpop.eup %6688  ;;  %v3895_v21 = vmul.f32 %v6685_v13, %v3751_v15  ;;  %v13980_v13 = vld [vmem:[#allocation255_spill] sm:$0xff]  ;;  %v13981_v15 = vld [vmem:[#allocation254_spill] sm:$0xff] }
 0x376   :  { %v10067_v3 = vpop.xlane.xlu1 %2839  ;;  %4215 = vperm.xlu1 %6435, %v3893_v29   ;;  %v3471_v20 = vadd.f32 1e-05, %v3327_v28  ;;  %v3473_v27 = vadd.f32 1e-05, %v3329_v61  ;;  %6698 = vrsqrt.f32 %v3482_v5  ;;  %v13976_v29 = vld [vmem:[#allocation341_spill] sm:$0xff]  ;;  %v13982_v9 = vsub.f32 %v13980_v13, %v13981_v15  ;;  %v6691_v57 = vpop.eup %6690 }
 0x377   :  { %13975 = vst [vmem:[#allocation193_spill] sm:$0xff] %v10067_v3  ;;  %v3484_v31 = vadd.f32 1e-05, %v3340_v58  ;;  %v13978_v38 = vsub.f32 %v13976_v29, %v13977_v32  ;;  %v3908_v35 = vmul.f32 %v6689_v63, %v3764_v54  ;;  %v3897_v5 = vmul.f32 %v6687_v18, %v3753_v7  ;;  %v3766_v58 = vld [vmem:[%s12814_s3 + $0xc8] sm:$0xff]  ;;  %v6693_v29 = vpop.eup %6692  ;;  %v3755_v18 = vld [vmem:[%s12814_s3 + $0x70] sm:$0xff] }
 0x378   :  { %v1906_v33 = vpop.xlane.xlu0 %1905  ;;  %6700 = vrsqrt.f32 %v3471_v20  ;;  %v3331_v61 = vmax.f32 %v13982_v9, 0.0  ;;  %v13984_v20 = vld [vmem:[#allocation271_spill] sm:$0xff]  ;;  %v13988_v54 = vsub.f32 %v9312_v44, %v9308_v1  ;;  %v3768_v1 = vld [vmem:[%s12814_s3 + $0xd8] sm:$0xff] }
 0x379   :  { %4280 = vperm.xlu0 %6434, %v3906_v11   ;;  %v3342_v28 = vmax.f32 %v13978_v38, 0.0  ;;  %v10078_v40 = vmul.f32 0.020408163, %v1906_v33  ;;  %6702 = vrsqrt.f32 %v3473_v27 }
 0x37a   :  { %v1909_v48 = vpop.xlane.xlu1 %1908  ;;  %4225 = vperm.xlu1 %6435, %v3895_v21   ;;  %v13985_v21 = vld [vmem:[#allocation270_spill] sm:$0xff]  ;;  %6704 = vrsqrt.f32 %v3484_v31  ;;  %v3344_v7 = vmax.f32 %v13988_v54, 0.0  ;;  %v3475_v15 = vadd.f32 1e-05, %v3331_v61  ;;  %v3899_v31 = vmul.f32 %v6693_v29, %v3755_v18 }
 0x37b   :  { %13979 = vst [vmem:[#allocation192_spill] sm:$0xff] %v10078_v40  ;;  %v10083_v11 = vmul.f32 0.020408163, %v1909_v48  ;;  %v13986_v32 = vsub.f32 %v13984_v20, %v13985_v21  ;;  %v3486_v63 = vadd.f32 1e-05, %v3342_v28  ;;  %v6695_v20 = vpop.eup %6694  ;;  %v13993_v18 = vsub.f32 %v9380_v25, %v9376_v47  ;;  %v3759_v47 = vld [vmem:[%s12814_s3 + $0x90] sm:$0xff] }
 0x37c   :  { %v2122_v3 = vpop.xlane.xlu0 %2121  ;;  %v6697_v44 = vpop.eup %6696  ;;  %v3488_v29 = vadd.f32 1e-05, %v3344_v7 }
 0x37d   :  { %13983 = vst [vmem:[#allocation129_spill] sm:$0xff] %v10083_v11  ;;  %v3333_v38 = vmax.f32 %v13986_v32, 0.0  ;;  %v10093_v13 = vmul.f32 0.020408163, %v2122_v3  ;;  %4290 = vperm.xlu0 %6434, %v3908_v35   ;;  %v3910_v3 = vmul.f32 %v6691_v57, %v3766_v58  ;;  %v13991_v32 = vld [vmem:[#allocation286_spill] sm:$0xff]  ;;  %6706 = vrsqrt.f32 %v3486_v63 }
 0x37e   :  { %v2125_v48 = vpop.xlane.xlu1 %2124  ;;  %4235 = vperm.xlu1 %6435, %v3897_v5   ;;  %v13990_v5 = vld [vmem:[#allocation287_spill] sm:$0xff]  ;;  %v3757_v57 = vld [vmem:[%s12814_s3 + $0x80] sm:$0xff]  ;;  %6708 = vrsqrt.f32 %v3475_v15  ;;  %v13995_v15 = vsub.f32 %v9448_v17, %v9444_v60 }
 0x37f   :  { %13987 = vst [vmem:[#allocation128_spill] sm:$0xff] %v10093_v13  ;;  %v10103_v9 = vmul.f32 0.020408163, %v2125_v48  ;;  %v3477_v28 = vadd.f32 1e-05, %v3333_v38  ;;  %v13992_v54 = vsub.f32 %v13990_v5, %v13991_v32  ;;  %v3346_v48 = vmax.f32 %v13993_v18, 0.0 }
 0x380   :  { %v10107_v21 = vpop.xlane.xlu0 %2626  ;;  %v3912_v38 = vmul.f32 %v6695_v20, %v3768_v1  ;;  %v6699_v5 = vpop.eup %6698  ;;  %v3901_v32 = vmul.f32 %v6697_v44, %v3757_v57  ;;  %v3348_v20 = vmax.f32 %v13995_v15, 0.0  ;;  %v13996_v44 = vld [vmem:[#allocation303_spill] sm:$0xff]  ;;  %v13997_v57 = vld [vmem:[#allocation302_spill] sm:$0xff] }
 0x381   :  { %13989 = vst [vmem:[#allocation209_spill] sm:$0xff] %v10103_v9  ;;  %v3335_v61 = vmax.f32 %v13992_v54, 0.0  ;;  %4300 = vperm.xlu0 %6434, %v3910_v3   ;;  %v3770_v54 = vld [vmem:[%s12814_s3 + $0xe8] sm:$0xff]  ;;  %6710 = vrsqrt.f32 %v3477_v28  ;;  %v3490_v25 = vadd.f32 1e-05, %v3346_v48  ;;  %v13998_v28 = vsub.f32 %v13996_v44, %v13997_v57  ;;  %v14000_v60 = vld [vmem:[#allocation322_spill] sm:$0xff] }
 0x382   :  { %v10123_v35 = vpop.xlane.xlu1 %2629  ;;  %4245 = vperm.xlu1 %6435, %v3899_v31   ;;  %v6701_v33 = vpop.eup %6700  ;;  %6712 = vrsqrt.f32 %v3488_v29  ;;  %v3772_v29 = vld [vmem:[%s12814_s3 + $0xf8] sm:$0xff] }
 0x383   :  { %v3479_v63 = vadd.f32 1e-05, %v3335_v61  ;;  %v6703_v1 = vpop.eup %6702  ;;  %v3337_v61 = vmax.f32 %v13998_v28, 0.0  ;;  %v3903_v27 = vmul.f32 %v6701_v33, %v3759_v47  ;;  %v14001_v48 = vld [vmem:[#allocation321_spill] sm:$0xff]  ;;  %v3492_v33 = vadd.f32 1e-05, %v3348_v20 }
 0x384   :  { %v1912_v3 = vpop.xlane.xlu0 %1911 }
 0x385   :  { %v10128_v7 = vmul.f32 0.020408163, %v1912_v3  ;;  %4310 = vperm.xlu0 %6434, %v3912_v38   ;;  %v3914_v38 = vmul.f32 %v6699_v5, %v3770_v54  ;;  %v6705_v3 = vpop.eup %6704  ;;  %6714 = vrsqrt.f32 %v3479_v63  ;;  %v3761_v5 = vld [vmem:[%s12814_s3 + $0xa0] sm:$0xff]  ;;  %v14004_v54 = vsub.f32 %v9516_v23, %v9512_v45  ;;  %v3774_v23 = vld [vmem:[%s12814_s3 + $0x108] sm:$0xff] }
 0x386   :  { %v1915_v31 = vpop.xlane.xlu1 %1914  ;;  %4255 = vperm.xlu1 %6435, %v3901_v32   ;;  %v14002_v32 = vsub.f32 %v14000_v60, %v14001_v48  ;;  %6716 = vrsqrt.f32 %v3490_v25  ;;  %v3481_v57 = vadd.f32 1e-05, %v3337_v61  ;;  %v14006_v48 = vld [vmem:[#allocation339_spill] sm:$0xff]  ;;  %v14007_v25 = vld [vmem:[#allocation338_spill] sm:$0xff]  ;;  %v3905_v45 = vmul.f32 %v6703_v1, %v3761_v5 }
 0x387   :  { %13994 = vst [vmem:[#allocation208_spill] sm:$0xff] %v10128_v7  ;;  %v10139_v18 = vmul.f32 0.020408163, %v1915_v31  ;;  %v3350_v47 = vmax.f32 %v14004_v54, 0.0  ;;  %v6707_v60 = vpop.eup %6706  ;;  %v14008_v20 = vsub.f32 %v14006_v48, %v14007_v25  ;;  %6718 = vrsqrt.f32 %v3492_v33  ;;  %v3776_v33 = vld [vmem:[%s12814_s3 + $0x118] sm:$0xff] }
 0x388   :  { %v2128_v58 = vpop.xlane.xlu0 %2127  ;;  %v3339_v15 = vmax.f32 %v14002_v32, 0.0  ;;  %6720 = vrsqrt.f32 %v3481_v57 }
 0x389   :  { %13999 = vst [vmem:[#allocation225_spill] sm:$0xff] %v10139_v18  ;;  %v10149_v44 = vmul.f32 0.020408163, %v2128_v58  ;;  %4320 = vperm.xlu0 %6434, %v3914_v38   ;;  %v3916_v58 = vmul.f32 %v6705_v3, %v3772_v29  ;;  %v3341_v32 = vmax.f32 %v14008_v20, 0.0  ;;  %v3763_v3 = vld [vmem:[%s12814_s3 + $0xb0] sm:$0xff]  ;;  %v14010_v20 = vld [vmem:[#allocation354_spill] sm:$0xff] }
 0x38a   :  { %v2131_v31 = vpop.xlane.xlu1 %2130  ;;  %4265 = vperm.xlu1 %6435, %v3903_v27   ;;  %v6709_v27 = vpop.eup %6708  ;;  %v3483_v61 = vadd.f32 1e-05, %v3339_v15  ;;  %v3494_v54 = vadd.f32 1e-05, %v3350_v47  ;;  %v3918_v15 = vmul.f32 %v6707_v60, %v3774_v23  ;;  %v14011_v38 = vsub.f32 %v9299_v36, %v14010_v20  ;;  %v14019_v20 = vld [vmem:[#allocation374_spill] sm:$0xff] }
 0x38b   :  { %14003 = vst [vmem:[#allocation224_spill] sm:$0xff] %v10149_v44  ;;  %v10159_v28 = vmul.f32 0.020408163, %v2131_v31  ;;  %v14009_v31 = vsub.f32 %v9582_v50, %v9578_v59  ;;  %v6711_v48 = vpop.eup %6710  ;;  %v3485_v25 = vadd.f32 1e-05, %v3341_v32  ;;  %v3907_v29 = vmul.f32 %v6709_v27, %v3763_v3  ;;  %v3765_v50 = vld [vmem:[%s12814_s3 + $0xc0] sm:$0xff] }
 0x38c   :  { %v10166_v17 = vpop.xlane.xlu0 %2632  ;;  %v3343_v63 = vmax.f32 %v14011_v38, 0.0  ;;  %6722 = vrsqrt.f32 %v3483_v61  ;;  %v2926_v59 = vmul.f32 0.020408163, %v9759_v24  ;;  %v14013_v36 = vsub.f32 %v9647_v49, %v9643_v41  ;;  %v14015_v3 = vld [vmem:[#allocation364_spill] sm:$0xff]  ;;  %v3778_v41 = vld [vmem:[%s12814_s3 + $0x128] sm:$0xff] }
 0x38d   :  { %14005 = vst [vmem:[#allocation143_spill] sm:$0xff] %v10159_v28  ;;  %4330 = vperm.xlu0 %6434, %v3916_v58   ;;  %v3352_v1 = vmax.f32 %v14009_v31, 0.0  ;;  %v6713_v58 = vpop.eup %6712  ;;  %6724 = vrsqrt.f32 %v3494_v54  ;;  %v3909_v61 = vmul.f32 %v6711_v48, %v3765_v50  ;;  %v14016_v54 = vld [vmem:[#allocation363_spill] sm:$0xff] }
 0x38e   :  { %v10179_v5 = vpop.xlane.xlu1 %2635  ;;  %4275 = vperm.xlu1 %6435, %v3905_v45   ;;  %v3354_v38 = vmax.f32 %v14013_v36, 0.0  ;;  %v3070_v45 = vmul.f32 %v9733_v14, %v9733_v14  ;;  %v3920_v27 = vmul.f32 %v6713_v58, %v3776_v33  ;;  %6726 = vrsqrt.f32 %v3485_v25  ;;  %v14020_v36 = vld [vmem:[#allocation373_spill] sm:$0xff]  ;;  %v3767_v33 = vld [vmem:[%s12814_s3 + $0xd0] sm:$0xff] }
 0x38f   :  { %v3496_v57 = vadd.f32 1e-05, %v3352_v1  ;;  %v6715_v32 = vpop.eup %6714  ;;  %v14017_v31 = vsub.f32 %v14015_v3, %v14016_v54  ;;  %v2928_v25 = vmul.f32 0.020408163, %v9805_v19  ;;  %v14023_v3 = vld [vmem:[#allocation416_spill] sm:$0xff]  ;;  %v14024_v54 = vld [vmem:[#allocation415_spill] sm:$0xff]  ;;  %v3072_v19 = vmul.f32 %v9777_v46, %v9777_v46 }
 0x390   :  { %v1918_v42 = vpop.xlane.xlu0 %1917  ;;  %v6717_v24 = vpop.eup %6716  ;;  %v3214_v48 = vsub.f32 %v2926_v59, %v3070_v45  ;;  %v3498_v50 = vadd.f32 1e-05, %v3354_v38  ;;  %v3780_v59 = vld [vmem:[%s12814_s3 + $0x138] sm:$0xff] }
 0x391   :  { %v10191_v47 = vmul.f32 0.020408163, %v1918_v42  ;;  %4340 = vperm.xlu0 %6434, %v3918_v15   ;;  %v3487_v42 = vadd.f32 1e-05, %v3343_v63  ;;  %v3345_v1 = vmax.f32 %v14017_v31, 0.0  ;;  %6728 = vrsqrt.f32 %v3496_v57  ;;  %v6719_v57 = vpop.eup %6718 }
 0x392   :  { %v1921_v60 = vpop.xlane.xlu1 %1920  ;;  %4285 = vperm.xlu1 %6435, %v3907_v29   ;;  %v14025_v31 = vsub.f32 %v14023_v3, %v14024_v54  ;;  %v6721_v52 = vpop.eup %6720 }
 0x393   :  { %14012 = vst [vmem:[#allocation142_spill] sm:$0xff] %v10191_v47  ;;  %v10198_v23 = vmul.f32 0.020408163, %v1921_v60  ;;  %v14021_v60 = vsub.f32 %v14019_v20, %v14020_v36  ;;  %v3489_v38 = vadd.f32 1e-05, %v3345_v1  ;;  %v14028_v36 = vld [vmem:[#allocation384_spill] sm:$0xff]  ;;  %6730 = vrsqrt.f32 %v3487_v42 }
 0x394   :  { %v2134_v15 = vpop.xlane.xlu0 %2133  ;;  %v3356_v29 = vmax.f32 %v14025_v31, 0.0  ;;  %v3769_v1 = vld [vmem:[%s12814_s3 + $0xe0] sm:$0xff]  ;;  %6732 = vrsqrt.f32 %v3498_v50  ;;  %v3924_v42 = vmul.f32 %v6719_v57, %v3780_v59 }
 0x395   :  { %14014 = vst [vmem:[#allocation241_spill] sm:$0xff] %v10198_v23  ;;  %v3347_v58 = vmax.f32 %v14021_v60, 0.0  ;;  %v10212_v63 = vmul.f32 0.020408163, %v2134_v15  ;;  %4350 = vperm.xlu0 %6434, %v3920_v27   ;;  %v3922_v27 = vmul.f32 %v6717_v24, %v3778_v41  ;;  %v14029_v60 = vld [vmem:[#allocation383_spill] sm:$0xff]  ;;  %v3216_v24 = vsub.f32 %v2928_v25, %v3072_v19  ;;  %v14048_v20 = vld [vmem:[#allocation414_spill] sm:$0xff] }
 0x396   :  { %v2137_v34 = vpop.xlane.xlu1 %2136  ;;  %4295 = vperm.xlu1 %6435, %v3909_v61   ;;  %v14030_v3 = vsub.f32 %v14028_v36, %v14029_v60  ;;  %v3911_v61 = vmul.f32 %v6715_v32, %v3767_v33  ;;  %v3500_v36 = vadd.f32 1e-05, %v3356_v29  ;;  %v2930_v32 = vmul.f32 0.020408163, %v9853_v55  ;;  %v6723_v60 = vpop.eup %6722  ;;  %v3782_v55 = vld [vmem:[%s12814_s3 + $0x148] sm:$0xff] }
 0x397   :  { %14022 = vst [vmem:[#allocation240_spill] sm:$0xff] %v10212_v63  ;;  %v10224_v45 = vmul.f32 0.020408163, %v2137_v34  ;;  %v3358_v34 = vmax.f32 %v3214_v48, 0.0  ;;  %v3771_v48 = vld [vmem:[%s12814_s3 + $0xf0] sm:$0xff]  ;;  %v6725_v25 = vpop.eup %6724  ;;  %6734 = vrsqrt.f32 %v3489_v38  ;;  %v3913_v29 = vmul.f32 %v6721_v52, %v3769_v1  ;;  %v3773_v52 = vld [vmem:[%s12814_s3 + $0x100] sm:$0xff] }
 0x398   :  { %v3349_v54 = vmax.f32 %v14030_v3, 0.0  ;;  %v10231_v31 = vpop.xlane.xlu0 %2638  ;;  %v3491_v3 = vadd.f32 1e-05, %v3347_v58  ;;  %v3360_v15 = vmax.f32 %v3216_v24, 0.0  ;;  %v6727_v59 = vpop.eup %6726  ;;  %6736 = vrsqrt.f32 %v3500_v36  ;;  %v14032_v1 = vld [vmem:[#allocation394_spill] sm:$0xff]  ;;  %v14036_v36 = vld [vmem:[#allocation404_spill] sm:$0xff] }
 0x399   :  { %14027 = vst [vmem:[#allocation159_spill] sm:$0xff] %v10224_v45  ;;  %4360 = vperm.xlu0 %6434, %v3922_v27   ;;  %v3074_v27 = vmul.f32 %v9826_v12, %v9826_v12  ;;  %v2932_v38 = vmul.f32 0.020408163, %v9907_v37  ;;  %v3915_v41 = vmul.f32 %v6723_v60, %v3771_v48  ;;  %v3076_v60 = vmul.f32 %v9882_v56, %v9882_v56 }
 0x39a   :  { %v10242_v33 = vpop.xlane.xlu1 %2641  ;;  %4305 = vperm.xlu1 %6435, %v3911_v61   ;;  %v3493_v19 = vadd.f32 1e-05, %v3349_v54  ;;  %v3502_v61 = vadd.f32 1e-05, %v3358_v34  ;;  %6738 = vrsqrt.f32 %v3491_v3  ;;  %v14034_v34 = vsub.f32 %v14032_v1, %v14033_v62  ;;  %v3784_v3 = vld [vmem:[%s12814_s3 + $0x158] sm:$0xff] }
 0x39b   :  { %v3218_v57 = vsub.f32 %v2930_v32, %v3074_v27  ;;  %v6729_v39 = vpop.eup %6728  ;;  %v14037_v32 = vld [vmem:[#allocation403_spill] sm:$0xff]  ;;  %v3220_v1 = vsub.f32 %v2932_v38, %v3076_v60  ;;  %v2936_v62 = vmul.f32 0.020408163, %v10048_v0  ;;  %v3080_v0 = vmul.f32 %v10011_v30, %v10011_v30 }
 0x39c   :  { %v1924_v50 = vpop.xlane.xlu0 %1923  ;;  %v3351_v24 = vmax.f32 %v14034_v34, 0.0  ;;  %6740 = vrsqrt.f32 %v3493_v19  ;;  %v14038_v37 = vsub.f32 %v14036_v36, %v14037_v32  ;;  %v3917_v19 = vmul.f32 %v6727_v59, %v3773_v52  ;;  %v14044_v52 = vld [vmem:[#allocation430_spill] sm:$0xff]  ;;  %v14045_v60 = vld [vmem:[#allocation419_spill] sm:$0xff] }
 0x39d   :  { %v10252_v58 = vmul.f32 0.020408163, %v1924_v50  ;;  %4370 = vperm.xlu0 %6434, %v3924_v42   ;;  %v3926_v42 = vmul.f32 %v6725_v25, %v3782_v55  ;;  %6742 = vrsqrt.f32 %v3502_v61  ;;  %v3362_v55 = vmax.f32 %v3218_v57, 0.0  ;;  %v6731_v8 = vpop.eup %6730  ;;  %v3775_v61 = vld [vmem:[%s12814_s3 + $0x110] sm:$0xff]  ;;  %v14043_v57 = vld [vmem:[#allocation423_spill] sm:$0xff]  ;;  %v3777_v32 = vld [vmem:[%s12814_s3 + $0x120] sm:$0xff] }
 0x39e   :  { %v1927_v54 = vpop.xlane.xlu1 %1926  ;;  %4315 = vperm.xlu1 %6435, %v3913_v29   ;;  %v3353_v27 = vmax.f32 %v14038_v37, 0.0  ;;  %v2934_v34 = vmul.f32 0.020408163, %v9976_v16  ;;  %v3495_v49 = vadd.f32 1e-05, %v3351_v24  ;;  %v3928_v29 = vmul.f32 %v6729_v39, %v3784_v3  ;;  %v14046_v3 = vld [vmem:[#allocation426_spill] sm:$0xff] }
 0x39f   :  { %14031 = vst [vmem:[#allocation158_spill] sm:$0xff] %v10252_v58  ;;  %v10261_v50 = vmul.f32 0.020408163, %v1927_v54  ;;  %v3504_v54 = vadd.f32 1e-05, %v3360_v15  ;;  %v3786_v15 = vld [vmem:[%s12814_s3 + $0x168] sm:$0xff]  ;;  %v3078_v39 = vmul.f32 %v9939_v10, %v9939_v10  ;;  %v3919_v53 = vmul.f32 %v6731_v8, %v3775_v61 }
 0x3a0   :  { %v2140_v48 = vpop.xlane.xlu0 %2139  ;;  %v3497_v59 = vadd.f32 1e-05, %v3353_v27  ;;  %v2925_v38 = vmul.f32 0.020408163, %v14043_v57  ;;  %v2927_v24 = vmul.f32 0.020408163, %v14044_v52  ;;  %v3224_v61 = vsub.f32 %v2936_v62, %v3080_v0 }
 0x3a1   :  { %14035 = vst [vmem:[#allocation175_spill] sm:$0xff] %v10261_v50  ;;  %v10273_v25 = vmul.f32 0.020408163, %v2140_v48  ;;  %4380 = vperm.xlu0 %6434, %v3926_v42   ;;  %v3069_v48 = vmul.f32 %v14045_v60, %v14045_v60  ;;  %6744 = vrsqrt.f32 %v3504_v54  ;;  %v3506_v57 = vadd.f32 1e-05, %v3362_v55 }
 0x3a2   :  { %v2143_v36 = vpop.xlane.xlu1 %2142  ;;  %4325 = vperm.xlu1 %6435, %v3915_v41   ;;  %v6733_v41 = vpop.eup %6732  ;;  %v3364_v51 = vmax.f32 %v3220_v1, 0.0  ;;  %v3222_v52 = vsub.f32 %v2934_v34, %v3078_v39  ;;  %v14050_v54 = vsub.f32 %v14048_v20, %v14049_v26  ;;  %6746 = vrsqrt.f32 %v3495_v49 }
 0x3a3   :  { %14040 = vst [vmem:[#allocation174_spill] sm:$0xff] %v10273_v25  ;;  %v10278_v22 = vmul.f32 0.020408163, %v2143_v36  ;;  %v3071_v36 = vmul.f32 %v14046_v3, %v14046_v3  ;;  %v6735_v37 = vpop.eup %6734  ;;  %v3930_v3 = vmul.f32 %v6733_v41, %v3786_v15  ;;  %v3213_v55 = vsub.f32 %v2925_v38, %v3069_v48 }
 0x3a4   :  { %v10292_v42 = vpop.xlane.xlu0 %2644  ;;  %v6737_v27 = vpop.eup %6736  ;;  %6748 = vrsqrt.f32 %v3497_v59  ;;  %v2938_v16 = vmul.f32 0.020408163, %v10123_v35  ;;  %v3921_v8 = vmul.f32 %v6735_v37, %v3777_v32  ;;  %v3508_v49 = vadd.f32 1e-05, %v3364_v51  ;;  %v3790_v51 = vld [vmem:[%s12814_s3 + $0x188] sm:$0xff]  ;;  %v14055_v37 = vld [vmem:[#allocation433_spill] sm:$0xff] }
 0x3a5   :  { %14042 = vst [vmem:[#allocation257_spill] sm:$0xff] %v10278_v22  ;;  %4390 = vperm.xlu0 %6434, %v3928_v29   ;;  %v3355_v29 = vmax.f32 %v14050_v54, 0.0  ;;  %v3215_v1 = vsub.f32 %v2927_v24, %v3071_v36  ;;  %v6739_v39 = vpop.eup %6738  ;;  %6750 = vrsqrt.f32 %v3506_v57  ;;  %v3366_v15 = vmax.f32 %v3222_v52, 0.0 }
 0x3a6   :  { %v10301_v2 = vpop.xlane.xlu1 %2647  ;;  %4335 = vperm.xlu1 %6435, %v3917_v19   ;;  %v3788_v19 = vld [vmem:[%s12814_s3 + $0x178] sm:$0xff]  ;;  %v6741_v20 = vpop.eup %6740  ;;  %v3082_v48 = vmul.f32 %v10083_v11, %v10083_v11  ;;  %v3357_v35 = vmax.f32 %v3213_v55, 0.0  ;;  %v3073_v57 = vmul.f32 %v14055_v37, %v14055_v37  ;;  %6752 = vrsqrt.f32 %v3508_v49 }
 0x3a7   :  { %v6743_v38 = vpop.eup %6742  ;;  %v3499_v24 = vadd.f32 1e-05, %v3355_v29  ;;  %v3932_v59 = vmul.f32 %v6737_v27, %v3788_v19  ;;  %v3359_v54 = vmax.f32 %v3215_v1, 0.0  ;;  %v2940_v29 = vmul.f32 0.020408163, %v10179_v5  ;;  %v3779_v27 = vld [vmem:[%s12814_s3 + $0x130] sm:$0xff] }
 0x3a8   :  { %v1930_v34 = vpop.xlane.xlu0 %1929  ;;  %v3226_v52 = vsub.f32 %v2938_v16, %v3082_v48  ;;  %v3510_v55 = vadd.f32 1e-05, %v3366_v15  ;;  %v3368_v1 = vmax.f32 %v3224_v61, 0.0  ;;  %v3084_v16 = vmul.f32 %v10139_v18, %v10139_v18 }
 0x3a9   :  { %v10315_v26 = vmul.f32 0.020408163, %v1930_v34  ;;  %4400 = vperm.xlu0 %6434, %v3930_v3   ;;  %v14053_v34 = vld [vmem:[#allocation437_spill] sm:$0xff]  ;;  %v3934_v48 = vmul.f32 %v6743_v38, %v3790_v51  ;;  %v2931_v49 = vmul.f32 0.020408163, %v9900_v4  ;;  %v3923_v61 = vmul.f32 %v6739_v39, %v3779_v27  ;;  %v14061_v4 = vld [vmem:[#allocation83_spill] sm:$0xff] }
 0x3aa   :  { %v1933_v41 = vpop.xlane.xlu1 %1932  ;;  %4345 = vperm.xlu1 %6435, %v3919_v53   ;;  %v2929_v3 = vmul.f32 0.020408163, %v14053_v34  ;;  %v3781_v34 = vld [vmem:[%s12814_s3 + $0x140] sm:$0xff]  ;;  %v3228_v38 = vsub.f32 %v2940_v29, %v3084_v16  ;;  %6754 = vrsqrt.f32 %v3510_v55  ;;  %v3512_v39 = vadd.f32 1e-05, %v3368_v1  ;;  %v3783_v29 = vld [vmem:[%s12814_s3 + $0x150] sm:$0xff] }
 0x3ab   :  { %14051 = vst [vmem:[#allocation256_spill] sm:$0xff] %v10315_v26  ;;  %v10319_v36 = vmul.f32 0.020408163, %v1933_v41  ;;  %v6745_v53 = vpop.eup %6744  ;;  %v3370_v41 = vmax.f32 %v3226_v52, 0.0  ;;  %v2942_v27 = vmul.f32 0.020408163, %v10242_v33  ;;  %6756 = vrsqrt.f32 %v3499_v24 }
 0x3ac   :  { %v2146_v32 = vpop.xlane.xlu0 %2145  ;;  %v3217_v62 = vsub.f32 %v2929_v3, %v3073_v57  ;;  %v6747_v57 = vpop.eup %6746  ;;  %v3503_v18 = vadd.f32 1e-05, %v3359_v54  ;;  %v3925_v52 = vmul.f32 %v6741_v20, %v3781_v34  ;;  %v14062_v51 = vld [vmem:[#allocation111_spill] sm:$0xff]  ;;  %v3086_v55 = vmul.f32 %v10198_v23, %v10198_v23 }
 0x3ad   :  { %14052 = vst [vmem:[#allocation191_spill] sm:$0xff] %v10319_v36  ;;  %v10330_v0 = vmul.f32 0.020408163, %v2146_v32  ;;  %4410 = vperm.xlu0 %6434, %v3932_v59   ;;  %v3075_v32 = vmul.f32 %v14061_v4, %v14061_v4  ;;  %v2933_v4 = vmul.f32 0.020408163, %v14062_v51  ;;  %v3794_v24 = vld [vmem:[%s12814_s3 + $0x1a8] sm:$0xff] }
 0x3ae   :  { %v2149_v19 = vpop.xlane.xlu1 %2148  ;;  %4355 = vperm.xlu1 %6435, %v3921_v8   ;;  %v3792_v8 = vld [vmem:[%s12814_s3 + $0x198] sm:$0xff]  ;;  %v6749_v37 = vpop.eup %6748  ;;  %v3514_v54 = vadd.f32 1e-05, %v3370_v41  ;;  %v3372_v20 = vmax.f32 %v3228_v38, 0.0  ;;  %v3230_v1 = vsub.f32 %v2942_v27, %v3086_v55 }
 0x3af   :  { %14056 = vst [vmem:[#allocation190_spill] sm:$0xff] %v10330_v0  ;;  %v10339_v5 = vmul.f32 0.020408163, %v2149_v19  ;;  %v3501_v19 = vadd.f32 1e-05, %v3357_v35  ;;  %v3936_v35 = vmul.f32 %v6745_v53, %v3792_v8  ;;  %v6751_v16 = vpop.eup %6750  ;;  %v3219_v3 = vsub.f32 %v2931_v49, %v3075_v32  ;;  %v14064_v49 = vld [vmem:[#allocation97_spill] sm:$0xff] }
 0x3b0   :  { %v10344_v15 = vpop.xlane.xlu0 %2650  ;;  %v3927_v32 = vmul.f32 %v6747_v57, %v3783_v29  ;;  %v3938_v51 = vmul.f32 %v6751_v16, %v3794_v24  ;;  %v3374_v16 = vmax.f32 %v3230_v1, 0.0  ;;  %v3090_v1 = vmul.f32 %v10319_v36, %v10319_v36 }
 0x3b1   :  { %14058 = vst [vmem:[#allocation273_spill] sm:$0xff] %v10339_v5  ;;  %4420 = vperm.xlu0 %6434, %v3934_v48   ;;  %v3361_v48 = vmax.f32 %v3217_v62, 0.0  ;;  %6758 = vrsqrt.f32 %v3501_v19  ;;  %v2944_v62 = vmul.f32 0.020408163, %v10301_v2  ;;  %v6753_v19 = vpop.eup %6752  ;;  %v3363_v38 = vmax.f32 %v3219_v3, 0.0  ;;  %v3796_v2 = vld [vmem:[%s12814_s3 + $0x1b8] sm:$0xff] }
 0x3b2   :  { %v2654_v59 = vpop.xlane.xlu1 %2653  ;;  %4365 = vperm.xlu1 %6435, %v3923_v61   ;;  %6760 = vrsqrt.f32 %v3512_v39  ;;  %v3077_v61 = vmul.f32 %v14064_v49, %v14064_v49  ;;  %v3785_v3 = vld [vmem:[%s12814_s3 + $0x160] sm:$0xff] }
 0x3b3   :  { %6762 = vrsqrt.f32 %v3503_v18  ;;  %v3505_v41 = vadd.f32 1e-05, %v3361_v48  ;;  %v2946_v55 = vmul.f32 0.020408163, %v2654_v59  ;;  %v2935_v18 = vmul.f32 0.020408163, %v10035_v6 }
 0x3b4   :  { %v1936_v33 = vpop.xlane.xlu0 %1935  ;;  %v3221_v27 = vsub.f32 %v2933_v4, %v3077_v61  ;;  %6764 = vrsqrt.f32 %v3514_v54  ;;  %v3940_v54 = vmul.f32 %v6753_v19, %v3796_v2  ;;  %v3929_v59 = vmul.f32 %v6749_v37, %v3785_v3 }
 0x3b5   :  { %v10366_v53 = vmul.f32 0.020408163, %v1936_v33  ;;  %4430 = vperm.xlu0 %6434, %v3936_v35   ;;  %v3088_v35 = vmul.f32 %v10261_v50, %v10261_v50  ;;  %6766 = vrsqrt.f32 %v3505_v41  ;;  %v3507_v6 = vadd.f32 1e-05, %v3363_v38  ;;  %v3787_v41 = vld [vmem:[%s12814_s3 + $0x170] sm:$0xff] }
 0x3b6   :  { %4375 = vperm.xlu1 %6435, %v3925_v52   ;;  %v1939_v34 = vpop.xlane.xlu1 %1938  ;;  %v3516_v52 = vadd.f32 1e-05, %v3372_v20  ;;  %v3079_v19 = vmul.f32 %v10009_v43, %v10009_v43  ;;  %v3518_v37 = vadd.f32 1e-05, %v3374_v16  ;;  %v3234_v61 = vsub.f32 %v2946_v55, %v3090_v1  ;;  %v3789_v55 = vld [vmem:[%s12814_s3 + $0x180] sm:$0xff] }
 0x3b7   :  { %14063 = vst [vmem:[#allocation272_spill] sm:$0xff] %v10366_v53  ;;  %v10371_v8 = vmul.f32 0.020408163, %v1939_v34  ;;  %v3232_v48 = vsub.f32 %v2944_v62, %v3088_v35 }
 0x3b8   :  { %v2152_v39 = vpop.xlane.xlu0 %2151  ;;  %6768 = vrsqrt.f32 %v3516_v52  ;;  %v3223_v38 = vsub.f32 %v2935_v18, %v3079_v19  ;;  %v3800_v52 = vld [vmem:[%s12814_s3 + $0x1d8] sm:$0xff]  ;;  %v3081_v18 = vmul.f32 %v10078_v40, %v10078_v40 }
 0x3b9   :  { %14065 = vst [vmem:[#allocation289_spill] sm:$0xff] %v10371_v8  ;;  %v10380_v29 = vmul.f32 0.020408163, %v2152_v39  ;;  %4440 = vperm.xlu0 %6434, %v3938_v51   ;;  %v6755_v51 = vpop.eup %6754  ;;  %v3365_v39 = vmax.f32 %v3221_v27, 0.0  ;;  %v3376_v3 = vmax.f32 %v3232_v48, 0.0  ;;  %v3092_v43 = vmul.f32 %v10371_v8, %v10371_v8 }
 0x3ba   :  { %4385 = vperm.xlu1 %6435, %v3927_v32   ;;  %v2155_v33 = vpop.xlane.xlu1 %2154  ;;  %v3798_v32 = vld [vmem:[%s12814_s3 + $0x1c8] sm:$0xff]  ;;  %v6757_v35 = vpop.eup %6756  ;;  %v2937_v27 = vmul.f32 0.020408163, %v10107_v21  ;;  %6770 = vrsqrt.f32 %v3507_v6  ;;  %v2939_v21 = vmul.f32 0.020408163, %v10166_v17 }
 0x3bb   :  { %14067 = vst [vmem:[#allocation288_spill] sm:$0xff] %v10380_v29  ;;  %v10388_v4 = vmul.f32 0.020408163, %v2155_v33  ;;  %v6759_v20 = vpop.eup %6758  ;;  %v3942_v24 = vmul.f32 %v6755_v51, %v3798_v32  ;;  %v3931_v49 = vmul.f32 %v6757_v35, %v3787_v41  ;;  %v3509_v48 = vadd.f32 1e-05, %v3365_v39  ;;  %v3802_v41 = vld [vmem:[%s12814_s3 + $0x1e8] sm:$0xff] }
 0x3bc   :  { %v10394_v62 = vpop.xlane.xlu0 %2656  ;;  %6772 = vrsqrt.f32 %v3518_v37  ;;  %v3378_v51 = vmax.f32 %v3234_v61, 0.0  ;;  %v3367_v35 = vmax.f32 %v3223_v38, 0.0  ;;  %v3225_v6 = vsub.f32 %v2937_v27, %v3081_v18  ;;  %v3810_v33 = vld [vmem:[%s12814_s3 + $0x228] sm:$0xff] }
 0x3bd   :  { %14069 = vst [vmem:[#allocation207_spill] sm:$0xff] %v10388_v4  ;;  %4450 = vperm.xlu0 %6434, %v3940_v54   ;;  %v6761_v54 = vpop.eup %6760  ;;  %v3083_v39 = vmul.f32 %v10128_v7, %v10128_v7  ;;  %v3085_v18 = vmul.f32 %v10191_v47, %v10191_v47 }
 0x3be   :  { %4395 = vperm.xlu1 %6435, %v3929_v59   ;;  %v2660_v34 = vpop.xlane.xlu1 %2659  ;;  %v6763_v16 = vpop.eup %6762  ;;  %v3944_v19 = vmul.f32 %v6761_v54, %v3800_v52  ;;  %v3522_v61 = vadd.f32 1e-05, %v3378_v51  ;;  %v3369_v27 = vmax.f32 %v3225_v6, 0.0  ;;  %v14073_v51 = vld [vmem:[#allocation78_spill] sm:$0xff] }
 0x3bf   :  { %v2948_v57 = vmul.f32 0.020408163, %v2660_v34  ;;  %v3520_v34 = vadd.f32 1e-05, %v3376_v3  ;;  %v6765_v32 = vpop.eup %6764  ;;  %v3227_v37 = vsub.f32 %v2939_v21, %v3083_v39 }
 0x3c0   :  { %v10409_v36 = vpop.xlane.xlu0 %2842  ;;  %v3946_v54 = vmul.f32 %v6765_v32, %v3802_v41  ;;  %v2943_v41 = vmul.f32 0.020408163, %v10292_v42  ;;  %v3795_v42 = vld [vmem:[%s12814_s3 + $0x1b0] sm:$0xff] }
 0x3c1   :  { %4460 = vperm.xlu0 %6434, %v3942_v24   ;;  %v3236_v1 = vsub.f32 %v2948_v57, %v3092_v43  ;;  %v3933_v24 = vmul.f32 %v6759_v20, %v3789_v55  ;;  %v3791_v43 = vld [vmem:[%s12814_s3 + $0x190] sm:$0xff]  ;;  %v2941_v57 = vmul.f32 0.020408163, %v10231_v31  ;;  %6774 = vrsqrt.f32 %v3520_v34  ;;  %v3804_v31 = vld [vmem:[%s12814_s3 + $0x1f8] sm:$0xff] }
 0x3c2   :  { %4405 = vperm.xlu1 %6435, %v3931_v49   ;;  %v10420_v59 = vpop.xlane.xlu1 %2845  ;;  %v6767_v49 = vpop.eup %6766  ;;  %6776 = vrsqrt.f32 %v3509_v48  ;;  %v3511_v20 = vadd.f32 1e-05, %v3367_v35  ;;  %v3935_v55 = vmul.f32 %v6763_v16, %v3791_v43  ;;  %v14072_v34 = vld [vmem:[#allocation81_spill] sm:$0xff]  ;;  %v3793_v48 = vld [vmem:[%s12814_s3 + $0x1a0] sm:$0xff]  ;;  %v3371_v32 = vmax.f32 %v3227_v37, 0.0  ;;  %v3806_v37 = vld [vmem:[%s12814_s3 + $0x208] sm:$0xff] }
 0x3c3   :  { %v3380_v3 = vmax.f32 %v3236_v1, 0.0  ;;  %v6769_v52 = vpop.eup %6768  ;;  %v14074_v1 = vsub.f32 %v14072_v34, %v14073_v51  ;;  %v3229_v35 = vsub.f32 %v2941_v57, %v3085_v18  ;;  %6778 = vrsqrt.f32 %v3522_v61  ;;  %v14075_v61 = vld [vmem:[#allocation101_spill] sm:$0xff] }
 0x3c4   :  { %v10424_v17 = vpop.xlane.xlu0 %2848  ;;  %v6771_v16 = vpop.eup %6770  ;;  %6780 = vrsqrt.f32 %v3511_v20  ;;  %v3948_v43 = vmul.f32 %v6769_v52, %v3804_v31  ;;  %v3087_v20 = vmul.f32 %v10252_v58, %v10252_v58 }
 0x3c5   :  { %4470 = vperm.xlu0 %6434, %v3944_v19   ;;  %v3382_v39 = vmax.f32 %v14074_v1, 0.0  ;;  %v3524_v6 = vadd.f32 1e-05, %v3380_v3  ;;  %v14076_v3 = vld [vmem:[#allocation100_spill] sm:$0xff]  ;;  %v3373_v52 = vmax.f32 %v3229_v35, 0.0  ;;  %v3797_v35 = vld [vmem:[%s12814_s3 + $0x1c0] sm:$0xff] }
 0x3c6   :  { %4415 = vperm.xlu1 %6435, %v3933_v24   ;;  %v10433_v38 = vpop.xlane.xlu1 %2851  ;;  %v3513_v24 = vadd.f32 1e-05, %v3369_v27  ;;  %v6773_v34 = vpop.eup %6772  ;;  %v14077_v18 = vsub.f32 %v14075_v61, %v14076_v3  ;;  %v3515_v27 = vadd.f32 1e-05, %v3371_v32  ;;  %v3231_v31 = vsub.f32 %v2943_v41, %v3087_v20 }
 0x3c7   :  { %v3526_v57 = vadd.f32 1e-05, %v3382_v39  ;;  %6782 = vrsqrt.f32 %v3524_v6  ;;  %v2945_v1 = vmul.f32 0.020408163, %v10344_v15  ;;  %v3950_v39 = vmul.f32 %v6773_v34, %v3806_v37  ;;  %v14078_v6 = vld [vmem:[#allocation117_spill] sm:$0xff]  ;;  %v14079_v15 = vld [vmem:[#allocation116_spill] sm:$0xff] }
 0x3c8   :  { %v10437_v21 = vpop.xlane.xlu0 %2854  ;;  %6784 = vrsqrt.f32 %v3513_v24  ;;  %v3939_v61 = vmul.f32 %v6771_v16, %v3795_v42  ;;  %v3089_v32 = vmul.f32 %v10315_v26, %v10315_v26  ;;  %v14080_v24 = vsub.f32 %v14078_v6, %v14079_v15 }
 0x3c9   :  { %4480 = vperm.xlu0 %6434, %v3946_v54   ;;  %v3937_v54 = vmul.f32 %v6767_v49, %v3793_v48  ;;  %6786 = vrsqrt.f32 %v3526_v57  ;;  %v3517_v16 = vadd.f32 1e-05, %v3373_v52  ;;  %v3375_v37 = vmax.f32 %v3231_v31, 0.0  ;;  %v3799_v52 = vld [vmem:[%s12814_s3 + $0x1d0] sm:$0xff] }
 0x3ca   :  { %4425 = vperm.xlu1 %6435, %v3935_v55   ;;  %v10448_v19 = vpop.xlane.xlu1 %2857  ;;  %v3384_v55 = vmax.f32 %v14077_v18, 0.0  ;;  %v3386_v41 = vmax.f32 %v14080_v24, 0.0  ;;  %6788 = vrsqrt.f32 %v3515_v27  ;;  %v3233_v57 = vsub.f32 %v2945_v1, %v3089_v32  ;;  %v14081_v1 = vld [vmem:[#allocation133_spill] sm:$0xff] }
 0x3cb   :  { %v6775_v48 = vpop.eup %6774  ;;  %v3091_v27 = vmul.f32 %v10366_v53, %v10366_v53 }
 0x3cc   :  { %v10451_v51 = vpop.xlane.xlu0 %2860  ;;  %v6777_v3 = vpop.eup %6776  ;;  %v3528_v18 = vadd.f32 1e-05, %v3384_v55  ;;  %v2947_v55 = vmul.f32 0.020408163, %v10394_v62  ;;  %v3530_v31 = vadd.f32 1e-05, %v3386_v41 }
 0x3cd   :  { %4490 = vperm.xlu0 %6434, %v3948_v43   ;;  %v3808_v43 = vld [vmem:[%s12814_s3 + $0x218] sm:$0xff]  ;;  %v6779_v42 = vpop.eup %6778  ;;  %v14082_v62 = vld [vmem:[#allocation132_spill] sm:$0xff]  ;;  %v3377_v32 = vmax.f32 %v3233_v57, 0.0 }
 0x3ce   :  { %4435 = vperm.xlu1 %6435, %v3937_v54   ;;  %v10464_v49 = vpop.xlane.xlu1 %2863  ;;  %v3952_v20 = vmul.f32 %v6775_v48, %v3808_v43  ;;  %v6781_v6 = vpop.eup %6780  ;;  %6790 = vrsqrt.f32 %v3528_v18  ;;  %v14083_v48 = vsub.f32 %v14081_v1, %v14082_v62  ;;  %v3235_v18 = vsub.f32 %v2947_v55, %v3091_v27  ;;  %v3812_v41 = vld [vmem:[%s12814_s3 + $0x238] sm:$0xff]  ;;  %v14085_v57 = vld [vmem:[#allocation148_spill] sm:$0xff] }
 0x3cf   :  { %6792 = vrsqrt.f32 %v3517_v16  ;;  %v3801_v16 = vld [vmem:[%s12814_s3 + $0x1e0] sm:$0xff]  ;;  %v3521_v27 = vadd.f32 1e-05, %v3377_v32 }
 0x3d0   :  { %v10478_v34 = vpop.xlane.xlu0 %2866  ;;  %6794 = vrsqrt.f32 %v3530_v31  ;;  %v3814_v31 = vld [vmem:[%s12814_s3 + $0x248] sm:$0xff] }
 0x3d1   :  { %4500 = vperm.xlu0 %6434, %v3950_v39   ;;  %v3941_v39 = vmul.f32 %v6777_v3, %v3797_v35  ;;  %v3519_v3 = vadd.f32 1e-05, %v3375_v37  ;;  %v3954_v35 = vmul.f32 %v6779_v42, %v3810_v33  ;;  %v6783_v15 = vpop.eup %6782  ;;  %v14084_v37 = vld [vmem:[#allocation149_spill] sm:$0xff] }
 0x3d2   :  { %4445 = vperm.xlu1 %6435, %v3939_v61   ;;  %v10480_v54 = vpop.xlane.xlu1 %2869  ;;  %v3388_v61 = vmax.f32 %v14083_v48, 0.0  ;;  %v6785_v2 = vpop.eup %6784  ;;  %v14086_v55 = vsub.f32 %v14084_v37, %v14085_v57  ;;  %v3956_v1 = vmul.f32 %v6783_v15, %v3812_v41  ;;  %v14087_v37 = vld [vmem:[#allocation165_spill] sm:$0xff] }
 0x3d3   :  { %6796 = vrsqrt.f32 %v3519_v3  ;;  %v14088_v3 = vld [vmem:[#allocation164_spill] sm:$0xff] }
 0x3d4   :  { %v10496_v24 = vpop.xlane.xlu0 %2872  ;;  %v3390_v33 = vmax.f32 %v14086_v55, 0.0  ;;  %v14089_v32 = vsub.f32 %v14087_v37, %v14088_v3  ;;  %v14093_v3 = vld [vmem:[#allocation181_spill] sm:$0xff] }
 0x3d5   :  { %4510 = vperm.xlu0 %6434, %v3952_v20   ;;  %v3943_v20 = vmul.f32 %v6781_v6, %v3799_v52  ;;  %v6787_v6 = vpop.eup %6786  ;;  %v3379_v52 = vmax.f32 %v3235_v18, 0.0 }
 0x3d6   :  { %4455 = vperm.xlu1 %6435, %v3941_v39   ;;  %v10494_v43 = vpop.xlane.xlu1 %2875  ;;  %v3532_v39 = vadd.f32 1e-05, %v3388_v61  ;;  %v6789_v62 = vpop.eup %6788  ;;  %v3803_v61 = vld [vmem:[%s12814_s3 + $0x1f0] sm:$0xff]  ;;  %v3392_v18 = vmax.f32 %v14089_v32, 0.0  ;;  %v3958_v53 = vmul.f32 %v6787_v6, %v3814_v31 }
 0x3d7   :  { %v14094_v32 = vld [vmem:[#allocation180_spill] sm:$0xff] }
 0x3d8   :  { %6798 = vrsqrt.f32 %v3532_v39  ;;  %v6791_v41 = vpop.eup %6790  ;;  %v3947_v39 = vmul.f32 %v6789_v62, %v3803_v61  ;;  %v3536_v37 = vadd.f32 1e-05, %v3392_v18  ;;  %v14096_v62 = vld [vmem:[#allocation99_spill] sm:$0xff]  ;;  %v14097_v61 = vld [vmem:[#allocation98_spill] sm:$0xff] }
 0x3d9   :  { %4520 = vperm.xlu0 %6434, %v3954_v35   ;;  %v3945_v35 = vmul.f32 %v6785_v2, %v3801_v16  ;;  %v14090_v2 = vld [vmem:[#allocation88_spill] sm:$0xff]  ;;  %v14091_v16 = vld [vmem:[#allocation87_spill] sm:$0xff]  ;;  %6800 = vrsqrt.f32 %v3521_v27  ;;  %v6793_v26 = vpop.eup %6792  ;;  %v14095_v27 = vsub.f32 %v14093_v3, %v14094_v32  ;;  %v14099_v3 = vld [vmem:[#allocation197_spill] sm:$0xff] }
 0x3da   :  { %4465 = vperm.xlu1 %6435, %v3943_v20   ;;  %v10507_v42 = vpop.permute.xlu1 %4180  ;;  %v3534_v20 = vadd.f32 1e-05, %v3390_v33  ;;  %v14092_v57 = vsub.f32 %v14090_v2, %v14091_v16  ;;  %v3816_v33 = vld [vmem:[%s12814_s3 + $0x258] sm:$0xff]  ;;  %v14098_v2 = vsub.f32 %v14096_v62, %v14097_v61  ;;  %v14100_v32 = vld [vmem:[#allocation196_spill] sm:$0xff] }
 0x3dc   :  { %v10509_v48 = vpop.permute.xlu0 %4175  ;;  %v3381_v55 = vmax.f32 %v14092_v57, 0.0  ;;  %6802 = vrsqrt.f32 %v3534_v20  ;;  %v3383_v16 = vmax.f32 %v14098_v2, 0.0  ;;  %v6795_v57 = vpop.eup %6794  ;;  %v3818_v20 = vld [vmem:[%s12814_s3 + $0x268] sm:$0xff] }
 0x3dd   :  { %4530 = vperm.xlu0 %6434, %v3956_v1   ;;  %v3523_v1 = vadd.f32 1e-05, %v3379_v52  ;;  %v3394_v52 = vmax.f32 %v14095_v27, 0.0  ;;  %v6797_v18 = vpop.eup %6796  ;;  %v14103_v27 = vld [vmem:[#allocation114_spill] sm:$0xff]  ;;  %v3962_v2 = vmul.f32 %v6795_v57, %v3818_v20 }
 0x3de   :  { %4475 = vperm.xlu1 %6435, %v3945_v35   ;;  %v10520_v15 = vpop.permute.xlu1 %4185  ;;  %v3805_v35 = vld [vmem:[%s12814_s3 + $0x200] sm:$0xff]  ;;  %v3525_v31 = vadd.f32 1e-05, %v3381_v55  ;;  %v3807_v55 = vld [vmem:[%s12814_s3 + $0x210] sm:$0xff] }
 0x3df   :  { %6804 = vrsqrt.f32 %v3523_v1  ;;  %v3949_v7 = vmul.f32 %v6793_v26, %v3805_v35  ;;  %v14101_v1 = vsub.f32 %v14099_v3, %v14100_v32  ;;  %v3527_v26 = vadd.f32 1e-05, %v3383_v16  ;;  %v14102_v35 = vld [vmem:[#allocation115_spill] sm:$0xff]  ;;  %v14105_v16 = vld [vmem:[#allocation213_spill] sm:$0xff]  ;;  %v14106_v3 = vld [vmem:[#allocation212_spill] sm:$0xff] }
 0x3e0   :  { %v10525_v58 = vpop.permute.xlu0 %4220  ;;  %6806 = vrsqrt.f32 %v3536_v37  ;;  %v14104_v62 = vsub.f32 %v14102_v35, %v14103_v27  ;;  %v3951_v8 = vmul.f32 %v6797_v18, %v3807_v55  ;;  %v3820_v37 = vld [vmem:[%s12814_s3 + $0x278] sm:$0xff]  ;;  %v14107_v32 = vsub.f32 %v14105_v16, %v14106_v3  ;;  %v14108_v55 = vld [vmem:[#allocation131_spill] sm:$0xff]  ;;  %v14112_v16 = vld [vmem:[#allocation228_spill] sm:$0xff] }
 0x3e1   :  { %4540 = vperm.xlu0 %6434, %v3958_v53   ;;  %v3960_v53 = vmul.f32 %v6791_v41, %v3816_v33  ;;  %v3396_v41 = vmax.f32 %v14101_v1, 0.0  ;;  %6808 = vrsqrt.f32 %v3525_v31  ;;  %v14109_v1 = vld [vmem:[#allocation130_spill] sm:$0xff] }
 0x3e2   :  { %4485 = vperm.xlu1 %6435, %v3947_v39   ;;  %v10536_v6 = vpop.permute.xlu1 %4190  ;;  %v3538_v39 = vadd.f32 1e-05, %v3394_v52  ;;  %v3385_v61 = vmax.f32 %v14104_v62, 0.0  ;;  %v3398_v57 = vmax.f32 %v14107_v32, 0.0  ;;  %v14110_v35 = vsub.f32 %v14108_v55, %v14109_v1  ;;  %v14116_v32 = vld [vmem:[#allocation146_spill] sm:$0xff] }
 0x3e3   :  { %v3540_v31 = vadd.f32 1e-05, %v3396_v41 }
 0x3e4   :  { %v10541_v47 = vpop.permute.xlu0 %4230  ;;  %6810 = vrsqrt.f32 %v3538_v39  ;;  %v3529_v18 = vadd.f32 1e-05, %v3385_v61  ;;  %v3387_v27 = vmax.f32 %v14110_v35, 0.0  ;;  %v3822_v39 = vld [vmem:[%s12814_s3 + $0x288] sm:$0xff]  ;;  %v14111_v61 = vld [vmem:[#allocation229_spill] sm:$0xff] }
 0x3e5   :  { %4550 = vperm.xlu0 %6434, %v3960_v53   ;;  %v6799_v53 = vpop.eup %6798  ;;  %6812 = vrsqrt.f32 %v3527_v26  ;;  %v3542_v26 = vadd.f32 1e-05, %v3398_v57  ;;  %v14113_v3 = vsub.f32 %v14111_v61, %v14112_v16  ;;  %v14120_v61 = vld [vmem:[#allocation244_spill] sm:$0xff] }
 0x3e6   :  { %4495 = vperm.xlu1 %6435, %v3949_v7   ;;  %v10552_v33 = vpop.permute.xlu1 %4195  ;;  %v6801_v52 = vpop.eup %6800  ;;  %v3809_v7 = vld [vmem:[%s12814_s3 + $0x220] sm:$0xff]  ;;  %v3964_v62 = vmul.f32 %v6799_v53, %v3820_v37  ;;  %6814 = vrsqrt.f32 %v3540_v31  ;;  %v3824_v31 = vld [vmem:[%s12814_s3 + $0x298] sm:$0xff] }
 0x3e7   :  { %v3953_v23 = vmul.f32 %v6801_v52, %v3809_v7  ;;  %v3400_v53 = vmax.f32 %v14113_v3, 0.0  ;;  %6816 = vrsqrt.f32 %v3529_v18  ;;  %v3531_v52 = vadd.f32 1e-05, %v3387_v27  ;;  %v14115_v7 = vld [vmem:[#allocation147_spill] sm:$0xff]  ;;  %v14119_v27 = vld [vmem:[#allocation245_spill] sm:$0xff]  ;;  %v14123_v3 = vld [vmem:[#allocation162_spill] sm:$0xff] }
 0x3e8   :  { %v10557_v40 = vpop.permute.xlu0 %4240  ;;  %v14117_v55 = vsub.f32 %v14115_v7, %v14116_v32  ;;  %6818 = vrsqrt.f32 %v3542_v26  ;;  %v14121_v16 = vsub.f32 %v14119_v27, %v14120_v61  ;;  %v3826_v26 = vld [vmem:[%s12814_s3 + $0x2a8] sm:$0xff]  ;;  %v14127_v27 = vld [vmem:[#allocation260_spill] sm:$0xff] }
 0x3e9   :  { %4560 = vperm.xlu0 %6434, %v3962_v2   ;;  %v6803_v2 = vpop.eup %6802  ;;  %v3544_v18 = vadd.f32 1e-05, %v3400_v53  ;;  %6820 = vrsqrt.f32 %v3531_v52 }
 0x3ea   :  { %4505 = vperm.xlu1 %6435, %v3951_v8   ;;  %v10568_v20 = vpop.permute.xlu1 %4200  ;;  %v6805_v41 = vpop.eup %6804  ;;  %v3811_v8 = vld [vmem:[%s12814_s3 + $0x230] sm:$0xff]  ;;  %v3389_v1 = vmax.f32 %v14117_v55, 0.0  ;;  %v3966_v35 = vmul.f32 %v6803_v2, %v3822_v39  ;;  %v3402_v2 = vmax.f32 %v14121_v16, 0.0  ;;  %v14131_v16 = vld [vmem:[#allocation178_spill] sm:$0xff] }
 0x3eb   :  { %v3955_v60 = vmul.f32 %v6805_v41, %v3811_v8  ;;  %v14122_v8 = vld [vmem:[#allocation163_spill] sm:$0xff]  ;;  %6822 = vrsqrt.f32 %v3544_v18  ;;  %v3828_v18 = vld [vmem:[%s12814_s3 + $0x2b8] sm:$0xff] }
 0x3ec   :  { %v10573_v50 = vpop.permute.xlu0 %4250  ;;  %v3533_v41 = vadd.f32 1e-05, %v3389_v1  ;;  %v14124_v7 = vsub.f32 %v14122_v8, %v14123_v3  ;;  %v3546_v52 = vadd.f32 1e-05, %v3402_v2  ;;  %v14126_v1 = vld [vmem:[#allocation261_spill] sm:$0xff] }
 0x3ed   :  { %4570 = vperm.xlu0 %6434, %v3964_v62   ;;  %v6807_v62 = vpop.eup %6806  ;;  %v14128_v61 = vsub.f32 %v14126_v1, %v14127_v27  ;;  %v14135_v1 = vld [vmem:[#allocation276_spill] sm:$0xff] }
 0x3ee   :  { %4515 = vperm.xlu1 %6435, %v3953_v23   ;;  %v10584_v37 = vpop.permute.xlu1 %4205  ;;  %v6809_v57 = vpop.eup %6808  ;;  %v3813_v23 = vld [vmem:[%s12814_s3 + $0x240] sm:$0xff]  ;;  %v3391_v32 = vmax.f32 %v14124_v7, 0.0  ;;  %v3968_v55 = vmul.f32 %v6807_v62, %v3824_v31  ;;  %6824 = vrsqrt.f32 %v3533_v41 }
 0x3ef   :  { %14114 = vst [vmem:[#allocation206_spill] sm:$0xff] %v10584_v37  ;;  %v3957_v10 = vmul.f32 %v6809_v57, %v3813_v23  ;;  %v3404_v62 = vmax.f32 %v14128_v61, 0.0  ;;  %v14130_v23 = vld [vmem:[#allocation179_spill] sm:$0xff]  ;;  %6826 = vrsqrt.f32 %v3546_v52  ;;  %v14139_v61 = vld [vmem:[#allocation194_spill] sm:$0xff] }
 0x3f0   :  { %v10589_v11 = vpop.permute.xlu0 %4260  ;;  %v3535_v57 = vadd.f32 1e-05, %v3391_v32  ;;  %v14132_v8 = vsub.f32 %v14130_v23, %v14131_v16  ;;  %v14134_v32 = vld [vmem:[#allocation277_spill] sm:$0xff]  ;;  %v3830_v52 = vld [vmem:[%s12814_s3 + $0x2c8] sm:$0xff] }
 0x3f1   :  { %14118 = vst [vmem:[#allocation306_spill] sm:$0xff] %v10589_v11  ;;  %4580 = vperm.xlu0 %6434, %v3966_v35   ;;  %v6811_v35 = vpop.eup %6810  ;;  %v3548_v41 = vadd.f32 1e-05, %v3404_v62  ;;  %v14136_v27 = vsub.f32 %v14134_v32, %v14135_v1  ;;  %v14143_v32 = vld [vmem:[#allocation294_spill] sm:$0xff]  ;;  %v14254_v11 = vld [vmem:[#allocation160_spill] sm:$0xff] }
 0x3f2   :  { %4525 = vperm.xlu1 %6435, %v3955_v60   ;;  %v10600_v39 = vpop.permute.xlu1 %4210  ;;  %v6813_v53 = vpop.eup %6812  ;;  %v3815_v60 = vld [vmem:[%s12814_s3 + $0x250] sm:$0xff]  ;;  %v3393_v3 = vmax.f32 %v14132_v8, 0.0  ;;  %v3970_v7 = vmul.f32 %v6811_v35, %v3826_v26  ;;  %6828 = vrsqrt.f32 %v3535_v57 }
 0x3f3   :  { %v3959_v12 = vmul.f32 %v6813_v53, %v3815_v60  ;;  %v3406_v35 = vmax.f32 %v14136_v27, 0.0  ;;  %v14138_v60 = vld [vmem:[#allocation195_spill] sm:$0xff]  ;;  %6830 = vrsqrt.f32 %v3548_v41  ;;  %v14147_v27 = vld [vmem:[#allocation210_spill] sm:$0xff]  ;;  %v3832_v41 = vld [vmem:[%s12814_s3 + $0x2d8] sm:$0xff] }
 0x3f4   :  { %v10605_v30 = vpop.permute.xlu0 %4270  ;;  %v3537_v53 = vadd.f32 1e-05, %v3393_v3  ;;  %v14140_v23 = vsub.f32 %v14138_v60, %v14139_v61  ;;  %v14142_v3 = vld [vmem:[#allocation295_spill] sm:$0xff] }
 0x3f5   :  { %14125 = vst [vmem:[#allocation305_spill] sm:$0xff] %v10605_v30  ;;  %4590 = vperm.xlu0 %6434, %v3968_v55   ;;  %v6815_v55 = vpop.eup %6814  ;;  %v3550_v57 = vadd.f32 1e-05, %v3406_v35  ;;  %v14144_v1 = vsub.f32 %v14142_v3, %v14143_v32  ;;  %v14151_v3 = vld [vmem:[#allocation312_spill] sm:$0xff] }
 0x3f6   :  { %4535 = vperm.xlu1 %6435, %v3957_v10   ;;  %v10616_v31 = vpop.permute.xlu1 %4215  ;;  %v6817_v2 = vpop.eup %6816  ;;  %v3817_v10 = vld [vmem:[%s12814_s3 + $0x260] sm:$0xff]  ;;  %v3395_v16 = vmax.f32 %v14140_v23, 0.0  ;;  %v3972_v8 = vmul.f32 %v6815_v55, %v3828_v18  ;;  %6832 = vrsqrt.f32 %v3537_v53 }
 0x3f7   :  { %14129 = vst [vmem:[#allocation223_spill] sm:$0xff] %v10616_v31  ;;  %v3961_v14 = vmul.f32 %v6817_v2, %v3817_v10  ;;  %v3408_v55 = vmax.f32 %v14144_v1, 0.0  ;;  %v14146_v10 = vld [vmem:[#allocation211_spill] sm:$0xff]  ;;  %6834 = vrsqrt.f32 %v3550_v57  ;;  %v14155_v1 = vld [vmem:[#allocation226_spill] sm:$0xff] }
 0x3f8   :  { %v10621_v56 = vpop.permute.xlu0 %4280  ;;  %v3539_v2 = vadd.f32 1e-05, %v3395_v16  ;;  %v14148_v60 = vsub.f32 %v14146_v10, %v14147_v27  ;;  %v14150_v16 = vld [vmem:[#allocation313_spill] sm:$0xff]  ;;  %v3834_v57 = vld [vmem:[%s12814_s3 + $0x2e8] sm:$0xff] }
 0x3f9   :  { %14133 = vst [vmem:[#allocation222_spill] sm:$0xff] %v10621_v56  ;;  %4600 = vperm.xlu0 %6434, %v3970_v7   ;;  %v6819_v7 = vpop.eup %6818  ;;  %v3552_v53 = vadd.f32 1e-05, %v3408_v55  ;;  %v14152_v32 = vsub.f32 %v14150_v16, %v14151_v3  ;;  %v14159_v16 = vld [vmem:[#allocation328_spill] sm:$0xff] }
 0x3fa   :  { %4545 = vperm.xlu1 %6435, %v3959_v12   ;;  %v10632_v26 = vpop.permute.xlu1 %4225  ;;  %v6821_v62 = vpop.eup %6820  ;;  %v3819_v12 = vld [vmem:[%s12814_s3 + $0x270] sm:$0xff]  ;;  %v3397_v61 = vmax.f32 %v14148_v60, 0.0  ;;  %v3974_v23 = vmul.f32 %v6819_v7, %v3830_v52  ;;  %6836 = vrsqrt.f32 %v3539_v2 }
 0x3fb   :  { %14137 = vst [vmem:[#allocation239_spill] sm:$0xff] %v10632_v26  ;;  %v3963_v26 = vmul.f32 %v6821_v62, %v3819_v12  ;;  %v3410_v7 = vmax.f32 %v14152_v32, 0.0  ;;  %v14154_v12 = vld [vmem:[#allocation227_spill] sm:$0xff]  ;;  %6838 = vrsqrt.f32 %v3552_v53  ;;  %v14163_v32 = vld [vmem:[#allocation242_spill] sm:$0xff]  ;;  %v3836_v53 = vld [vmem:[%s12814_s3 + $0x2f8] sm:$0xff] }
 0x3fc   :  { %v10637_v46 = vpop.permute.xlu0 %4290  ;;  %v3541_v62 = vadd.f32 1e-05, %v3397_v61  ;;  %v14156_v10 = vsub.f32 %v14154_v12, %v14155_v1  ;;  %v14158_v61 = vld [vmem:[#allocation329_spill] sm:$0xff] }
 0x3fd   :  { %14141 = vst [vmem:[#allocation238_spill] sm:$0xff] %v10637_v46  ;;  %4610 = vperm.xlu0 %6434, %v3972_v8   ;;  %v6823_v8 = vpop.eup %6822  ;;  %v3554_v2 = vadd.f32 1e-05, %v3410_v7  ;;  %v14160_v3 = vsub.f32 %v14158_v61, %v14159_v16  ;;  %v14167_v61 = vld [vmem:[#allocation346_spill] sm:$0xff] }
 0x3fe   :  { %4555 = vperm.xlu1 %6435, %v3961_v14   ;;  %v10648_v18 = vpop.permute.xlu1 %4235  ;;  %v6825_v35 = vpop.eup %6824  ;;  %v3821_v14 = vld [vmem:[%s12814_s3 + $0x280] sm:$0xff]  ;;  %v3399_v27 = vmax.f32 %v14156_v10, 0.0  ;;  %v3976_v60 = vmul.f32 %v6823_v8, %v3832_v41  ;;  %6840 = vrsqrt.f32 %v3541_v62 }
 0x3ff   :  { %14145 = vst [vmem:[#allocation325_spill] sm:$0xff] %v10648_v18  ;;  %v3965_v18 = vmul.f32 %v6825_v35, %v3821_v14  ;;  %v3412_v8 = vmax.f32 %v14160_v3, 0.0  ;;  %v14162_v14 = vld [vmem:[#allocation243_spill] sm:$0xff]  ;;  %6842 = vrsqrt.f32 %v3554_v2  ;;  %v14171_v3 = vld [vmem:[#allocation258_spill] sm:$0xff] }
 0x400   :  { %v10653_v46 = vpop.permute.xlu0 %4300  ;;  %v3543_v35 = vadd.f32 1e-05, %v3399_v27  ;;  %v14164_v12 = vsub.f32 %v14162_v14, %v14163_v32  ;;  %v14166_v27 = vld [vmem:[#allocation347_spill] sm:$0xff] }
 0x401   :  { %14149 = vst [vmem:[#allocation324_spill] sm:$0xff] %v10653_v46  ;;  %4620 = vperm.xlu0 %6434, %v3974_v23   ;;  %v6827_v23 = vpop.eup %6826  ;;  %v3556_v62 = vadd.f32 1e-05, %v3412_v8  ;;  %v14168_v16 = vsub.f32 %v14166_v27, %v14167_v61  ;;  %v3838_v2 = vld [vmem:[%s12814_s3 + $0x308] sm:$0xff]  ;;  %v14175_v27 = vld [vmem:[#allocation357_spill] sm:$0xff] }
 0x402   :  { %4565 = vperm.xlu1 %6435, %v3963_v26   ;;  %v10664_v52 = vpop.permute.xlu1 %4245  ;;  %v6829_v55 = vpop.eup %6828  ;;  %v3823_v26 = vld [vmem:[%s12814_s3 + $0x290] sm:$0xff]  ;;  %v3401_v1 = vmax.f32 %v14164_v12, 0.0  ;;  %v3978_v10 = vmul.f32 %v6827_v23, %v3834_v57  ;;  %6844 = vrsqrt.f32 %v3543_v35 }
 0x403   :  { %14153 = vst [vmem:[#allocation341_spill] sm:$0xff] %v10664_v52  ;;  %v3967_v52 = vmul.f32 %v6829_v55, %v3823_v26  ;;  %v3414_v23 = vmax.f32 %v14168_v16, 0.0  ;;  %v14170_v26 = vld [vmem:[#allocation259_spill] sm:$0xff]  ;;  %6846 = vrsqrt.f32 %v3556_v62  ;;  %v14179_v16 = vld [vmem:[#allocation274_spill] sm:$0xff]  ;;  %v3840_v62 = vld [vmem:[%s12814_s3 + $0x318] sm:$0xff] }
 0x404   :  { %v10669_v46 = vpop.permute.xlu0 %4310  ;;  %v3545_v55 = vadd.f32 1e-05, %v3401_v1  ;;  %v14172_v14 = vsub.f32 %v14170_v26, %v14171_v3  ;;  %v14174_v1 = vld [vmem:[#allocation358_spill] sm:$0xff] }
 0x405   :  { %14157 = vst [vmem:[#allocation340_spill] sm:$0xff] %v10669_v46  ;;  %4630 = vperm.xlu0 %6434, %v3976_v60   ;;  %v6831_v60 = vpop.eup %6830  ;;  %v3558_v35 = vadd.f32 1e-05, %v3414_v23  ;;  %v14176_v61 = vsub.f32 %v14174_v1, %v14175_v27  ;;  %v14183_v1 = vld [vmem:[#allocation367_spill] sm:$0xff] }
 0x406   :  { %4575 = vperm.xlu1 %6435, %v3965_v18   ;;  %v10680_v41 = vpop.permute.xlu1 %4255  ;;  %v6833_v7 = vpop.eup %6832  ;;  %v3825_v18 = vld [vmem:[%s12814_s3 + $0x2a0] sm:$0xff]  ;;  %v3403_v32 = vmax.f32 %v14172_v14, 0.0  ;;  %v3980_v12 = vmul.f32 %v6831_v60, %v3836_v53  ;;  %6848 = vrsqrt.f32 %v3545_v55 }
 0x407   :  { %14161 = vst [vmem:[#allocation255_spill] sm:$0xff] %v10680_v41  ;;  %v3969_v41 = vmul.f32 %v6833_v7, %v3825_v18  ;;  %v3416_v60 = vmax.f32 %v14176_v61, 0.0  ;;  %v14178_v18 = vld [vmem:[#allocation275_spill] sm:$0xff]  ;;  %6850 = vrsqrt.f32 %v3558_v35 }
 0x408   :  { %v10685_v46 = vpop.permute.xlu0 %4320  ;;  %v3547_v7 = vadd.f32 1e-05, %v3403_v32  ;;  %v14180_v26 = vsub.f32 %v14178_v18, %v14179_v16  ;;  %v14182_v32 = vld [vmem:[#allocation368_spill] sm:$0xff]  ;;  %v14187_v61 = vld [vmem:[#allocation291_spill] sm:$0xff] }
 0x409   :  { %14165 = vst [vmem:[#allocation254_spill] sm:$0xff] %v10685_v46  ;;  %4640 = vperm.xlu0 %6434, %v3978_v10   ;;  %v6835_v10 = vpop.eup %6834  ;;  %v3560_v55 = vadd.f32 1e-05, %v3416_v60  ;;  %v14184_v27 = vsub.f32 %v14182_v32, %v14183_v1  ;;  %v3842_v35 = vld [vmem:[%s12814_s3 + $0x328] sm:$0xff]  ;;  %v14191_v32 = vld [vmem:[#allocation377_spill] sm:$0xff] }
 0x40a   :  { %4585 = vperm.xlu1 %6435, %v3967_v52   ;;  %v10696_v57 = vpop.permute.xlu1 %4265  ;;  %v6837_v8 = vpop.eup %6836  ;;  %v3827_v52 = vld [vmem:[%s12814_s3 + $0x2b0] sm:$0xff]  ;;  %v3405_v3 = vmax.f32 %v14180_v26, 0.0  ;;  %v3982_v14 = vmul.f32 %v6835_v10, %v3838_v2  ;;  %6852 = vrsqrt.f32 %v3547_v7 }
 0x40b   :  { %14169 = vst [vmem:[#allocation271_spill] sm:$0xff] %v10696_v57  ;;  %v3971_v57 = vmul.f32 %v6837_v8, %v3827_v52  ;;  %v3418_v10 = vmax.f32 %v14184_v27, 0.0  ;;  %v14186_v52 = vld [vmem:[#allocation292_spill] sm:$0xff]  ;;  %6854 = vrsqrt.f32 %v3560_v55  ;;  %v14195_v27 = vld [vmem:[#allocation309_spill] sm:$0xff] }
 0x40c   :  { %v10701_v46 = vpop.permute.xlu0 %4330  ;;  %v3549_v8 = vadd.f32 1e-05, %v3405_v3  ;;  %v14188_v18 = vsub.f32 %v14186_v52, %v14187_v61  ;;  %v14190_v3 = vld [vmem:[#allocation378_spill] sm:$0xff]  ;;  %v3844_v55 = vld [vmem:[%s12814_s3 + $0x338] sm:$0xff] }
 0x40d   :  { %14173 = vst [vmem:[#allocation270_spill] sm:$0xff] %v10701_v46  ;;  %4650 = vperm.xlu0 %6434, %v3980_v12   ;;  %v6839_v12 = vpop.eup %6838  ;;  %v3562_v7 = vadd.f32 1e-05, %v3418_v10  ;;  %v14192_v1 = vsub.f32 %v14190_v3, %v14191_v32  ;;  %v14199_v3 = vld [vmem:[#allocation387_spill] sm:$0xff] }
 0x40e   :  { %4595 = vperm.xlu1 %6435, %v3969_v41   ;;  %v10712_v53 = vpop.permute.xlu1 %4275  ;;  %v6841_v23 = vpop.eup %6840  ;;  %v3829_v41 = vld [vmem:[%s12814_s3 + $0x2c0] sm:$0xff]  ;;  %v3407_v16 = vmax.f32 %v14188_v18, 0.0  ;;  %v3984_v26 = vmul.f32 %v6839_v12, %v3840_v62  ;;  %6856 = vrsqrt.f32 %v3549_v8 }
 0x40f   :  { %14177 = vst [vmem:[#allocation287_spill] sm:$0xff] %v10712_v53  ;;  %v3973_v53 = vmul.f32 %v6841_v23, %v3829_v41  ;;  %v3420_v12 = vmax.f32 %v14192_v1, 0.0  ;;  %v14194_v41 = vld [vmem:[#allocation310_spill] sm:$0xff]  ;;  %6858 = vrsqrt.f32 %v3562_v7  ;;  %v3846_v7 = vld [vmem:[%s12814_s3 + $0x348] sm:$0xff] }
 0x410   :  { %v10717_v46 = vpop.permute.xlu0 %4340  ;;  %v3551_v23 = vadd.f32 1e-05, %v3407_v16  ;;  %v14196_v52 = vsub.f32 %v14194_v41, %v14195_v27  ;;  %v14198_v16 = vld [vmem:[#allocation388_spill] sm:$0xff]  ;;  %v14203_v1 = vld [vmem:[#allocation326_spill] sm:$0xff] }
 0x411   :  { %14181 = vst [vmem:[#allocation286_spill] sm:$0xff] %v10717_v46  ;;  %4660 = vperm.xlu0 %6434, %v3982_v14   ;;  %v6843_v14 = vpop.eup %6842  ;;  %v3564_v8 = vadd.f32 1e-05, %v3420_v12  ;;  %v14200_v32 = vsub.f32 %v14198_v16, %v14199_v3  ;;  %v14206_v16 = vld [vmem:[#allocation398_spill] sm:$0xff] }
 0x412   :  { %4605 = vperm.xlu1 %6435, %v3971_v57   ;;  %v10728_v2 = vpop.permute.xlu1 %4285  ;;  %v6845_v60 = vpop.eup %6844  ;;  %v3831_v57 = vld [vmem:[%s12814_s3 + $0x2d0] sm:$0xff]  ;;  %v3409_v61 = vmax.f32 %v14196_v52, 0.0  ;;  %v3986_v18 = vmul.f32 %v6843_v14, %v3842_v35  ;;  %6860 = vrsqrt.f32 %v3551_v23 }
 0x413   :  { %14185 = vst [vmem:[#allocation303_spill] sm:$0xff] %v10728_v2  ;;  %v3975_v2 = vmul.f32 %v6845_v60, %v3831_v57  ;;  %v3422_v14 = vmax.f32 %v14200_v32, 0.0  ;;  %v14202_v57 = vld [vmem:[#allocation327_spill] sm:$0xff]  ;;  %v3835_v23 = vld [vmem:[%s12814_s3 + $0x2f0] sm:$0xff]  ;;  %6862 = vrsqrt.f32 %v3564_v8 }
 0x414   :  { %v10733_v46 = vpop.permute.xlu0 %4350  ;;  %v3553_v60 = vadd.f32 1e-05, %v3409_v61  ;;  %v14204_v41 = vsub.f32 %v14202_v57, %v14203_v1  ;;  %v14211_v57 = vld [vmem:[#allocation344_spill] sm:$0xff]  ;;  %v14212_v1 = vld [vmem:[#allocation343_spill] sm:$0xff] }
 0x415   :  { %14189 = vst [vmem:[#allocation302_spill] sm:$0xff] %v10733_v46  ;;  %4670 = vperm.xlu0 %6434, %v3984_v26   ;;  %v6847_v26 = vpop.eup %6846  ;;  %v3566_v61 = vadd.f32 1e-05, %v3422_v14 }
 0x416   :  { %4615 = vperm.xlu1 %6435, %v3973_v53   ;;  %v10744_v62 = vpop.permute.xlu1 %4295  ;;  %v6849_v10 = vpop.eup %6848  ;;  %v3833_v53 = vld [vmem:[%s12814_s3 + $0x2e0] sm:$0xff]  ;;  %v3411_v27 = vmax.f32 %v14204_v41, 0.0  ;;  %v3988_v52 = vmul.f32 %v6847_v26, %v3844_v55  ;;  %6864 = vrsqrt.f32 %v3553_v60  ;;  %v14213_v41 = vsub.f32 %v14211_v57, %v14212_v1  ;;  %v14217_v60 = vld [vmem:[#allocation355_spill] sm:$0xff] }
 0x417   :  { %14193 = vst [vmem:[#allocation322_spill] sm:$0xff] %v10744_v62  ;;  %v3977_v62 = vmul.f32 %v6849_v10, %v3833_v53  ;;  %v14209_v26 = vld [vmem:[#allocation418_spill] sm:$0xff]  ;;  %6866 = vrsqrt.f32 %v3566_v61  ;;  %v14220_v57 = vld [vmem:[#allocation407_spill] sm:$0xff] }
 0x418   :  { %v10749_v46 = vpop.permute.xlu0 %4360  ;;  %v2996_v55 = vmul.f32 0.020408163, %v14209_v26  ;;  %v3555_v53 = vadd.f32 1e-05, %v3411_v27  ;;  %v14216_v26 = vld [vmem:[#allocation356_spill] sm:$0xff] }
 0x419   :  { %14197 = vst [vmem:[#allocation321_spill] sm:$0xff] %v10749_v46  ;;  %4680 = vperm.xlu0 %6434, %v3986_v18   ;;  %v6851_v18 = vpop.eup %6850  ;;  %v14218_v27 = vsub.f32 %v14216_v26, %v14217_v60 }
 0x41a   :  { %4625 = vperm.xlu1 %6435, %v3975_v2   ;;  %v10760_v35 = vpop.permute.xlu1 %4305  ;;  %v6853_v12 = vpop.eup %6852  ;;  %v14207_v2 = vld [vmem:[#allocation397_spill] sm:$0xff]  ;;  %6868 = vrsqrt.f32 %v3555_v53 }
 0x41b   :  { %14201 = vst [vmem:[#allocation339_spill] sm:$0xff] %v10760_v35  ;;  %v14208_v3 = vsub.f32 %v14206_v16, %v14207_v2  ;;  %v3990_v16 = vmul.f32 %v6851_v18, %v3846_v7  ;;  %v6855_v2 = vpop.eup %6854  ;;  %v3979_v8 = vmul.f32 %v6853_v12, %v3835_v23  ;;  %v3837_v18 = vld [vmem:[%s12814_s3 + $0x300] sm:$0xff]  ;;  %v14219_v7 = vld [vmem:[#allocation408_spill] sm:$0xff] }
 0x41c   :  { %v10765_v46 = vpop.permute.xlu0 %4370  ;;  %v6857_v14 = vpop.eup %6856  ;;  %v14221_v1 = vsub.f32 %v14219_v7, %v14220_v57  ;;  %v3850_v7 = vld [vmem:[%s12814_s3 + $0x368] sm:$0xff] }
 0x41d   :  { %14205 = vst [vmem:[#allocation338_spill] sm:$0xff] %v10765_v46  ;;  %v3424_v32 = vmax.f32 %v14208_v3, 0.0  ;;  %4690 = vperm.xlu0 %6434, %v3988_v52   ;;  %v3413_v46 = vmax.f32 %v14213_v41, 0.0  ;;  %v14214_v52 = vld [vmem:[#allocation412_spill] sm:$0xff]  ;;  %v14222_v41 = vld [vmem:[#allocation425_spill] sm:$0xff]  ;;  %v3981_v61 = vmul.f32 %v6857_v14, %v3837_v18  ;;  %v14228_v14 = vld [vmem:[#allocation366_spill] sm:$0xff] }
 0x41e   :  { %4635 = vperm.xlu1 %6435, %v3977_v62   ;;  %v10777_v10 = vpop.permute.xlu1 %4315  ;;  %v3140_v3 = vmul.f32 %v14214_v52, %v14214_v52  ;;  %v3848_v62 = vld [vmem:[%s12814_s3 + $0x358] sm:$0xff]  ;;  %v3426_v12 = vmax.f32 %v14221_v1, 0.0  ;;  %v2998_v52 = vmul.f32 0.020408163, %v14222_v41 }
 0x41f   :  { %14210 = vst [vmem:[#allocation354_spill] sm:$0xff] %v10777_v10  ;;  %v3415_v10 = vmax.f32 %v14218_v27, 0.0  ;;  %v3568_v56 = vadd.f32 1e-05, %v3424_v32  ;;  %v3557_v26 = vadd.f32 1e-05, %v3413_v46  ;;  %v3992_v60 = vmul.f32 %v6855_v2, %v3848_v62  ;;  %v6859_v32 = vpop.eup %6858 }
 0x420   :  { %v10784_v35 = vpop.permute.xlu0 %4380  ;;  %v3284_v23 = vsub.f32 %v2996_v55, %v3140_v3  ;;  %v6861_v55 = vpop.eup %6860  ;;  %v3839_v46 = vld [vmem:[%s12814_s3 + $0x310] sm:$0xff]  ;;  %v3570_v53 = vadd.f32 1e-05, %v3426_v12  ;;  %v14229_v18 = vld [vmem:[#allocation365_spill] sm:$0xff] }
 0x421   :  { %14215 = vst [vmem:[#allocation364_spill] sm:$0xff] %v10784_v35  ;;  %4700 = vperm.xlu0 %6434, %v3990_v16   ;;  %v14224_v16 = vld [vmem:[#allocation422_spill] sm:$0xff]  ;;  %v3559_v3 = vadd.f32 1e-05, %v3415_v10  ;;  %6870 = vrsqrt.f32 %v3568_v56  ;;  %v14226_v62 = vld [vmem:[#allocation432_spill] sm:$0xff]  ;;  %v14230_v41 = vsub.f32 %v14228_v14, %v14229_v18  ;;  %v3994_v10 = vmul.f32 %v6859_v32, %v3850_v7  ;;  %v6863_v56 = vpop.eup %6862  ;;  %v14236_v18 = vld [vmem:[#allocation375_spill] sm:$0xff] }
 0x422   :  { %4645 = vperm.xlu1 %6435, %v3979_v8   ;;  %v10799_v35 = vpop.permute.xlu1 %4325  ;;  %v3142_v27 = vmul.f32 %v14224_v16, %v14224_v16  ;;  %v3428_v2 = vmax.f32 %v3284_v23, 0.0  ;;  %v3000_v57 = vmul.f32 0.020408163, %v14226_v62  ;;  %6872 = vrsqrt.f32 %v3557_v26  ;;  %v6865_v23 = vpop.eup %6864  ;;  %v3841_v32 = vld [vmem:[%s12814_s3 + $0x320] sm:$0xff] }
 0x423   :  { %14223 = vst [vmem:[#allocation363_spill] sm:$0xff] %v10799_v35  ;;  %v3417_v16 = vmax.f32 %v14230_v41, 0.0  ;;  %v3983_v12 = vmul.f32 %v6861_v55, %v3839_v46  ;;  %6874 = vrsqrt.f32 %v3559_v3  ;;  %v14235_v46 = vld [vmem:[#allocation376_spill] sm:$0xff]  ;;  %v3985_v30 = vmul.f32 %v6865_v23, %v3841_v32 }
 0x424   :  { %v10803_v31 = vpop.permute.xlu0 %4390  ;;  %v3286_v8 = vsub.f32 %v2998_v52, %v3142_v27  ;;  %v3852_v52 = vld [vmem:[%s12814_s3 + $0x378] sm:$0xff]  ;;  %v14233_v27 = vld [vmem:[#allocation80_spill] sm:$0xff]  ;;  %6876 = vrsqrt.f32 %v3570_v53  ;;  %v14237_v41 = vsub.f32 %v14235_v46, %v14236_v18  ;;  %v14242_v46 = vld [vmem:[#allocation386_spill] sm:$0xff] }
 0x425   :  { %14225 = vst [vmem:[#allocation374_spill] sm:$0xff] %v10803_v31  ;;  %4710 = vperm.xlu0 %6434, %v3992_v60   ;;  %v14231_v60 = vld [vmem:[#allocation429_spill] sm:$0xff]  ;;  %v3002_v26 = vmul.f32 0.020408163, %v14233_v27  ;;  %v3561_v55 = vadd.f32 1e-05, %v3417_v16 }
 0x426   :  { %4655 = vperm.xlu1 %6435, %v3981_v61   ;;  %v10812_v1 = vpop.permute.xlu1 %4335  ;;  %v3144_v31 = vmul.f32 %v14231_v60, %v14231_v60  ;;  %v3572_v61 = vadd.f32 1e-05, %v3428_v2  ;;  %v3430_v7 = vmax.f32 %v3286_v8, 0.0  ;;  %v3419_v60 = vmax.f32 %v14237_v41, 0.0  ;;  %v14238_v3 = vld [vmem:[#allocation436_spill] sm:$0xff]  ;;  %v14243_v18 = vld [vmem:[#allocation385_spill] sm:$0xff] }
 0x427   :  { %14227 = vst [vmem:[#allocation373_spill] sm:$0xff] %v10812_v1  ;;  %v3146_v27 = vmul.f32 %v14238_v3, %v14238_v3  ;;  %v3843_v16 = vld [vmem:[%s12814_s3 + $0x330] sm:$0xff]  ;;  %v14244_v41 = vsub.f32 %v14242_v46, %v14243_v18  ;;  %v14249_v18 = vld [vmem:[#allocation177_spill] sm:$0xff] }
 0x428   :  { %v10819_v35 = vpop.permute.xlu0 %4400  ;;  %v3288_v62 = vsub.f32 %v3000_v57, %v3144_v31  ;;  %v3854_v31 = vld [vmem:[%s12814_s3 + $0x388] sm:$0xff]  ;;  %6878 = vrsqrt.f32 %v3572_v61  ;;  %v3574_v8 = vadd.f32 1e-05, %v3430_v7  ;;  %v3563_v32 = vadd.f32 1e-05, %v3419_v60 }
 0x429   :  { %14232 = vst [vmem:[#allocation416_spill] sm:$0xff] %v10819_v35  ;;  %4720 = vperm.xlu0 %6434, %v3994_v10   ;;  %v3996_v10 = vmul.f32 %v6863_v56, %v3852_v52  ;;  %v6867_v35 = vpop.eup %6866  ;;  %v3290_v2 = vsub.f32 %v3002_v26, %v3146_v27  ;;  %6880 = vrsqrt.f32 %v3561_v55  ;;  %v3421_v26 = vmax.f32 %v14244_v41, 0.0  ;;  %v14248_v55 = vld [vmem:[#allocation411_spill] sm:$0xff] }
 0x42a   :  { %4665 = vperm.xlu1 %6435, %v3983_v12   ;;  %v10828_v14 = vpop.permute.xlu1 %4345  ;;  %v6869_v53 = vpop.eup %6868  ;;  %v3432_v57 = vmax.f32 %v3288_v62, 0.0  ;;  %v14240_v12 = vld [vmem:[#allocation144_spill] sm:$0xff]  ;;  %v3998_v27 = vmul.f32 %v6867_v35, %v3854_v31  ;;  %v3139_v60 = vmul.f32 %v14248_v55, %v14248_v55  ;;  %v3845_v35 = vld [vmem:[%s12814_s3 + $0x340] sm:$0xff]  ;;  %6882 = vrsqrt.f32 %v3574_v8 }
 0x42b   :  { %14234 = vst [vmem:[#allocation415_spill] sm:$0xff] %v10828_v14  ;;  %v3004_v56 = vmul.f32 0.020408163, %v14240_v12  ;;  %v6871_v23 = vpop.eup %6870  ;;  %v3987_v62 = vmul.f32 %v6869_v53, %v3843_v16  ;;  %v3006_v41 = vmul.f32 0.020408163, %v14249_v18  ;;  %6884 = vrsqrt.f32 %v3563_v32  ;;  %v14257_v32 = vld [vmem:[#allocation405_spill] sm:$0xff] }
 0x42c   :  { %v10835_v1 = vpop.permute.xlu0 %4410  ;;  %v6873_v12 = vpop.eup %6872  ;;  %v3576_v31 = vadd.f32 1e-05, %v3432_v57  ;;  %v3150_v8 = vmul.f32 %v14254_v11, %v14254_v11 }
 0x42d   :  { %14239 = vst [vmem:[#allocation384_spill] sm:$0xff] %v10835_v1  ;;  %4730 = vperm.xlu0 %6434, %v3996_v10   ;;  %v14245_v10 = vld [vmem:[#allocation417_spill] sm:$0xff]  ;;  %v14246_v1 = vld [vmem:[#allocation94_spill] sm:$0xff]  ;;  %v6875_v16 = vpop.eup %6874 }
 0x42e   :  { %4675 = vperm.xlu1 %6435, %v3985_v30   ;;  %v10844_v52 = vpop.permute.xlu1 %4355  ;;  %v2995_v3 = vmul.f32 0.020408163, %v14245_v10  ;;  %v3148_v61 = vmul.f32 %v14246_v1, %v14246_v1  ;;  %v3856_v30 = vld [vmem:[%s12814_s3 + $0x398] sm:$0xff]  ;;  %v3565_v10 = vadd.f32 1e-05, %v3421_v26  ;;  %v14251_v1 = vld [vmem:[#allocation396_spill] sm:$0xff]  ;;  %v6877_v14 = vpop.eup %6876  ;;  %6886 = vrsqrt.f32 %v3576_v31 }
 0x42f   :  { %14241 = vst [vmem:[#allocation383_spill] sm:$0xff] %v10844_v52  ;;  %v3434_v52 = vmax.f32 %v3290_v2, 0.0 }
 0x430   :  { %v10852_v7 = vpop.permute.xlu0 %4420  ;;  %v3292_v46 = vsub.f32 %v3004_v56, %v3148_v61  ;;  %v3283_v37 = vsub.f32 %v2995_v3, %v3139_v60  ;;  %v3989_v56 = vmul.f32 %v6873_v12, %v3845_v35  ;;  %v3858_v61 = vld [vmem:[%s12814_s3 + $0x3a8] sm:$0xff]  ;;  %v3847_v3 = vld [vmem:[%s12814_s3 + $0x350] sm:$0xff]  ;;  %v14260_v12 = vld [vmem:[#allocation193_spill] sm:$0xff]  ;;  %6888 = vrsqrt.f32 %v3565_v10 }
 0x431   :  { %14247 = vst [vmem:[#allocation394_spill] sm:$0xff] %v10852_v7  ;;  %4740 = vperm.xlu0 %6434, %v3998_v27   ;;  %v14252_v7 = vld [vmem:[#allocation395_spill] sm:$0xff]  ;;  %v4000_v27 = vmul.f32 %v6871_v23, %v3856_v30  ;;  %v3294_v30 = vsub.f32 %v3006_v41, %v3150_v8  ;;  %v3991_v31 = vmul.f32 %v6875_v16, %v3847_v3 }
 0x432   :  { %4685 = vperm.xlu1 %6435, %v3987_v62   ;;  %v10863_v53 = vpop.permute.xlu1 %4365  ;;  %v14253_v55 = vsub.f32 %v14251_v1, %v14252_v7  ;;  %v14256_v62 = vld [vmem:[#allocation406_spill] sm:$0xff]  ;;  %v3578_v7 = vadd.f32 1e-05, %v3434_v52  ;;  %v3436_v23 = vmax.f32 %v3292_v46, 0.0  ;;  %v6879_v52 = vpop.eup %6878  ;;  %v3860_v46 = vld [vmem:[%s12814_s3 + $0x3b8] sm:$0xff]  ;;  %v14263_v3 = vld [vmem:[#allocation431_spill] sm:$0xff] }
 0x433   :  { %14250 = vst [vmem:[#allocation393_spill] sm:$0xff] %v10863_v53  ;;  %v14258_v26 = vsub.f32 %v14256_v62, %v14257_v32  ;;  %v14259_v53 = vld [vmem:[#allocation424_spill] sm:$0xff]  ;;  %v14261_v62 = vld [vmem:[#allocation421_spill] sm:$0xff]  ;;  %v6881_v41 = vpop.eup %6880 }
 0x434   :  { %v3423_v2 = vmax.f32 %v14253_v55, 0.0  ;;  %v10870_v57 = vpop.permute.xlu0 %4430  ;;  %v2997_v1 = vmul.f32 0.020408163, %v14259_v53  ;;  %v3008_v55 = vmul.f32 0.020408163, %v14260_v12  ;;  %v3141_v32 = vmul.f32 %v14261_v62, %v14261_v62 }
 0x435   :  { %14255 = vst [vmem:[#allocation404_spill] sm:$0xff] %v10870_v57  ;;  %v3425_v18 = vmax.f32 %v14258_v26, 0.0  ;;  %4750 = vperm.xlu0 %6434, %v4000_v27   ;;  %v4002_v53 = vmul.f32 %v6877_v14, %v3858_v61  ;;  %v3427_v27 = vmax.f32 %v3283_v37, 0.0  ;;  %v14262_v26 = vld [vmem:[#allocation127_spill] sm:$0xff]  ;;  %6890 = vrsqrt.f32 %v3578_v7  ;;  %v3849_v14 = vld [vmem:[%s12814_s3 + $0x360] sm:$0xff] }
 0x436   :  { %4695 = vperm.xlu1 %6435, %v3989_v56   ;;  %v10883_v60 = vpop.permute.xlu1 %4375  ;;  %v3567_v35 = vadd.f32 1e-05, %v3423_v2  ;;  %v3152_v11 = vmul.f32 %v14262_v26, %v14262_v26  ;;  %v3285_v10 = vsub.f32 %v2997_v1, %v3141_v32  ;;  %v3580_v37 = vadd.f32 1e-05, %v3436_v23 }
 0x437   :  { %v3569_v8 = vadd.f32 1e-05, %v3425_v18  ;;  %v3438_v2 = vmax.f32 %v3294_v30, 0.0  ;;  %v3010_v61 = vmul.f32 0.020408163, %v10420_v59  ;;  %v4004_v62 = vmul.f32 %v6879_v52, %v3860_v46  ;;  %v6883_v18 = vpop.eup %6882  ;;  %v14264_v30 = vld [vmem:[#allocation428_spill] sm:$0xff] }
 0x438   :  { %v10889_v57 = vpop.permute.xlu0 %4440  ;;  %v3296_v56 = vsub.f32 %v3008_v55, %v3152_v11  ;;  %6892 = vrsqrt.f32 %v3567_v35  ;;  %v2999_v12 = vmul.f32 0.020408163, %v14263_v3  ;;  %v3571_v1 = vadd.f32 1e-05, %v3427_v27  ;;  %v3862_v11 = vld [vmem:[%s12814_s3 + $0x3c8] sm:$0xff]  ;;  %v6885_v59 = vpop.eup %6884  ;;  %v3851_v52 = vld [vmem:[%s12814_s3 + $0x370] sm:$0xff] }
 0x439   :  { %4760 = vperm.xlu0 %6434, %v4002_v53   ;;  %v3154_v7 = vmul.f32 %v10103_v9, %v10103_v9  ;;  %v3993_v53 = vmul.f32 %v6881_v41, %v3849_v14  ;;  %6894 = vrsqrt.f32 %v3569_v8  ;;  %v3429_v23 = vmax.f32 %v3285_v10, 0.0  ;;  %v14265_v8 = vld [vmem:[#allocation79_spill] sm:$0xff] }
 0x43a   :  { %4705 = vperm.xlu1 %6435, %v3991_v31   ;;  %v10898_v16 = vpop.permute.xlu1 %4385  ;;  %v3143_v55 = vmul.f32 %v14264_v30, %v14264_v30  ;;  %v3012_v35 = vmul.f32 0.020408163, %v10433_v38  ;;  %6896 = vrsqrt.f32 %v3580_v37  ;;  %v3582_v27 = vadd.f32 1e-05, %v3438_v2  ;;  %v6887_v38 = vpop.eup %6886  ;;  %v3864_v37 = vld [vmem:[%s12814_s3 + $0x3d8] sm:$0xff] }
 0x43b   :  { %v3440_v31 = vmax.f32 %v3296_v56, 0.0  ;;  %v3298_v46 = vsub.f32 %v3010_v61, %v3154_v7  ;;  %v3001_v10 = vmul.f32 0.020408163, %v14265_v8  ;;  %v3156_v3 = vmul.f32 %v10159_v28, %v10159_v28  ;;  %v6889_v2 = vpop.eup %6888  ;;  %v14266_v61 = vld [vmem:[#allocation435_spill] sm:$0xff]  ;;  %v14267_v7 = vld [vmem:[#allocation145_spill] sm:$0xff] }
 0x43c   :  { %v10903_v32 = vpop.permute.xlu0 %4450  ;;  %v3287_v14 = vsub.f32 %v2999_v12, %v3143_v55  ;;  %v4006_v30 = vmul.f32 %v6883_v18, %v3862_v11  ;;  %6898 = vrsqrt.f32 %v3571_v1  ;;  %v3995_v9 = vmul.f32 %v6885_v59, %v3851_v52  ;;  %v3853_v18 = vld [vmem:[%s12814_s3 + $0x380] sm:$0xff] }
 0x43d   :  { %4770 = vperm.xlu0 %6434, %v4004_v62   ;;  %v3573_v56 = vadd.f32 1e-05, %v3429_v23  ;;  %v3145_v12 = vmul.f32 %v14266_v61, %v14266_v61  ;;  %v3300_v55 = vsub.f32 %v3012_v35, %v3156_v3  ;;  %6900 = vrsqrt.f32 %v3582_v27  ;;  %v14268_v61 = vld [vmem:[#allocation95_spill] sm:$0xff] }
 0x43e   :  { %4715 = vperm.xlu1 %6435, %v3993_v53   ;;  %v10914_v41 = vpop.permute.xlu1 %4395  ;;  %v3003_v53 = vmul.f32 0.020408163, %v14267_v7  ;;  %v3584_v1 = vadd.f32 1e-05, %v3440_v31  ;;  %v3442_v11 = vmax.f32 %v3298_v46, 0.0  ;;  %v3431_v8 = vmax.f32 %v3287_v14, 0.0 }
 0x43f   :  { %v3014_v59 = vmul.f32 0.020408163, %v10448_v19  ;;  %v6891_v23 = vpop.eup %6890  ;;  %v3289_v28 = vsub.f32 %v3001_v10, %v3145_v12  ;;  %v3147_v7 = vmul.f32 %v14268_v61, %v14268_v61  ;;  %v4008_v35 = vmul.f32 %v6887_v38, %v3864_v37  ;;  %v3866_v19 = vld [vmem:[%s12814_s3 + $0x3e8] sm:$0xff]  ;;  %v14269_v46 = vld [vmem:[#allocation110_spill] sm:$0xff]  ;;  %v3855_v38 = vld [vmem:[%s12814_s3 + $0x390] sm:$0xff] }
 0x440   :  { %v10919_v62 = vpop.permute.xlu0 %4460  ;;  %v3997_v27 = vmul.f32 %v6889_v2, %v3853_v18  ;;  %6902 = vrsqrt.f32 %v3573_v56  ;;  %v3005_v14 = vmul.f32 0.020408163, %v14269_v46  ;;  %v3444_v10 = vmax.f32 %v3300_v55, 0.0 }
 0x441   :  { %4780 = vperm.xlu0 %6434, %v4006_v30   ;;  %v3158_v30 = vmul.f32 %v10224_v45, %v10224_v45  ;;  %v3291_v31 = vsub.f32 %v3003_v53, %v3147_v7  ;;  %6904 = vrsqrt.f32 %v3584_v1  ;;  %v3586_v37 = vadd.f32 1e-05, %v3442_v11  ;;  %v14270_v53 = vld [vmem:[#allocation161_spill] sm:$0xff] }
 0x442   :  { %4725 = vperm.xlu1 %6435, %v3995_v9   ;;  %v10931_v52 = vpop.permute.xlu1 %4405  ;;  %v6893_v9 = vpop.eup %6892  ;;  %v3016_v2 = vmul.f32 0.020408163, %v10464_v49  ;;  %v3575_v45 = vadd.f32 1e-05, %v3431_v8  ;;  %v3433_v56 = vmax.f32 %v3289_v28, 0.0  ;;  %v3149_v7 = vmul.f32 %v14270_v53, %v14270_v53  ;;  %v3868_v49 = vld [vmem:[%s12814_s3 + $0x3f8] sm:$0xff] }
 0x443   :  { %v3302_v12 = vsub.f32 %v3014_v59, %v3158_v30  ;;  %v6895_v61 = vpop.eup %6894  ;;  %v4010_v55 = vmul.f32 %v6891_v23, %v3866_v19  ;;  %v3160_v46 = vmul.f32 %v10278_v22, %v10278_v22  ;;  %v3999_v1 = vmul.f32 %v6893_v9, %v3855_v38  ;;  %v3857_v28 = vld [vmem:[%s12814_s3 + $0x3a0] sm:$0xff] }
 0x444   :  { %v10937_v3 = vpop.permute.xlu0 %4470  ;;  %v3435_v11 = vmax.f32 %v3291_v31, 0.0  ;;  %v3293_v59 = vsub.f32 %v3005_v14, %v3149_v7  ;;  %v3588_v30 = vadd.f32 1e-05, %v3444_v10  ;;  %6906 = vrsqrt.f32 %v3586_v37  ;;  %v14271_v53 = vld [vmem:[#allocation126_spill] sm:$0xff]  ;;  %v3870_v37 = vld [vmem:[%s12814_s3 + $0x408] sm:$0xff] }
 0x445   :  { %4790 = vperm.xlu0 %6434, %v4008_v35   ;;  %v6897_v35 = vpop.eup %6896  ;;  %v3446_v8 = vmax.f32 %v3302_v12, 0.0  ;;  %v3018_v19 = vmul.f32 0.020408163, %v10480_v54  ;;  %6908 = vrsqrt.f32 %v3575_v45  ;;  %v3577_v38 = vadd.f32 1e-05, %v3433_v56  ;;  %v3859_v56 = vld [vmem:[%s12814_s3 + $0x3b0] sm:$0xff] }
 0x446   :  { %4735 = vperm.xlu1 %6435, %v3997_v27   ;;  %v10947_v18 = vpop.permute.xlu1 %4415  ;;  %v6899_v23 = vpop.eup %6898  ;;  %v3304_v27 = vsub.f32 %v3016_v2, %v3160_v46  ;;  %v3007_v31 = vmul.f32 0.020408163, %v14271_v53  ;;  %v4012_v14 = vmul.f32 %v6897_v35, %v3868_v49  ;;  %v3162_v7 = vmul.f32 %v10339_v5, %v10339_v5  ;;  %v14272_v2 = vld [vmem:[#allocation112_spill] sm:$0xff] }
 0x447   :  { %v6901_v10 = vpop.eup %6900  ;;  %v4001_v22 = vmul.f32 %v6895_v61, %v3857_v28  ;;  %v3579_v54 = vadd.f32 1e-05, %v3435_v11  ;;  %v3437_v12 = vmax.f32 %v3293_v59, 0.0  ;;  %v3151_v45 = vmul.f32 %v14272_v2, %v14272_v2 }
 0x448   :  { %v10953_v26 = vpop.permute.xlu0 %4480  ;;  %6910 = vrsqrt.f32 %v3588_v30  ;;  %v3590_v53 = vadd.f32 1e-05, %v3446_v8  ;;  %v3448_v35 = vmax.f32 %v3304_v27, 0.0  ;;  %v3306_v46 = vsub.f32 %v3018_v19, %v3162_v7 }
 0x449   :  { %4800 = vperm.xlu0 %6434, %v4010_v55   ;;  %v3020_v61 = vmul.f32 0.020408163, %v10494_v43  ;;  %6912 = vrsqrt.f32 %v3577_v38  ;;  %v3295_v11 = vsub.f32 %v3007_v31, %v3151_v45  ;;  %v3009_v59 = vmul.f32 0.020408163, %v10409_v36  ;;  %v3872_v43 = vld [vmem:[%s12814_s3 + $0x418] sm:$0xff]  ;;  %v3861_v36 = vld [vmem:[%s12814_s3 + $0x3c0] sm:$0xff] }
 0x44a   :  { %4745 = vperm.xlu1 %6435, %v3999_v1   ;;  %v10962_v9 = vpop.permute.xlu1 %4425  ;;  %v6903_v49 = vpop.eup %6902  ;;  %v4014_v28 = vmul.f32 %v6901_v10, %v3870_v37  ;;  %v4003_v8 = vmul.f32 %v6899_v23, %v3859_v56  ;;  %6914 = vrsqrt.f32 %v3579_v54  ;;  %v3153_v27 = vmul.f32 %v10093_v13, %v10093_v13 }
 0x44b   :  { %v6905_v30 = vpop.eup %6904  ;;  %v3011_v19 = vmul.f32 0.020408163, %v10424_v17  ;;  %6916 = vrsqrt.f32 %v3590_v53  ;;  %v3592_v38 = vadd.f32 1e-05, %v3448_v35  ;;  %v3450_v31 = vmax.f32 %v3306_v46, 0.0  ;;  %v3874_v53 = vld [vmem:[%s12814_s3 + $0x428] sm:$0xff] }
 0x44c   :  { %v10967_v55 = vpop.permute.xlu0 %4490  ;;  %v3439_v7 = vmax.f32 %v3295_v11, 0.0  ;;  %v3155_v37 = vmul.f32 %v10149_v44, %v10149_v44  ;;  %v3297_v54 = vsub.f32 %v3009_v59, %v3153_v27  ;;  %v4005_v56 = vmul.f32 %v6903_v49, %v3861_v36 }
 0x44d   :  { %4810 = vperm.xlu0 %6434, %v4012_v14   ;;  %v3164_v14 = vmul.f32 %v10388_v4, %v10388_v4  ;;  %v3013_v11 = vmul.f32 0.020408163, %v10437_v21  ;;  %6918 = vrsqrt.f32 %v3592_v38  ;;  %v3594_v59 = vadd.f32 1e-05, %v3450_v31  ;;  %v3876_v21 = vld [vmem:[%s12814_s3 + $0x438] sm:$0xff]  ;;  %v3865_v31 = vld [vmem:[%s12814_s3 + $0x3e0] sm:$0xff] }
 0x44e   :  { %4755 = vperm.xlu1 %6435, %v4001_v22   ;;  %v10978_v1 = vpop.permute.xlu1 %4435  ;;  %v3581_v22 = vadd.f32 1e-05, %v3437_v12  ;;  %v4016_v12 = vmul.f32 %v6905_v30, %v3872_v43  ;;  %v6907_v45 = vpop.eup %6906  ;;  %v3299_v46 = vsub.f32 %v3011_v19, %v3155_v37  ;;  %v3157_v27 = vmul.f32 %v10212_v63, %v10212_v63 }
 0x44f   :  { %v3308_v23 = vsub.f32 %v3020_v61, %v3164_v14  ;;  %v6909_v35 = vpop.eup %6908  ;;  %v3863_v61 = vld [vmem:[%s12814_s3 + $0x3d0] sm:$0xff]  ;;  %v3583_v14 = vadd.f32 1e-05, %v3439_v7  ;;  %v4018_v43 = vmul.f32 %v6907_v45, %v3874_v53  ;;  %v3015_v45 = vmul.f32 0.020408163, %v10451_v51 }
 0x450   :  { %v10983_v2 = vpop.permute.xlu0 %4500  ;;  %6920 = vrsqrt.f32 %v3581_v22  ;;  %v4007_v36 = vmul.f32 %v6909_v35, %v3863_v61  ;;  %v3443_v22 = vmax.f32 %v3299_v46, 0.0  ;;  %v3878_v46 = vld [vmem:[%s12814_s3 + $0x448] sm:$0xff] }
 0x451   :  { %4820 = vperm.xlu0 %6434, %v4014_v28   ;;  %v3452_v28 = vmax.f32 %v3308_v23, 0.0  ;;  %v3301_v23 = vsub.f32 %v3013_v11, %v3157_v27  ;;  %6922 = vrsqrt.f32 %v3594_v59  ;;  %v3159_v11 = vmul.f32 %v10273_v25, %v10273_v25  ;;  %v3867_v59 = vld [vmem:[%s12814_s3 + $0x3f0] sm:$0xff] }
 0x452   :  { %4765 = vperm.xlu1 %6435, %v4003_v8   ;;  %v10994_v10 = vpop.permute.xlu1 %4445  ;;  %v6911_v49 = vpop.eup %6910  ;;  %v3441_v8 = vmax.f32 %v3297_v54, 0.0  ;;  %6924 = vrsqrt.f32 %v3583_v14 }
 0x453   :  { %v6913_v38 = vpop.eup %6912  ;;  %v3596_v7 = vadd.f32 1e-05, %v3452_v28  ;;  %v3587_v28 = vadd.f32 1e-05, %v3443_v22  ;;  %v3445_v14 = vmax.f32 %v3301_v23, 0.0  ;;  %v3161_v22 = vmul.f32 %v10330_v0, %v10330_v0  ;;  %v3869_v23 = vld [vmem:[%s12814_s3 + $0x400] sm:$0xff] }
 0x454   :  { %v10998_v17 = vpop.permute.xlu0 %4510  ;;  %v6915_v54 = vpop.eup %6914  ;;  %v4009_v61 = vmul.f32 %v6913_v38, %v3865_v31  ;;  %v3880_v38 = vld [vmem:[%s12814_s3 + $0x458] sm:$0xff] }
 0x455   :  { %4830 = vperm.xlu0 %6434, %v4016_v12   ;;  %v3585_v12 = vadd.f32 1e-05, %v3441_v8  ;;  %v6917_v53 = vpop.eup %6916  ;;  %6926 = vrsqrt.f32 %v3596_v7  ;;  %v3017_v8 = vmul.f32 0.020408163, %v10478_v34  ;;  %v3589_v34 = vadd.f32 1e-05, %v3445_v14 }
 0x456   :  { %4775 = vperm.xlu1 %6435, %v4005_v56   ;;  %v11007_v30 = vpop.permute.xlu1 %4455  ;;  %v4020_v56 = vmul.f32 %v6911_v49, %v3876_v21  ;;  %v3303_v49 = vsub.f32 %v3015_v45, %v3159_v11  ;;  %v4011_v21 = vmul.f32 %v6915_v54, %v3867_v59  ;;  %v3019_v45 = vmul.f32 0.020408163, %v10496_v24  ;;  %v3882_v11 = vld [vmem:[%s12814_s3 + $0x468] sm:$0xff]  ;;  %v3871_v14 = vld [vmem:[%s12814_s3 + $0x410] sm:$0xff] }
 0x457   :  { %6928 = vrsqrt.f32 %v3585_v12  ;;  %v6919_v27 = vpop.eup %6918  ;;  %v3305_v54 = vsub.f32 %v3017_v8, %v3161_v22  ;;  %v3884_v22 = vld [vmem:[%s12814_s3 + $0x478] sm:$0xff] }
 0x458   :  { %v11011_v19 = vpop.permute.xlu0 %4520  ;;  %6930 = vrsqrt.f32 %v3587_v28  ;;  %v3447_v12 = vmax.f32 %v3303_v49, 0.0  ;;  %v3163_v28 = vmul.f32 %v10380_v29, %v10380_v29 }
 0x459   :  { %4840 = vperm.xlu0 %6434, %v4018_v43   ;;  %v4022_v43 = vmul.f32 %v6917_v53, %v3878_v46  ;;  %6932 = vrsqrt.f32 %v3589_v34  ;;  %v3449_v8 = vmax.f32 %v3305_v54, 0.0  ;;  %v3873_v34 = vld [vmem:[%s12814_s3 + $0x420] sm:$0xff] }
 0x45a   :  { %4785 = vperm.xlu1 %6435, %v4007_v36   ;;  %v11019_v37 = vpop.permute.xlu1 %4465  ;;  %v6921_v31 = vpop.eup %6920  ;;  %v3591_v49 = vadd.f32 1e-05, %v3447_v12 }
 0x45b   :  { %v6923_v53 = vpop.eup %6922  ;;  %v4013_v46 = vmul.f32 %v6921_v31, %v3869_v23  ;;  %v3593_v12 = vadd.f32 1e-05, %v3449_v8 }
 0x45c   :  { %v11022_v35 = vpop.permute.xlu0 %4530  ;;  %v6925_v59 = vpop.eup %6924  ;;  %6934 = vrsqrt.f32 %v3591_v49 }
 0x45d   :  { %4850 = vperm.xlu0 %6434, %v4020_v56   ;;  %v4024_v56 = vmul.f32 %v6919_v27, %v3880_v38  ;;  %v4026_v27 = vmul.f32 %v6923_v53, %v3882_v11  ;;  %v4015_v31 = vmul.f32 %v6925_v59, %v3871_v14  ;;  %v3875_v59 = vld [vmem:[%s12814_s3 + $0x430] sm:$0xff]  ;;  %v5038_v14 = vld [vmem:[%s12815_s4 + $0x8] sm:$0xff]  ;;  %6936 = vrsqrt.f32 %v3593_v12 }
 0x45e   :  { %4795 = vperm.xlu1 %6435, %v4009_v61   ;;  %v11032_v51 = vpop.permute.xlu1 %4475 }
 0x460   :  { %v11035_v36 = vpop.permute.xlu0 %4540 }
 0x461   :  { %4860 = vperm.xlu0 %6434, %v4022_v43   ;;  %v3307_v43 = vsub.f32 %v3019_v45, %v3163_v28 }
 0x462   :  { %4805 = vperm.xlu1 %6435, %v4011_v21   ;;  %v11045_v7 = vpop.permute.xlu1 %4485  ;;  %v6927_v21 = vpop.eup %6926 }
 0x463   :  { %v6929_v23 = vpop.eup %6928  ;;  %v3451_v54 = vmax.f32 %v3307_v43, 0.0  ;;  %v4028_v45 = vmul.f32 %v6927_v21, %v3884_v22  ;;  %v3877_v21 = vld [vmem:[%s12814_s3 + $0x440] sm:$0xff]  ;;  %v5040_v22 = vld [vmem:[%s12815_s4 + $0x18] sm:$0xff] }
 0x464   :  { %v11048_v61 = vpop.permute.xlu0 %4550  ;;  %v6931_v53 = vpop.eup %6930  ;;  %v4017_v11 = vmul.f32 %v6929_v23, %v3873_v34 }
 0x465   :  { %4870 = vperm.xlu0 %6434, %v4024_v56   ;;  %v3595_v49 = vadd.f32 1e-05, %v3451_v54  ;;  %v6933_v8 = vpop.eup %6932  ;;  %v3879_v54 = vld [vmem:[%s12814_s3 + $0x450] sm:$0xff] }
 0x466   :  { %4815 = vperm.xlu1 %6435, %v4013_v46   ;;  %v11058_v24 = vpop.permute.xlu1 %4495  ;;  %v4021_v34 = vmul.f32 %v6933_v8, %v3877_v21  ;;  %v6935_v12 = vpop.eup %6934 }
 0x467   :  { %6938 = vrsqrt.f32 %v3595_v49  ;;  %v3881_v49 = vld [vmem:[%s12814_s3 + $0x460] sm:$0xff] }
 0x468   :  { %v11060_v38 = vpop.permute.xlu0 %4560 }
 0x469   :  { %4880 = vperm.xlu0 %6434, %v4026_v27   ;;  %v4019_v27 = vmul.f32 %v6931_v53, %v3875_v59  ;;  %v5042_v53 = vld [vmem:[%s12815_s4 + $0x28] sm:$0xff]  ;;  %v4023_v59 = vmul.f32 %v6935_v12, %v3879_v54  ;;  %v3883_v12 = vld [vmem:[%s12814_s3 + $0x470] sm:$0xff] }
 0x46a   :  { %4825 = vperm.xlu1 %6435, %v4015_v31   ;;  %v11068_v56 = vpop.permute.xlu1 %4505 }
 0x46c   :  { %v11070_v46 = vpop.permute.xlu0 %4570 }
 0x46d   :  { %4890 = vperm.xlu0 %6434, %v4028_v45  }
 0x46e   :  { %4835 = vperm.xlu1 %6435, %v4017_v11   ;;  %v11075_v28 = vpop.permute.xlu1 %4515 }
 0x470   :  { %v11080_v43 = vpop.permute.xlu0 %4580 }
 0x471   :  { %5188 = vperm.xlu0 %6434, %v5038_v14   ;;  %v6937_v14 = vpop.eup %6936 }
 0x472   :  { %4845 = vperm.xlu1 %6435, %v4019_v27   ;;  %v11085_v31 = vpop.permute.xlu1 %4525  ;;  %v5044_v27 = vld [vmem:[%s12815_s4 + $0x38] sm:$0xff] }
 0x474   :  { %v11090_v23 = vpop.permute.xlu0 %4590 }
 0x475   :  { %5198 = vperm.xlu0 %6434, %v5040_v22   ;;  %v4025_v22 = vmul.f32 %v6937_v14, %v3881_v49  ;;  %v5048_v14 = vld [vmem:[%s12815_s4 + $0x58] sm:$0xff]  ;;  %v5037_v49 = vld [vmem:[%s12815_s4] sm:$0xff] }
 0x476   :  { %4855 = vperm.xlu1 %6435, %v4021_v34   ;;  %v11095_v45 = vpop.permute.xlu1 %4535  ;;  %v6939_v34 = vpop.eup %6938 }
 0x477   :  { %v4027_v29 = vmul.f32 %v6939_v34, %v3883_v12  ;;  %v5039_v34 = vld [vmem:[%s12815_s4 + $0x10] sm:$0xff] }
 0x478   :  { %v11100_v11 = vpop.permute.xlu0 %4600 }
 0x479   :  { %5208 = vperm.xlu0 %6434, %v5042_v53   ;;  %v5046_v53 = vld [vmem:[%s12815_s4 + $0x48] sm:$0xff] }
 0x47a   :  { %4865 = vperm.xlu1 %6435, %v4023_v59   ;;  %v11105_v8 = vpop.permute.xlu1 %4545 }
 0x47c   :  { %v11110_v21 = vpop.permute.xlu0 %4610 }
 0x47d   :  { %5218 = vperm.xlu0 %6434, %v5044_v27  }
 0x47e   :  { %4875 = vperm.xlu1 %6435, %v4025_v22   ;;  %v11115_v54 = vpop.permute.xlu1 %4555 }
 0x480   :  { %v11120_v59 = vpop.permute.xlu0 %4620 }
 0x481   :  { %5228 = vperm.xlu0 %6434, %v5046_v53  }
 0x482   :  { %4885 = vperm.xlu1 %6435, %v4027_v29   ;;  %v11122_v0 = vpop.permute.xlu1 %4565  ;;  %v5050_v29 = vld [vmem:[%s12815_s4 + $0x68] sm:$0xff] }
 0x484   :  { %v11130_v27 = vpop.permute.xlu0 %4630 }
 0x485   :  { %5238 = vperm.xlu0 %6434, %v5048_v14   ;;  %v5052_v14 = vld [vmem:[%s12815_s4 + $0x78] sm:$0xff] }
 0x486   :  { %5183 = vperm.xlu1 %6435, %v5037_v49   ;;  %v11132_v22 = vpop.permute.xlu1 %4575  ;;  %v5041_v49 = vld [vmem:[%s12815_s4 + $0x20] sm:$0xff] }
 0x487   :  { %14273 = vst [vmem:[#allocation403_spill] sm:$0xff] %v11132_v22 }
 0x488   :  { %v11140_v12 = vpop.permute.xlu0 %4640 }
 0x489   :  { %14274 = vst [vmem:[#allocation423_spill] sm:$0xff] %v11140_v12  ;;  %5248 = vperm.xlu0 %6434, %v5050_v29   ;;  %v5054_v29 = vld [vmem:[%s12815_s4 + $0x88] sm:$0xff] }
 0x48a   :  { %5193 = vperm.xlu1 %6435, %v5039_v34   ;;  %v11142_v53 = vpop.permute.xlu1 %4585  ;;  %v5043_v34 = vld [vmem:[%s12815_s4 + $0x30] sm:$0xff] }
 0x48b   :  { %14275 = vst [vmem:[#allocation430_spill] sm:$0xff] %v11142_v53 }
 0x48c   :  { %v11150_v25 = vpop.permute.xlu0 %4650 }
 0x48d   :  { %14276 = vst [vmem:[#allocation414_spill] sm:$0xff] %v11150_v25  ;;  %5258 = vperm.xlu0 %6434, %v5052_v14   ;;  %v5056_v14 = vld [vmem:[%s12815_s4 + $0x98] sm:$0xff]  ;;  %v5091_v25 = vld [vmem:[%s12815_s4 + $0x1b0] sm:$0xff] }
 0x48e   :  { %5203 = vperm.xlu1 %6435, %v5041_v49   ;;  %v11152_v63 = vpop.permute.xlu1 %4595  ;;  %v5045_v49 = vld [vmem:[%s12815_s4 + $0x40] sm:$0xff] }
 0x48f   :  { %14277 = vst [vmem:[#allocation413_spill] sm:$0xff] %v11152_v63 }
 0x490   :  { %v11160_v44 = vpop.permute.xlu0 %4660 }
 0x491   :  { %14278 = vst [vmem:[#allocation437_spill] sm:$0xff] %v11160_v44  ;;  %5268 = vperm.xlu0 %6434, %v5054_v29   ;;  %v5058_v29 = vld [vmem:[%s12815_s4 + $0xa8] sm:$0xff] }
 0x492   :  { %5213 = vperm.xlu1 %6435, %v5043_v34   ;;  %v11162_v13 = vpop.permute.xlu1 %4605  ;;  %v5047_v34 = vld [vmem:[%s12815_s4 + $0x50] sm:$0xff] }
 0x493   :  { %14279 = vst [vmem:[#allocation111_spill] sm:$0xff] %v11162_v13 }
 0x494   :  { %v11170_v4 = vpop.permute.xlu0 %4670 }
 0x495   :  { %14280 = vst [vmem:[#allocation81_spill] sm:$0xff] %v11170_v4  ;;  %5278 = vperm.xlu0 %6434, %v5056_v14   ;;  %v5060_v14 = vld [vmem:[%s12815_s4 + $0xb8] sm:$0xff] }
 0x496   :  { %5223 = vperm.xlu1 %6435, %v5045_v49   ;;  %v11172_v5 = vpop.permute.xlu1 %4615  ;;  %v5049_v49 = vld [vmem:[%s12815_s4 + $0x60] sm:$0xff] }
 0x497   :  { %14281 = vst [vmem:[#allocation78_spill] sm:$0xff] %v11172_v5 }
 0x498   :  { %v11180_v13 = vpop.permute.xlu0 %4680 }
 0x499   :  { %14282 = vst [vmem:[#allocation101_spill] sm:$0xff] %v11180_v13  ;;  %5288 = vperm.xlu0 %6434, %v5058_v29   ;;  %v5062_v29 = vld [vmem:[%s12815_s4 + $0xc8] sm:$0xff] }
 0x49a   :  { %5233 = vperm.xlu1 %6435, %v5047_v34   ;;  %v11182_v44 = vpop.permute.xlu1 %4625  ;;  %v5051_v34 = vld [vmem:[%s12815_s4 + $0x70] sm:$0xff] }
 0x49b   :  { %14283 = vst [vmem:[#allocation100_spill] sm:$0xff] %v11182_v44 }
 0x49c   :  { %v11190_v5 = vpop.permute.xlu0 %4690 }
 0x49d   :  { %14284 = vst [vmem:[#allocation117_spill] sm:$0xff] %v11190_v5  ;;  %5298 = vperm.xlu0 %6434, %v5060_v14   ;;  %v5064_v14 = vld [vmem:[%s12815_s4 + $0xd8] sm:$0xff] }
 0x49e   :  { %5243 = vperm.xlu1 %6435, %v5049_v49   ;;  %v11192_v4 = vpop.permute.xlu1 %4635  ;;  %v5053_v49 = vld [vmem:[%s12815_s4 + $0x80] sm:$0xff] }
 0x49f   :  { %14285 = vst [vmem:[#allocation116_spill] sm:$0xff] %v11192_v4 }
 0x4a0   :  { %v11200_v44 = vpop.permute.xlu0 %4700 }
 0x4a1   :  { %14286 = vst [vmem:[#allocation133_spill] sm:$0xff] %v11200_v44  ;;  %5308 = vperm.xlu0 %6434, %v5062_v29   ;;  %v5066_v29 = vld [vmem:[%s12815_s4 + $0xe8] sm:$0xff] }
 0x4a2   :  { %5253 = vperm.xlu1 %6435, %v5051_v34   ;;  %v11202_v13 = vpop.permute.xlu1 %4645  ;;  %v5055_v34 = vld [vmem:[%s12815_s4 + $0x90] sm:$0xff] }
 0x4a3   :  { %14287 = vst [vmem:[#allocation132_spill] sm:$0xff] %v11202_v13 }
 0x4a4   :  { %v11210_v4 = vpop.permute.xlu0 %4710 }
 0x4a5   :  { %14288 = vst [vmem:[#allocation149_spill] sm:$0xff] %v11210_v4  ;;  %5318 = vperm.xlu0 %6434, %v5064_v14   ;;  %v5068_v14 = vld [vmem:[%s12815_s4 + $0xf8] sm:$0xff] }
 0x4a6   :  { %5263 = vperm.xlu1 %6435, %v5053_v49   ;;  %v11212_v5 = vpop.permute.xlu1 %4655  ;;  %v5057_v49 = vld [vmem:[%s12815_s4 + $0xa0] sm:$0xff] }
 0x4a7   :  { %14289 = vst [vmem:[#allocation148_spill] sm:$0xff] %v11212_v5 }
 0x4a8   :  { %v11220_v13 = vpop.permute.xlu0 %4720 }
 0x4a9   :  { %14290 = vst [vmem:[#allocation165_spill] sm:$0xff] %v11220_v13  ;;  %5328 = vperm.xlu0 %6434, %v5066_v29   ;;  %v5070_v29 = vld [vmem:[%s12815_s4 + $0x108] sm:$0xff] }
 0x4aa   :  { %5273 = vperm.xlu1 %6435, %v5055_v34   ;;  %v11222_v44 = vpop.permute.xlu1 %4665  ;;  %v5059_v34 = vld [vmem:[%s12815_s4 + $0xb0] sm:$0xff] }
 0x4ab   :  { %14291 = vst [vmem:[#allocation164_spill] sm:$0xff] %v11222_v44 }
 0x4ac   :  { %v11230_v5 = vpop.permute.xlu0 %4730 }
 0x4ad   :  { %14292 = vst [vmem:[#allocation88_spill] sm:$0xff] %v11230_v5  ;;  %5338 = vperm.xlu0 %6434, %v5068_v14   ;;  %v5072_v14 = vld [vmem:[%s12815_s4 + $0x118] sm:$0xff] }
 0x4ae   :  { %5283 = vperm.xlu1 %6435, %v5057_v49   ;;  %v11232_v4 = vpop.permute.xlu1 %4675  ;;  %v5061_v49 = vld [vmem:[%s12815_s4 + $0xc0] sm:$0xff] }
 0x4af   :  { %14293 = vst [vmem:[#allocation87_spill] sm:$0xff] %v11232_v4 }
 0x4b0   :  { %v11240_v44 = vpop.permute.xlu0 %4740 }
 0x4b1   :  { %14294 = vst [vmem:[#allocation181_spill] sm:$0xff] %v11240_v44  ;;  %5348 = vperm.xlu0 %6434, %v5070_v29   ;;  %v5074_v29 = vld [vmem:[%s12815_s4 + $0x128] sm:$0xff] }
 0x4b2   :  { %5293 = vperm.xlu1 %6435, %v5059_v34   ;;  %v11242_v13 = vpop.permute.xlu1 %4685  ;;  %v5063_v34 = vld [vmem:[%s12815_s4 + $0xd0] sm:$0xff] }
 0x4b3   :  { %14295 = vst [vmem:[#allocation180_spill] sm:$0xff] %v11242_v13 }
 0x4b4   :  { %v11250_v4 = vpop.permute.xlu0 %4750 }
 0x4b5   :  { %14296 = vst [vmem:[#allocation99_spill] sm:$0xff] %v11250_v4  ;;  %5358 = vperm.xlu0 %6434, %v5072_v14   ;;  %v5076_v14 = vld [vmem:[%s12815_s4 + $0x138] sm:$0xff] }
 0x4b6   :  { %5303 = vperm.xlu1 %6435, %v5061_v49   ;;  %v11252_v5 = vpop.permute.xlu1 %4695  ;;  %v5065_v49 = vld [vmem:[%s12815_s4 + $0xe0] sm:$0xff] }
 0x4b7   :  { %14297 = vst [vmem:[#allocation98_spill] sm:$0xff] %v11252_v5 }
 0x4b8   :  { %v11260_v13 = vpop.permute.xlu0 %4760 }
 0x4b9   :  { %14298 = vst [vmem:[#allocation197_spill] sm:$0xff] %v11260_v13  ;;  %5368 = vperm.xlu0 %6434, %v5074_v29   ;;  %v5078_v29 = vld [vmem:[%s12815_s4 + $0x148] sm:$0xff] }
 0x4ba   :  { %5313 = vperm.xlu1 %6435, %v5063_v34   ;;  %v11262_v44 = vpop.permute.xlu1 %4705  ;;  %v5067_v34 = vld [vmem:[%s12815_s4 + $0xf0] sm:$0xff] }
 0x4bb   :  { %14299 = vst [vmem:[#allocation196_spill] sm:$0xff] %v11262_v44 }
 0x4bc   :  { %v11270_v5 = vpop.permute.xlu0 %4770 }
 0x4bd   :  { %14300 = vst [vmem:[#allocation115_spill] sm:$0xff] %v11270_v5  ;;  %5378 = vperm.xlu0 %6434, %v5076_v14   ;;  %v5080_v14 = vld [vmem:[%s12815_s4 + $0x158] sm:$0xff] }
 0x4be   :  { %5323 = vperm.xlu1 %6435, %v5065_v49   ;;  %v11272_v4 = vpop.permute.xlu1 %4715  ;;  %v5069_v49 = vld [vmem:[%s12815_s4 + $0x100] sm:$0xff] }
 0x4bf   :  { %14301 = vst [vmem:[#allocation114_spill] sm:$0xff] %v11272_v4 }
 0x4c0   :  { %v11280_v44 = vpop.permute.xlu0 %4780 }
 0x4c1   :  { %14302 = vst [vmem:[#allocation213_spill] sm:$0xff] %v11280_v44  ;;  %5388 = vperm.xlu0 %6434, %v5078_v29   ;;  %v5082_v29 = vld [vmem:[%s12815_s4 + $0x168] sm:$0xff] }
 0x4c2   :  { %5333 = vperm.xlu1 %6435, %v5067_v34   ;;  %v11282_v13 = vpop.permute.xlu1 %4725  ;;  %v5071_v34 = vld [vmem:[%s12815_s4 + $0x110] sm:$0xff] }
 0x4c3   :  { %14303 = vst [vmem:[#allocation212_spill] sm:$0xff] %v11282_v13 }
 0x4c4   :  { %v11290_v4 = vpop.permute.xlu0 %4790 }
 0x4c5   :  { %14304 = vst [vmem:[#allocation131_spill] sm:$0xff] %v11290_v4  ;;  %5398 = vperm.xlu0 %6434, %v5080_v14   ;;  %v5084_v14 = vld [vmem:[%s12815_s4 + $0x178] sm:$0xff] }
 0x4c6   :  { %5343 = vperm.xlu1 %6435, %v5069_v49   ;;  %v11292_v5 = vpop.permute.xlu1 %4735  ;;  %v5073_v49 = vld [vmem:[%s12815_s4 + $0x120] sm:$0xff] }
 0x4c7   :  { %14305 = vst [vmem:[#allocation130_spill] sm:$0xff] %v11292_v5 }
 0x4c8   :  { %v11300_v13 = vpop.permute.xlu0 %4800 }
 0x4c9   :  { %14306 = vst [vmem:[#allocation229_spill] sm:$0xff] %v11300_v13  ;;  %5408 = vperm.xlu0 %6434, %v5082_v29   ;;  %v5086_v29 = vld [vmem:[%s12815_s4 + $0x188] sm:$0xff] }
 0x4ca   :  { %5353 = vperm.xlu1 %6435, %v5071_v34   ;;  %v11302_v44 = vpop.permute.xlu1 %4745  ;;  %v5075_v34 = vld [vmem:[%s12815_s4 + $0x130] sm:$0xff] }
 0x4cb   :  { %14307 = vst [vmem:[#allocation228_spill] sm:$0xff] %v11302_v44 }
 0x4cc   :  { %v11310_v5 = vpop.permute.xlu0 %4810 }
 0x4cd   :  { %14308 = vst [vmem:[#allocation147_spill] sm:$0xff] %v11310_v5  ;;  %5418 = vperm.xlu0 %6434, %v5084_v14   ;;  %v5088_v14 = vld [vmem:[%s12815_s4 + $0x198] sm:$0xff] }
 0x4ce   :  { %5363 = vperm.xlu1 %6435, %v5073_v49   ;;  %v11312_v4 = vpop.permute.xlu1 %4755  ;;  %v5077_v49 = vld [vmem:[%s12815_s4 + $0x140] sm:$0xff] }
 0x4cf   :  { %14309 = vst [vmem:[#allocation146_spill] sm:$0xff] %v11312_v4 }
 0x4d0   :  { %v11320_v44 = vpop.permute.xlu0 %4820 }
 0x4d1   :  { %14310 = vst [vmem:[#allocation245_spill] sm:$0xff] %v11320_v44  ;;  %5428 = vperm.xlu0 %6434, %v5086_v29   ;;  %v5090_v29 = vld [vmem:[%s12815_s4 + $0x1a8] sm:$0xff] }
 0x4d2   :  { %5373 = vperm.xlu1 %6435, %v5075_v34   ;;  %v11322_v13 = vpop.permute.xlu1 %4765  ;;  %v5079_v34 = vld [vmem:[%s12815_s4 + $0x150] sm:$0xff] }
 0x4d3   :  { %14311 = vst [vmem:[#allocation244_spill] sm:$0xff] %v11322_v13 }
 0x4d4   :  { %v11330_v4 = vpop.permute.xlu0 %4830 }
 0x4d5   :  { %14312 = vst [vmem:[#allocation163_spill] sm:$0xff] %v11330_v4  ;;  %5438 = vperm.xlu0 %6434, %v5088_v14   ;;  %v5092_v14 = vld [vmem:[%s12815_s4 + $0x1b8] sm:$0xff] }
 0x4d6   :  { %5383 = vperm.xlu1 %6435, %v5077_v49   ;;  %v11332_v5 = vpop.permute.xlu1 %4775  ;;  %v5081_v49 = vld [vmem:[%s12815_s4 + $0x160] sm:$0xff] }
 0x4d7   :  { %14313 = vst [vmem:[#allocation162_spill] sm:$0xff] %v11332_v5 }
 0x4d8   :  { %v11340_v13 = vpop.permute.xlu0 %4840 }
 0x4d9   :  { %14314 = vst [vmem:[#allocation261_spill] sm:$0xff] %v11340_v13  ;;  %5448 = vperm.xlu0 %6434, %v5090_v29   ;;  %v5094_v29 = vld [vmem:[%s12815_s4 + $0x1c8] sm:$0xff] }
 0x4da   :  { %5393 = vperm.xlu1 %6435, %v5079_v34   ;;  %v11342_v44 = vpop.permute.xlu1 %4785  ;;  %v5083_v34 = vld [vmem:[%s12815_s4 + $0x170] sm:$0xff] }
 0x4db   :  { %14315 = vst [vmem:[#allocation260_spill] sm:$0xff] %v11342_v44 }
 0x4dc   :  { %v11350_v5 = vpop.permute.xlu0 %4850 }
 0x4dd   :  { %14316 = vst [vmem:[#allocation179_spill] sm:$0xff] %v11350_v5  ;;  %5458 = vperm.xlu0 %6434, %v5092_v14   ;;  %v5096_v14 = vld [vmem:[%s12815_s4 + $0x1d8] sm:$0xff] }
 0x4de   :  { %5403 = vperm.xlu1 %6435, %v5081_v49   ;;  %v11352_v4 = vpop.permute.xlu1 %4795  ;;  %v5085_v49 = vld [vmem:[%s12815_s4 + $0x180] sm:$0xff] }
 0x4df   :  { %14317 = vst [vmem:[#allocation178_spill] sm:$0xff] %v11352_v4 }
 0x4e0   :  { %v11360_v44 = vpop.permute.xlu0 %4860 }
 0x4e1   :  { %14318 = vst [vmem:[#allocation277_spill] sm:$0xff] %v11360_v44  ;;  %5468 = vperm.xlu0 %6434, %v5094_v29   ;;  %v5098_v29 = vld [vmem:[%s12815_s4 + $0x1e8] sm:$0xff] }
 0x4e2   :  { %5413 = vperm.xlu1 %6435, %v5083_v34   ;;  %v11362_v13 = vpop.permute.xlu1 %4805  ;;  %v5087_v34 = vld [vmem:[%s12815_s4 + $0x190] sm:$0xff] }
 0x4e3   :  { %14319 = vst [vmem:[#allocation276_spill] sm:$0xff] %v11362_v13 }
 0x4e4   :  { %v11370_v4 = vpop.permute.xlu0 %4870 }
 0x4e5   :  { %14320 = vst [vmem:[#allocation195_spill] sm:$0xff] %v11370_v4  ;;  %5478 = vperm.xlu0 %6434, %v5096_v14   ;;  %v5100_v14 = vld [vmem:[%s12815_s4 + $0x1f8] sm:$0xff] }
 0x4e6   :  { %5423 = vperm.xlu1 %6435, %v5085_v49   ;;  %v11372_v5 = vpop.permute.xlu1 %4815  ;;  %v5089_v49 = vld [vmem:[%s12815_s4 + $0x1a0] sm:$0xff] }
 0x4e7   :  { %14321 = vst [vmem:[#allocation194_spill] sm:$0xff] %v11372_v5 }
 0x4e8   :  { %v11380_v13 = vpop.permute.xlu0 %4880 }
 0x4e9   :  { %14322 = vst [vmem:[#allocation295_spill] sm:$0xff] %v11380_v13  ;;  %5488 = vperm.xlu0 %6434, %v5098_v29   ;;  %v5102_v29 = vld [vmem:[%s12815_s4 + $0x208] sm:$0xff] }
 0x4ea   :  { %5433 = vperm.xlu1 %6435, %v5087_v34   ;;  %v11382_v44 = vpop.permute.xlu1 %4825  ;;  %v14326_v34 = vld [vmem:[#allocation5_spill] sm:$0xff] }
 0x4eb   :  { %14323 = vst [vmem:[#allocation294_spill] sm:$0xff] %v11382_v44  ;;  %v14327_v44 = vld [vmem:[#allocation77_spill] sm:$0xff] }
 0x4ec   :  { %v11390_v5 = vpop.permute.xlu0 %4890  ;;  %v14328_v13 = vsub.f32 %v14326_v34, %v14327_v44 }
 0x4ed   :  { %14324 = vst [vmem:[#allocation211_spill] sm:$0xff] %v11390_v5  ;;  %5498 = vperm.xlu0 %6434, %v5100_v14   ;;  %v14330_v5 = vld [vmem:[#allocation89_spill] sm:$0xff] }
 0x4ee   :  { %5443 = vperm.xlu1 %6435, %v5089_v49   ;;  %v11392_v4 = vpop.permute.xlu1 %4835  ;;  %v4894_v63 = vmul.f32 %v10507_v42, %v14328_v13  ;;  %v5104_v49 = vld [vmem:[%s12815_s4 + $0x218] sm:$0xff]  ;;  %v5093_v13 = vld [vmem:[%s12815_s4 + $0x1c0] sm:$0xff] }
 0x4ef   :  { %14325 = vst [vmem:[#allocation210_spill] sm:$0xff] %v11392_v4  ;;  %v14329_v4 = vld [vmem:[#allocation8_spill] sm:$0xff] }
 0x4f0   :  { %v5189_v53 = vpop.permute.xlu0 %5188  ;;  %v14331_v22 = vsub.f32 %v14329_v4, %v14330_v5  ;;  %v5106_v5 = vld [vmem:[%s12815_s4 + $0x228] sm:$0xff]  ;;  %v14332_v4 = vld [vmem:[#allocation12_spill] sm:$0xff] }
 0x4f1   :  { %v5902_v12 = vadd.f32 %v5189_v53, %v4894_v63  ;;  %5508 = vperm.xlu0 %6434, %v5102_v29  }
 0x4f2   :  { %5453 = vperm.xlu1 %6435, %v5091_v25   ;;  %v11404_v14 = vpop.permute.xlu1 %4845  ;;  %v4896_v44 = vmul.f32 %v10536_v6, %v14331_v22  ;;  %v14333_v6 = vld [vmem:[#allocation106_spill] sm:$0xff] }
 0x4f3   :  { %6046 = vst.msk [vmem:[%s12816_s5 + $0x8] sm:$0xff] %vm1723_vm1, %v5902_v12  ;;  %v14334_v22 = vsub.f32 %v14332_v4, %v14333_v6  ;;  %v5095_v12 = vld [vmem:[%s12815_s4 + $0x1d0] sm:$0xff] }
 0x4f4   :  { %v5199_v63 = vpop.permute.xlu0 %5198 }
 0x4f5   :  { %v5904_v25 = vadd.f32 %v5199_v63, %v4896_v44  ;;  %5518 = vperm.xlu0 %6434, %v5104_v49   ;;  %v4898_v53 = vmul.f32 %v10568_v20, %v14334_v22  ;;  %v5108_v44 = vld [vmem:[%s12815_s4 + $0x238] sm:$0xff]  ;;  %v14335_v20 = vld [vmem:[#allocation16_spill] sm:$0xff] }
 0x4f6   :  { %5463 = vperm.xlu1 %6435, %v5093_v13   ;;  %v11420_v42 = vpop.permute.xlu1 %4855  ;;  %v14336_v13 = vld [vmem:[#allocation121_spill] sm:$0xff] }
 0x4f7   :  { %6048 = vst.msk [vmem:[%s12816_s5 + $0x18] sm:$0xff] %vm1723_vm1, %v5904_v25  ;;  %v14337_v63 = vsub.f32 %v14335_v20, %v14336_v13  ;;  %v5097_v25 = vld [vmem:[%s12815_s4 + $0x1e0] sm:$0xff] }
 0x4f8   :  { %v5209_v29 = vpop.permute.xlu0 %5208 }
 0x4f9   :  { %v5906_v34 = vadd.f32 %v5209_v29, %v4898_v53  ;;  %5528 = vperm.xlu0 %6434, %v5106_v5   ;;  %v4900_v4 = vmul.f32 %v10600_v39, %v14337_v63  ;;  %v5110_v53 = vld [vmem:[%s12815_s4 + $0x248] sm:$0xff]  ;;  %v14338_v39 = vld [vmem:[#allocation20_spill] sm:$0xff] }
 0x4fa   :  { %5473 = vperm.xlu1 %6435, %v5095_v12   ;;  %v11436_v49 = vpop.permute.xlu1 %4865  ;;  %v14339_v12 = vld [vmem:[#allocation136_spill] sm:$0xff] }
 0x4fb   :  { %6050 = vst.msk [vmem:[%s12816_s5 + $0x28] sm:$0xff] %vm1723_vm1, %v5906_v34  ;;  %v14340_v29 = vsub.f32 %v14338_v39, %v14339_v12  ;;  %v5099_v34 = vld [vmem:[%s12815_s4 + $0x1f0] sm:$0xff]  ;;  %v14345_v12 = vld [vmem:[#allocation2_spill] sm:$0xff] }
 0x4fc   :  { %v5219_v5 = vpop.permute.xlu0 %5218 }
 0x4fd   :  { %v5908_v6 = vadd.f32 %v5219_v5, %v4900_v4  ;;  %5538 = vperm.xlu0 %6434, %v5108_v44   ;;  %v4902_v20 = vmul.f32 %v10525_v58, %v14340_v29  ;;  %v5112_v4 = vld [vmem:[%s12815_s4 + $0x258] sm:$0xff]  ;;  %v14342_v58 = vld [vmem:[#allocation24_spill] sm:$0xff]  ;;  %v14346_v29 = vld [vmem:[#allocation71_spill] sm:$0xff] }
 0x4fe   :  { %5483 = vperm.xlu1 %6435, %v5097_v25   ;;  %v11452_v22 = vpop.permute.xlu1 %4875  ;;  %v14343_v25 = vld [vmem:[#allocation152_spill] sm:$0xff] }
 0x4ff   :  { %6052 = vst.msk [vmem:[%s12816_s5 + $0x38] sm:$0xff] %vm1723_vm1, %v5908_v6  ;;  %v14344_v5 = vsub.f32 %v14342_v58, %v14343_v25  ;;  %v5101_v6 = vld [vmem:[%s12815_s4 + $0x200] sm:$0xff]  ;;  %v14348_v25 = vld [vmem:[#allocation28_spill] sm:$0xff] }
 0x500   :  { %v5229_v44 = vpop.permute.xlu0 %5228 }
 0x501   :  { %v5910_v13 = vadd.f32 %v5229_v44, %v4902_v20  ;;  %5548 = vperm.xlu0 %6434, %v5110_v53   ;;  %v4904_v39 = vmul.f32 %v10541_v47, %v14344_v5  ;;  %v14347_v20 = vsub.f32 %v14345_v12, %v14346_v29  ;;  %v5114_v47 = vld [vmem:[%s12815_s4 + $0x268] sm:$0xff] }
 0x502   :  { %5493 = vperm.xlu1 %6435, %v5099_v34   ;;  %v11468_v63 = vpop.permute.xlu1 %4885 }
 0x503   :  { %14341 = vst [vmem:[#allocation313_spill] sm:$0xff] %v11468_v63  ;;  %6054 = vst.msk [vmem:[%s12816_s5 + $0x48] sm:$0xff] %vm1723_vm1, %v5910_v13  ;;  %v4893_v34 = vmul.f32 %v10509_v48, %v14347_v20  ;;  %v14349_v13 = vld [vmem:[#allocation168_spill] sm:$0xff] }
 0x504   :  { %v5239_v53 = vpop.permute.xlu0 %5238  ;;  %v14350_v5 = vsub.f32 %v14348_v25, %v14349_v13  ;;  %v5103_v48 = vld [vmem:[%s12815_s4 + $0x210] sm:$0xff] }
 0x505   :  { %v5912_v44 = vadd.f32 %v5239_v53, %v4904_v39  ;;  %5558 = vperm.xlu0 %6434, %v5112_v4   ;;  %v14351_v39 = vld [vmem:[#allocation6_spill] sm:$0xff] }
 0x506   :  { %5503 = vperm.xlu1 %6435, %v5101_v6   ;;  %v5184_v58 = vpop.permute.xlu1 %5183  ;;  %v4906_v63 = vmul.f32 %v10557_v40, %v14350_v5  ;;  %v14352_v6 = vld [vmem:[#allocation84_spill] sm:$0xff]  ;;  %v14357_v5 = vld [vmem:[#allocation10_spill] sm:$0xff] }
 0x507   :  { %6056 = vst.msk [vmem:[%s12816_s5 + $0x58] sm:$0xff] %vm1723_vm1, %v5912_v44  ;;  %v5901_v12 = vadd.f32 %v5184_v58, %v4893_v34  ;;  %v14353_v53 = vsub.f32 %v14351_v39, %v14352_v6  ;;  %v5116_v34 = vld [vmem:[%s12815_s4 + $0x278] sm:$0xff]  ;;  %v14354_v44 = vld [vmem:[#allocation32_spill] sm:$0xff]  ;;  %v5118_v6 = vld [vmem:[%s12815_s4 + $0x288] sm:$0xff] }
 0x508   :  { %v5249_v4 = vpop.permute.xlu0 %5248  ;;  %v14355_v58 = vld [vmem:[#allocation184_spill] sm:$0xff] }
 0x509   :  { %v4895_v29 = vmul.f32 %v10520_v15, %v14353_v53  ;;  %6045 = vst.msk [vmem:[%s12816_s5] sm:$0xff] %vm1723_vm1, %v5901_v12  ;;  %v5914_v40 = vadd.f32 %v5249_v4, %v4906_v63  ;;  %5568 = vperm.xlu0 %6434, %v5114_v47   ;;  %v14356_v25 = vsub.f32 %v14354_v44, %v14355_v58  ;;  %v5105_v63 = vld [vmem:[%s12815_s4 + $0x220] sm:$0xff]  ;;  %v14358_v12 = vld [vmem:[#allocation104_spill] sm:$0xff] }
 0x50a   :  { %5513 = vperm.xlu1 %6435, %v5103_v48   ;;  %v5194_v20 = vpop.permute.xlu1 %5193  ;;  %v14359_v48 = vsub.f32 %v14357_v5, %v14358_v12  ;;  %v14360_v53 = vld [vmem:[#allocation36_spill] sm:$0xff] }
 0x50b   :  { %v4908_v13 = vmul.f32 %v10573_v50, %v14356_v25  ;;  %6058 = vst.msk [vmem:[%s12816_s5 + $0x68] sm:$0xff] %vm1723_vm1, %v5914_v40  ;;  %v5903_v15 = vadd.f32 %v5194_v20, %v4895_v29  ;;  %v14361_v29 = vld [vmem:[#allocation200_spill] sm:$0xff]  ;;  %v14363_v20 = vld [vmem:[#allocation306_spill] sm:$0xff] }
 0x50c   :  { %v5259_v47 = vpop.permute.xlu0 %5258  ;;  %v4897_v4 = vmul.f32 %v10552_v33, %v14359_v48  ;;  %v14362_v40 = vsub.f32 %v14360_v53, %v14361_v29  ;;  %v14364_v25 = vld [vmem:[#allocation14_spill] sm:$0xff]  ;;  %v5120_v48 = vld [vmem:[%s12815_s4 + $0x298] sm:$0xff] }
 0x50d   :  { %6047 = vst.msk [vmem:[%s12816_s5 + $0x10] sm:$0xff] %vm1723_vm1, %v5903_v15  ;;  %v5916_v50 = vadd.f32 %v5259_v47, %v4908_v13  ;;  %5578 = vperm.xlu0 %6434, %v5116_v34   ;;  %v5107_v34 = vld [vmem:[%s12815_s4 + $0x230] sm:$0xff]  ;;  %v14371_v53 = vld [vmem:[#allocation305_spill] sm:$0xff] }
 0x50e   :  { %5523 = vperm.xlu1 %6435, %v5105_v63   ;;  %v5204_v39 = vpop.permute.xlu1 %5203  ;;  %v4910_v44 = vmul.f32 %v14363_v20, %v14362_v40  ;;  %v14365_v13 = vld [vmem:[#allocation120_spill] sm:$0xff]  ;;  %v14367_v63 = vld [vmem:[#allocation206_spill] sm:$0xff] }
 0x50f   :  { %6060 = vst.msk [vmem:[%s12816_s5 + $0x78] sm:$0xff] %vm1723_vm1, %v5916_v50  ;;  %v5905_v33 = vadd.f32 %v5204_v39, %v4897_v4  ;;  %v14366_v15 = vsub.f32 %v14364_v25, %v14365_v13  ;;  %v14368_v4 = vld [vmem:[#allocation40_spill] sm:$0xff] }
 0x510   :  { %v5269_v58 = vpop.permute.xlu0 %5268  ;;  %v14369_v50 = vld [vmem:[#allocation216_spill] sm:$0xff] }
 0x511   :  { %v4899_v47 = vmul.f32 %v14367_v63, %v14366_v15  ;;  %6049 = vst.msk [vmem:[%s12816_s5 + $0x20] sm:$0xff] %vm1723_vm1, %v5905_v33  ;;  %v5918_v5 = vadd.f32 %v5269_v58, %v4910_v44  ;;  %5588 = vperm.xlu0 %6434, %v5118_v6   ;;  %v14370_v39 = vsub.f32 %v14368_v4, %v14369_v50  ;;  %v5109_v6 = vld [vmem:[%s12815_s4 + $0x240] sm:$0xff]  ;;  %v14375_v58 = vld [vmem:[#allocation223_spill] sm:$0xff] }
 0x512   :  { %5533 = vperm.xlu1 %6435, %v5107_v34   ;;  %v5214_v12 = vpop.permute.xlu1 %5213  ;;  %v14372_v44 = vld [vmem:[#allocation18_spill] sm:$0xff]  ;;  %v5122_v63 = vld [vmem:[%s12815_s4 + $0x2a8] sm:$0xff] }
 0x513   :  { %v4912_v29 = vmul.f32 %v14371_v53, %v14370_v39  ;;  %6062 = vst.msk [vmem:[%s12816_s5 + $0x88] sm:$0xff] %vm1723_vm1, %v5918_v5  ;;  %v5907_v40 = vadd.f32 %v5214_v12, %v4899_v47  ;;  %v14373_v33 = vld [vmem:[#allocation138_spill] sm:$0xff]  ;;  %v14376_v47 = vld [vmem:[#allocation44_spill] sm:$0xff] }
 0x514   :  { %v5279_v20 = vpop.permute.xlu0 %5278  ;;  %v14374_v34 = vsub.f32 %v14372_v44, %v14373_v33  ;;  %v14377_v5 = vld [vmem:[#allocation232_spill] sm:$0xff]  ;;  %v14379_v4 = vld [vmem:[#allocation222_spill] sm:$0xff] }
 0x515   :  { %6051 = vst.msk [vmem:[%s12816_s5 + $0x30] sm:$0xff] %vm1723_vm1, %v5907_v40  ;;  %v5920_v13 = vadd.f32 %v5279_v20, %v4912_v29  ;;  %5598 = vperm.xlu0 %6434, %v5120_v48   ;;  %v14378_v12 = vsub.f32 %v14376_v47, %v14377_v5  ;;  %v5111_v48 = vld [vmem:[%s12815_s4 + $0x250] sm:$0xff]  ;;  %v14380_v29 = vld [vmem:[#allocation22_spill] sm:$0xff]  ;;  %v14383_v20 = vld [vmem:[#allocation239_spill] sm:$0xff] }
 0x516   :  { %v4901_v25 = vmul.f32 %v14375_v58, %v14374_v34  ;;  %5543 = vperm.xlu1 %6435, %v5109_v6   ;;  %v5224_v15 = vpop.permute.xlu1 %5223  ;;  %v14381_v40 = vld [vmem:[#allocation154_spill] sm:$0xff]  ;;  %v5124_v58 = vld [vmem:[%s12815_s4 + $0x2b8] sm:$0xff] }
 0x517   :  { %v4914_v50 = vmul.f32 %v14379_v4, %v14378_v12  ;;  %6064 = vst.msk [vmem:[%s12816_s5 + $0x98] sm:$0xff] %vm1723_vm1, %v5920_v13  ;;  %v14382_v6 = vsub.f32 %v14380_v29, %v14381_v40  ;;  %v14385_v13 = vld [vmem:[#allocation248_spill] sm:$0xff]  ;;  %v14387_v47 = vld [vmem:[#allocation238_spill] sm:$0xff] }
 0x518   :  { %v5909_v39 = vadd.f32 %v5224_v15, %v4901_v25  ;;  %v5289_v53 = vpop.permute.xlu0 %5288  ;;  %v14384_v25 = vld [vmem:[#allocation48_spill] sm:$0xff] }
 0x519   :  { %v4903_v44 = vmul.f32 %v14383_v20, %v14382_v6  ;;  %v5922_v33 = vadd.f32 %v5289_v53, %v4914_v50  ;;  %5608 = vperm.xlu0 %6434, %v5122_v63   ;;  %v14386_v15 = vsub.f32 %v14384_v25, %v14385_v13  ;;  %v5113_v63 = vld [vmem:[%s12815_s4 + $0x260] sm:$0xff]  ;;  %v14391_v53 = vld [vmem:[#allocation325_spill] sm:$0xff]  ;;  %v5126_v20 = vld [vmem:[%s12815_s4 + $0x2c8] sm:$0xff] }
 0x51a   :  { %6053 = vst.msk [vmem:[%s12816_s5 + $0x40] sm:$0xff] %vm1723_vm1, %v5909_v39  ;;  %5553 = vperm.xlu1 %6435, %v5111_v48   ;;  %v5234_v34 = vpop.permute.xlu1 %5233  ;;  %v14388_v50 = vld [vmem:[#allocation26_spill] sm:$0xff]  ;;  %v14395_v25 = vld [vmem:[#allocation324_spill] sm:$0xff] }
 0x51b   :  { %v4916_v5 = vmul.f32 %v14387_v47, %v14386_v15  ;;  %6066 = vst.msk [vmem:[%s12816_s5 + $0xa8] sm:$0xff] %vm1723_vm1, %v5922_v33  ;;  %v5911_v12 = vadd.f32 %v5234_v34, %v4903_v44  ;;  %v14389_v39 = vld [vmem:[#allocation170_spill] sm:$0xff]  ;;  %v14392_v44 = vld [vmem:[#allocation52_spill] sm:$0xff] }
 0x51c   :  { %v5299_v4 = vpop.permute.xlu0 %5298  ;;  %v14390_v48 = vsub.f32 %v14388_v50, %v14389_v39  ;;  %v14393_v33 = vld [vmem:[#allocation264_spill] sm:$0xff] }
 0x51d   :  { %6055 = vst.msk [vmem:[%s12816_s5 + $0x50] sm:$0xff] %vm1723_vm1, %v5911_v12  ;;  %v5924_v40 = vadd.f32 %v5299_v4, %v4916_v5  ;;  %5618 = vperm.xlu0 %6434, %v5124_v58   ;;  %v14394_v34 = vsub.f32 %v14392_v44, %v14393_v33  ;;  %v5115_v58 = vld [vmem:[%s12815_s4 + $0x270] sm:$0xff]  ;;  %v14396_v5 = vld [vmem:[#allocation30_spill] sm:$0xff]  ;;  %v14399_v4 = vld [vmem:[#allocation341_spill] sm:$0xff] }
 0x51e   :  { %v4905_v29 = vmul.f32 %v14391_v53, %v14390_v48  ;;  %5563 = vperm.xlu1 %6435, %v5113_v63   ;;  %v5244_v6 = vpop.permute.xlu1 %5243  ;;  %v14397_v12 = vld [vmem:[#allocation186_spill] sm:$0xff]  ;;  %v5128_v53 = vld [vmem:[%s12815_s4 + $0x2d8] sm:$0xff]  ;;  %v14403_v44 = vld [vmem:[#allocation340_spill] sm:$0xff] }
 0x51f   :  { %v4918_v13 = vmul.f32 %v14395_v25, %v14394_v34  ;;  %6068 = vst.msk [vmem:[%s12816_s5 + $0xb8] sm:$0xff] %vm1723_vm1, %v5924_v40  ;;  %v14398_v63 = vsub.f32 %v14396_v5, %v14397_v12  ;;  %v14401_v40 = vld [vmem:[#allocation280_spill] sm:$0xff] }
 0x520   :  { %v5913_v15 = vadd.f32 %v5244_v6, %v4905_v29  ;;  %v5309_v47 = vpop.permute.xlu0 %5308  ;;  %v14400_v29 = vld [vmem:[#allocation56_spill] sm:$0xff] }
 0x521   :  { %v4907_v50 = vmul.f32 %v14399_v4, %v14398_v63  ;;  %v5926_v39 = vadd.f32 %v5309_v47, %v4918_v13  ;;  %5628 = vperm.xlu0 %6434, %v5126_v20   ;;  %v14402_v6 = vsub.f32 %v14400_v29, %v14401_v40  ;;  %v5117_v20 = vld [vmem:[%s12815_s4 + $0x280] sm:$0xff]  ;;  %v14407_v47 = vld [vmem:[#allocation255_spill] sm:$0xff] }
 0x522   :  { %6057 = vst.msk [vmem:[%s12816_s5 + $0x60] sm:$0xff] %vm1723_vm1, %v5913_v15  ;;  %5573 = vperm.xlu1 %6435, %v5115_v58   ;;  %v5254_v48 = vpop.permute.xlu1 %5253  ;;  %v14404_v13 = vld [vmem:[#allocation34_spill] sm:$0xff]  ;;  %v5130_v4 = vld [vmem:[%s12815_s4 + $0x2e8] sm:$0xff] }
 0x523   :  { %v4920_v33 = vmul.f32 %v14403_v44, %v14402_v6  ;;  %6070 = vst.msk [vmem:[%s12816_s5 + $0xc8] sm:$0xff] %vm1723_vm1, %v5926_v39  ;;  %v5915_v34 = vadd.f32 %v5254_v48, %v4907_v50  ;;  %v14405_v15 = vld [vmem:[#allocation202_spill] sm:$0xff]  ;;  %v14408_v50 = vld [vmem:[#allocation60_spill] sm:$0xff]  ;;  %v14409_v39 = vld [vmem:[#allocation299_spill] sm:$0xff] }
 0x524   :  { %v5319_v25 = vpop.permute.xlu0 %5318  ;;  %v14406_v58 = vsub.f32 %v14404_v13, %v14405_v15  ;;  %v14410_v48 = vsub.f32 %v14408_v50, %v14409_v39  ;;  %v14411_v29 = vld [vmem:[#allocation254_spill] sm:$0xff] }
 0x525   :  { %6059 = vst.msk [vmem:[%s12816_s5 + $0x70] sm:$0xff] %vm1723_vm1, %v5915_v34  ;;  %v5928_v12 = vadd.f32 %v5319_v25, %v4920_v33  ;;  %5638 = vperm.xlu0 %6434, %v5128_v53   ;;  %v5119_v53 = vld [vmem:[%s12815_s4 + $0x290] sm:$0xff]  ;;  %v14412_v33 = vld [vmem:[#allocation38_spill] sm:$0xff]  ;;  %v14415_v25 = vld [vmem:[#allocation271_spill] sm:$0xff] }
 0x526   :  { %v4909_v5 = vmul.f32 %v14407_v47, %v14406_v58  ;;  %5583 = vperm.xlu1 %6435, %v5117_v20   ;;  %v5264_v63 = vpop.permute.xlu1 %5263  ;;  %v4922_v40 = vmul.f32 %v14411_v29, %v14410_v48  ;;  %v14413_v34 = vld [vmem:[#allocation218_spill] sm:$0xff]  ;;  %v5132_v47 = vld [vmem:[%s12815_s4 + $0x2f8] sm:$0xff] }
 0x527   :  { %6072 = vst.msk [vmem:[%s12816_s5 + $0xd8] sm:$0xff] %vm1723_vm1, %v5928_v12  ;;  %v14414_v20 = vsub.f32 %v14412_v33, %v14413_v34  ;;  %v14417_v12 = vld [vmem:[#allocation315_spill] sm:$0xff]  ;;  %v14419_v50 = vld [vmem:[#allocation270_spill] sm:$0xff] }
 0x528   :  { %v5917_v6 = vadd.f32 %v5264_v63, %v4909_v5  ;;  %v5329_v44 = vpop.permute.xlu0 %5328  ;;  %v14416_v5 = vld [vmem:[#allocation64_spill] sm:$0xff] }
 0x529   :  { %v4911_v13 = vmul.f32 %v14415_v25, %v14414_v20  ;;  %v5930_v15 = vadd.f32 %v5329_v44, %v4922_v40  ;;  %5648 = vperm.xlu0 %6434, %v5130_v4   ;;  %v14418_v63 = vsub.f32 %v14416_v5, %v14417_v12  ;;  %v5121_v4 = vld [vmem:[%s12815_s4 + $0x2a0] sm:$0xff]  ;;  %v14423_v44 = vld [vmem:[#allocation287_spill] sm:$0xff] }
 0x52a   :  { %6061 = vst.msk [vmem:[%s12816_s5 + $0x80] sm:$0xff] %vm1723_vm1, %v5917_v6  ;;  %5593 = vperm.xlu1 %6435, %v5119_v53   ;;  %v5274_v58 = vpop.permute.xlu1 %5273  ;;  %v14420_v40 = vld [vmem:[#allocation42_spill] sm:$0xff]  ;;  %v5134_v25 = vld [vmem:[%s12815_s4 + $0x308] sm:$0xff] }
 0x52b   :  { %v4924_v39 = vmul.f32 %v14419_v50, %v14418_v63  ;;  %6074 = vst.msk [vmem:[%s12816_s5 + $0xe8] sm:$0xff] %vm1723_vm1, %v5930_v15  ;;  %v5919_v48 = vadd.f32 %v5274_v58, %v4911_v13  ;;  %v14421_v6 = vld [vmem:[#allocation234_spill] sm:$0xff]  ;;  %v14424_v13 = vld [vmem:[#allocation67_spill] sm:$0xff]  ;;  %v14425_v15 = vld [vmem:[#allocation332_spill] sm:$0xff] }
 0x52c   :  { %v5339_v29 = vpop.permute.xlu0 %5338  ;;  %v14422_v53 = vsub.f32 %v14420_v40, %v14421_v6  ;;  %v14426_v58 = vsub.f32 %v14424_v13, %v14425_v15  ;;  %v14427_v5 = vld [vmem:[#allocation286_spill] sm:$0xff] }
 0x52d   :  { %6063 = vst.msk [vmem:[%s12816_s5 + $0x90] sm:$0xff] %vm1723_vm1, %v5919_v48  ;;  %v5932_v34 = vadd.f32 %v5339_v29, %v4924_v39  ;;  %5658 = vperm.xlu0 %6434, %v5132_v47   ;;  %v5123_v47 = vld [vmem:[%s12815_s4 + $0x2b0] sm:$0xff]  ;;  %v14428_v39 = vld [vmem:[#allocation46_spill] sm:$0xff]  ;;  %v14431_v29 = vld [vmem:[#allocation303_spill] sm:$0xff] }
 0x52e   :  { %v4913_v33 = vmul.f32 %v14423_v44, %v14422_v53  ;;  %5603 = vperm.xlu1 %6435, %v5121_v4   ;;  %v5284_v20 = vpop.permute.xlu1 %5283  ;;  %v4926_v12 = vmul.f32 %v14427_v5, %v14426_v58  ;;  %v14429_v48 = vld [vmem:[#allocation250_spill] sm:$0xff]  ;;  %v5136_v44 = vld [vmem:[%s12815_s4 + $0x318] sm:$0xff] }
 0x52f   :  { %6076 = vst.msk [vmem:[%s12816_s5 + $0xf8] sm:$0xff] %vm1723_vm1, %v5932_v34  ;;  %v14430_v4 = vsub.f32 %v14428_v39, %v14429_v48  ;;  %v14433_v34 = vld [vmem:[#allocation351_spill] sm:$0xff]  ;;  %v14435_v13 = vld [vmem:[#allocation302_spill] sm:$0xff] }
 0x530   :  { %v5921_v63 = vadd.f32 %v5284_v20, %v4913_v33  ;;  %v5349_v50 = vpop.permute.xlu0 %5348  ;;  %v14432_v33 = vld [vmem:[#allocation72_spill] sm:$0xff] }
 0x531   :  { %v4915_v40 = vmul.f32 %v14431_v29, %v14430_v4  ;;  %v5934_v6 = vadd.f32 %v5349_v50, %v4926_v12  ;;  %5668 = vperm.xlu0 %6434, %v5134_v25   ;;  %v14434_v20 = vsub.f32 %v14432_v33, %v14433_v34  ;;  %v5125_v25 = vld [vmem:[%s12815_s4 + $0x2c0] sm:$0xff]  ;;  %v5138_v29 = vld [vmem:[%s12815_s4 + $0x328] sm:$0xff]  ;;  %v14443_v33 = vld [vmem:[#allocation321_spill] sm:$0xff] }
 0x532   :  { %6065 = vst.msk [vmem:[%s12816_s5 + $0xa0] sm:$0xff] %vm1723_vm1, %v5921_v63  ;;  %5613 = vperm.xlu1 %6435, %v5123_v47   ;;  %v5294_v53 = vpop.permute.xlu1 %5293  ;;  %v14436_v12 = vld [vmem:[#allocation50_spill] sm:$0xff] }
 0x533   :  { %v4928_v15 = vmul.f32 %v14435_v13, %v14434_v20  ;;  %6078 = vst.msk [vmem:[%s12816_s5 + $0x108] sm:$0xff] %vm1723_vm1, %v5934_v6  ;;  %v5923_v58 = vadd.f32 %v5294_v53, %v4915_v40  ;;  %v14437_v63 = vld [vmem:[#allocation266_spill] sm:$0xff]  ;;  %v14441_v6 = vld [vmem:[#allocation360_spill] sm:$0xff] }
 0x534   :  { %v5359_v5 = vpop.permute.xlu0 %5358  ;;  %v14438_v47 = vsub.f32 %v14436_v12, %v14437_v63  ;;  %v14439_v50 = vld [vmem:[#allocation322_spill] sm:$0xff] }
 0x535   :  { %6067 = vst.msk [vmem:[%s12816_s5 + $0xb0] sm:$0xff] %vm1723_vm1, %v5923_v58  ;;  %v5936_v48 = vadd.f32 %v5359_v5, %v4928_v15  ;;  %5678 = vperm.xlu0 %6434, %v5136_v44   ;;  %v14440_v40 = vld [vmem:[#allocation86_spill] sm:$0xff]  ;;  %v5127_v44 = vld [vmem:[%s12815_s4 + $0x2d0] sm:$0xff]  ;;  %v14447_v5 = vld [vmem:[#allocation339_spill] sm:$0xff] }
 0x536   :  { %v4917_v39 = vmul.f32 %v14439_v50, %v14438_v47  ;;  %5623 = vperm.xlu1 %6435, %v5125_v25   ;;  %v5304_v4 = vpop.permute.xlu1 %5303  ;;  %v14442_v53 = vsub.f32 %v14440_v40, %v14441_v6  ;;  %v14444_v15 = vld [vmem:[#allocation54_spill] sm:$0xff]  ;;  %v5140_v50 = vld [vmem:[%s12815_s4 + $0x338] sm:$0xff] }
 0x537   :  { %6080 = vst.msk [vmem:[%s12816_s5 + $0x118] sm:$0xff] %vm1723_vm1, %v5936_v48  ;;  %v14445_v58 = vld [vmem:[#allocation282_spill] sm:$0xff] }
 0x538   :  { %v4930_v34 = vmul.f32 %v14443_v33, %v14442_v53  ;;  %v5925_v20 = vadd.f32 %v5304_v4, %v4917_v39  ;;  %v5369_v13 = vpop.permute.xlu0 %5368  ;;  %v14446_v25 = vsub.f32 %v14444_v15, %v14445_v58  ;;  %v14448_v39 = vld [vmem:[#allocation103_spill] sm:$0xff]  ;;  %v14449_v48 = vld [vmem:[#allocation370_spill] sm:$0xff] }
 0x539   :  { %5688 = vperm.xlu0 %6434, %v5138_v29   ;;  %v14450_v4 = vsub.f32 %v14448_v39, %v14449_v48  ;;  %v14451_v40 = vld [vmem:[#allocation338_spill] sm:$0xff]  ;;  %v14459_v39 = vld [vmem:[#allocation364_spill] sm:$0xff] }
 0x53a   :  { %v4919_v12 = vmul.f32 %v14447_v5, %v14446_v25  ;;  %6069 = vst.msk [vmem:[%s12816_s5 + $0xc0] sm:$0xff] %vm1723_vm1, %v5925_v20  ;;  %v5938_v63 = vadd.f32 %v5369_v13, %v4930_v34  ;;  %5633 = vperm.xlu1 %6435, %v5127_v44   ;;  %v5314_v47 = vpop.permute.xlu1 %5313  ;;  %v5129_v29 = vld [vmem:[%s12815_s4 + $0x2e0] sm:$0xff]  ;;  %v5142_v5 = vld [vmem:[%s12815_s4 + $0x348] sm:$0xff] }
 0x53b   :  { %v4932_v6 = vmul.f32 %v14451_v40, %v14450_v4  ;;  %v14452_v34 = vld [vmem:[#allocation58_spill] sm:$0xff] }
 0x53c   :  { %6082 = vst.msk [vmem:[%s12816_s5 + $0x128] sm:$0xff] %vm1723_vm1, %v5938_v63  ;;  %v5927_v53 = vadd.f32 %v5314_v47, %v4919_v12  ;;  %v5379_v33 = vpop.permute.xlu0 %5378  ;;  %v14453_v20 = vld [vmem:[#allocation298_spill] sm:$0xff]  ;;  %v14456_v12 = vld [vmem:[#allocation119_spill] sm:$0xff]  ;;  %v14457_v63 = vld [vmem:[#allocation380_spill] sm:$0xff] }
 0x53d   :  { %v14454_v44 = vsub.f32 %v14452_v34, %v14453_v20  ;;  %v14455_v13 = vld [vmem:[#allocation354_spill] sm:$0xff]  ;;  %v5940_v58 = vadd.f32 %v5379_v33, %v4932_v6  ;;  %5698 = vperm.xlu0 %6434, %v5140_v50   ;;  %v14458_v47 = vsub.f32 %v14456_v12, %v14457_v63  ;;  %v5131_v50 = vld [vmem:[%s12815_s4 + $0x2f0] sm:$0xff]  ;;  %v14463_v33 = vld [vmem:[#allocation363_spill] sm:$0xff] }
 0x53e   :  { %6071 = vst.msk [vmem:[%s12816_s5 + $0xd0] sm:$0xff] %vm1723_vm1, %v5927_v53  ;;  %5643 = vperm.xlu1 %6435, %v5129_v29   ;;  %v5324_v25 = vpop.permute.xlu1 %5323  ;;  %v14460_v6 = vld [vmem:[#allocation62_spill] sm:$0xff] }
 0x53f   :  { %v4921_v15 = vmul.f32 %v14455_v13, %v14454_v44  ;;  %v4934_v48 = vmul.f32 %v14459_v39, %v14458_v47  ;;  %6084 = vst.msk [vmem:[%s12816_s5 + $0x138] sm:$0xff] %vm1723_vm1, %v5940_v58  ;;  %v14461_v53 = vld [vmem:[#allocation314_spill] sm:$0xff]  ;;  %v5144_v13 = vld [vmem:[%s12815_s4 + $0x358] sm:$0xff] }
 0x540   :  { %v5389_v40 = vpop.permute.xlu0 %5388  ;;  %v14462_v29 = vsub.f32 %v14460_v6, %v14461_v53  ;;  %v14465_v58 = vld [vmem:[#allocation390_spill] sm:$0xff] }
 0x541   :  { %v5929_v4 = vadd.f32 %v5324_v25, %v4921_v15  ;;  %v5942_v20 = vadd.f32 %v5389_v40, %v4934_v48  ;;  %5708 = vperm.xlu0 %6434, %v5142_v5   ;;  %v14464_v15 = vld [vmem:[#allocation135_spill] sm:$0xff]  ;;  %v14467_v12 = vld [vmem:[#allocation374_spill] sm:$0xff]  ;;  %v14471_v40 = vld [vmem:[#allocation373_spill] sm:$0xff] }
 0x542   :  { %v4923_v34 = vmul.f32 %v14463_v33, %v14462_v29  ;;  %5653 = vperm.xlu1 %6435, %v5131_v50   ;;  %v5334_v44 = vpop.permute.xlu1 %5333  ;;  %v14466_v25 = vsub.f32 %v14464_v15, %v14465_v58  ;;  %v5133_v5 = vld [vmem:[%s12815_s4 + $0x300] sm:$0xff]  ;;  %v5146_v33 = vld [vmem:[%s12815_s4 + $0x368] sm:$0xff]  ;;  %v14475_v15 = vld [vmem:[#allocation416_spill] sm:$0xff] }
 0x543   :  { %6073 = vst.msk [vmem:[%s12816_s5 + $0xe0] sm:$0xff] %vm1723_vm1, %v5929_v4  ;;  %6086 = vst.msk [vmem:[%s12816_s5 + $0x148] sm:$0xff] %vm1723_vm1, %v5942_v20  ;;  %v14468_v48 = vld [vmem:[#allocation66_spill] sm:$0xff]  ;;  %v14473_v20 = vld [vmem:[#allocation400_spill] sm:$0xff] }
 0x544   :  { %v4936_v63 = vmul.f32 %v14467_v12, %v14466_v25  ;;  %v5931_v47 = vadd.f32 %v5334_v44, %v4923_v34  ;;  %v5399_v39 = vpop.permute.xlu0 %5398  ;;  %v14469_v4 = vld [vmem:[#allocation334_spill] sm:$0xff]  ;;  %v14472_v34 = vld [vmem:[#allocation151_spill] sm:$0xff] }
 0x545   :  { %v14470_v50 = vsub.f32 %v14468_v48, %v14469_v4  ;;  %5718 = vperm.xlu0 %6434, %v5144_v13   ;;  %v14474_v44 = vsub.f32 %v14472_v34, %v14473_v20  ;;  %v5135_v13 = vld [vmem:[%s12815_s4 + $0x310] sm:$0xff] }
 0x546   :  { %6075 = vst.msk [vmem:[%s12816_s5 + $0xf0] sm:$0xff] %vm1723_vm1, %v5931_v47  ;;  %v5944_v53 = vadd.f32 %v5399_v39, %v4936_v63  ;;  %5663 = vperm.xlu1 %6435, %v5133_v5   ;;  %v5344_v29 = vpop.permute.xlu1 %5343  ;;  %v14476_v63 = vld [vmem:[#allocation70_spill] sm:$0xff]  ;;  %v14479_v39 = vld [vmem:[#allocation415_spill] sm:$0xff]  ;;  %v14483_v34 = vld [vmem:[#allocation384_spill] sm:$0xff] }
 0x547   :  { %v4925_v6 = vmul.f32 %v14471_v40, %v14470_v50  ;;  %v4938_v58 = vmul.f32 %v14475_v15, %v14474_v44  ;;  %v14477_v47 = vld [vmem:[#allocation350_spill] sm:$0xff]  ;;  %v5148_v40 = vld [vmem:[%s12815_s4 + $0x378] sm:$0xff] }
 0x548   :  { %6088 = vst.msk [vmem:[%s12816_s5 + $0x158] sm:$0xff] %vm1723_vm1, %v5944_v53  ;;  %v5409_v12 = vpop.permute.xlu0 %5408  ;;  %v14478_v5 = vsub.f32 %v14476_v63, %v14477_v47  ;;  %v14481_v53 = vld [vmem:[#allocation410_spill] sm:$0xff] }
 0x549   :  { %v5933_v25 = vadd.f32 %v5344_v29, %v4925_v6  ;;  %v5946_v4 = vadd.f32 %v5409_v12, %v4938_v58  ;;  %5728 = vperm.xlu0 %6434, %v5146_v33   ;;  %v14480_v6 = vld [vmem:[#allocation167_spill] sm:$0xff]  ;;  %v5137_v33 = vld [vmem:[%s12815_s4 + $0x320] sm:$0xff]  ;;  %v14484_v58 = vld [vmem:[#allocation85_spill] sm:$0xff] }
 0x54a   :  { %v4927_v48 = vmul.f32 %v14479_v39, %v14478_v5  ;;  %5673 = vperm.xlu1 %6435, %v5135_v13   ;;  %v5354_v50 = vpop.permute.xlu1 %5353  ;;  %v14482_v29 = vsub.f32 %v14480_v6, %v14481_v53  ;;  %v14487_v12 = vld [vmem:[#allocation383_spill] sm:$0xff]  ;;  %v14491_v6 = vld [vmem:[#allocation394_spill] sm:$0xff] }
 0x54b   :  { %6077 = vst.msk [vmem:[%s12816_s5 + $0x100] sm:$0xff] %vm1723_vm1, %v5933_v25  ;;  %6090 = vst.msk [vmem:[%s12816_s5 + $0x168] sm:$0xff] %vm1723_vm1, %v5946_v4  ;;  %v14485_v25 = vld [vmem:[#allocation359_spill] sm:$0xff]  ;;  %v14489_v4 = vld [vmem:[#allocation420_spill] sm:$0xff] }
 0x54c   :  { %v4940_v20 = vmul.f32 %v14483_v34, %v14482_v29  ;;  %v5935_v44 = vadd.f32 %v5354_v50, %v4927_v48  ;;  %v5419_v15 = vpop.permute.xlu0 %5418  ;;  %v14486_v13 = vsub.f32 %v14484_v58, %v14485_v25  ;;  %v5150_v39 = vld [vmem:[%s12815_s4 + $0x388] sm:$0xff] }
 0x54d   :  { %5738 = vperm.xlu0 %6434, %v5148_v40   ;;  %v14488_v48 = vld [vmem:[#allocation183_spill] sm:$0xff]  ;;  %v5139_v40 = vld [vmem:[%s12815_s4 + $0x330] sm:$0xff] }
 0x54e   :  { %v4929_v63 = vmul.f32 %v14487_v12, %v14486_v13  ;;  %6079 = vst.msk [vmem:[%s12816_s5 + $0x110] sm:$0xff] %vm1723_vm1, %v5935_v44  ;;  %v5948_v47 = vadd.f32 %v5419_v15, %v4940_v20  ;;  %5683 = vperm.xlu1 %6435, %v5137_v33   ;;  %v5364_v5 = vpop.permute.xlu1 %5363  ;;  %v14490_v50 = vsub.f32 %v14488_v48, %v14489_v4  ;;  %v14492_v20 = vld [vmem:[#allocation102_spill] sm:$0xff]  ;;  %v14493_v44 = vld [vmem:[#allocation369_spill] sm:$0xff]  ;;  %v14499_v48 = vld [vmem:[#allocation404_spill] sm:$0xff] }
 0x54f   :  { %v14494_v33 = vsub.f32 %v14492_v20, %v14493_v44  ;;  %v14495_v15 = vld [vmem:[#allocation393_spill] sm:$0xff] }
 0x550   :  { %v4942_v53 = vmul.f32 %v14491_v6, %v14490_v50  ;;  %6092 = vst.msk [vmem:[%s12816_s5 + $0x178] sm:$0xff] %vm1723_vm1, %v5948_v47  ;;  %v5937_v29 = vadd.f32 %v5364_v5, %v4929_v63  ;;  %v5429_v34 = vpop.permute.xlu0 %5428  ;;  %v5152_v12 = vld [vmem:[%s12815_s4 + $0x398] sm:$0xff]  ;;  %v14496_v63 = vld [vmem:[#allocation199_spill] sm:$0xff] }
 0x551   :  { %v4931_v58 = vmul.f32 %v14495_v15, %v14494_v33  ;;  %5748 = vperm.xlu0 %6434, %v5150_v39   ;;  %v14497_v47 = vld [vmem:[#allocation427_spill] sm:$0xff]  ;;  %v5141_v39 = vld [vmem:[%s12815_s4 + $0x340] sm:$0xff] }
 0x552   :  { %6081 = vst.msk [vmem:[%s12816_s5 + $0x120] sm:$0xff] %vm1723_vm1, %v5937_v29  ;;  %v5950_v25 = vadd.f32 %v5429_v34, %v4942_v53  ;;  %5693 = vperm.xlu1 %6435, %v5139_v40   ;;  %v5374_v13 = vpop.permute.xlu1 %5373  ;;  %v14498_v5 = vsub.f32 %v14496_v63, %v14497_v47  ;;  %v14500_v53 = vld [vmem:[#allocation118_spill] sm:$0xff]  ;;  %v14501_v29 = vld [vmem:[#allocation379_spill] sm:$0xff] }
 0x553   :  { %v5939_v50 = vadd.f32 %v5374_v13, %v4931_v58  ;;  %v14502_v40 = vsub.f32 %v14500_v53, %v14501_v29  ;;  %v5154_v33 = vld [vmem:[%s12815_s4 + $0x3a8] sm:$0xff]  ;;  %v14504_v58 = vld [vmem:[#allocation434_spill] sm:$0xff] }
 0x554   :  { %v4944_v4 = vmul.f32 %v14499_v48, %v14498_v5  ;;  %6094 = vst.msk [vmem:[%s12816_s5 + $0x188] sm:$0xff] %vm1723_vm1, %v5950_v25  ;;  %v5439_v6 = vpop.permute.xlu0 %5438  ;;  %v14503_v15 = vld [vmem:[#allocation215_spill] sm:$0xff]  ;;  %v14506_v47 = vld [vmem:[#allocation134_spill] sm:$0xff]  ;;  %v14507_v5 = vld [vmem:[#allocation389_spill] sm:$0xff] }
 0x555   :  { %v4933_v34 = vmul.f32 %v10883_v60, %v14502_v40  ;;  %6083 = vst.msk [vmem:[%s12816_s5 + $0x130] sm:$0xff] %vm1723_vm1, %v5939_v50  ;;  %5758 = vperm.xlu0 %6434, %v5152_v12   ;;  %v14505_v25 = vsub.f32 %v14503_v15, %v14504_v58  ;;  %v5143_v12 = vld [vmem:[%s12815_s4 + $0x350] sm:$0xff]  ;;  %v14508_v48 = vsub.f32 %v14506_v47, %v14507_v5  ;;  %v14510_v53 = vld [vmem:[#allocation82_spill] sm:$0xff] }
 0x556   :  { %v5952_v20 = vadd.f32 %v5439_v6, %v4944_v4  ;;  %5703 = vperm.xlu1 %6435, %v5141_v39   ;;  %v5384_v44 = vpop.permute.xlu1 %5383  ;;  %v5156_v39 = vld [vmem:[%s12815_s4 + $0x3b8] sm:$0xff]  ;;  %v14509_v6 = vld [vmem:[#allocation231_spill] sm:$0xff]  ;;  %v5147_v5 = vld [vmem:[%s12815_s4 + $0x370] sm:$0xff] }
 0x557   :  { %v4946_v13 = vmul.f32 %v10889_v57, %v14505_v25  ;;  %v5941_v60 = vadd.f32 %v5384_v44, %v4933_v34  ;;  %v4935_v4 = vmul.f32 %v10898_v16, %v14508_v48  ;;  %v14511_v29 = vsub.f32 %v14509_v6, %v14510_v53  ;;  %v5145_v34 = vld [vmem:[%s12815_s4 + $0x360] sm:$0xff]  ;;  %v5160_v53 = vld [vmem:[%s12815_s4 + $0x3d8] sm:$0xff] }
 0x558   :  { %6096 = vst.msk [vmem:[%s12816_s5 + $0x198] sm:$0xff] %vm1723_vm1, %v5952_v20  ;;  %v5449_v63 = vpop.permute.xlu0 %5448  ;;  %v14512_v44 = vld [vmem:[#allocation150_spill] sm:$0xff] }
 0x559   :  { %6085 = vst.msk [vmem:[%s12816_s5 + $0x140] sm:$0xff] %vm1723_vm1, %v5941_v60  ;;  %v5954_v57 = vadd.f32 %v5449_v63, %v4946_v13  ;;  %5768 = vperm.xlu0 %6434, %v5154_v33   ;;  %v4948_v40 = vmul.f32 %v10903_v32, %v14511_v29  ;;  %v14513_v33 = vld [vmem:[#allocation399_spill] sm:$0xff] }
 0x55a   :  { %5713 = vperm.xlu1 %6435, %v5143_v12   ;;  %v5394_v50 = vpop.permute.xlu1 %5393  ;;  %v14514_v15 = vsub.f32 %v14512_v44, %v14513_v33  ;;  %v5158_v13 = vld [vmem:[%s12815_s4 + $0x3c8] sm:$0xff]  ;;  %v14516_v12 = vld [vmem:[#allocation96_spill] sm:$0xff]  ;;  %v14524_v33 = vld [vmem:[#allocation182_spill] sm:$0xff] }
 0x55b   :  { %6098 = vst.msk [vmem:[%s12816_s5 + $0x1a8] sm:$0xff] %vm1723_vm1, %v5954_v57  ;;  %v5943_v16 = vadd.f32 %v5394_v50, %v4935_v4  ;;  %v14515_v60 = vld [vmem:[#allocation247_spill] sm:$0xff]  ;;  %v14518_v4 = vld [vmem:[#allocation166_spill] sm:$0xff]  ;;  %v14519_v57 = vld [vmem:[#allocation409_spill] sm:$0xff] }
 0x55c   :  { %v5459_v20 = vpop.permute.xlu0 %5458  ;;  %v4937_v58 = vmul.f32 %v10914_v41, %v14514_v15  ;;  %v14517_v63 = vsub.f32 %v14515_v60, %v14516_v12  ;;  %v14520_v50 = vsub.f32 %v14518_v4, %v14519_v57  ;;  %v14521_v29 = vld [vmem:[#allocation263_spill] sm:$0xff]  ;;  %v14528_v12 = vld [vmem:[#allocation129_spill] sm:$0xff]  ;;  %v14531_v4 = vld [vmem:[#allocation426_spill] sm:$0xff] }
 0x55d   :  { %6087 = vst.msk [vmem:[%s12816_s5 + $0x150] sm:$0xff] %vm1723_vm1, %v5943_v16  ;;  %v5956_v32 = vadd.f32 %v5459_v20, %v4948_v40  ;;  %5778 = vperm.xlu0 %6434, %v5156_v39   ;;  %v14522_v40 = vld [vmem:[#allocation113_spill] sm:$0xff]  ;;  %v5149_v20 = vld [vmem:[%s12815_s4 + $0x380] sm:$0xff]  ;;  %v14525_v15 = vld [vmem:[#allocation419_spill] sm:$0xff] }
 0x55e   :  { %5723 = vperm.xlu1 %6435, %v5145_v34   ;;  %v5404_v25 = vpop.permute.xlu1 %5403  ;;  %v4950_v47 = vmul.f32 %v10919_v62, %v14517_v63  ;;  %v4939_v39 = vmul.f32 %v10931_v52, %v14520_v50  ;;  %v14523_v16 = vsub.f32 %v14521_v29, %v14522_v40  ;;  %v14527_v60 = vld [vmem:[#allocation279_spill] sm:$0xff] }
 0x55f   :  { %6100 = vst.msk [vmem:[%s12816_s5 + $0x1b8] sm:$0xff] %vm1723_vm1, %v5956_v32  ;;  %v5945_v41 = vadd.f32 %v5404_v25, %v4937_v58  ;;  %v14526_v58 = vsub.f32 %v14524_v33, %v14525_v15  ;;  %v14529_v63 = vsub.f32 %v14527_v60, %v14528_v12  ;;  %v5155_v60 = vld [vmem:[%s12815_s4 + $0x3b0] sm:$0xff] }
 0x560   :  { %v5469_v48 = vpop.permute.xlu0 %5468  ;;  %v4952_v34 = vmul.f32 %v10937_v3, %v14523_v16  ;;  %v5153_v16 = vld [vmem:[%s12815_s4 + $0x3a0] sm:$0xff] }
 0x561   :  { %6089 = vst.msk [vmem:[%s12816_s5 + $0x160] sm:$0xff] %vm1723_vm1, %v5945_v41  ;;  %v5958_v62 = vadd.f32 %v5469_v48, %v4950_v47  ;;  %5788 = vperm.xlu0 %6434, %v5158_v13   ;;  %v4941_v32 = vmul.f32 %v10947_v18, %v14526_v58  ;;  %v5162_v13 = vld [vmem:[%s12815_s4 + $0x3e8] sm:$0xff]  ;;  %v4954_v47 = vmul.f32 %v10953_v26, %v14529_v63  ;;  %v5151_v41 = vld [vmem:[%s12815_s4 + $0x390] sm:$0xff]  ;;  %v14530_v48 = vld [vmem:[#allocation198_spill] sm:$0xff] }
 0x562   :  { %5733 = vperm.xlu1 %6435, %v5147_v5   ;;  %v5414_v6 = vpop.permute.xlu1 %5413  ;;  %v14532_v57 = vsub.f32 %v14530_v48, %v14531_v4  ;;  %v5166_v58 = vld [vmem:[%s12815_s4 + $0x408] sm:$0xff]  ;;  %v14542_v63 = vld [vmem:[#allocation230_spill] sm:$0xff]  ;;  %v5168_v48 = vld [vmem:[%s12815_s4 + $0x418] sm:$0xff] }
 0x563   :  { %6102 = vst.msk [vmem:[%s12816_s5 + $0x1c8] sm:$0xff] %vm1723_vm1, %v5958_v62  ;;  %v5947_v52 = vadd.f32 %v5414_v6, %v4939_v39  ;;  %v5164_v62 = vld [vmem:[%s12815_s4 + $0x3f8] sm:$0xff] }
 0x564   :  { %v5479_v44 = vpop.permute.xlu0 %5478  ;;  %v4943_v50 = vmul.f32 %v10962_v9, %v14532_v57  ;;  %v14533_v6 = vld [vmem:[#allocation293_spill] sm:$0xff]  ;;  %v14546_v57 = vld [vmem:[#allocation175_spill] sm:$0xff] }
 0x565   :  { %6091 = vst.msk [vmem:[%s12816_s5 + $0x170] sm:$0xff] %vm1723_vm1, %v5947_v52  ;;  %v5960_v3 = vadd.f32 %v5479_v44, %v4952_v34  ;;  %5798 = vperm.xlu0 %6434, %v5160_v53   ;;  %v14534_v53 = vld [vmem:[#allocation225_spill] sm:$0xff]  ;;  %v14536_v52 = vld [vmem:[#allocation214_spill] sm:$0xff] }
 0x566   :  { %5743 = vperm.xlu1 %6435, %v5149_v20   ;;  %v5424_v25 = vpop.permute.xlu1 %5423  ;;  %v14535_v29 = vsub.f32 %v14533_v6, %v14534_v53  ;;  %v14537_v20 = vld [vmem:[#allocation433_spill] sm:$0xff]  ;;  %v14548_v6 = vld [vmem:[#allocation246_spill] sm:$0xff] }
 0x567   :  { %6104 = vst.msk [vmem:[%s12816_s5 + $0x1d8] sm:$0xff] %vm1723_vm1, %v5960_v3  ;;  %v5949_v18 = vadd.f32 %v5424_v25, %v4941_v32  ;;  %v14538_v44 = vsub.f32 %v14536_v52, %v14537_v20  ;;  %v14539_v32 = vld [vmem:[#allocation307_spill] sm:$0xff]  ;;  %v14540_v3 = vld [vmem:[#allocation241_spill] sm:$0xff] }
 0x568   :  { %v5489_v5 = vpop.permute.xlu0 %5488  ;;  %v4956_v40 = vmul.f32 %v10967_v55, %v14535_v29  ;;  %v14541_v25 = vsub.f32 %v14539_v32, %v14540_v3  ;;  %v14545_v4 = vld [vmem:[#allocation317_spill] sm:$0xff]  ;;  %v14552_v52 = vld [vmem:[#allocation191_spill] sm:$0xff] }
 0x569   :  { %6093 = vst.msk [vmem:[%s12816_s5 + $0x180] sm:$0xff] %vm1723_vm1, %v5949_v18  ;;  %v5962_v26 = vadd.f32 %v5489_v5, %v4954_v47  ;;  %5808 = vperm.xlu0 %6434, %v5162_v13   ;;  %v4945_v33 = vmul.f32 %v10978_v1, %v14538_v44  ;;  %v14543_v47 = vld [vmem:[#allocation83_spill] sm:$0xff]  ;;  %v14549_v53 = vld [vmem:[#allocation97_spill] sm:$0xff] }
 0x56a   :  { %5753 = vperm.xlu1 %6435, %v5151_v41   ;;  %v5434_v39 = vpop.permute.xlu1 %5433  ;;  %v4958_v13 = vmul.f32 %v10983_v2, %v14541_v25  ;;  %v14544_v18 = vsub.f32 %v14542_v63, %v14543_v47  ;;  %v14550_v29 = vsub.f32 %v14548_v6, %v14549_v53  ;;  %v5161_v47 = vld [vmem:[%s12815_s4 + $0x3e0] sm:$0xff] }
 0x56b   :  { %6106 = vst.msk [vmem:[%s12816_s5 + $0x1e8] sm:$0xff] %vm1723_vm1, %v5962_v26  ;;  %v5951_v9 = vadd.f32 %v5434_v39, %v4943_v50  ;;  %v14547_v50 = vsub.f32 %v14545_v4, %v14546_v57  ;;  %v5157_v39 = vld [vmem:[%s12815_s4 + $0x3c0] sm:$0xff]  ;;  %v5174_v57 = vld [vmem:[%s12815_s4 + $0x448] sm:$0xff] }
 0x56c   :  { %v5499_v34 = vpop.permute.xlu0 %5498  ;;  %v4947_v41 = vmul.f32 %v10994_v10, %v14544_v18  ;;  %v14566_v53 = vld [vmem:[#allocation290_spill] sm:$0xff] }
 0x56d   :  { %6095 = vst.msk [vmem:[%s12816_s5 + $0x190] sm:$0xff] %vm1723_vm1, %v5951_v9  ;;  %v5964_v55 = vadd.f32 %v5499_v34, %v4956_v40  ;;  %5818 = vperm.xlu0 %6434, %v5164_v62   ;;  %v4960_v26 = vmul.f32 %v10998_v17, %v14547_v50  ;;  %v4949_v40 = vmul.f32 %v11007_v30, %v14550_v29  ;;  %v14551_v34 = vld [vmem:[#allocation331_spill] sm:$0xff]  ;;  %v14563_v50 = vld [vmem:[#allocation4_spill] sm:$0xff] }
 0x56e   :  { %5763 = vperm.xlu1 %6435, %v5153_v16   ;;  %v5444_v15 = vpop.permute.xlu1 %5443  ;;  %v5170_v16 = vld [vmem:[%s12815_s4 + $0x428] sm:$0xff]  ;;  %v14553_v20 = vsub.f32 %v14551_v34, %v14552_v52  ;;  %v14567_v29 = vld [vmem:[#allocation208_spill] sm:$0xff]  ;;  %v14569_v34 = vld [vmem:[#allocation9_spill] sm:$0xff] }
 0x56f   :  { %6108 = vst.msk [vmem:[%s12816_s5 + $0x1f8] sm:$0xff] %vm1723_vm1, %v5964_v55  ;;  %v5953_v1 = vadd.f32 %v5444_v15, %v4945_v33  ;;  %v5159_v33 = vld [vmem:[%s12815_s4 + $0x3d0] sm:$0xff]  ;;  %v14554_v15 = vld [vmem:[#allocation262_spill] sm:$0xff]  ;;  %v14570_v52 = vld [vmem:[#allocation93_spill] sm:$0xff] }
 0x570   :  { %v5509_v12 = vpop.permute.xlu0 %5508  ;;  %v4962_v44 = vmul.f32 %v11011_v19, %v14553_v20  ;;  %v14571_v20 = vsub.f32 %v14569_v34, %v14570_v52  ;;  %v14591_v34 = vld [vmem:[#allocation272_spill] sm:$0xff] }
 0x571   :  { %6097 = vst.msk [vmem:[%s12816_s5 + $0x1a0] sm:$0xff] %vm1723_vm1, %v5953_v1  ;;  %v5966_v2 = vadd.f32 %v5509_v12, %v4958_v13  ;;  %5828 = vperm.xlu0 %6434, %v5166_v58   ;;  %v14555_v58 = vld [vmem:[#allocation176_spill] sm:$0xff]  ;;  %v5172_v13 = vld [vmem:[%s12815_s4 + $0x438] sm:$0xff] }
 0x572   :  { %5773 = vperm.xlu1 %6435, %v5155_v60   ;;  %v5454_v5 = vpop.permute.xlu1 %5453  ;;  %v14556_v32 = vsub.f32 %v14554_v15, %v14555_v58  ;;  %v14557_v1 = vld [vmem:[#allocation345_spill] sm:$0xff]  ;;  %v14573_v15 = vld [vmem:[#allocation142_spill] sm:$0xff] }
 0x573   :  { %6110 = vst.msk [vmem:[%s12816_s5 + $0x208] sm:$0xff] %vm1723_vm1, %v5966_v2  ;;  %v5955_v10 = vadd.f32 %v5454_v5, %v4947_v41  ;;  %v14558_v60 = vld [vmem:[#allocation289_spill] sm:$0xff]  ;;  %v14560_v41 = vld [vmem:[#allocation278_spill] sm:$0xff]  ;;  %v14561_v2 = vld [vmem:[#allocation192_spill] sm:$0xff] }
 0x574   :  { %v5519_v62 = vpop.permute.xlu0 %5518  ;;  %v4951_v3 = vmul.f32 %v11019_v37, %v14556_v32  ;;  %v14559_v12 = vsub.f32 %v14557_v1, %v14558_v60  ;;  %v14562_v5 = vsub.f32 %v14560_v41, %v14561_v2 }
 0x575   :  { %6099 = vst.msk [vmem:[%s12816_s5 + $0x1b0] sm:$0xff] %vm1723_vm1, %v5955_v10  ;;  %v5968_v17 = vadd.f32 %v5519_v62, %v4960_v26  ;;  %5838 = vperm.xlu0 %6434, %v5168_v48   ;;  %v14564_v26 = vld [vmem:[#allocation73_spill] sm:$0xff]  ;;  %v5163_v62 = vld [vmem:[%s12815_s4 + $0x3f0] sm:$0xff] }
 0x576   :  { %5783 = vperm.xlu1 %6435, %v5157_v39   ;;  %v5464_v9 = vpop.permute.xlu1 %5463  ;;  %v4964_v63 = vmul.f32 %v11022_v35, %v14559_v12  ;;  %v4953_v48 = vmul.f32 %v11032_v51, %v14562_v5  ;;  %v14565_v10 = vsub.f32 %v14563_v50, %v14564_v26  ;;  %v5167_v12 = vld [vmem:[%s12815_s4 + $0x410] sm:$0xff]  ;;  %v5180_v5 = vld [vmem:[%s12815_s4 + $0x478] sm:$0xff]  ;;  %v5169_v50 = vld [vmem:[%s12815_s4 + $0x420] sm:$0xff] }
 0x577   :  { %6112 = vst.msk [vmem:[%s12816_s5 + $0x218] sm:$0xff] %vm1723_vm1, %v5968_v17  ;;  %v5957_v30 = vadd.f32 %v5464_v9, %v4949_v40  ;;  %v14568_v40 = vsub.f32 %v14566_v53, %v14567_v29  ;;  %v14587_v53 = vld [vmem:[#allocation21_spill] sm:$0xff] }
 0x578   :  { %v5529_v55 = vpop.permute.xlu0 %5528  ;;  %v4966_v39 = vmul.f32 %v11035_v36, %v14565_v10  ;;  %v14584_v10 = vld [vmem:[#allocation330_spill] sm:$0xff]  ;;  %v14588_v29 = vld [vmem:[#allocation141_spill] sm:$0xff] }
 0x579   :  { %6101 = vst.msk [vmem:[%s12816_s5 + $0x1c0] sm:$0xff] %vm1723_vm1, %v5957_v30  ;;  %v5970_v19 = vadd.f32 %v5529_v55, %v4962_v44  ;;  %5848 = vperm.xlu0 %6434, %v5170_v16   ;;  %v4955_v17 = vmul.f32 %v11045_v7, %v14568_v40  ;;  %v5176_v16 = vld [vmem:[%s12815_s4 + $0x458] sm:$0xff]  ;;  %v4968_v44 = vmul.f32 %v11048_v61, %v14571_v20  ;;  %v5165_v30 = vld [vmem:[%s12815_s4 + $0x400] sm:$0xff]  ;;  %v14572_v55 = vld [vmem:[#allocation304_spill] sm:$0xff] }
 0x57a   :  { %5793 = vperm.xlu1 %6435, %v5159_v33   ;;  %v5474_v25 = vpop.permute.xlu1 %5473  ;;  %v14574_v58 = vsub.f32 %v14572_v55, %v14573_v15  ;;  %v14589_v40 = vsub.f32 %v14587_v53, %v14588_v29 }
 0x57b   :  { %6114 = vst.msk [vmem:[%s12816_s5 + $0x228] sm:$0xff] %vm1723_vm1, %v5970_v19  ;;  %v5959_v37 = vadd.f32 %v5474_v25, %v4951_v3  ;;  %v5178_v19 = vld [vmem:[%s12815_s4 + $0x468] sm:$0xff]  ;;  %v14575_v25 = vld [vmem:[#allocation13_spill] sm:$0xff] }
 0x57c   :  { %v5539_v18 = vpop.permute.xlu0 %5538  ;;  %v4957_v32 = vmul.f32 %v11058_v24, %v14574_v58 }
 0x57d   :  { %6103 = vst.msk [vmem:[%s12816_s5 + $0x1d0] sm:$0xff] %vm1723_vm1, %v5959_v37  ;;  %v5972_v35 = vadd.f32 %v5539_v18, %v4964_v63  ;;  %5858 = vperm.xlu0 %6434, %v5172_v13   ;;  %v14576_v13 = vld [vmem:[#allocation109_spill] sm:$0xff]  ;;  %v14578_v37 = vld [vmem:[#allocation316_spill] sm:$0xff] }
 0x57e   :  { %5803 = vperm.xlu1 %6435, %v5161_v47   ;;  %v5484_v4 = vpop.permute.xlu1 %5483  ;;  %v14577_v1 = vsub.f32 %v14575_v25, %v14576_v13  ;;  %v14579_v47 = vld [vmem:[#allocation158_spill] sm:$0xff]  ;;  %v14599_v13 = vld [vmem:[#allocation29_spill] sm:$0xff] }
 0x57f   :  { %6116 = vst.msk [vmem:[%s12816_s5 + $0x238] sm:$0xff] %vm1723_vm1, %v5972_v35  ;;  %v5961_v51 = vadd.f32 %v5484_v4, %v4953_v48  ;;  %v14580_v18 = vsub.f32 %v14578_v37, %v14579_v47  ;;  %v14581_v48 = vld [vmem:[#allocation17_spill] sm:$0xff]  ;;  %v14602_v37 = vld [vmem:[#allocation7_spill] sm:$0xff] }
 0x580   :  { %v5549_v6 = vpop.permute.xlu0 %5548  ;;  %v4970_v60 = vmul.f32 %v11060_v38, %v14577_v1  ;;  %v14582_v35 = vld [vmem:[#allocation125_spill] sm:$0xff]  ;;  %v14603_v47 = vld [vmem:[#allocation91_spill] sm:$0xff] }
 0x581   :  { %6105 = vst.msk [vmem:[%s12816_s5 + $0x1e0] sm:$0xff] %vm1723_vm1, %v5961_v51  ;;  %v5974_v36 = vadd.f32 %v5549_v6, %v4966_v39  ;;  %5868 = vperm.xlu0 %6434, %v5174_v57   ;;  %v4959_v41 = vmul.f32 %v11068_v56, %v14580_v18  ;;  %v14583_v4 = vsub.f32 %v14581_v48, %v14582_v35  ;;  %v14585_v39 = vld [vmem:[#allocation256_spill] sm:$0xff]  ;;  %v14600_v1 = vld [vmem:[#allocation173_spill] sm:$0xff] }
 0x582   :  { %5813 = vperm.xlu1 %6435, %v5163_v62   ;;  %v5494_v9 = vpop.permute.xlu1 %5493  ;;  %v14586_v51 = vsub.f32 %v14584_v10, %v14585_v39  ;;  %v14604_v18 = vsub.f32 %v14602_v37, %v14603_v47  ;;  %v14633_v37 = vld [vmem:[#allocation253_spill] sm:$0xff] }
 0x583   :  { %6118 = vst.msk [vmem:[%s12816_s5 + $0x248] sm:$0xff] %vm1723_vm1, %v5974_v36  ;;  %v5963_v7 = vadd.f32 %v5494_v9, %v4955_v17  ;;  %v4972_v57 = vmul.f32 %v11070_v46, %v14583_v4  ;;  %v4974_v17 = vmul.f32 %v11080_v43, %v14589_v40  ;;  %v5171_v36 = vld [vmem:[%s12815_s4 + $0x430] sm:$0xff]  ;;  %v14614_v40 = vld [vmem:[#allocation15_spill] sm:$0xff] }
 0x584   :  { %v5559_v33 = vpop.permute.xlu0 %5558  ;;  %v4961_v62 = vmul.f32 %v11075_v28, %v14586_v51  ;;  %v14611_v51 = vld [vmem:[#allocation37_spill] sm:$0xff] }
 0x585   :  { %6107 = vst.msk [vmem:[%s12816_s5 + $0x1f0] sm:$0xff] %vm1723_vm1, %v5963_v7  ;;  %v5976_v61 = vadd.f32 %v5559_v33, %v4968_v44  ;;  %5878 = vperm.xlu0 %6434, %v5176_v16   ;;  %v14590_v16 = vld [vmem:[#allocation342_spill] sm:$0xff]  ;;  %v14593_v7 = vld [vmem:[#allocation25_spill] sm:$0xff] }
 0x586   :  { %5823 = vperm.xlu1 %6435, %v5165_v30   ;;  %v5504_v3 = vpop.permute.xlu1 %5503  ;;  %v14592_v52 = vsub.f32 %v14590_v16, %v14591_v34  ;;  %v14594_v30 = vld [vmem:[#allocation157_spill] sm:$0xff] }
 0x587   :  { %6120 = vst.msk [vmem:[%s12816_s5 + $0x258] sm:$0xff] %vm1723_vm1, %v5976_v61  ;;  %v5965_v24 = vadd.f32 %v5504_v3, %v4957_v32  ;;  %v14595_v33 = vsub.f32 %v14593_v7, %v14594_v30  ;;  %v14596_v32 = vld [vmem:[#allocation3_spill] sm:$0xff]  ;;  %v14617_v16 = vld [vmem:[#allocation41_spill] sm:$0xff]  ;;  %v14621_v7 = vld [vmem:[#allocation140_spill] sm:$0xff] }
 0x588   :  { %v5569_v63 = vpop.permute.xlu0 %5568  ;;  %v4963_v20 = vmul.f32 %v11085_v31, %v14592_v52  ;;  %v5173_v31 = vld [vmem:[%s12815_s4 + $0x440] sm:$0xff]  ;;  %v14597_v61 = vld [vmem:[#allocation75_spill] sm:$0xff]  ;;  %v14618_v34 = vld [vmem:[#allocation221_spill] sm:$0xff] }
 0x589   :  { %6109 = vst.msk [vmem:[%s12816_s5 + $0x200] sm:$0xff] %vm1723_vm1, %v5965_v24  ;;  %v5978_v38 = vadd.f32 %v5569_v63, %v4970_v60  ;;  %5888 = vperm.xlu0 %6434, %v5178_v19   ;;  %v4976_v55 = vmul.f32 %v11090_v23, %v14595_v33  ;;  %v14598_v3 = vsub.f32 %v14596_v32, %v14597_v61  ;;  %v14623_v33 = vld [vmem:[#allocation403_spill] sm:$0xff] }
 0x58a   :  { %5833 = vperm.xlu1 %6435, %v5167_v12   ;;  %v5514_v2 = vpop.permute.xlu1 %5513  ;;  %v14601_v60 = vsub.f32 %v14599_v13, %v14600_v1  ;;  %v14619_v52 = vsub.f32 %v14617_v16, %v14618_v34  ;;  %v14627_v61 = vld [vmem:[#allocation423_spill] sm:$0xff]  ;;  %v14629_v13 = vld [vmem:[#allocation156_spill] sm:$0xff] }
 0x58b   :  { %6122 = vst.msk [vmem:[%s12816_s5 + $0x268] sm:$0xff] %vm1723_vm1, %v5978_v38  ;;  %v5967_v56 = vadd.f32 %v5514_v2, %v4959_v41  ;;  %v4965_v19 = vmul.f32 %v11095_v45, %v14598_v3  ;;  %v5175_v45 = vld [vmem:[%s12815_s4 + $0x450] sm:$0xff]  ;;  %v4967_v41 = vmul.f32 %v11105_v8, %v14604_v18  ;;  %v14605_v2 = vld [vmem:[#allocation33_spill] sm:$0xff]  ;;  %v5177_v8 = vld [vmem:[%s12815_s4 + $0x460] sm:$0xff] }
 0x58c   :  { %v5579_v26 = vpop.permute.xlu0 %5578  ;;  %v4978_v24 = vmul.f32 %v11100_v11, %v14601_v60  ;;  %v14631_v60 = vld [vmem:[#allocation430_spill] sm:$0xff] }
 0x58d   :  { %6111 = vst.msk [vmem:[%s12816_s5 + $0x210] sm:$0xff] %vm1723_vm1, %v5967_v56  ;;  %v5980_v46 = vadd.f32 %v5579_v26, %v4972_v57  ;;  %5898 = vperm.xlu0 %6434, %v5180_v5   ;;  %v14606_v5 = vld [vmem:[#allocation189_spill] sm:$0xff]  ;;  %v14608_v56 = vld [vmem:[#allocation11_spill] sm:$0xff]  ;;  %v14635_v18 = vld [vmem:[#allocation414_spill] sm:$0xff] }
 0x58e   :  { %5843 = vperm.xlu1 %6435, %v5169_v50   ;;  %v5524_v6 = vpop.permute.xlu1 %5523  ;;  %v14607_v48 = vsub.f32 %v14605_v2, %v14606_v5  ;;  %v14609_v50 = vld [vmem:[#allocation108_spill] sm:$0xff]  ;;  %v14636_v2 = vld [vmem:[#allocation27_spill] sm:$0xff] }
 0x58f   :  { %6124 = vst.msk [vmem:[%s12816_s5 + $0x278] sm:$0xff] %vm1723_vm1, %v5980_v46  ;;  %v5969_v28 = vadd.f32 %v5524_v6, %v4961_v62  ;;  %v14610_v26 = vsub.f32 %v14608_v56, %v14609_v50  ;;  %v14612_v62 = vld [vmem:[#allocation205_spill] sm:$0xff]  ;;  %v14637_v5 = vld [vmem:[#allocation172_spill] sm:$0xff] }
 0x590   :  { %v5589_v9 = vpop.permute.xlu0 %5588  ;;  %v4980_v35 = vmul.f32 %v11110_v21, %v14607_v48  ;;  %v14613_v46 = vsub.f32 %v14611_v51, %v14612_v62  ;;  %v14638_v48 = vsub.f32 %v14636_v2, %v14637_v5  ;;  %v14640_v56 = vld [vmem:[#allocation53_spill] sm:$0xff]  ;;  %v14644_v62 = vld [vmem:[#allocation31_spill] sm:$0xff] }
 0x591   :  { %6113 = vst.msk [vmem:[%s12816_s5 + $0x220] sm:$0xff] %vm1723_vm1, %v5969_v28  ;;  %v5982_v43 = vadd.f32 %v5589_v9, %v4974_v17  ;;  %v4969_v10 = vmul.f32 %v11115_v54, %v14610_v26  ;;  %v5179_v54 = vld [vmem:[%s12815_s4 + $0x470] sm:$0xff]  ;;  %v14615_v17 = vld [vmem:[#allocation123_spill] sm:$0xff]  ;;  %v14641_v50 = vld [vmem:[#allocation269_spill] sm:$0xff] }
 0x592   :  { %5853 = vperm.xlu1 %6435, %v5171_v36   ;;  %v5534_v44 = vpop.permute.xlu1 %5533  ;;  %v4982_v6 = vmul.f32 %v11120_v59, %v14613_v46  ;;  %v14616_v28 = vsub.f32 %v14614_v40, %v14615_v17  ;;  %v14642_v26 = vsub.f32 %v14640_v56, %v14641_v50  ;;  %v14645_v46 = vld [vmem:[#allocation188_spill] sm:$0xff]  ;;  %v14648_v17 = vld [vmem:[#allocation57_spill] sm:$0xff] }
 0x593   :  { %6126 = vst.msk [vmem:[%s12816_s5 + $0x288] sm:$0xff] %vm1723_vm1, %v5982_v43  ;;  %v5971_v15 = vadd.f32 %v5534_v44, %v4963_v20  ;;  %v4984_v20 = vmul.f32 %v11130_v27, %v14619_v52  ;;  %v14620_v44 = vld [vmem:[#allocation19_spill] sm:$0xff]  ;;  %v14624_v27 = vld [vmem:[#allocation45_spill] sm:$0xff] }
 0x594   :  { %v5599_v58 = vpop.permute.xlu0 %5598  ;;  %v4971_v36 = vmul.f32 %v11122_v0, %v14616_v28  ;;  %v14622_v30 = vsub.f32 %v14620_v44, %v14621_v7  ;;  %v14649_v28 = vld [vmem:[#allocation285_spill] sm:$0xff]  ;;  %v14652_v52 = vld [vmem:[#allocation35_spill] sm:$0xff] }
 0x595   :  { %6115 = vst.msk [vmem:[%s12816_s5 + $0x230] sm:$0xff] %vm1723_vm1, %v5971_v15  ;;  %v5984_v23 = vadd.f32 %v5599_v58, %v4976_v55  ;;  %v14625_v58 = vld [vmem:[#allocation237_spill] sm:$0xff] }
 0x596   :  { %5863 = vperm.xlu1 %6435, %v5173_v31   ;;  %v5544_v25 = vpop.permute.xlu1 %5543  ;;  %v4973_v55 = vmul.f32 %v14623_v33, %v14622_v30  ;;  %v14626_v32 = vsub.f32 %v14624_v27, %v14625_v58  ;;  %v14656_v33 = vld [vmem:[#allocation61_spill] sm:$0xff] }
 0x597   :  { %6128 = vst.msk [vmem:[%s12816_s5 + $0x298] sm:$0xff] %vm1723_vm1, %v5984_v23  ;;  %v5973_v12 = vadd.f32 %v5544_v25, %v4965_v19  ;;  %v14628_v25 = vld [vmem:[#allocation23_spill] sm:$0xff] }
 0x598   :  { %v5609_v63 = vpop.permute.xlu0 %5608  ;;  %v4986_v3 = vmul.f32 %v14627_v61, %v14626_v32  ;;  %v14630_v1 = vsub.f32 %v14628_v25, %v14629_v13  ;;  %v14660_v61 = vld [vmem:[#allocation39_spill] sm:$0xff] }
 0x599   :  { %6117 = vst.msk [vmem:[%s12816_s5 + $0x240] sm:$0xff] %vm1723_vm1, %v5973_v12  ;;  %v5986_v11 = vadd.f32 %v5609_v63, %v4978_v24  ;;  %v14632_v63 = vld [vmem:[#allocation49_spill] sm:$0xff] }
 0x59a   :  { %5873 = vperm.xlu1 %6435, %v5175_v45   ;;  %v5554_v38 = vpop.permute.xlu1 %5553  ;;  %v4975_v24 = vmul.f32 %v14631_v60, %v14630_v1  ;;  %v14634_v47 = vsub.f32 %v14632_v63, %v14633_v37  ;;  %v14664_v60 = vld [vmem:[#allocation65_spill] sm:$0xff] }
 0x59b   :  { %6130 = vst.msk [vmem:[%s12816_s5 + $0x2a8] sm:$0xff] %vm1723_vm1, %v5986_v11  ;;  %v5975_v4 = vadd.f32 %v5554_v38, %v4967_v41 }
 0x59c   :  { %v5619_v57 = vpop.permute.xlu0 %5618  ;;  %v4988_v41 = vmul.f32 %v14635_v18, %v14634_v47  ;;  %v14668_v18 = vld [vmem:[#allocation43_spill] sm:$0xff] }
 0x59d   :  { %6119 = vst.msk [vmem:[%s12816_s5 + $0x250] sm:$0xff] %vm1723_vm1, %v5975_v4  ;;  %v5988_v21 = vadd.f32 %v5619_v57, %v4980_v35  ;;  %v14639_v35 = vld [vmem:[#allocation413_spill] sm:$0xff] }
 0x59e   :  { %5883 = vperm.xlu1 %6435, %v5177_v8   ;;  %v5564_v39 = vpop.permute.xlu1 %5563  ;;  %v4977_v4 = vmul.f32 %v14639_v35, %v14638_v48  ;;  %v14672_v35 = vld [vmem:[#allocation69_spill] sm:$0xff] }
 0x59f   :  { %6132 = vst.msk [vmem:[%s12816_s5 + $0x2b8] sm:$0xff] %vm1723_vm1, %v5988_v21  ;;  %v5977_v53 = vadd.f32 %v5564_v39, %v4969_v10  ;;  %v14643_v10 = vld [vmem:[#allocation437_spill] sm:$0xff] }
 0x5a0   :  { %v5629_v29 = vpop.permute.xlu0 %5628  ;;  %v4990_v21 = vmul.f32 %v14643_v10, %v14642_v26  ;;  %v14676_v10 = vld [vmem:[#allocation47_spill] sm:$0xff] }
 0x5a1   :  { %6121 = vst.msk [vmem:[%s12816_s5 + $0x260] sm:$0xff] %vm1723_vm1, %v5977_v53  ;;  %v5990_v59 = vadd.f32 %v5629_v29, %v4982_v6  ;;  %v14646_v6 = vsub.f32 %v14644_v62, %v14645_v46  ;;  %v14647_v53 = vld [vmem:[#allocation111_spill] sm:$0xff] }
 0x5a2   :  { %5893 = vperm.xlu1 %6435, %v5179_v54   ;;  %v5574_v9 = vpop.permute.xlu1 %5573 }
 0x5a3   :  { %6134 = vst.msk [vmem:[%s12816_s5 + $0x2c8] sm:$0xff] %vm1723_vm1, %v5990_v59  ;;  %v5979_v43 = vadd.f32 %v5574_v9, %v4971_v36  ;;  %v4979_v54 = vmul.f32 %v14647_v53, %v14646_v6  ;;  %v14650_v36 = vsub.f32 %v14648_v17, %v14649_v28  ;;  %v14651_v59 = vld [vmem:[#allocation81_spill] sm:$0xff]  ;;  %v14680_v53 = vld [vmem:[#allocation76_spill] sm:$0xff] }
 0x5a4   :  { %v5639_v0 = vpop.permute.xlu0 %5638 }
 0x5a5   :  { %6123 = vst.msk [vmem:[%s12816_s5 + $0x270] sm:$0xff] %vm1723_vm1, %v5979_v43  ;;  %v5992_v15 = vadd.f32 %v5639_v0, %v4984_v20  ;;  %v4992_v9 = vmul.f32 %v14651_v59, %v14650_v36  ;;  %v14653_v20 = vld [vmem:[#allocation204_spill] sm:$0xff]  ;;  %v14655_v0 = vld [vmem:[#allocation78_spill] sm:$0xff]  ;;  %v14684_v59 = vld [vmem:[#allocation51_spill] sm:$0xff] }
 0x5a6   :  { %v5584_v31 = vpop.permute.xlu1 %5583  ;;  %v14654_v43 = vsub.f32 %v14652_v52, %v14653_v20 }
 0x5a7   :  { %6136 = vst.msk [vmem:[%s12816_s5 + $0x2d8] sm:$0xff] %vm1723_vm1, %v5992_v15  ;;  %v5981_v19 = vadd.f32 %v5584_v31, %v4973_v55  ;;  %v14657_v55 = vld [vmem:[#allocation301_spill] sm:$0xff] }
 0x5a8   :  { %v5649_v23 = vpop.permute.xlu0 %5648  ;;  %v4981_v44 = vmul.f32 %v14655_v0, %v14654_v43  ;;  %v14658_v15 = vsub.f32 %v14656_v33, %v14657_v55  ;;  %v14659_v31 = vld [vmem:[#allocation101_spill] sm:$0xff]  ;;  %v14688_v0 = vld [vmem:[#allocation92_spill] sm:$0xff] }
 0x5a9   :  { %6125 = vst.msk [vmem:[%s12816_s5 + $0x280] sm:$0xff] %vm1723_vm1, %v5981_v19  ;;  %v5994_v12 = vadd.f32 %v5649_v23, %v4986_v3  ;;  %v14661_v3 = vld [vmem:[#allocation220_spill] sm:$0xff] }
 0x5aa   :  { %v5594_v45 = vpop.permute.xlu1 %5593  ;;  %v4994_v27 = vmul.f32 %v14659_v31, %v14658_v15  ;;  %v14662_v19 = vsub.f32 %v14660_v61, %v14661_v3  ;;  %v14663_v23 = vld [vmem:[#allocation100_spill] sm:$0xff]  ;;  %v14692_v31 = vld [vmem:[#allocation55_spill] sm:$0xff] }
 0x5ab   :  { %6138 = vst.msk [vmem:[%s12816_s5 + $0x2e8] sm:$0xff] %vm1723_vm1, %v5994_v12  ;;  %v5983_v11 = vadd.f32 %v5594_v45, %v4975_v24  ;;  %v14665_v24 = vld [vmem:[#allocation319_spill] sm:$0xff]  ;;  %v14667_v45 = vld [vmem:[#allocation117_spill] sm:$0xff] }
 0x5ac   :  { %v5659_v38 = vpop.permute.xlu0 %5658  ;;  %v4983_v25 = vmul.f32 %v14663_v23, %v14662_v19  ;;  %v14666_v12 = vsub.f32 %v14664_v60, %v14665_v24  ;;  %v14696_v23 = vld [vmem:[#allocation107_spill] sm:$0xff] }
 0x5ad   :  { %6127 = vst.msk [vmem:[%s12816_s5 + $0x290] sm:$0xff] %vm1723_vm1, %v5983_v11  ;;  %v5996_v8 = vadd.f32 %v5659_v38, %v4988_v41  ;;  %v14669_v41 = vld [vmem:[#allocation236_spill] sm:$0xff] }
 0x5ae   :  { %v5604_v57 = vpop.permute.xlu1 %5603  ;;  %v4996_v63 = vmul.f32 %v14667_v45, %v14666_v12  ;;  %v14670_v11 = vsub.f32 %v14668_v18, %v14669_v41  ;;  %v14671_v38 = vld [vmem:[#allocation116_spill] sm:$0xff]  ;;  %v14700_v45 = vld [vmem:[#allocation59_spill] sm:$0xff] }
 0x5af   :  { %6140 = vst.msk [vmem:[%s12816_s5 + $0x2f8] sm:$0xff] %vm1723_vm1, %v5996_v8  ;;  %v5985_v39 = vadd.f32 %v5604_v57, %v4977_v4  ;;  %v14673_v4 = vld [vmem:[#allocation337_spill] sm:$0xff] }
 0x5b0   :  { %v5669_v51 = vpop.permute.xlu0 %5668  ;;  %v4985_v2 = vmul.f32 %v14671_v38, %v14670_v11  ;;  %v14674_v8 = vsub.f32 %v14672_v35, %v14673_v4  ;;  %v14675_v57 = vld [vmem:[#allocation133_spill] sm:$0xff]  ;;  %v14704_v38 = vld [vmem:[#allocation124_spill] sm:$0xff] }
 0x5b1   :  { %6129 = vst.msk [vmem:[%s12816_s5 + $0x2a0] sm:$0xff] %vm1723_vm1, %v5985_v39  ;;  %v5998_v29 = vadd.f32 %v5669_v51, %v4990_v21  ;;  %v14677_v21 = vld [vmem:[#allocation252_spill] sm:$0xff] }
 0x5b2   :  { %v5614_v40 = vpop.permute.xlu1 %5613  ;;  %v4998_v56 = vmul.f32 %v14675_v57, %v14674_v8  ;;  %v14678_v39 = vsub.f32 %v14676_v10, %v14677_v21  ;;  %v14679_v51 = vld [vmem:[#allocation132_spill] sm:$0xff]  ;;  %v14708_v57 = vld [vmem:[#allocation63_spill] sm:$0xff] }
 0x5b3   :  { %6142 = vst.msk [vmem:[%s12816_s5 + $0x308] sm:$0xff] %vm1723_vm1, %v5998_v29  ;;  %v5987_v16 = vadd.f32 %v5614_v40, %v4979_v54  ;;  %v14681_v54 = vld [vmem:[#allocation353_spill] sm:$0xff] }
 0x5b4   :  { %v5679_v34 = vpop.permute.xlu0 %5678  ;;  %v4987_v62 = vmul.f32 %v14679_v51, %v14678_v39  ;;  %v14682_v29 = vsub.f32 %v14680_v53, %v14681_v54  ;;  %v14683_v40 = vld [vmem:[#allocation149_spill] sm:$0xff]  ;;  %v14712_v51 = vld [vmem:[#allocation139_spill] sm:$0xff] }
 0x5b5   :  { %6131 = vst.msk [vmem:[%s12816_s5 + $0x2b0] sm:$0xff] %vm1723_vm1, %v5987_v16  ;;  %v6000_v7 = vadd.f32 %v5679_v34, %v4992_v9  ;;  %v14685_v9 = vld [vmem:[#allocation268_spill] sm:$0xff] }
 0x5b6   :  { %v5624_v30 = vpop.permute.xlu1 %5623  ;;  %v5000_v17 = vmul.f32 %v14683_v40, %v14682_v29  ;;  %v14686_v16 = vsub.f32 %v14684_v59, %v14685_v9  ;;  %v14687_v34 = vld [vmem:[#allocation148_spill] sm:$0xff] }
 0x5b7   :  { %6144 = vst.msk [vmem:[%s12816_s5 + $0x318] sm:$0xff] %vm1723_vm1, %v6000_v7  ;;  %v5989_v58 = vadd.f32 %v5624_v30, %v4981_v44  ;;  %v14689_v44 = vld [vmem:[#allocation362_spill] sm:$0xff]  ;;  %v14691_v30 = vld [vmem:[#allocation165_spill] sm:$0xff]  ;;  %v14716_v40 = vld [vmem:[#allocation68_spill] sm:$0xff] }
 0x5b8   :  { %v5689_v32 = vpop.permute.xlu0 %5688  ;;  %v4989_v52 = vmul.f32 %v14687_v34, %v14686_v16  ;;  %v14690_v7 = vsub.f32 %v14688_v0, %v14689_v44  ;;  %v14720_v34 = vld [vmem:[#allocation155_spill] sm:$0xff] }
 0x5b9   :  { %6133 = vst.msk [vmem:[%s12816_s5 + $0x2c0] sm:$0xff] %vm1723_vm1, %v5989_v58  ;;  %v6002_v13 = vadd.f32 %v5689_v32, %v4994_v27  ;;  %v14693_v27 = vld [vmem:[#allocation284_spill] sm:$0xff] }
 0x5ba   :  { %v5634_v1 = vpop.permute.xlu1 %5633  ;;  %v5002_v33 = vmul.f32 %v14691_v30, %v14690_v7  ;;  %v14694_v58 = vsub.f32 %v14692_v31, %v14693_v27  ;;  %v14695_v32 = vld [vmem:[#allocation164_spill] sm:$0xff]  ;;  %v14724_v30 = vld [vmem:[#allocation74_spill] sm:$0xff] }
 0x5bb   :  { %6146 = vst.msk [vmem:[%s12816_s5 + $0x328] sm:$0xff] %vm1723_vm1, %v6002_v13  ;;  %v5991_v37 = vadd.f32 %v5634_v1, %v4983_v25  ;;  %v14697_v25 = vld [vmem:[#allocation372_spill] sm:$0xff] }
 0x5bc   :  { %v5699_v47 = vpop.permute.xlu0 %5698  ;;  %v4991_v61 = vmul.f32 %v14695_v32, %v14694_v58  ;;  %v14698_v13 = vsub.f32 %v14696_v23, %v14697_v25  ;;  %v14699_v1 = vld [vmem:[#allocation88_spill] sm:$0xff]  ;;  %v14728_v32 = vld [vmem:[#allocation171_spill] sm:$0xff] }
 0x5bd   :  { %6135 = vst.msk [vmem:[%s12816_s5 + $0x2d0] sm:$0xff] %vm1723_vm1, %v5991_v37  ;;  %v6004_v5 = vadd.f32 %v5699_v47, %v4996_v63  ;;  %v14701_v63 = vld [vmem:[#allocation300_spill] sm:$0xff]  ;;  %v14703_v47 = vld [vmem:[#allocation87_spill] sm:$0xff] }
 0x5be   :  { %v5644_v48 = vpop.permute.xlu1 %5643  ;;  %v5004_v60 = vmul.f32 %v14699_v1, %v14698_v13  ;;  %v14702_v37 = vsub.f32 %v14700_v45, %v14701_v63  ;;  %v14732_v1 = vld [vmem:[#allocation90_spill] sm:$0xff] }
 0x5bf   :  { %6148 = vst.msk [vmem:[%s12816_s5 + $0x338] sm:$0xff] %vm1723_vm1, %v6004_v5  ;;  %v5993_v50 = vadd.f32 %v5644_v48, %v4985_v2  ;;  %v14705_v2 = vld [vmem:[#allocation382_spill] sm:$0xff]  ;;  %v14707_v48 = vld [vmem:[#allocation181_spill] sm:$0xff] }
 0x5c0   :  { %v5709_v26 = vpop.permute.xlu0 %5708  ;;  %v4993_v18 = vmul.f32 %v14703_v47, %v14702_v37  ;;  %v14706_v5 = vsub.f32 %v14704_v38, %v14705_v2  ;;  %v14736_v47 = vld [vmem:[#allocation187_spill] sm:$0xff] }
 0x5c1   :  { %6137 = vst.msk [vmem:[%s12816_s5 + $0x2e0] sm:$0xff] %vm1723_vm1, %v5993_v50  ;;  %v6006_v46 = vadd.f32 %v5709_v26, %v4998_v56  ;;  %v14709_v56 = vld [vmem:[#allocation318_spill] sm:$0xff]  ;;  %v14711_v26 = vld [vmem:[#allocation180_spill] sm:$0xff] }
 0x5c2   :  { %v5654_v6 = vpop.permute.xlu1 %5653  ;;  %v5006_v35 = vmul.f32 %v14707_v48, %v14706_v5  ;;  %v14710_v50 = vsub.f32 %v14708_v57, %v14709_v56  ;;  %v14740_v48 = vld [vmem:[#allocation105_spill] sm:$0xff] }
 0x5c3   :  { %6150 = vst.msk [vmem:[%s12816_s5 + $0x348] sm:$0xff] %vm1723_vm1, %v6006_v46  ;;  %v5995_v28 = vadd.f32 %v5654_v6, %v4987_v62  ;;  %v14713_v62 = vld [vmem:[#allocation392_spill] sm:$0xff]  ;;  %v14715_v6 = vld [vmem:[#allocation99_spill] sm:$0xff] }
 0x5c4   :  { %v5719_v36 = vpop.permute.xlu0 %5718  ;;  %v4995_v10 = vmul.f32 %v14711_v26, %v14710_v50  ;;  %v14714_v46 = vsub.f32 %v14712_v51, %v14713_v62  ;;  %v14744_v26 = vld [vmem:[#allocation203_spill] sm:$0xff] }
 0x5c5   :  { %6139 = vst.msk [vmem:[%s12816_s5 + $0x2f0] sm:$0xff] %vm1723_vm1, %v5995_v28  ;;  %v6008_v20 = vadd.f32 %v5719_v36, %v5000_v17  ;;  %v14717_v17 = vld [vmem:[#allocation336_spill] sm:$0xff]  ;;  %v14719_v36 = vld [vmem:[#allocation98_spill] sm:$0xff] }
 0x5c6   :  { %v5664_v43 = vpop.permute.xlu1 %5663  ;;  %v5008_v53 = vmul.f32 %v14715_v6, %v14714_v46  ;;  %v14718_v28 = vsub.f32 %v14716_v40, %v14717_v17  ;;  %v14748_v6 = vld [vmem:[#allocation122_spill] sm:$0xff] }
 0x5c7   :  { %6152 = vst.msk [vmem:[%s12816_s5 + $0x358] sm:$0xff] %vm1723_vm1, %v6008_v20  ;;  %v5997_v55 = vadd.f32 %v5664_v43, %v4989_v52  ;;  %v14721_v52 = vld [vmem:[#allocation402_spill] sm:$0xff]  ;;  %v14723_v43 = vld [vmem:[#allocation197_spill] sm:$0xff] }
 0x5c8   :  { %v5729_v15 = vpop.permute.xlu0 %5728  ;;  %v4997_v59 = vmul.f32 %v14719_v36, %v14718_v28  ;;  %v14722_v20 = vsub.f32 %v14720_v34, %v14721_v52  ;;  %v14752_v36 = vld [vmem:[#allocation219_spill] sm:$0xff] }
 0x5c9   :  { %6141 = vst.msk [vmem:[%s12816_s5 + $0x300] sm:$0xff] %vm1723_vm1, %v5997_v55  ;;  %v6010_v3 = vadd.f32 %v5729_v15, %v5002_v33  ;;  %v14725_v33 = vld [vmem:[#allocation352_spill] sm:$0xff] }
 0x5ca   :  { %v5674_v19 = vpop.permute.xlu1 %5673  ;;  %v5010_v0 = vmul.f32 %v14723_v43, %v14722_v20  ;;  %v14726_v55 = vsub.f32 %v14724_v30, %v14725_v33  ;;  %v14727_v15 = vld [vmem:[#allocation196_spill] sm:$0xff]  ;;  %v14756_v43 = vld [vmem:[#allocation137_spill] sm:$0xff] }
 0x5cb   :  { %6154 = vst.msk [vmem:[%s12816_s5 + $0x368] sm:$0xff] %vm1723_vm1, %v6010_v3  ;;  %v5999_v24 = vadd.f32 %v5674_v19, %v4991_v61  ;;  %v14729_v61 = vld [vmem:[#allocation412_spill] sm:$0xff]  ;;  %v14731_v19 = vld [vmem:[#allocation115_spill] sm:$0xff] }
 0x5cc   :  { %v5739_v12 = vpop.permute.xlu0 %5738  ;;  %v4999_v31 = vmul.f32 %v14727_v15, %v14726_v55  ;;  %v14730_v3 = vsub.f32 %v14728_v32, %v14729_v61  ;;  %v14760_v15 = vld [vmem:[#allocation235_spill] sm:$0xff] }
 0x5cd   :  { %6143 = vst.msk [vmem:[%s12816_s5 + $0x310] sm:$0xff] %vm1723_vm1, %v5999_v24  ;;  %v6012_v41 = vadd.f32 %v5739_v12, %v5004_v60  ;;  %v14733_v60 = vld [vmem:[#allocation361_spill] sm:$0xff]  ;;  %v14735_v12 = vld [vmem:[#allocation114_spill] sm:$0xff] }
 0x5ce   :  { %v5684_v11 = vpop.permute.xlu1 %5683  ;;  %v5012_v23 = vmul.f32 %v14731_v19, %v14730_v3  ;;  %v14734_v24 = vsub.f32 %v14732_v1, %v14733_v60  ;;  %v14764_v19 = vld [vmem:[#allocation153_spill] sm:$0xff] }
 0x5cf   :  { %6156 = vst.msk [vmem:[%s12816_s5 + $0x378] sm:$0xff] %vm1723_vm1, %v6012_v41  ;;  %v6001_v4 = vadd.f32 %v5684_v11, %v4993_v18  ;;  %v14737_v18 = vld [vmem:[#allocation422_spill] sm:$0xff]  ;;  %v14739_v11 = vld [vmem:[#allocation213_spill] sm:$0xff] }
 0x5d0   :  { %v5749_v8 = vpop.permute.xlu0 %5748  ;;  %v5001_v45 = vmul.f32 %v14735_v12, %v14734_v24  ;;  %v14738_v41 = vsub.f32 %v14736_v47, %v14737_v18  ;;  %v14768_v12 = vld [vmem:[#allocation251_spill] sm:$0xff] }
 0x5d1   :  { %6145 = vst.msk [vmem:[%s12816_s5 + $0x320] sm:$0xff] %vm1723_vm1, %v6001_v4  ;;  %v6014_v21 = vadd.f32 %v5749_v8, %v5006_v35  ;;  %v14741_v35 = vld [vmem:[#allocation371_spill] sm:$0xff]  ;;  %v14743_v8 = vld [vmem:[#allocation212_spill] sm:$0xff] }
 0x5d2   :  { %v5694_v39 = vpop.permute.xlu1 %5693  ;;  %v5014_v38 = vmul.f32 %v14739_v11, %v14738_v41  ;;  %v14742_v4 = vsub.f32 %v14740_v48, %v14741_v35  ;;  %v14772_v11 = vld [vmem:[#allocation169_spill] sm:$0xff] }
 0x5d3   :  { %6158 = vst.msk [vmem:[%s12816_s5 + $0x388] sm:$0xff] %vm1723_vm1, %v6014_v21  ;;  %v6003_v54 = vadd.f32 %v5694_v39, %v4995_v10  ;;  %v14745_v10 = vld [vmem:[#allocation429_spill] sm:$0xff]  ;;  %v14747_v39 = vld [vmem:[#allocation131_spill] sm:$0xff] }
 0x5d4   :  { %v5759_v29 = vpop.permute.xlu0 %5758  ;;  %v5003_v57 = vmul.f32 %v14743_v8, %v14742_v4  ;;  %v14746_v21 = vsub.f32 %v14744_v26, %v14745_v10  ;;  %v14776_v8 = vld [vmem:[#allocation267_spill] sm:$0xff] }
 0x5d5   :  { %6147 = vst.msk [vmem:[%s12816_s5 + $0x330] sm:$0xff] %vm1723_vm1, %v6003_v54  ;;  %v6016_v9 = vadd.f32 %v5759_v29, %v5008_v53  ;;  %v14749_v53 = vld [vmem:[#allocation381_spill] sm:$0xff]  ;;  %v14751_v29 = vld [vmem:[#allocation130_spill] sm:$0xff] }
 0x5d6   :  { %v5704_v16 = vpop.permute.xlu1 %5703  ;;  %v5016_v51 = vmul.f32 %v14747_v39, %v14746_v21  ;;  %v14750_v54 = vsub.f32 %v14748_v6, %v14749_v53  ;;  %v14780_v39 = vld [vmem:[#allocation185_spill] sm:$0xff] }
 0x5d7   :  { %6160 = vst.msk [vmem:[%s12816_s5 + $0x398] sm:$0xff] %vm1723_vm1, %v6016_v9  ;;  %v6005_v44 = vadd.f32 %v5704_v16, %v4997_v59  ;;  %v14753_v59 = vld [vmem:[#allocation436_spill] sm:$0xff]  ;;  %v14755_v16 = vld [vmem:[#allocation229_spill] sm:$0xff] }
 0x5d8   :  { %v5769_v7 = vpop.permute.xlu0 %5768  ;;  %v5005_v40 = vmul.f32 %v14751_v29, %v14750_v54  ;;  %v14754_v9 = vsub.f32 %v14752_v36, %v14753_v59  ;;  %v14784_v29 = vld [vmem:[#allocation283_spill] sm:$0xff] }
 0x5d9   :  { %6149 = vst.msk [vmem:[%s12816_s5 + $0x340] sm:$0xff] %vm1723_vm1, %v6005_v44  ;;  %v6018_v27 = vadd.f32 %v5769_v7, %v5010_v0  ;;  %v14757_v0 = vld [vmem:[#allocation391_spill] sm:$0xff]  ;;  %v14759_v7 = vld [vmem:[#allocation228_spill] sm:$0xff] }
 0x5da   :  { %v5714_v58 = vpop.permute.xlu1 %5713  ;;  %v5018_v34 = vmul.f32 %v14755_v16, %v14754_v9  ;;  %v14758_v44 = vsub.f32 %v14756_v43, %v14757_v0  ;;  %v14788_v16 = vld [vmem:[#allocation201_spill] sm:$0xff] }
 0x5db   :  { %6162 = vst.msk [vmem:[%s12816_s5 + $0x3a8] sm:$0xff] %vm1723_vm1, %v6018_v27  ;;  %v6007_v25 = vadd.f32 %v5714_v58, %v4999_v31  ;;  %v14761_v31 = vld [vmem:[#allocation94_spill] sm:$0xff]  ;;  %v14763_v58 = vld [vmem:[#allocation147_spill] sm:$0xff] }
 0x5dc   :  { %v5779_v13 = vpop.permute.xlu0 %5778  ;;  %v5007_v30 = vmul.f32 %v14759_v7, %v14758_v44  ;;  %v14762_v27 = vsub.f32 %v14760_v15, %v14761_v31  ;;  %v14792_v7 = vld [vmem:[#allocation297_spill] sm:$0xff] }
 0x5dd   :  { %6151 = vst.msk [vmem:[%s12816_s5 + $0x350] sm:$0xff] %vm1723_vm1, %v6007_v25  ;;  %v6020_v63 = vadd.f32 %v5779_v13, %v5012_v23  ;;  %v14765_v23 = vld [vmem:[#allocation401_spill] sm:$0xff]  ;;  %v14767_v13 = vld [vmem:[#allocation146_spill] sm:$0xff] }
 0x5de   :  { %v5724_v37 = vpop.permute.xlu1 %5723  ;;  %v5020_v32 = vmul.f32 %v14763_v58, %v14762_v27  ;;  %v14766_v25 = vsub.f32 %v14764_v19, %v14765_v23  ;;  %v14796_v58 = vld [vmem:[#allocation217_spill] sm:$0xff] }
 0x5df   :  { %6164 = vst.msk [vmem:[%s12816_s5 + $0x3b8] sm:$0xff] %vm1723_vm1, %v6020_v63  ;;  %v6009_v2 = vadd.f32 %v5724_v37, %v5001_v45  ;;  %v14769_v45 = vld [vmem:[#allocation160_spill] sm:$0xff]  ;;  %v14771_v37 = vld [vmem:[#allocation245_spill] sm:$0xff] }
 0x5e0   :  { %v5789_v5 = vpop.permute.xlu0 %5788  ;;  %v5009_v1 = vmul.f32 %v14767_v13, %v14766_v25  ;;  %v14770_v63 = vsub.f32 %v14768_v12, %v14769_v45  ;;  %v14800_v13 = vld [vmem:[#allocation311_spill] sm:$0xff] }
 0x5e1   :  { %6153 = vst.msk [vmem:[%s12816_s5 + $0x360] sm:$0xff] %vm1723_vm1, %v6009_v2  ;;  %v6022_v56 = vadd.f32 %v5789_v5, %v5014_v38  ;;  %v14773_v38 = vld [vmem:[#allocation411_spill] sm:$0xff]  ;;  %v14775_v5 = vld [vmem:[#allocation244_spill] sm:$0xff] }
 0x5e2   :  { %v5734_v50 = vpop.permute.xlu1 %5733  ;;  %v5022_v47 = vmul.f32 %v14771_v37, %v14770_v63  ;;  %v14774_v2 = vsub.f32 %v14772_v11, %v14773_v38  ;;  %v14804_v37 = vld [vmem:[#allocation233_spill] sm:$0xff] }
 0x5e3   :  { %6166 = vst.msk [vmem:[%s12816_s5 + $0x3c8] sm:$0xff] %vm1723_vm1, %v6022_v56  ;;  %v6011_v62 = vadd.f32 %v5734_v50, %v5003_v57  ;;  %v14777_v57 = vld [vmem:[#allocation127_spill] sm:$0xff] }
 0x5e4   :  { %v5799_v46 = vpop.permute.xlu0 %5798  ;;  %v5011_v48 = vmul.f32 %v14775_v5, %v14774_v2  ;;  %v14778_v56 = vsub.f32 %v14776_v8, %v14777_v57  ;;  %v14779_v50 = vld [vmem:[#allocation163_spill] sm:$0xff] }
 0x5e5   :  { %6155 = vst.msk [vmem:[%s12816_s5 + $0x370] sm:$0xff] %vm1723_vm1, %v6011_v62  ;;  %v6024_v17 = vadd.f32 %v5799_v46, %v5016_v51  ;;  %v14781_v51 = vld [vmem:[#allocation421_spill] sm:$0xff]  ;;  %v14783_v46 = vld [vmem:[#allocation162_spill] sm:$0xff]  ;;  %v14808_v5 = vld [vmem:[#allocation323_spill] sm:$0xff] }
 0x5e6   :  { %v5744_v28 = vpop.permute.xlu1 %5743  ;;  %v5024_v26 = vmul.f32 %v14779_v50, %v14778_v56  ;;  %v14782_v62 = vsub.f32 %v14780_v39, %v14781_v51  ;;  %v14812_v50 = vld [vmem:[#allocation249_spill] sm:$0xff] }
 0x5e7   :  { %6168 = vst.msk [vmem:[%s12816_s5 + $0x3d8] sm:$0xff] %vm1723_vm1, %v6024_v17  ;;  %v6013_v52 = vadd.f32 %v5744_v28, %v5005_v40  ;;  %v14785_v40 = vld [vmem:[#allocation209_spill] sm:$0xff] }
 0x5e8   :  { %v5809_v20 = vpop.permute.xlu0 %5808  ;;  %v5013_v6 = vmul.f32 %v14783_v46, %v14782_v62  ;;  %v14786_v17 = vsub.f32 %v14784_v29, %v14785_v40  ;;  %v14787_v28 = vld [vmem:[#allocation261_spill] sm:$0xff]  ;;  %v14816_v46 = vld [vmem:[#allocation335_spill] sm:$0xff] }
 0x5e9   :  { %6157 = vst.msk [vmem:[%s12816_s5 + $0x380] sm:$0xff] %vm1723_vm1, %v6013_v52  ;;  %v6026_v33 = vadd.f32 %v5809_v20, %v5018_v34  ;;  %v14789_v34 = vld [vmem:[#allocation428_spill] sm:$0xff] }
 0x5ea   :  { %v5754_v55 = vpop.permute.xlu1 %5753  ;;  %v5026_v36 = vmul.f32 %v14787_v28, %v14786_v17  ;;  %v14790_v52 = vsub.f32 %v14788_v16, %v14789_v34  ;;  %v14791_v20 = vld [vmem:[#allocation260_spill] sm:$0xff]  ;;  %v14820_v28 = vld [vmem:[#allocation265_spill] sm:$0xff] }
 0x5eb   :  { %6170 = vst.msk [vmem:[%s12816_s5 + $0x3e8] sm:$0xff] %vm1723_vm1, %v6026_v33  ;;  %v6015_v61 = vadd.f32 %v5754_v55, %v5007_v30  ;;  %v14793_v30 = vld [vmem:[#allocation143_spill] sm:$0xff] }
 0x5ec   :  { %v5819_v3 = vpop.permute.xlu0 %5818  ;;  %v5015_v43 = vmul.f32 %v14791_v20, %v14790_v52  ;;  %v14794_v33 = vsub.f32 %v14792_v7, %v14793_v30  ;;  %v14795_v55 = vld [vmem:[#allocation179_spill] sm:$0xff]  ;;  %v14824_v20 = vld [vmem:[#allocation349_spill] sm:$0xff] }
 0x5ed   :  { %6159 = vst.msk [vmem:[%s12816_s5 + $0x390] sm:$0xff] %vm1723_vm1, %v6015_v61  ;;  %v6028_v60 = vadd.f32 %v5819_v3, %v5020_v32  ;;  %v14797_v32 = vld [vmem:[#allocation435_spill] sm:$0xff]  ;;  %v14799_v3 = vld [vmem:[#allocation178_spill] sm:$0xff] }
 0x5ee   :  { %v5764_v24 = vpop.permute.xlu1 %5763  ;;  %v5028_v15 = vmul.f32 %v14795_v55, %v14794_v33  ;;  %v14798_v61 = vsub.f32 %v14796_v58, %v14797_v32  ;;  %v14828_v55 = vld [vmem:[#allocation281_spill] sm:$0xff] }
 0x5ef   :  { %6172 = vst.msk [vmem:[%s12816_s5 + $0x3f8] sm:$0xff] %vm1723_vm1, %v6028_v60  ;;  %v6017_v18 = vadd.f32 %v5764_v24, %v5009_v1  ;;  %v14801_v1 = vld [vmem:[#allocation159_spill] sm:$0xff]  ;;  %v14803_v24 = vld [vmem:[#allocation277_spill] sm:$0xff] }
 0x5f0   :  { %v5829_v41 = vpop.permute.xlu0 %5828  ;;  %v5017_v19 = vmul.f32 %v14799_v3, %v14798_v61  ;;  %v14802_v60 = vsub.f32 %v14800_v13, %v14801_v1 }
 0x5f1   :  { %6161 = vst.msk [vmem:[%s12816_s5 + $0x3a0] sm:$0xff] %vm1723_vm1, %v6017_v18  ;;  %v6030_v35 = vadd.f32 %v5829_v41, %v5022_v47  ;;  %v14805_v47 = vld [vmem:[#allocation95_spill] sm:$0xff]  ;;  %v14807_v41 = vld [vmem:[#allocation276_spill] sm:$0xff] }
 0x5f2   :  { %v5774_v4 = vpop.permute.xlu1 %5773  ;;  %v5030_v12 = vmul.f32 %v14803_v24, %v14802_v60  ;;  %v14806_v18 = vsub.f32 %v14804_v37, %v14805_v47  ;;  %v14835_v24 = vld [vmem:[#allocation308_spill] sm:$0xff] }
 0x5f3   :  { %6174 = vst.msk [vmem:[%s12816_s5 + $0x408] sm:$0xff] %vm1723_vm1, %v6030_v35  ;;  %v6019_v10 = vadd.f32 %v5774_v4, %v5011_v48  ;;  %v14809_v48 = vld [vmem:[#allocation257_spill] sm:$0xff]  ;;  %v14811_v4 = vld [vmem:[#allocation195_spill] sm:$0xff] }
 0x5f4   :  { %v5839_v21 = vpop.permute.xlu0 %5838  ;;  %v5019_v11 = vmul.f32 %v14807_v41, %v14806_v18  ;;  %v14810_v35 = vsub.f32 %v14808_v5, %v14809_v48  ;;  %v14839_v18 = vld [vmem:[#allocation174_spill] sm:$0xff] }
 0x5f5   :  { %6163 = vst.msk [vmem:[%s12816_s5 + $0x3b0] sm:$0xff] %vm1723_vm1, %v6019_v10  ;;  %v6032_v53 = vadd.f32 %v5839_v21, %v5024_v26  ;;  %v14813_v26 = vld [vmem:[#allocation161_spill] sm:$0xff]  ;;  %v14815_v21 = vld [vmem:[#allocation194_spill] sm:$0xff] }
 0x5f6   :  { %v5784_v54 = vpop.permute.xlu1 %5783  ;;  %v5032_v8 = vmul.f32 %v14811_v4, %v14810_v35  ;;  %v14814_v10 = vsub.f32 %v14812_v50, %v14813_v26  ;;  %v14842_v5 = vld [vmem:[#allocation190_spill] sm:$0xff]  ;;  %v14847_v50 = vld [vmem:[#allocation313_spill] sm:$0xff] }
 0x5f7   :  { %6176 = vst.msk [vmem:[%s12816_s5 + $0x418] sm:$0xff] %vm1723_vm1, %v6032_v53  ;;  %v6021_v59 = vadd.f32 %v5784_v54, %v5013_v6  ;;  %v14817_v6 = vld [vmem:[#allocation273_spill] sm:$0xff]  ;;  %v14819_v54 = vld [vmem:[#allocation295_spill] sm:$0xff] }
 0x5f8   :  { %v5849_v9 = vpop.permute.xlu0 %5848  ;;  %v5021_v39 = vmul.f32 %v14815_v21, %v14814_v10  ;;  %v14818_v53 = vsub.f32 %v14816_v46, %v14817_v6 }
 0x5f9   :  { %6165 = vst.msk [vmem:[%s12816_s5 + $0x3c0] sm:$0xff] %vm1723_vm1, %v6021_v59  ;;  %v6034_v0 = vadd.f32 %v5849_v9, %v5026_v36  ;;  %v14821_v36 = vld [vmem:[#allocation112_spill] sm:$0xff]  ;;  %v14823_v9 = vld [vmem:[#allocation294_spill] sm:$0xff] }
 0x5fa   :  { %v5794_v44 = vpop.permute.xlu1 %5793  ;;  %v5034_v29 = vmul.f32 %v14819_v54, %v14818_v53  ;;  %v14822_v59 = vsub.f32 %v14820_v28, %v14821_v36 }
 0x5fb   :  { %6178 = vst.msk [vmem:[%s12816_s5 + $0x428] sm:$0xff] %vm1723_vm1, %v6034_v0  ;;  %v6023_v31 = vadd.f32 %v5794_v44, %v5015_v43  ;;  %v14825_v43 = vld [vmem:[#allocation207_spill] sm:$0xff] }
 0x5fc   :  { %v5859_v27 = vpop.permute.xlu0 %5858  ;;  %v5023_v16 = vmul.f32 %v14823_v9, %v14822_v59  ;;  %v14826_v0 = vsub.f32 %v14824_v20, %v14825_v43  ;;  %v14827_v44 = vld [vmem:[#allocation211_spill] sm:$0xff] }
 0x5fd   :  { %6167 = vst.msk [vmem:[%s12816_s5 + $0x3d0] sm:$0xff] %vm1723_vm1, %v6023_v31  ;;  %v6036_v23 = vadd.f32 %v5859_v27, %v5028_v15  ;;  %v14829_v15 = vld [vmem:[#allocation128_spill] sm:$0xff]  ;;  %v14831_v27 = vld [vmem:[#allocation210_spill] sm:$0xff] }
 0x5fe   :  { %v5804_v25 = vpop.permute.xlu1 %5803  ;;  %v5036_v7 = vmul.f32 %v14827_v44, %v14826_v0  ;;  %v14830_v31 = vsub.f32 %v14828_v55, %v14829_v15 }
 0x5ff   :  { %6180 = vst.msk [vmem:[%s12816_s5 + $0x438] sm:$0xff] %vm1723_vm1, %v6036_v23  ;;  %v6025_v45 = vadd.f32 %v5804_v25, %v5017_v19  ;;  %v14832_v19 = vld [vmem:[#allocation296_spill] sm:$0xff] }
 0x600   :  { %v5869_v63 = vpop.permute.xlu0 %5868  ;;  %v5025_v58 = vmul.f32 %v14831_v27, %v14830_v31  ;;  %v14833_v23 = vld [vmem:[#allocation224_spill] sm:$0xff] }
 0x601   :  { %6169 = vst.msk [vmem:[%s12816_s5 + $0x3e0] sm:$0xff] %vm1723_vm1, %v6025_v45  ;;  %v6038_v38 = vadd.f32 %v5869_v63, %v5030_v12  ;;  %v14834_v25 = vsub.f32 %v14832_v19, %v14833_v23  ;;  %v14836_v12 = vld [vmem:[#allocation240_spill] sm:$0xff] }
 0x602   :  { %v5814_v2 = vpop.permute.xlu1 %5813  ;;  %v14837_v45 = vsub.f32 %v14835_v24, %v14836_v12 }
 0x603   :  { %6182 = vst.msk [vmem:[%s12816_s5 + $0x448] sm:$0xff] %vm1723_vm1, %v6038_v38  ;;  %v6027_v57 = vadd.f32 %v5814_v2, %v5019_v11  ;;  %v5027_v13 = vmul.f32 %v11404_v14, %v14834_v25  ;;  %v14838_v14 = vld [vmem:[#allocation320_spill] sm:$0xff] }
 0x604   :  { %v5879_v56 = vpop.permute.xlu0 %5878  ;;  %v5029_v63 = vmul.f32 %v11420_v42, %v14837_v45  ;;  %v14840_v41 = vsub.f32 %v14838_v14, %v14839_v18  ;;  %v14841_v42 = vld [vmem:[#allocation333_spill] sm:$0xff] }
 0x605   :  { %6171 = vst.msk [vmem:[%s12816_s5 + $0x3f0] sm:$0xff] %vm1723_vm1, %v6027_v57  ;;  %v6040_v51 = vadd.f32 %v5879_v56, %v5032_v8  ;;  %v14843_v48 = vsub.f32 %v14841_v42, %v14842_v5  ;;  %v14845_v57 = vld [vmem:[#allocation288_spill] sm:$0xff] }
 0x606   :  { %v5824_v62 = vpop.permute.xlu1 %5823  ;;  %v5031_v11 = vmul.f32 %v11436_v49, %v14840_v41  ;;  %v14844_v49 = vld [vmem:[#allocation348_spill] sm:$0xff] }
 0x607   :  { %6184 = vst.msk [vmem:[%s12816_s5 + $0x458] sm:$0xff] %vm1723_vm1, %v6040_v51  ;;  %v6029_v40 = vadd.f32 %v5824_v62, %v5021_v39  ;;  %v5033_v35 = vmul.f32 %v11452_v22, %v14843_v48  ;;  %v14846_v56 = vsub.f32 %v14844_v49, %v14845_v57 }
 0x608   :  { %v5889_v17 = vpop.permute.xlu0 %5888 }
 0x609   :  { %6173 = vst.msk [vmem:[%s12816_s5 + $0x400] sm:$0xff] %vm1723_vm1, %v6029_v40  ;;  %v6042_v34 = vadd.f32 %v5889_v17, %v5034_v29  ;;  %v5035_v26 = vmul.f32 %v14847_v50, %v14846_v56 }
 0x60a   :  { %v5834_v52 = vpop.permute.xlu1 %5833 }
 0x60b   :  { %6186 = vst.msk [vmem:[%s12816_s5 + $0x468] sm:$0xff] %vm1723_vm1, %v6042_v34  ;;  %v6031_v30 = vadd.f32 %v5834_v52, %v5023_v16 }
 0x60c   :  { %v5899_v33 = vpop.permute.xlu0 %5898 }
 0x60d   :  { %6175 = vst.msk [vmem:[%s12816_s5 + $0x410] sm:$0xff] %vm1723_vm1, %v6031_v30  ;;  %v6044_v32 = vadd.f32 %v5899_v33, %v5036_v7 }
 0x60e   :  { %v5844_v61 = vpop.permute.xlu1 %5843 }
 0x60f   :  { %6188 = vst.msk [vmem:[%s12816_s5 + $0x478] sm:$0xff] %vm1723_vm1, %v6044_v32  ;;  %v6033_v3 = vadd.f32 %v5844_v61, %v5025_v58 }
 0x611   :  { %6177 = vst.msk [vmem:[%s12816_s5 + $0x420] sm:$0xff] %vm1723_vm1, %v6033_v3 }
 0x612   :  { %v5854_v1 = vpop.permute.xlu1 %5853 }
 0x613   :  { %v6035_v60 = vadd.f32 %v5854_v1, %v5027_v13 }
 0x615   :  { %6179 = vst.msk [vmem:[%s12816_s5 + $0x430] sm:$0xff] %vm1723_vm1, %v6035_v60 }
 0x616   :  { %v5864_v37 = vpop.permute.xlu1 %5863 }
 0x617   :  { %v6037_v47 = vadd.f32 %v5864_v37, %v5029_v63 }
 0x619   :  { %6181 = vst.msk [vmem:[%s12816_s5 + $0x440] sm:$0xff] %vm1723_vm1, %v6037_v47 }
 0x61a   :  { %v5874_v38 = vpop.permute.xlu1 %5873 }
 0x61b   :  { %v6039_v2 = vadd.f32 %v5874_v38, %v5031_v11 }
 0x61d   :  { %6183 = vst.msk [vmem:[%s12816_s5 + $0x450] sm:$0xff] %vm1723_vm1, %v6039_v2 }
 0x61e   :  { %v5884_v4 = vpop.permute.xlu1 %5883 }
 0x61f   :  { %v6041_v8 = vadd.f32 %v5884_v4, %v5033_v35 }
 0x621   :  { %6185 = vst.msk [vmem:[%s12816_s5 + $0x460] sm:$0xff] %vm1723_vm1, %v6041_v8 }
 0x622   :  { %v5894_v10 = vpop.permute.xlu1 %5893 }
 0x623   :  { %v6043_v21 = vadd.f32 %v5894_v10, %v5035_v26 }
 0x625   :  { %6187 = vst.msk [vmem:[%s12816_s5 + $0x470] sm:$0xff] %vm1723_vm1, %v6043_v21 }

</bundles_post_ra>
